<compile_context>
chip_gen: v6e
topology: v6e:2x2x1
jax: 0.10.0
libtpu: 0.0.40
codegen_flags: <defaults>
</compile_context>

<pallas_src>
import functools
import math

import jax
import jax.numpy as jnp
from jax import lax
from jax.experimental import pallas as pl
from jax.experimental.pallas import tpu as pltpu


# ---------------------------------------------------------------------------
# Kernel: one batched matmul per grid step.
# ---------------------------------------------------------------------------
def _target_block_kernel(idx_exp_ref, bw_ref, bias_ref, out_ref, *, vp):
    # idx_exp_ref: (TB, SEQ*VP) int32  -- token id repeated VP times per position
    # bw_ref:      (SEQ*VP, O)  bf16   -- fused embedding+conv+fc weight
    # bias_ref:    (1, O)       f32    -- fused bias (fc bias + conv-bias term)
    # out_ref:     (TB, O)      f32
    idx = idx_exp_ref[...]                                       # (TB, SEQ*VP)
    pos = lax.broadcasted_iota(jnp.int32, idx.shape, 1)
    vocab_lane = jnp.bitwise_and(pos, vp - 1)                    # lane % VP
    onehot = (vocab_lane == idx).astype(jnp.bfloat16)            # exact 0/1
    acc = jnp.dot(onehot, bw_ref[...],
                  preferred_element_type=jnp.float32)            # (TB, O)
    out_ref[...] = acc + bias_ref[...]


# ---------------------------------------------------------------------------
# One-time parameter fusion (plain JAX, runs outside the kernel).
#   out[b,o] = sum_{f,p} Wfc[o,f,p] * ( sum_{c,k} Wconv[f,c,k] * T[idx[b,c],p+k]
#                                       + bconv[f] ) + bfc[o]
#            = sum_c Bw[c, idx[b,c], o] + bias'[o]
# ---------------------------------------------------------------------------
def _fuse_params(table, wconv, bconv, wfc, bfc, *, vp):
    VOCAB, E = table.shape
    F, SEQ, K = wconv.shape
    O = wfc.shape[0]
    P = E - K + 1
    wfc_r = wfc.reshape(O, F, P)                                  # (O, F, P)
    # G[k, f, v, o] = sum_p table[v, k+p] * wfc_r[o, f, p]
    G = jnp.stack(
        [jnp.einsum('vp,ofp->fvo', table[:, k:k + P], wfc_r,
                    precision=lax.Precision.HIGHEST) for k in range(K)],
        axis=0)                                                   # (K, F, V, O)
    # Bw[c, v, o] = sum_{f,k} wconv[f, c, k] * G[k, f, v, o]
    bw = jnp.einsum('fck,kfvo->cvo', wconv, G,
                    precision=lax.Precision.HIGHEST)              # (SEQ, V, O)
    bw = jnp.pad(bw, ((0, 0), (0, vp - VOCAB), (0, 0)))           # pad vocab
    bw = bw.reshape(SEQ * vp, O).astype(jnp.bfloat16)             # lane-dense
    bias = bfc + jnp.einsum('ofp,f->o', wfc_r, bconv,
                            precision=lax.Precision.HIGHEST)
    return bw, bias.reshape(1, O).astype(jnp.float32)


# ---------------------------------------------------------------------------
# Wrapper
# ---------------------------------------------------------------------------
def target_block_forward(prot_feature, params, *, num_filters, tb=8):
    """Pallas implementation of TargetBlock.forward(prot_feature, num_filters)."""
    table = params["emb_table"]          # (VOCAB, E)
    wconv = params["conv_w"]             # (F, SEQ, K)  PyTorch Conv1d layout
    bconv = params["conv_b"]             # (F,)
    wfc = params["fc_w"]                 # (O, F*126)   PyTorch Linear layout
    bfc = params["fc_b"]                 # (O,)

    B, SEQ = prot_feature.shape
    VOCAB, E = table.shape
    F, SEQ_w, K = wconv.shape
    P = E - K + 1                        # conv output length (must equal 126)
    O = wfc.shape[0]
    assert F == num_filters and wfc.shape[1] == F * P and SEQ_w == SEQ

    VP = max(32, pl.next_power_of_2(VOCAB))          # lane-friendly padded vocab
    KD = SEQ * VP                                     # fused contraction length
    assert KD % 128 == 0

    bw, bias = _fuse_params(table, wconv, bconv, wfc, bfc, vp=VP)

    # Pad batch to a multiple of TB and expand idx so the in-kernel one-hot
    # compare is purely elementwise (idx repeated VP times per position).
    B_pad = pl.cdiv(B, tb) * tb
    idx = prot_feature.astype(jnp.int32)
    idx = jnp.pad(idx, ((0, B_pad - B), (0, 0)))
    idx_exp = jnp.repeat(idx, VP, axis=1)             # (B_pad, SEQ*VP)

    kernel = functools.partial(_target_block_kernel, vp=VP)

    out = pl.pallas_call(
        kernel,
        out_shape=jax.ShapeDtypeStruct((B_pad, O), jnp.float32),
        grid_spec=pltpu.PrefetchScalarGridSpec(
            num_scalar_prefetch=0,
            grid=(B_pad // tb,),
            in_specs=[
                pl.BlockSpec((tb, KD), lambda b: (b, 0)),   # expanded token ids
                pl.BlockSpec((KD, O), lambda b: (0, 0)),    # fused weight (resident)
                pl.BlockSpec((1, O), lambda b: (0, 0)),     # fused bias
            ],
            out_specs=pl.BlockSpec((tb, O), lambda b: (b, 0)),
        ),
        compiler_params=pltpu.CompilerParams(
            dimension_semantics=("parallel",),
            vmem_limit_bytes=48 * 1024 * 1024),
    )(idx_exp, bw, bias)
    return out[:B]


# ---------------------------------------------------------------------------
# Pure-JAX reference mirroring the PyTorch forward exactly.
# ---------------------------------------------------------------------------
def target_block_reference(prot_feature, params, *, num_filters):
    table = params["emb_table"]
    wconv = params["conv_w"]
    bconv = params["conv_b"]
    wfc = params["fc_w"]
    bfc = params["fc_b"]

    emb = jnp.take(table, prot_feature, axis=0)          # (B, SEQ, E) == NCL
    conv = lax.conv_general_dilated(
        emb, wconv, window_strides=(1,), padding="VALID",
        dimension_numbers=("NCH", "OIH", "NCH"),
        precision=lax.Precision.HIGHEST)                  # (B, F, P)
    conv = conv + bconv[None, :, None]
    B = conv.shape[0]
    P = conv.shape[-1]
    xt = conv.reshape(B, num_filters * P)                 # row-major view
    return jnp.dot(xt, wfc.T, precision=lax.Precision.HIGHEST) + bfc[None, :]


if __name__ == "__main__":
    # Consistent config: fc1 expects num_filters*126, so E - K + 1 must be 126
    # -> E=128, K=3.  SEQ=1000 is fixed by Conv1d(in_channels=1000).
    TARGET_DICT_LEN = 25
    VOCAB = TARGET_DICT_LEN + 1
    EMBED_DIM = 128
    NUM_FILTERS = 4
    KERNEL_SIZE = 3
    SEQ = 1000
    B = 2
    P = EMBED_DIM - KERNEL_SIZE + 1      # 126
    OUT = 128

    key = jax.random.PRNGKey(0)
    k_idx, k_emb, k_cw, k_cb, k_fw, k_fb = jax.random.split(key, 6)

    prot_feature = jax.random.randint(k_idx, (B, SEQ), 0, VOCAB, dtype=jnp.int32)

    params = {
        "emb_table": jax.random.normal(k_emb, (VOCAB, EMBED_DIM), jnp.float32),
        "conv_w": jax.random.normal(k_cw, (NUM_FILTERS, SEQ, KERNEL_SIZE),
                                    jnp.float32) / math.sqrt(SEQ * KERNEL_SIZE),
        "conv_b": jax.random.normal(k_cb, (NUM_FILTERS,), jnp.float32) * 0.01,
        "fc_w": jax.random.normal(k_fw, (OUT, NUM_FILTERS * P),
                                  jnp.float32) / math.sqrt(NUM_FILTERS * P),
        "fc_b": jax.random.normal(k_fb, (OUT,), jnp.float32) * 0.01,
    }

    out = target_block_forward(prot_feature, params, num_filters=NUM_FILTERS)
    out = jax.block_until_ready(out)

    ref = target_block_reference(prot_feature, params, num_filters=NUM_FILTERS)
    assert out.shape == (B, OUT), out.shape
    assert jnp.allclose(out, ref, atol=5e-2, rtol=5e-2), (
        float(jnp.max(jnp.abs(out - ref))))

    print("KERNEL_OK")
</pallas_src>

<mosaic_0001>
module attributes {stable_mosaic.version = 11 : i64} {
  func.func @_target_block_kernel(%arg0: i32, %arg1: memref<8x32000xi32, #tpu.memory_space<vmem>>, %arg2: memref<32000x128xbf16, #tpu.memory_space<vmem>>, %arg3: memref<1x128xf32, #tpu.memory_space<vmem>>, %arg4: memref<8x128xf32, #tpu.memory_space<vmem>>) attributes {dimension_semantics = [#tpu.dimension_semantics<parallel>], iteration_bounds = array<i64: 1>, scalar_prefetch = 0 : i64, scratch_operands = 0 : i64, tpu.core_type = #tpu.core_type<tc>, window_params = [{transform_indices = @transform_0, window_bounds = array<i64: 8, 32000>}, {pipeline_mode = #tpu.pipeline_mode<synchronous>, transform_indices = @transform_1, window_bounds = array<i64: 32000, 128>}, {pipeline_mode = #tpu.pipeline_mode<synchronous>, transform_indices = @transform_2, window_bounds = array<i64: 1, 128>}, {transform_indices = @transform_3, window_bounds = array<i64: 8, 128>}]} {
    %c0 = arith.constant 0 : index
    %c0_0 = arith.constant 0 : index
    %0 = vector.load %arg1[%c0, %c0_0] : memref<8x32000xi32, #tpu.memory_space<vmem>>, vector<8x32000xi32>
    %1 = tpu.iota {dimensions = array<i32: 1>} : vector<8x32000xi32>
    %c31_i32 = arith.constant 31 : i32
    %2 = vector.broadcast %c31_i32 : i32 to vector<8x32000xi32>
    %3 = arith.andi %1, %2 : vector<8x32000xi32>
    %4 = arith.cmpi eq, %3, %0 : vector<8x32000xi32>
    %5 = arith.extui %4 : vector<8x32000xi1> to vector<8x32000xi32>
    %6 = arith.sitofp %5 : vector<8x32000xi32> to vector<8x32000xf32>
    %7 = arith.truncf %6 : vector<8x32000xf32> to vector<8x32000xbf16>
    %c0_1 = arith.constant 0 : index
    %c0_2 = arith.constant 0 : index
    %8 = vector.load %arg2[%c0_1, %c0_2] : memref<32000x128xbf16, #tpu.memory_space<vmem>>, vector<32000x128xbf16>
    %cst = arith.constant dense<0.000000e+00> : vector<8x128xf32>
    %9 = tpu.matmul %7, %8, %cst {dimension_numbers = #tpu.dot_dimension_numbers<[1], [0], [0], [1], [0, 0, 1, 1], [], []>} : vector<8x32000xbf16>, vector<32000x128xbf16>, vector<8x128xf32> -> vector<8x128xf32>
    %c0_3 = arith.constant 0 : index
    %c0_4 = arith.constant 0 : index
    %10 = vector.load %arg3[%c0_3, %c0_4] : memref<1x128xf32, #tpu.memory_space<vmem>>, vector<1x128xf32>
    %11 = vector.broadcast %10 : vector<1x128xf32> to vector<8x128xf32>
    %12 = arith.addf %9, %11 : vector<8x128xf32>
    %c0_5 = arith.constant 0 : index
    %c0_6 = arith.constant 0 : index
    %13 = vector.load %arg4[%c0_5, %c0_6] : memref<8x128xf32, #tpu.memory_space<vmem>>, vector<8x128xf32>
    tpu.vector_store %arg4[%c0_5, %c0_6], %12 {strides = array<i32>} : memref<8x128xf32, #tpu.memory_space<vmem>>, vector<8x128xf32>,
    return
  }
  func.func @transform_0(%arg0: i32) -> (i32, i32) {
    %c0_i32 = arith.constant 0 : i32
    %c0_i32_0 = arith.constant 0 : i32
    return %arg0, %c0_i32 : i32, i32
  }
  func.func @transform_1(%arg0: i32) -> (i32, i32) {
    %c0_i32 = arith.constant 0 : i32
    %c0_i32_0 = arith.constant 0 : i32
    %c0_i32_1 = arith.constant 0 : i32
    return %c0_i32, %c0_i32_0 : i32, i32
  }
  func.func @transform_2(%arg0: i32) -> (i32, i32) {
    %c0_i32 = arith.constant 0 : i32
    %c0_i32_0 = arith.constant 0 : i32
    %c0_i32_1 = arith.constant 0 : i32
    return %c0_i32, %c0_i32_0 : i32, i32
  }
  func.func @transform_3(%arg0: i32) -> (i32, i32) {
    %c0_i32 = arith.constant 0 : i32
    %c0_i32_0 = arith.constant 0 : i32
    return %arg0, %c0_i32 : i32, i32
  }
}

</mosaic_0001>

<bundles_post_ra>
// kernel: tpu_custom_call.1
= control target key start
LH: loop header
LB: loop body
LE: loop exit
PB: predicated region body
PF: predicated region fallthrough
CT: control target
= control target key end

     0   :  { %8 = vsyncpa [#allocation3], 0  ;;  %s31128_s0 = inlined_call_operand.hbm [shape: s32[8,32000], index: 0, kind: input, shape index: {}]   ;;  %s31129_s1 = inlined_call_operand.hbm [shape: bf16[32000,128], index: 1, kind: input, shape index: {}]   ;;  %s31130_s2 = inlined_call_operand.hbm [shape: f32[1,128], index: 2, kind: input, shape index: {}]   ;;  %s31131_s3 = inlined_call_operand.hbm [shape: f32[8,128], index: 3, kind: output, shape index: {}]  }
   0x1   :  { %9 = vsyncpa [#allocation6], 0 }
   0x2   :  { %10 = vsyncpa [#allocation4], 0  ;;  %s30422_s12 = smov [#allocation5]  }
   0x3   :  { %s26_s13 = sshll.u32 %s30422_s12, 4  ;;  %s27_s13 = int_to_ptr.vmem [resolvable:$true] %s26_s13 }
   0x4   :  { %s30344_s14 = scalar_lea.vmem %s27_s13, 256000  ;;  %p30349_p1 = scmp.lt.s32.totalorder %s27_s13, %s27_s13 }
   0x5   :  { %p30345_p0 = scmp.ne.s32.totalorder %s27_s13, %s30344_s14  ;;  %p30350_p2 = scmp.lt.s32.totalorder %s30344_s14, %s30344_s14 }
   0x7   :  { %p30351_p3 = por %p30350_p2, %p30349_p1 }
   0x9   :  { %p30352_p4 = pnand %p30351_p3, %p30345_p0 }
   0xb   :  { %30355 = shalt.err (!%p30352_p4)
}
   0xc   :  { %s30423_s15 = smov 64   ;;  %s30424_s16 = smov 4  }
   0xd   :  { %32 = dma.hbm_to_vmem [thread:$0]  %s31129_s1, 256000, %s27_s13, [#allocation6], %s30423_s15, %s30423_s15, %s30424_s16  }
   0xe   :  { %s30425_s19 = smov [#allocation2]   ;;  %s30426_s21 = smov [#allocation7]  }
   0xf   :  { %s17_s20 = sshll.u32 %s30425_s19, 4  ;;  %s39_s22 = sshll.u32 %s30426_s21, 4  ;;  %s18_s20 = int_to_ptr.vmem [resolvable:$true] %s17_s20  ;;  %s40_s22 = int_to_ptr.vmem [resolvable:$true] %s39_s22 }
  0x10   :  { %s30364_s23 = scalar_lea.vmem %s18_s20, 32000  ;;  %p30369_p6 = scmp.lt.s32.totalorder %s18_s20, %s18_s20 }
  0x11   :  { %p30365_p5 = scmp.ne.s32.totalorder %s18_s20, %s30364_s23  ;;  %p30370_p7 = scmp.lt.s32.totalorder %s30364_s23, %s30364_s23 }
  0x13   :  { %p30371_p8 = por %p30370_p7, %p30369_p6 }
  0x15   :  { %p30372_p9 = pnand %p30371_p8, %p30365_p5 }
  0x17   :  { %30375 = shalt.err (!%p30372_p9)
}
  0x18   :  { %20 = dma.hbm_to_vmem [thread:$0]  %s31128_s0, 32000, %s18_s20, [#allocation3]  }
  0x19   :  { %s30384_s26 = scalar_lea.vmem %s40_s22, 16  ;;  %s30388_s1 = scalar_lea.vmem %s40_s22, 32 }
  0x1a   :  { %p30385_p10 = scmp.ne.s32.totalorder %s40_s22, %s30384_s26  ;;  %p30389_p11 = scmp.lt.s32.totalorder %s40_s22, %s40_s22 }
  0x1b   :  { %p30390_p12 = scmp.lt.s32.totalorder %s30388_s1, %s30384_s26 }
  0x1d   :  { %p30391_p13 = por %p30390_p12, %p30389_p11 }
  0x1f   :  { %p30392_p0 = pnand %p30391_p13, %p30385_p10 }
  0x21   :  { %30395 = shalt.err (!%p30392_p0)
}
  0x22   :  { %42 = dma.hbm_to_vmem [thread:$0]  %s31130_s2, 16, %s40_s22, [#allocation6]  }
  0x23   :  { %30416 = dma.done.wait [#allocation3], 32000  }
  0x24   :  { %30417 = vsyncadd [#allocation3], 4294935296 }
  0x25   :  { %30418 = dma.done.wait [#allocation6], 256016  }
  0x26   :  { %30419 = vsyncadd [#allocation6], 4294711280  ;;  %v28336_v0 = vld [vmem:[#allocation5 + $0x78] sm:$0xff]   ;;  %v28340_v4 = vld [vmem:[#allocation5 + $0x70] sm:$0xff]   ;;  %v303_v17 = vlaneseq  ;;  %v30427_v44 = vmov 1.0|1.0  }
  0x27   :  { %v28337_v1 = vld [vmem:[#allocation5 + $0x38] sm:$0xff]   ;;  %25579 = vmatprep.subr.bf16.mxu0 %v28336_v0  ;;  %v28341_v5 = vld [vmem:[#allocation5 + $0x30] sm:$0xff]   ;;  %v28344_v8 = vld [vmem:[#allocation5 + $0x68] sm:$0xff]   ;;  %s30428_s0 = smov [#allocation8]  }
  0x28   :  { %v28338_v2 = vld [vmem:[#allocation5 + $0xf8] sm:$0xff]   ;;  %25580 = vmatpush3.bf16.msra.mxu0 %v28337_v1  ;;  %v28342_v6 = vld [vmem:[#allocation5 + $0xf0] sm:$0xff]   ;;  %v28345_v9 = vld [vmem:[#allocation5 + $0x28] sm:$0xff]   ;;  %v30458_v22 = vand.u32 127, %v303_v17  ;;  %s22818_s2 = sshll.u32 %s30428_s0, 4  ;;  %s22819_s2 = int_to_ptr.vmem [resolvable:$true] %s22818_s2 }
  0x29   :  { %v28339_v3 = vld [vmem:[#allocation5 + $0xb8] sm:$0xff]   ;;  %25601 = vmatprep.subr.bf16.mxu1 %v28338_v2  ;;  %25581 = vmatprep.subr.bf16.mxu0 %v28340_v4  ;;  %v28343_v7 = vld [vmem:[#allocation5 + $0xb0] sm:$0xff]   ;;  %v28346_v10 = vld [vmem:[#allocation5 + $0xe8] sm:$0xff]   ;;  %s30396_s29 = scalar_lea.vmem %s22819_s2, 128  ;;  %p30401_p2 = scmp.lt.s32.totalorder %s22819_s2, %s22819_s2 }
  0x2a   :  { %25602 = vmatpush3.bf16.msra.mxu1 %v28339_v3  ;;  %v28347_v11 = vld [vmem:[#allocation5 + $0xa8] sm:$0xff]   ;;  %v28348_v12 = vld [vmem:[#allocation5 + $0x60] sm:$0xff]   ;;  %v28352_v16 = vld [vmem:[#allocation5 + $0x58] sm:$0xff]   ;;  %v305_v27 = vadd.s32 128, %v30458_v22  ;;  %v307_v30 = vadd.s32 384, %v30458_v22  ;;  %v306_v32 = vadd.s32 256, %v30458_v22  ;;  %p30397_p1 = scmp.ne.s32.totalorder %s22819_s2, %s30396_s29  ;;  %p30402_p3 = scmp.lt.s32.totalorder %s30396_s29, %s30396_s29 }
  0x2b   :  { %25603 = vmatprep.subr.bf16.mxu1 %v28342_v6  ;;  %v28349_v13 = vld [vmem:[#allocation5 + $0x20] sm:$0xff]   ;;  %v28353_v18 = vld [vmem:[#allocation5 + $0x18] sm:$0xff]   ;;  %v28356_v21 = vld [vmem:[#allocation5 + $0x50] sm:$0xff]   ;;  %v554_v36 = vand.u32 31, %v30458_v22  ;;  %v309_v6 = vadd.s32 640, %v30458_v22 }
  0x2c   :  { %25582 = vmatpush3.bf16.msra.mxu0 %v28341_v5  ;;  %v28350_v14 = vld [vmem:[#allocation5 + $0xe0] sm:$0xff]   ;;  %v28354_v19 = vld [vmem:[#allocation5 + $0xd8] sm:$0xff]   ;;  %v28357_v23 = vld [vmem:[#allocation5 + $0x10] sm:$0xff]   ;;  %v555_v34 = vand.u32 31, %v305_v27  ;;  %v557_v39 = vand.u32 31, %v307_v30  ;;  %v556_v42 = vand.u32 31, %v306_v32  ;;  %p30403_p4 = por %p30402_p3, %p30401_p2 }
  0x2d   :  { %25583 = vmatprep.subr.bf16.mxu0 %v28344_v8  ;;  %v28351_v15 = vld [vmem:[#allocation5 + $0xa0] sm:$0xff]   ;;  %v28355_v20 = vld [vmem:[#allocation5 + $0x98] sm:$0xff]   ;;  %v28358_v24 = vld [vmem:[#allocation5 + $0xd0] sm:$0xff]  }
  0x2e   :  { %25604 = vmatpush3.bf16.msra.mxu1 %v28343_v7  ;;  %v28359_v25 = vld [vmem:[#allocation5 + $0x90] sm:$0xff]   ;;  %v28360_v26 = vld [vmem:[#allocation5 + $0x48] sm:$0xff]   ;;  %v28364_v33 = vld [vmem:[#allocation5 + $0x40] sm:$0xff]   ;;  %p30404_p5 = pnand %p30403_p4, %p30397_p1 }
  0x2f   :  { %25605 = vmatprep.subr.bf16.mxu1 %v28346_v10  ;;  %v28361_v28 = vld [vmem:[#allocation5 + $0x8] sm:$0xff]   ;;  %v28365_v35 = vld [vmem:[#allocation5] sm:$0xff]   ;;  %v54_v38 = vld [vmem:[#allocation2 + $0x8] sm:$0xff] }
  0x30   :  { %25584 = vmatpush3.bf16.msra.mxu0 %v28345_v9  ;;  %v28362_v29 = vld [vmem:[#allocation5 + $0xc8] sm:$0xff]   ;;  %v28366_v37 = vld [vmem:[#allocation5 + $0xc0] sm:$0xff]   ;;  %vm805_vm0 = vcmp.eq.s32.totalorder %v555_v34, %v54_v38  ;;  %v53_v41 = vld [vmem:[#allocation2] sm:$0xff]  ;;  %v308_v9 = vadd.s32 512, %v30458_v22 }
  0x31   :  { %25585 = vmatprep.subr.bf16.mxu0 %v28348_v12  ;;  %v28363_v31 = vld [vmem:[#allocation5 + $0x88] sm:$0xff]   ;;  %v28367_v40 = vld [vmem:[#allocation5 + $0x80] sm:$0xff]   ;;  %vm25079_vm1 = vmpackc.low %vm805_vm0, %vm805_vm0  ;;  %vm804_vm2 = vcmp.eq.s32.totalorder %v554_v36, %v53_v41 }
  0x32   :  { %25606 = vmatpush3.bf16.msra.mxu1 %v28347_v11  ;;  %v28368_v43 = vld [vmem:[#allocation5 + $0x178] sm:$0xff]   ;;  %25080 = vmatprep.mubr.msk.bf16.mxu0 %vm25079_vm1, %v30427_v44  ;;  %vm25081_vm3 = vmpackc.low %vm804_vm2, %vm804_vm2  ;;  %v56_v45 = vld [vmem:[#allocation2 + $0x18] sm:$0xff]  ;;  %v311_v11 = vadd.s32 896, %v30458_v22  ;;  %v558_v17 = vand.u32 31, %v308_v9 }
  0x33   :  { %25607 = vmatprep.subr.bf16.mxu1 %v28350_v14  ;;  %vm807_vm4 = vcmp.eq.s32.totalorder %v557_v39, %v56_v45  ;;  %v28369_v46 = vld [vmem:[#allocation5 + $0x138] sm:$0xff]   ;;  %v55_v47 = vld [vmem:[#allocation2 + $0x10] sm:$0xff]  ;;  %v28372_v50 = vld [vmem:[#allocation5 + $0x170] sm:$0xff]  }
  0x34   :  { %25586 = vmatpush3.bf16.msra.mxu0 %v28349_v13  ;;  %vm25083_vm5 = vmpackc.low %vm807_vm4, %vm807_vm4  ;;  %vm806_vm6 = vcmp.eq.s32.totalorder %v556_v42, %v55_v47  ;;  %v28370_v48 = vld [vmem:[#allocation5 + $0x1f8] sm:$0xff]   ;;  %v28373_v51 = vld [vmem:[#allocation5 + $0x130] sm:$0xff]   ;;  %v559_v13 = vand.u32 31, %v309_v6 }
  0x35   :  { %25587 = vmatprep.subr.bf16.mxu0 %v28352_v16  ;;  %25084 = vmatprep.mubr.msk.bf16.mxu1 %vm25083_vm5, %v30427_v44  ;;  %vm25085_vm7 = vmpackc.low %vm806_vm6, %vm806_vm6  ;;  %v28371_v49 = vld [vmem:[#allocation5 + $0x1b8] sm:$0xff]   ;;  %v28374_v52 = vld [vmem:[#allocation5 + $0x1f0] sm:$0xff]  }
  0x36   :  { %25608 = vmatpush3.bf16.msra.mxu1 %v28351_v15  ;;  %v28375_v53 = vld [vmem:[#allocation5 + $0x1b0] sm:$0xff]   ;;  %v28376_v54 = vld [vmem:[#allocation5 + $0x168] sm:$0xff]   ;;  %v28380_v58 = vld [vmem:[#allocation5 + $0x160] sm:$0xff]   ;;  %v310_v15 = vadd.s32 768, %v30458_v22 }
  0x37   :  { %25609 = vmatprep.subr.bf16.mxu1 %v28354_v19  ;;  %v28377_v55 = vld [vmem:[#allocation5 + $0x128] sm:$0xff]   ;;  %v28381_v59 = vld [vmem:[#allocation5 + $0x120] sm:$0xff]   ;;  %v28384_v62 = vld [vmem:[#allocation5 + $0x158] sm:$0xff]  }
  0x38   :  { %25588 = vmatpush3.bf16.msra.mxu0 %v28353_v18  ;;  %v28378_v56 = vld [vmem:[#allocation5 + $0x1e8] sm:$0xff]   ;;  %v28382_v60 = vld [vmem:[#allocation5 + $0x1e0] sm:$0xff]   ;;  %v28385_v63 = vld [vmem:[#allocation5 + $0x118] sm:$0xff]  }
  0x39   :  { %25589 = vmatprep.subr.bf16.mxu0 %v28356_v21  ;;  %v28379_v57 = vld [vmem:[#allocation5 + $0x1a8] sm:$0xff]   ;;  %v28383_v61 = vld [vmem:[#allocation5 + $0x1a0] sm:$0xff]   ;;  %v28386_v0 = vld [vmem:[#allocation5 + $0x1d8] sm:$0xff]  }
  0x3a   :  { %25610 = vmatpush3.bf16.msra.mxu1 %v28355_v20  ;;  %v28387_v1 = vld [vmem:[#allocation5 + $0x198] sm:$0xff]   ;;  %v28388_v2 = vld [vmem:[#allocation5 + $0x150] sm:$0xff]   ;;  %v28392_v7 = vld [vmem:[#allocation5 + $0x148] sm:$0xff]   ;;  %v561_v20 = vand.u32 31, %v311_v11 }
  0x3b   :  { %25611 = vmatprep.subr.bf16.mxu1 %v28358_v24  ;;  %v28389_v3 = vld [vmem:[#allocation5 + $0x110] sm:$0xff]   ;;  %v28393_v8 = vld [vmem:[#allocation5 + $0x108] sm:$0xff]   ;;  %v28396_v14 = vld [vmem:[#allocation5 + $0x140] sm:$0xff]   ;;  %v560_v24 = vand.u32 31, %v310_v15 }
  0x3c   :  { %25590 = vmatpush3.bf16.msra.mxu0 %v28357_v23  ;;  %v28390_v4 = vld [vmem:[#allocation5 + $0x1d0] sm:$0xff]   ;;  %v28394_v10 = vld [vmem:[#allocation5 + $0x1c8] sm:$0xff]   ;;  %v28397_v16 = vld [vmem:[#allocation5 + $0x100] sm:$0xff]  }
  0x3d   :  { %25591 = vmatprep.subr.bf16.mxu0 %v28360_v26  ;;  %v28391_v5 = vld [vmem:[#allocation5 + $0x190] sm:$0xff]   ;;  %v28395_v12 = vld [vmem:[#allocation5 + $0x188] sm:$0xff]   ;;  %v28398_v18 = vld [vmem:[#allocation5 + $0x1c0] sm:$0xff]  }
  0x3e   :  { %25612 = vmatpush3.bf16.msra.mxu1 %v28359_v25  ;;  %v58_v19 = vld [vmem:[#allocation2 + $0x28] sm:$0xff]  ;;  %v28399_v21 = vld [vmem:[#allocation5 + $0x180] sm:$0xff]   ;;  %v57_v23 = vld [vmem:[#allocation2 + $0x20] sm:$0xff] }
  0x3f   :  { %25613 = vmatprep.subr.bf16.mxu1 %v28362_v29  ;;  %vm809_vm8 = vcmp.eq.s32.totalorder %v559_v13, %v58_v19  ;;  %vm808_vm10 = vcmp.eq.s32.totalorder %v558_v17, %v57_v23  ;;  %v28400_v25 = vld [vmem:[#allocation5 + $0x278] sm:$0xff]   ;;  %v60_v26 = vld [vmem:[#allocation2 + $0x38] sm:$0xff]  ;;  %v28405_v32 = vld [vmem:[#allocation5 + $0x230] sm:$0xff]  }
  0x40   :  { %25592 = vmatpush3.bf16.msra.mxu0 %v28361_v28  ;;  %vm25087_vm9 = vmpackc.low %vm809_vm8, %vm809_vm8  ;;  %vm811_vm12 = vcmp.eq.s32.totalorder %v561_v20, %v60_v26  ;;  %v28401_v27 = vld [vmem:[#allocation5 + $0x238] sm:$0xff]   ;;  %v59_v28 = vld [vmem:[#allocation2 + $0x30] sm:$0xff] }
  0x41   :  { %25593 = vmatprep.subr.bf16.mxu0 %v28364_v33  ;;  %vm25089_vm11 = vmpackc.low %vm808_vm10, %vm808_vm10  ;;  %vm810_vm14 = vcmp.eq.s32.totalorder %v560_v24, %v59_v28  ;;  %v28402_v29 = vld [vmem:[#allocation5 + $0x2f8] sm:$0xff]   ;;  %v28406_v33 = vld [vmem:[#allocation5 + $0x2f0] sm:$0xff]  }
  0x42   :  { %25614 = vmatpush3.bf16.msra.mxu1 %v28363_v31  ;;  %vm25091_vm13 = vmpackc.low %vm811_vm12, %vm811_vm12  ;;  %v28403_v30 = vld [vmem:[#allocation5 + $0x2b8] sm:$0xff]   ;;  %v28404_v31 = vld [vmem:[#allocation5 + $0x270] sm:$0xff]  }
  0x43   :  { %25615 = vmatprep.subr.bf16.mxu1 %v28366_v37  ;;  %vm25093_vm15 = vmpackc.low %vm810_vm14, %vm810_vm14  ;;  %v28407_v34 = vld [vmem:[#allocation5 + $0x2b0] sm:$0xff]   ;;  %v28409_v36 = vld [vmem:[#allocation5 + $0x228] sm:$0xff]  }
  0x44   :  { %25594 = vmatpush3.bf16.msra.mxu0 %v28365_v35  ;;  %v28408_v35 = vld [vmem:[#allocation5 + $0x268] sm:$0xff]   ;;  %v28412_v39 = vld [vmem:[#allocation5 + $0x260] sm:$0xff]   ;;  %v28417_v45 = vld [vmem:[#allocation5 + $0x218] sm:$0xff]  }
  0x45   :  { %25623 = vmatprep.subr.bf16.mxu0 %v28368_v43  ;;  %v28410_v37 = vld [vmem:[#allocation5 + $0x2e8] sm:$0xff]   ;;  %v28414_v41 = vld [vmem:[#allocation5 + $0x2e0] sm:$0xff]   ;;  %v28416_v43 = vld [vmem:[#allocation5 + $0x258] sm:$0xff]  }
  0x46   :  { %25616 = vmatpush3.bf16.msra.mxu1 %v28367_v40  ;;  %v28411_v38 = vld [vmem:[#allocation5 + $0x2a8] sm:$0xff]   ;;  %v28413_v40 = vld [vmem:[#allocation5 + $0x220] sm:$0xff]   ;;  %v28419_v47 = vld [vmem:[#allocation5 + $0x298] sm:$0xff]  }
  0x47   :  { %25082 = vmatmul.mubr.msk.bf16.vlgmr.msra.gmra.mxu0 %vm25081_vm3, %v30427_v44  ;;  %25645 = vmatprep.subr.bf16.mxu1 %v28370_v48  ;;  %v28415_v42 = vld [vmem:[#allocation5 + $0x2a0] sm:$0xff]   ;;  %v28420_v48 = vld [vmem:[#allocation5 + $0x250] sm:$0xff]   ;;  %v28432_v6 = vld [vmem:[#allocation5 + $0x378] sm:$0xff]  }
  0x48   :  { %25624 = vmatpush3.bf16.msra.mxu0 %v28369_v46  ;;  %25088 = vmatprep.mubr.msk.bf16.mxu0 %vm25087_vm9, %v30427_v44  ;;  %v28418_v46 = vld [vmem:[#allocation5 + $0x2d8] sm:$0xff]   ;;  %v63_v9 = vld [vmem:[#allocation2 + $0x50] sm:$0xff]  ;;  %v28437_v13 = vld [vmem:[#allocation5 + $0x330] sm:$0xff]  }
  0x49   :  { %25086 = vmatmul.mubr.msk.bf16.vlgmr.msra.gmra.mxu1 %vm25085_vm7, %v30427_v44  ;;  %25625 = vmatprep.subr.bf16.mxu0 %v28372_v50  ;;  %v313_v50 = vadd.s32 1152, %v30458_v22  ;;  %v28435_v11 = vld [vmem:[#allocation5 + $0x3b8] sm:$0xff]   ;;  %v28439_v15 = vld [vmem:[#allocation5 + $0x3b0] sm:$0xff]   ;;  %v28441_v17 = vld [vmem:[#allocation5 + $0x328] sm:$0xff]  }
  0x4a   :  { %25646 = vmatpush3.bf16.msra.mxu1 %v28371_v49  ;;  %25092 = vmatprep.mubr.msk.bf16.mxu1 %vm25091_vm13, %v30427_v44  ;;  %v28421_v49 = vld [vmem:[#allocation5 + $0x210] sm:$0xff]   ;;  %v28443_v19 = vld [vmem:[#allocation5 + $0x3a8] sm:$0xff]   ;;  %v28444_v20 = vld [vmem:[#allocation5 + $0x360] sm:$0xff]  }
  0x4b   :  { %25647 = vmatprep.subr.bf16.mxu1 %v28374_v52  ;;  %v28423_v52 = vld [vmem:[#allocation5 + $0x290] sm:$0xff]   ;;  %v28446_v23 = vld [vmem:[#allocation5 + $0x3e0] sm:$0xff]   ;;  %v28449_v26 = vld [vmem:[#allocation5 + $0x318] sm:$0xff]  }
  0x4c   :  { %25626 = vmatpush3.bf16.msra.mxu0 %v28373_v51  ;;  %v28422_v51 = vld [vmem:[#allocation5 + $0x2d0] sm:$0xff]   ;;  %v28447_v24 = vld [vmem:[#allocation5 + $0x3a0] sm:$0xff]   ;;  %v28451_v28 = vld [vmem:[#allocation5 + $0x398] sm:$0xff]  }
  0x4d   :  { %25627 = vmatprep.subr.bf16.mxu0 %v28376_v54  ;;  %v28424_v54 = vld [vmem:[#allocation5 + $0x248] sm:$0xff]  }
  0x4e   :  { %25648 = vmatpush3.bf16.msra.mxu1 %v28375_v53  ;;  %v312_v53 = vadd.s32 1024, %v30458_v22 }
  0x4f   :  { %25649 = vmatprep.subr.bf16.mxu1 %v28378_v56  ;;  %v563_v56 = vand.u32 31, %v313_v50  ;;  %v65_v50 = vld [vmem:[#allocation2 + $0x60] sm:$0xff] }
  0x50   :  { %25628 = vmatpush3.bf16.msra.mxu0 %v28377_v55  ;;  %v28425_v55 = vld [vmem:[#allocation5 + $0x208] sm:$0xff]  }
  0x51   :  { %25629 = vmatprep.subr.bf16.mxu0 %v28380_v58  ;;  %v315_v58 = vadd.s32 1408, %v30458_v22 }
  0x52   :  { %25650 = vmatpush3.bf16.msra.mxu1 %v28379_v57  ;;  %v28426_v57 = vld [vmem:[#allocation5 + $0x2c8] sm:$0xff]  }
  0x53   :  { %25651 = vmatprep.subr.bf16.mxu1 %v28382_v60  ;;  %v562_v60 = vand.u32 31, %v312_v53  ;;  %v68_v53 = vld [vmem:[#allocation2 + $0x78] sm:$0xff] }
  0x54   :  { %25630 = vmatpush3.bf16.msra.mxu0 %v28381_v59  ;;  %v28427_v59 = vld [vmem:[#allocation5 + $0x288] sm:$0xff]  }
  0x55   :  { %25631 = vmatprep.subr.bf16.mxu0 %v28384_v62  ;;  %v314_v62 = vadd.s32 1280, %v30458_v22 }
  0x56   :  { %25652 = vmatpush3.bf16.msra.mxu1 %v28383_v61  ;;  %v28428_v61 = vld [vmem:[#allocation5 + $0x240] sm:$0xff]  }
  0x57   :  { %25653 = vmatprep.subr.bf16.mxu1 %v28386_v0  ;;  %v28430_v0 = vld [vmem:[#allocation5 + $0x2c0] sm:$0xff]  }
  0x58   :  { %25632 = vmatpush3.bf16.msra.mxu0 %v28385_v63  ;;  %v28429_v63 = vld [vmem:[#allocation5 + $0x200] sm:$0xff]  }
  0x59   :  { %25633 = vmatprep.subr.bf16.mxu0 %v28388_v2  ;;  %v565_v2 = vand.u32 31, %v315_v58  ;;  %v28468_v58 = vld [vmem:[#allocation5 + $0x470] sm:$0xff]  }
  0x5a   :  { %25654 = vmatpush3.bf16.msra.mxu1 %v28387_v1  ;;  %v62_v1 = vld [vmem:[#allocation2 + $0x48] sm:$0xff] }
  0x5b   :  { %25655 = vmatprep.subr.bf16.mxu1 %v28390_v4  ;;  %vm813_vm0 = vcmp.eq.s32.totalorder %v563_v56, %v62_v1  ;;  %v61_v4 = vld [vmem:[#allocation2 + $0x40] sm:$0xff]  ;;  %v28466_v56 = vld [vmem:[#allocation5 + $0x4f8] sm:$0xff]   ;;  %v28475_v1 = vld [vmem:[#allocation5 + $0x4a8] sm:$0xff]  }
  0x5c   :  { %25634 = vmatpush3.bf16.msra.mxu0 %v28389_v3  ;;  %v28431_v3 = vld [vmem:[#allocation5 + $0x280] sm:$0xff]   ;;  %vm25095_vm1 = vmpackc.low %vm813_vm0, %vm813_vm0  ;;  %vm812_vm2 = vcmp.eq.s32.totalorder %v562_v60, %v61_v4  ;;  %v28470_v60 = vld [vmem:[#allocation5 + $0x4f0] sm:$0xff]  }
  0x5d   :  { %25635 = vmatprep.subr.bf16.mxu0 %v28392_v7  ;;  %vm25097_vm3 = vmpackc.low %vm812_vm2, %vm812_vm2  ;;  %v64_v7 = vld [vmem:[#allocation2 + $0x58] sm:$0xff]  ;;  %v28478_v4 = vld [vmem:[#allocation5 + $0x4e0] sm:$0xff]  }
  0x5e   :  { %25656 = vmatpush3.bf16.msra.mxu1 %v28391_v5  ;;  %v564_v5 = vand.u32 31, %v314_v62  ;;  %vm815_vm4 = vcmp.eq.s32.totalorder %v565_v2, %v64_v7  ;;  %v28472_v62 = vld [vmem:[#allocation5 + $0x468] sm:$0xff]   ;;  %v28476_v2 = vld [vmem:[#allocation5 + $0x460] sm:$0xff]   ;;  %v28481_v7 = vld [vmem:[#allocation5 + $0x418] sm:$0xff]  }
  0x5f   :  { %25657 = vmatprep.subr.bf16.mxu1 %v28394_v10  ;;  %vm25099_vm5 = vmpackc.low %vm815_vm4, %vm815_vm4  ;;  %v28434_v10 = vld [vmem:[#allocation5 + $0x3f8] sm:$0xff]  }
  0x60   :  { %25636 = vmatpush3.bf16.msra.mxu0 %v28393_v8  ;;  %v28433_v8 = vld [vmem:[#allocation5 + $0x338] sm:$0xff]   ;;  %vm814_vm6 = vcmp.eq.s32.totalorder %v564_v5, %v63_v9  ;;  %v28479_v5 = vld [vmem:[#allocation5 + $0x4a0] sm:$0xff]  }
  0x61   :  { %25637 = vmatprep.subr.bf16.mxu0 %v28396_v14  ;;  %vm25101_vm7 = vmpackc.low %vm814_vm6, %vm814_vm6  ;;  %v28438_v14 = vld [vmem:[#allocation5 + $0x3f0] sm:$0xff]   ;;  %v28483_v9 = vld [vmem:[#allocation5 + $0x498] sm:$0xff]  }
  0x62   :  { %25658 = vmatpush3.bf16.msra.mxu1 %v28395_v12  ;;  %v28436_v12 = vld [vmem:[#allocation5 + $0x370] sm:$0xff]  }
  0x63   :  { %25659 = vmatprep.subr.bf16.mxu1 %v28398_v18  ;;  %v28442_v18 = vld [vmem:[#allocation5 + $0x3e8] sm:$0xff]  }
  0x64   :  { %25638 = vmatpush3.bf16.msra.mxu0 %v28397_v16  ;;  %v28440_v16 = vld [vmem:[#allocation5 + $0x368] sm:$0xff]  }
  0x65   :  { %25667 = vmatprep.subr.bf16.mxu0 %v28400_v25  ;;  %v28448_v25 = vld [vmem:[#allocation5 + $0x358] sm:$0xff]  }
  0x66   :  { %25660 = vmatpush3.bf16.msra.mxu1 %v28399_v21  ;;  %v28445_v21 = vld [vmem:[#allocation5 + $0x320] sm:$0xff]  }
  0x67   :  { %25090 = vmatmul.mubr.msk.bf16.vlgmr.msra.gmra.mxu0 %vm25089_vm11, %v30427_v44  ;;  %25689 = vmatprep.subr.bf16.mxu1 %v28402_v29  ;;  %v28452_v29 = vld [vmem:[#allocation5 + $0x350] sm:$0xff]  }
  0x68   :  { %25668 = vmatpush3.bf16.msra.mxu0 %v28401_v27  ;;  %25096 = vmatprep.mubr.msk.bf16.mxu0 %vm25095_vm1, %v30427_v44  ;;  %v28450_v27 = vld [vmem:[#allocation5 + $0x3d8] sm:$0xff]  }
  0x69   :  { %25094 = vmatmul.mubr.msk.bf16.vlgmr.msra.gmra.mxu1 %vm25093_vm15, %v30427_v44  ;;  %25669 = vmatprep.subr.bf16.mxu0 %v28404_v31  ;;  %v28454_v31 = vld [vmem:[#allocation5 + $0x3d0] sm:$0xff]  }
  0x6a   :  { %25690 = vmatpush3.bf16.msra.mxu1 %v28403_v30  ;;  %25100 = vmatprep.mubr.msk.bf16.mxu1 %vm25099_vm5, %v30427_v44  ;;  %v28453_v30 = vld [vmem:[#allocation5 + $0x310] sm:$0xff]  }
  0x6b   :  { %25691 = vmatprep.subr.bf16.mxu1 %v28406_v33  ;;  %v28455_v33 = vld [vmem:[#allocation5 + $0x390] sm:$0xff]  }
  0x6c   :  { %25670 = vmatpush3.bf16.msra.mxu0 %v28405_v32  ;;  %v317_v32 = vadd.s32 1664, %v30458_v22 }
  0x6d   :  { %25671 = vmatprep.subr.bf16.mxu0 %v28408_v35  ;;  %v28457_v35 = vld [vmem:[#allocation5 + $0x308] sm:$0xff]  }
  0x6e   :  { %25692 = vmatpush3.bf16.msra.mxu1 %v28407_v34  ;;  %v28456_v34 = vld [vmem:[#allocation5 + $0x348] sm:$0xff]  }
  0x6f   :  { %25693 = vmatprep.subr.bf16.mxu1 %v28410_v37  ;;  %v28458_v37 = vld [vmem:[#allocation5 + $0x3c8] sm:$0xff]  }
  0x70   :  { %25672 = vmatpush3.bf16.msra.mxu0 %v28409_v36  ;;  %v316_v36 = vadd.s32 1536, %v30458_v22 }
  0x71   :  { %25673 = vmatprep.subr.bf16.mxu0 %v28412_v39  ;;  %v28459_v39 = vld [vmem:[#allocation5 + $0x388] sm:$0xff]  }
  0x72   :  { %25694 = vmatpush3.bf16.msra.mxu1 %v28411_v38  ;;  %v567_v38 = vand.u32 31, %v317_v32 }
  0x73   :  { %25695 = vmatprep.subr.bf16.mxu1 %v28414_v41  ;;  %v28460_v41 = vld [vmem:[#allocation5 + $0x340] sm:$0xff]  }
  0x74   :  { %25674 = vmatpush3.bf16.msra.mxu0 %v28413_v40  ;;  %v319_v40 = vadd.s32 1920, %v30458_v22 }
  0x75   :  { %25675 = vmatprep.subr.bf16.mxu0 %v28416_v43  ;;  %v28461_v43 = vld [vmem:[#allocation5 + $0x300] sm:$0xff]  }
  0x76   :  { %25696 = vmatpush3.bf16.msra.mxu1 %v28415_v42  ;;  %v318_v42 = vadd.s32 1792, %v30458_v22 }
  0x77   :  { %25697 = vmatprep.subr.bf16.mxu1 %v28418_v46  ;;  %v28462_v46 = vld [vmem:[#allocation5 + $0x3c0] sm:$0xff]  }
  0x78   :  { %25676 = vmatpush3.bf16.msra.mxu0 %v28417_v45  ;;  %v566_v45 = vand.u32 31, %v316_v36  ;;  %v71_v36 = vld [vmem:[#allocation2 + $0x90] sm:$0xff] }
  0x79   :  { %25677 = vmatprep.subr.bf16.mxu0 %v28420_v48  ;;  %v569_v48 = vand.u32 31, %v319_v40  ;;  %v28501_v40 = vld [vmem:[#allocation5 + $0x530] sm:$0xff]  }
  0x7a   :  { %25698 = vmatpush3.bf16.msra.mxu1 %v28419_v47  ;;  %v66_v47 = vld [vmem:[#allocation2 + $0x68] sm:$0xff]  ;;  %vm816_vm10 = vcmp.eq.s32.totalorder %v566_v45, %v65_v50  ;;  %v28505_v45 = vld [vmem:[#allocation5 + $0x528] sm:$0xff]   ;;  %v28510_v50 = vld [vmem:[#allocation5 + $0x5e0] sm:$0xff]  }
  0x7b   :  { %25699 = vmatprep.subr.bf16.mxu1 %v28422_v51  ;;  %vm817_vm8 = vcmp.eq.s32.totalorder %v567_v38, %v66_v47  ;;  %v568_v51 = vand.u32 31, %v318_v42  ;;  %vm25105_vm11 = vmpackc.low %vm816_vm10, %vm816_vm10  ;;  %vm819_vm12 = vcmp.eq.s32.totalorder %v569_v48, %v68_v53  ;;  %v28499_v38 = vld [vmem:[#allocation5 + $0x5b8] sm:$0xff]   ;;  %v28503_v42 = vld [vmem:[#allocation5 + $0x5b0] sm:$0xff]  }
  0x7c   :  { %25678 = vmatpush3.bf16.msra.mxu0 %v28421_v49  ;;  %v28463_v49 = vld [vmem:[#allocation5 + $0x380] sm:$0xff]   ;;  %vm25103_vm9 = vmpackc.low %vm817_vm8, %vm817_vm8  ;;  %v28507_v47 = vld [vmem:[#allocation5 + $0x5a8] sm:$0xff]  }
  0x7d   :  { %25679 = vmatprep.subr.bf16.mxu0 %v28424_v54  ;;  %v28465_v54 = vld [vmem:[#allocation5 + $0x438] sm:$0xff]   ;;  %vm25107_vm13 = vmpackc.low %vm819_vm12, %vm819_vm12  ;;  %v28508_v48 = vld [vmem:[#allocation5 + $0x560] sm:$0xff]  }
  0x7e   :  { %25700 = vmatpush3.bf16.msra.mxu1 %v28423_v52  ;;  %v28464_v52 = vld [vmem:[#allocation5 + $0x478] sm:$0xff]  }
  0x7f   :  { %25701 = vmatprep.subr.bf16.mxu1 %v28426_v57  ;;  %v28467_v57 = vld [vmem:[#allocation5 + $0x4b8] sm:$0xff]  }
  0x80   :  { %25680 = vmatpush3.bf16.msra.mxu0 %v28425_v55  ;;  %v67_v55 = vld [vmem:[#allocation2 + $0x70] sm:$0xff]  ;;  %v28513_v53 = vld [vmem:[#allocation5 + $0x518] sm:$0xff]  }
  0x81   :  { %25681 = vmatprep.subr.bf16.mxu0 %v28428_v61  ;;  %vm818_vm14 = vcmp.eq.s32.totalorder %v568_v51, %v67_v55  ;;  %v28471_v61 = vld [vmem:[#allocation5 + $0x4b0] sm:$0xff]   ;;  %v28511_v51 = vld [vmem:[#allocation5 + $0x5a0] sm:$0xff]   ;;  %v28515_v55 = vld [vmem:[#allocation5 + $0x598] sm:$0xff]  }
  0x82   :  { %25702 = vmatpush3.bf16.msra.mxu1 %v28427_v59  ;;  %vm25109_vm15 = vmpackc.low %vm818_vm14, %vm818_vm14  ;;  %v28469_v59 = vld [vmem:[#allocation5 + $0x430] sm:$0xff]  }
  0x83   :  { %25703 = vmatprep.subr.bf16.mxu1 %v28430_v0  ;;  %v28474_v0 = vld [vmem:[#allocation5 + $0x4e8] sm:$0xff]  }
  0x84   :  { %25682 = vmatpush3.bf16.msra.mxu0 %v28429_v63  ;;  %v28473_v63 = vld [vmem:[#allocation5 + $0x428] sm:$0xff]  }
  0x85   :  { %25711 = vmatprep.subr.bf16.mxu0 %v28432_v6  ;;  %v28480_v6 = vld [vmem:[#allocation5 + $0x458] sm:$0xff]  }
  0x86   :  { %25704 = vmatpush3.bf16.msra.mxu1 %v28431_v3  ;;  %v28477_v3 = vld [vmem:[#allocation5 + $0x420] sm:$0xff]  }
  0x87   :  { %25098 = vmatmul.mubr.msk.bf16.vlgmr.msra.gmra.mxu0 %vm25097_vm3, %v30427_v44  ;;  %25733 = vmatprep.subr.bf16.mxu1 %v28434_v10  ;;  %v28484_v10 = vld [vmem:[#allocation5 + $0x450] sm:$0xff]  }
  0x88   :  { %25712 = vmatpush3.bf16.msra.mxu0 %v28433_v8  ;;  %25104 = vmatprep.mubr.msk.bf16.mxu0 %vm25103_vm9, %v30427_v44  ;;  %v28482_v8 = vld [vmem:[#allocation5 + $0x4d8] sm:$0xff]  }
  0x89   :  { %25102 = vmatmul.mubr.msk.bf16.vlgmr.msra.gmra.mxu1 %vm25101_vm7, %v30427_v44  ;;  %25713 = vmatprep.subr.bf16.mxu0 %v28436_v12  ;;  %v28486_v12 = vld [vmem:[#allocation5 + $0x4d0] sm:$0xff]  }
  0x8a   :  { %25734 = vmatpush3.bf16.msra.mxu1 %v28435_v11  ;;  %25108 = vmatprep.mubr.msk.bf16.mxu1 %vm25107_vm13, %v30427_v44  ;;  %v28485_v11 = vld [vmem:[#allocation5 + $0x410] sm:$0xff]  }
  0x8b   :  { %25735 = vmatprep.subr.bf16.mxu1 %v28438_v14  ;;  %v321_v14 = vadd.s32 2176, %v30458_v22 }
  0x8c   :  { %25714 = vmatpush3.bf16.msra.mxu0 %v28437_v13  ;;  %v28487_v13 = vld [vmem:[#allocation5 + $0x490] sm:$0xff]  }
  0x8d   :  { %25715 = vmatprep.subr.bf16.mxu0 %v28440_v16  ;;  %v28489_v16 = vld [vmem:[#allocation5 + $0x408] sm:$0xff]  }
  0x8e   :  { %25736 = vmatpush3.bf16.msra.mxu1 %v28439_v15  ;;  %v28488_v15 = vld [vmem:[#allocation5 + $0x448] sm:$0xff]  }
  0x8f   :  { %25737 = vmatprep.subr.bf16.mxu1 %v28442_v18  ;;  %v28490_v18 = vld [vmem:[#allocation5 + $0x4c8] sm:$0xff]  }
  0x90   :  { %25716 = vmatpush3.bf16.msra.mxu0 %v28441_v17  ;;  %v320_v17 = vadd.s32 2048, %v30458_v22 }
  0x91   :  { %25717 = vmatprep.subr.bf16.mxu0 %v28444_v20  ;;  %v28491_v20 = vld [vmem:[#allocation5 + $0x488] sm:$0xff]  }
  0x92   :  { %25738 = vmatpush3.bf16.msra.mxu1 %v28443_v19  ;;  %v323_v19 = vadd.s32 2432, %v30458_v22 }
  0x93   :  { %25739 = vmatprep.subr.bf16.mxu1 %v28446_v23  ;;  %v28492_v23 = vld [vmem:[#allocation5 + $0x440] sm:$0xff]  }
  0x94   :  { %25718 = vmatpush3.bf16.msra.mxu0 %v28445_v21  ;;  %v571_v21 = vand.u32 31, %v321_v14  ;;  %v28528_v14 = vld [vmem:[#allocation5 + $0x678] sm:$0xff]  }
  0x95   :  { %25719 = vmatprep.subr.bf16.mxu0 %v28448_v25  ;;  %v28493_v25 = vld [vmem:[#allocation5 + $0x400] sm:$0xff]  }
  0x96   :  { %25740 = vmatpush3.bf16.msra.mxu1 %v28447_v24  ;;  %v322_v24 = vadd.s32 2304, %v30458_v22 }
  0x97   :  { %25741 = vmatprep.subr.bf16.mxu1 %v28450_v27  ;;  %v28494_v27 = vld [vmem:[#allocation5 + $0x4c0] sm:$0xff]  }
  0x98   :  { %25720 = vmatpush3.bf16.msra.mxu0 %v28449_v26  ;;  %v570_v26 = vand.u32 31, %v320_v17  ;;  %v572_v32 = vand.u32 31, %v322_v24  ;;  %v75_v17 = vld [vmem:[#allocation2 + $0xb0] sm:$0xff]  ;;  %v28535_v24 = vld [vmem:[#allocation5 + $0x6b0] sm:$0xff]  }
  0x99   :  { %25721 = vmatprep.subr.bf16.mxu0 %v28452_v29  ;;  %v573_v29 = vand.u32 31, %v323_v19  ;;  %v28531_v19 = vld [vmem:[#allocation5 + $0x6b8] sm:$0xff]  }
  0x9a   :  { %25742 = vmatpush3.bf16.msra.mxu1 %v28451_v28  ;;  %v70_v28 = vld [vmem:[#allocation2 + $0x88] sm:$0xff]  ;;  %vm822_vm6 = vcmp.eq.s32.totalorder %v572_v32, %v71_v36  ;;  %v28543_v32 = vld [vmem:[#allocation5 + $0x6a0] sm:$0xff]  }
  0x9b   :  { %25743 = vmatprep.subr.bf16.mxu1 %v28454_v31  ;;  %vm821_vm0 = vcmp.eq.s32.totalorder %v571_v21, %v70_v28  ;;  %v69_v31 = vld [vmem:[#allocation2 + $0x80] sm:$0xff]  ;;  %vm25117_vm7 = vmpackc.low %vm822_vm6, %vm822_vm6  ;;  %v28539_v28 = vld [vmem:[#allocation5 + $0x6a8] sm:$0xff]  }
  0x9c   :  { %25722 = vmatpush3.bf16.msra.mxu0 %v28453_v30  ;;  %v28495_v30 = vld [vmem:[#allocation5 + $0x480] sm:$0xff]   ;;  %vm25111_vm1 = vmpackc.low %vm821_vm0, %vm821_vm0  ;;  %vm820_vm2 = vcmp.eq.s32.totalorder %v570_v26, %v69_v31  ;;  %v28533_v21 = vld [vmem:[#allocation5 + $0x630] sm:$0xff]  }
  0x9d   :  { %25723 = vmatprep.subr.bf16.mxu0 %v28456_v34  ;;  %v72_v34 = vld [vmem:[#allocation2 + $0x98] sm:$0xff]  ;;  %vm25113_vm3 = vmpackc.low %vm820_vm2, %vm820_vm2  ;;  %v28542_v31 = vld [vmem:[#allocation5 + $0x6e0] sm:$0xff]  }
  0x9e   :  { %25744 = vmatpush3.bf16.msra.mxu1 %v28455_v33  ;;  %v28496_v33 = vld [vmem:[#allocation5 + $0x578] sm:$0xff]   ;;  %vm823_vm4 = vcmp.eq.s32.totalorder %v573_v29, %v72_v34  ;;  %v28537_v26 = vld [vmem:[#allocation5 + $0x628] sm:$0xff]   ;;  %v28540_v29 = vld [vmem:[#allocation5 + $0x660] sm:$0xff]  }
  0x9f   :  { %25745 = vmatprep.subr.bf16.mxu1 %v28458_v37  ;;  %vm25115_vm5 = vmpackc.low %vm823_vm4, %vm823_vm4  ;;  %v28498_v37 = vld [vmem:[#allocation5 + $0x5f8] sm:$0xff]  }
  0xa0   :  { %25724 = vmatpush3.bf16.msra.mxu0 %v28457_v35  ;;  %v28497_v35 = vld [vmem:[#allocation5 + $0x538] sm:$0xff]  }
  0xa1   :  { %25725 = vmatprep.subr.bf16.mxu0 %v28460_v41  ;;  %v28502_v41 = vld [vmem:[#allocation5 + $0x5f0] sm:$0xff]   ;;  %v28545_v34 = vld [vmem:[#allocation5 + $0x618] sm:$0xff]  }
  0xa2   :  { %25746 = vmatpush3.bf16.msra.mxu1 %v28459_v39  ;;  %v28500_v39 = vld [vmem:[#allocation5 + $0x570] sm:$0xff]   ;;  %v28547_v36 = vld [vmem:[#allocation5 + $0x698] sm:$0xff]  }
  0xa3   :  { %25747 = vmatprep.subr.bf16.mxu1 %v28462_v46  ;;  %v28506_v46 = vld [vmem:[#allocation5 + $0x5e8] sm:$0xff]  }
  0xa4   :  { %25726 = vmatpush3.bf16.msra.mxu0 %v28461_v43  ;;  %v28504_v43 = vld [vmem:[#allocation5 + $0x568] sm:$0xff]  }
  0xa5   :  { %25755 = vmatprep.subr.bf16.mxu0 %v28464_v52  ;;  %v28512_v52 = vld [vmem:[#allocation5 + $0x558] sm:$0xff]  }
  0xa6   :  { %25748 = vmatpush3.bf16.msra.mxu1 %v28463_v49  ;;  %v28509_v49 = vld [vmem:[#allocation5 + $0x520] sm:$0xff]  }
  0xa7   :  { %25106 = vmatmul.mubr.msk.bf16.vlgmr.msra.gmra.mxu0 %vm25105_vm11, %v30427_v44  ;;  %25777 = vmatprep.subr.bf16.mxu1 %v28466_v56  ;;  %v28516_v56 = vld [vmem:[#allocation5 + $0x550] sm:$0xff]  }
  0xa8   :  { %25756 = vmatpush3.bf16.msra.mxu0 %v28465_v54  ;;  %25112 = vmatprep.mubr.msk.bf16.mxu0 %vm25111_vm1, %v30427_v44  ;;  %v28514_v54 = vld [vmem:[#allocation5 + $0x5d8] sm:$0xff]  }
  0xa9   :  { %25110 = vmatmul.mubr.msk.bf16.vlgmr.msra.gmra.mxu1 %vm25109_vm15, %v30427_v44  ;;  %25757 = vmatprep.subr.bf16.mxu0 %v28468_v58  ;;  %v325_v58 = vadd.s32 2688, %v30458_v22 }
  0xaa   :  { %25778 = vmatpush3.bf16.msra.mxu1 %v28467_v57  ;;  %25116 = vmatprep.mubr.msk.bf16.mxu1 %vm25115_vm5, %v30427_v44  ;;  %v28517_v57 = vld [vmem:[#allocation5 + $0x510] sm:$0xff]  }
  0xab   :  { %25779 = vmatprep.subr.bf16.mxu1 %v28470_v60  ;;  %v28519_v60 = vld [vmem:[#allocation5 + $0x590] sm:$0xff]  }
  0xac   :  { %25758 = vmatpush3.bf16.msra.mxu0 %v28469_v59  ;;  %v28518_v59 = vld [vmem:[#allocation5 + $0x5d0] sm:$0xff]  }
  0xad   :  { %25759 = vmatprep.subr.bf16.mxu0 %v28472_v62  ;;  %v28520_v62 = vld [vmem:[#allocation5 + $0x548] sm:$0xff]  }
  0xae   :  { %25780 = vmatpush3.bf16.msra.mxu1 %v28471_v61  ;;  %v324_v61 = vadd.s32 2560, %v30458_v22 }
  0xaf   :  { %25781 = vmatprep.subr.bf16.mxu1 %v28474_v0  ;;  %v575_v0 = vand.u32 31, %v325_v58  ;;  %v331_v58 = vadd.s32 3456, %v30458_v22 }
  0xb0   :  { %25760 = vmatpush3.bf16.msra.mxu0 %v28473_v63  ;;  %v28521_v63 = vld [vmem:[#allocation5 + $0x508] sm:$0xff]  }
  0xb1   :  { %25761 = vmatprep.subr.bf16.mxu0 %v28476_v2  ;;  %v327_v2 = vadd.s32 2944, %v30458_v22 }
  0xb2   :  { %25782 = vmatpush3.bf16.msra.mxu1 %v28475_v1  ;;  %v28522_v1 = vld [vmem:[#allocation5 + $0x5c8] sm:$0xff]  }
  0xb3   :  { %25783 = vmatprep.subr.bf16.mxu1 %v28478_v4  ;;  %v574_v4 = vand.u32 31, %v324_v61 }
  0xb4   :  { %25762 = vmatpush3.bf16.msra.mxu0 %v28477_v3  ;;  %v28523_v3 = vld [vmem:[#allocation5 + $0x588] sm:$0xff]  }
  0xb5   :  { %25763 = vmatprep.subr.bf16.mxu0 %v28480_v6  ;;  %v326_v6 = vadd.s32 2816, %v30458_v22 }
  0xb6   :  { %25784 = vmatpush3.bf16.msra.mxu1 %v28479_v5  ;;  %v28524_v5 = vld [vmem:[#allocation5 + $0x540] sm:$0xff]  }
  0xb7   :  { %25785 = vmatprep.subr.bf16.mxu1 %v28482_v8  ;;  %v28526_v8 = vld [vmem:[#allocation5 + $0x5c0] sm:$0xff]  }
  0xb8   :  { %25764 = vmatpush3.bf16.msra.mxu0 %v28481_v7  ;;  %v28525_v7 = vld [vmem:[#allocation5 + $0x500] sm:$0xff]  }
  0xb9   :  { %25765 = vmatprep.subr.bf16.mxu0 %v28484_v10  ;;  %v577_v10 = vand.u32 31, %v327_v2  ;;  %v581_v2 = vand.u32 31, %v331_v58 }
  0xba   :  { %25786 = vmatpush3.bf16.msra.mxu1 %v28483_v9  ;;  %v74_v9 = vld [vmem:[#allocation2 + $0xa8] sm:$0xff] }
  0xbb   :  { %25787 = vmatprep.subr.bf16.mxu1 %v28486_v12  ;;  %vm825_vm8 = vcmp.eq.s32.totalorder %v575_v0, %v74_v9  ;;  %v73_v12 = vld [vmem:[#allocation2 + $0xa0] sm:$0xff]  ;;  %v28558_v0 = vld [vmem:[#allocation5 + $0x6c0] sm:$0xff]  }
  0xbc   :  { %25766 = vmatpush3.bf16.msra.mxu0 %v28485_v11  ;;  %v28527_v11 = vld [vmem:[#allocation5 + $0x580] sm:$0xff]   ;;  %vm25119_vm9 = vmpackc.low %vm825_vm8, %vm825_vm8  ;;  %vm824_vm10 = vcmp.eq.s32.totalorder %v574_v4, %v73_v12  ;;  %v77_v4 = vld [vmem:[#allocation2 + $0xc0] sm:$0xff] }
  0xbd   :  { %25767 = vmatprep.subr.bf16.mxu0 %v28488_v15  ;;  %vm25121_vm11 = vmpackc.low %vm824_vm10, %vm824_vm10  ;;  %v76_v15 = vld [vmem:[#allocation2 + $0xb8] sm:$0xff]  ;;  %v23078_v9 = vld [vmem:[#allocation7] ss:$0 sm:$0xff] }
  0xbe   :  { %25788 = vmatpush3.bf16.msra.mxu1 %v28487_v13  ;;  %v576_v13 = vand.u32 31, %v326_v6  ;;  %vm827_vm12 = vcmp.eq.s32.totalorder %v577_v10, %v76_v15  ;;  %v28562_v12 = vld [vmem:[#allocation5 + $0x7f8] sm:$0xff]   ;;  %v28564_v15 = vld [vmem:[#allocation5 + $0x770] sm:$0xff]  }
  0xbf   :  { %25789 = vmatprep.subr.bf16.mxu1 %v28490_v18  ;;  %vm25123_vm13 = vmpackc.low %vm827_vm12, %vm827_vm12  ;;  %v28530_v18 = vld [vmem:[#allocation5 + $0x6f8] sm:$0xff]  }
  0xc0   :  { %25768 = vmatpush3.bf16.msra.mxu0 %v28489_v16  ;;  %v28529_v16 = vld [vmem:[#allocation5 + $0x638] sm:$0xff]   ;;  %vm826_vm14 = vcmp.eq.s32.totalorder %v576_v13, %v75_v17  ;;  %v28566_v17 = vld [vmem:[#allocation5 + $0x7f0] sm:$0xff]  }
  0xc1   :  { %25769 = vmatprep.subr.bf16.mxu0 %v28492_v23  ;;  %vm25125_vm15 = vmpackc.low %vm826_vm14, %vm826_vm14  ;;  %v28534_v23 = vld [vmem:[#allocation5 + $0x6f0] sm:$0xff]   ;;  %v28563_v13 = vld [vmem:[#allocation5 + $0x7b8] sm:$0xff]  }
  0xc2   :  { %25790 = vmatpush3.bf16.msra.mxu1 %v28491_v20  ;;  %v28532_v20 = vld [vmem:[#allocation5 + $0x670] sm:$0xff]  }
  0xc3   :  { %25791 = vmatprep.subr.bf16.mxu1 %v28494_v27  ;;  %v28538_v27 = vld [vmem:[#allocation5 + $0x6e8] sm:$0xff]  }
  0xc4   :  { %25770 = vmatpush3.bf16.msra.mxu0 %v28493_v25  ;;  %v28536_v25 = vld [vmem:[#allocation5 + $0x668] sm:$0xff]  }
  0xc5   :  { %25799 = vmatprep.subr.bf16.mxu0 %v28496_v33  ;;  %v28544_v33 = vld [vmem:[#allocation5 + $0x658] sm:$0xff]  }
  0xc6   :  { %25792 = vmatpush3.bf16.msra.mxu1 %v28495_v30  ;;  %v28541_v30 = vld [vmem:[#allocation5 + $0x620] sm:$0xff]  }
  0xc7   :  { %25114 = vmatmul.mubr.msk.bf16.vlgmr.msra.gmra.mxu0 %vm25113_vm3, %v30427_v44  ;;  %25821 = vmatprep.subr.bf16.mxu1 %v28498_v37 }
  0xc8   :  { %25800 = vmatpush3.bf16.msra.mxu0 %v28497_v35  ;;  %25120 = vmatprep.mubr.msk.bf16.mxu0 %vm25119_vm9, %v30427_v44  ;;  %v28546_v35 = vld [vmem:[#allocation5 + $0x6d8] sm:$0xff]  }
  0xc9   :  { %25118 = vmatmul.mubr.msk.bf16.vlgmr.msra.gmra.mxu1 %vm25117_vm7, %v30427_v44  ;;  %25801 = vmatprep.subr.bf16.mxu0 %v28500_v39  ;;  %v28549_v39 = vld [vmem:[#allocation5 + $0x610] sm:$0xff]  }
  0xca   :  { %25822 = vmatpush3.bf16.msra.mxu1 %v28499_v38  ;;  %25124 = vmatprep.mubr.msk.bf16.mxu1 %vm25123_vm13, %v30427_v44  ;;  %v28548_v38 = vld [vmem:[#allocation5 + $0x650] sm:$0xff]  }
  0xcb   :  { %25823 = vmatprep.subr.bf16.mxu1 %v28502_v41  ;;  %v28550_v41 = vld [vmem:[#allocation5 + $0x6d0] sm:$0xff]  }
  0xcc   :  { %25802 = vmatpush3.bf16.msra.mxu0 %v28501_v40 }
  0xcd   :  { %25803 = vmatprep.subr.bf16.mxu0 %v28504_v43 }
  0xce   :  { %25824 = vmatpush3.bf16.msra.mxu1 %v28503_v42  ;;  %v329_v42 = vadd.s32 3200, %v30458_v22 }
  0xcf   :  { %25825 = vmatprep.subr.bf16.mxu1 %v28506_v46  ;;  %v28551_v46 = vld [vmem:[#allocation5 + $0x690] sm:$0xff]  }
  0xd0   :  { %25804 = vmatpush3.bf16.msra.mxu0 %v28505_v45 }
  0xd1   :  { %25805 = vmatprep.subr.bf16.mxu0 %v28508_v48  ;;  %v28552_v48 = vld [vmem:[#allocation5 + $0x648] sm:$0xff]  }
  0xd2   :  { %25826 = vmatpush3.bf16.msra.mxu1 %v28507_v47 }
  0xd3   :  { %25827 = vmatprep.subr.bf16.mxu1 %v28510_v50 }
  0xd4   :  { %25806 = vmatpush3.bf16.msra.mxu0 %v28509_v49  ;;  %v328_v49 = vadd.s32 3072, %v30458_v22 }
  0xd5   :  { %25807 = vmatprep.subr.bf16.mxu0 %v28512_v52 }
  0xd6   :  { %25828 = vmatpush3.bf16.msra.mxu1 %v28511_v51  ;;  %v28553_v51 = vld [vmem:[#allocation5 + $0x608] sm:$0xff]  }
  0xd7   :  { %25829 = vmatprep.subr.bf16.mxu1 %v28514_v54  ;;  %v28554_v54 = vld [vmem:[#allocation5 + $0x6c8] sm:$0xff]  }
  0xd8   :  { %25808 = vmatpush3.bf16.msra.mxu0 %v28513_v53 }
  0xd9   :  { %25809 = vmatprep.subr.bf16.mxu0 %v28516_v56 }
  0xda   :  { %25830 = vmatpush3.bf16.msra.mxu1 %v28515_v55  ;;  %v579_v55 = vand.u32 31, %v329_v42  ;;  %v28584_v42 = vld [vmem:[#allocation5 + $0x748] sm:$0xff]  }
  0xdb   :  { %25831 = vmatprep.subr.bf16.mxu1 %v28518_v59  ;;  %v28556_v59 = vld [vmem:[#allocation5 + $0x640] sm:$0xff]  }
  0xdc   :  { %25810 = vmatpush3.bf16.msra.mxu0 %v28517_v57  ;;  %v28555_v57 = vld [vmem:[#allocation5 + $0x688] sm:$0xff]  }
  0xdd   :  { %25811 = vmatprep.subr.bf16.mxu0 %v28520_v62  ;;  %v28557_v62 = vld [vmem:[#allocation5 + $0x600] sm:$0xff]  }
  0xde   :  { %25832 = vmatpush3.bf16.msra.mxu1 %v28519_v60  ;;  %v578_v60 = vand.u32 31, %v328_v49 }
  0xdf   :  { %25833 = vmatprep.subr.bf16.mxu1 %v28522_v1  ;;  %v78_v1 = vld [vmem:[#allocation2 + $0xc8] sm:$0xff] }
  0xe0   :  { %25812 = vmatpush3.bf16.msra.mxu0 %v28521_v63  ;;  %v330_v63 = vadd.s32 3328, %v30458_v22  ;;  %vm829_vm0 = vcmp.eq.s32.totalorder %v579_v55, %v78_v1  ;;  %vm828_vm2 = vcmp.eq.s32.totalorder %v578_v60, %v77_v4  ;;  %v81_v1 = vld [vmem:[#allocation2 + $0xe0] sm:$0xff]  ;;  %v84_v4 = vld [vmem:[#allocation2 + $0xf8] sm:$0xff] }
  0xe1   :  { %25813 = vmatprep.subr.bf16.mxu0 %v28524_v5  ;;  %vm25127_vm1 = vmpackc.low %vm829_vm0, %vm829_vm0  ;;  %v28560_v5 = vld [vmem:[#allocation5 + $0x778] sm:$0xff]  }
  0xe2   :  { %25834 = vmatpush3.bf16.msra.mxu1 %v28523_v3  ;;  %v28559_v3 = vld [vmem:[#allocation5 + $0x680] sm:$0xff]   ;;  %v580_v6 = vand.u32 31, %v330_v63  ;;  %vm25129_vm3 = vmpackc.low %vm828_vm2, %vm828_vm2 }
  0xe3   :  { %25835 = vmatprep.subr.bf16.mxu1 %v28526_v8  ;;  %v28561_v8 = vld [vmem:[#allocation5 + $0x738] sm:$0xff]  }
  0xe4   :  { %25814 = vmatpush3.bf16.msra.mxu0 %v28525_v7  ;;  %v80_v7 = vld [vmem:[#allocation2 + $0xd8] sm:$0xff] }
  0xe5   :  { %25843 = vmatprep.subr.bf16.mxu0 %v28528_v14  ;;  %vm831_vm4 = vcmp.eq.s32.totalorder %v581_v2, %v80_v7  ;;  %v28594_v7 = vld [vmem:[#allocation5 + $0x8f8] sm:$0xff]  }
  0xe6   :  { %25836 = vmatpush3.bf16.msra.mxu1 %v28527_v11  ;;  %vm25131_vm5 = vmpackc.low %vm831_vm4, %vm831_vm4  ;;  %v79_v11 = vld [vmem:[#allocation2 + $0xd0] sm:$0xff] }
  0xe7   :  { %25122 = vmatmul.mubr.msk.bf16.vlgmr.msra.gmra.mxu0 %vm25121_vm11, %v30427_v44  ;;  %25865 = vmatprep.subr.bf16.mxu1 %v28530_v18  ;;  %vm830_vm6 = vcmp.eq.s32.totalorder %v580_v6, %v79_v11  ;;  %v28567_v18 = vld [vmem:[#allocation5 + $0x7b0] sm:$0xff]   ;;  %v83_v6 = vld [vmem:[#allocation2 + $0xf0] sm:$0xff] }
  0xe8   :  { %25844 = vmatpush3.bf16.msra.mxu0 %v28529_v16  ;;  %25128 = vmatprep.mubr.msk.bf16.mxu0 %vm25127_vm1, %v30427_v44  ;;  %vm25133_vm7 = vmpackc.low %vm830_vm6, %vm830_vm6  ;;  %v28565_v16 = vld [vmem:[#allocation5 + $0x730] sm:$0xff]  }
  0xe9   :  { %25126 = vmatmul.mubr.msk.bf16.vlgmr.msra.gmra.mxu1 %vm25125_vm15, %v30427_v44  ;;  %25845 = vmatprep.subr.bf16.mxu0 %v28532_v20  ;;  %v28569_v20 = vld [vmem:[#allocation5 + $0x728] sm:$0xff]   ;;  %v28598_v11 = vld [vmem:[#allocation5 + $0x8f0] sm:$0xff]  }
  0xea   :  { %25866 = vmatpush3.bf16.msra.mxu1 %v28531_v19  ;;  %25132 = vmatprep.mubr.msk.bf16.mxu1 %vm25131_vm5, %v30427_v44  ;;  %v28568_v19 = vld [vmem:[#allocation5 + $0x768] sm:$0xff]  }
  0xeb   :  { %25867 = vmatprep.subr.bf16.mxu1 %v28534_v23  ;;  %v28571_v23 = vld [vmem:[#allocation5 + $0x7a8] sm:$0xff]  }
  0xec   :  { %25846 = vmatpush3.bf16.msra.mxu0 %v28533_v21  ;;  %v28570_v21 = vld [vmem:[#allocation5 + $0x7e8] sm:$0xff]  }
  0xed   :  { %25847 = vmatprep.subr.bf16.mxu0 %v28536_v25  ;;  %v28573_v25 = vld [vmem:[#allocation5 + $0x720] sm:$0xff]  }
  0xee   :  { %25868 = vmatpush3.bf16.msra.mxu1 %v28535_v24  ;;  %v28572_v24 = vld [vmem:[#allocation5 + $0x760] sm:$0xff]  }
  0xef   :  { %25869 = vmatprep.subr.bf16.mxu1 %v28538_v27  ;;  %v28575_v27 = vld [vmem:[#allocation5 + $0x7a0] sm:$0xff]  }
  0xf0   :  { %25848 = vmatpush3.bf16.msra.mxu0 %v28537_v26  ;;  %v28574_v26 = vld [vmem:[#allocation5 + $0x7e0] sm:$0xff]  }
  0xf1   :  { %25849 = vmatprep.subr.bf16.mxu0 %v28540_v29  ;;  %v28577_v29 = vld [vmem:[#allocation5 + $0x718] sm:$0xff]  }
  0xf2   :  { %25870 = vmatpush3.bf16.msra.mxu1 %v28539_v28  ;;  %v28576_v28 = vld [vmem:[#allocation5 + $0x758] sm:$0xff]  }
  0xf3   :  { %25871 = vmatprep.subr.bf16.mxu1 %v28542_v31  ;;  %v28579_v31 = vld [vmem:[#allocation5 + $0x798] sm:$0xff]  }
  0xf4   :  { %25850 = vmatpush3.bf16.msra.mxu0 %v28541_v30  ;;  %v28578_v30 = vld [vmem:[#allocation5 + $0x7d8] sm:$0xff]  }
  0xf5   :  { %25851 = vmatprep.subr.bf16.mxu0 %v28544_v33  ;;  %v28580_v33 = vld [vmem:[#allocation5 + $0x750] sm:$0xff]  }
  0xf6   :  { %25872 = vmatpush3.bf16.msra.mxu1 %v28543_v32 }
  0xf7   :  { %25873 = vmatprep.subr.bf16.mxu1 %v28546_v35 }
  0xf8   :  { %25852 = vmatpush3.bf16.msra.mxu0 %v28545_v34  ;;  %v28581_v34 = vld [vmem:[#allocation5 + $0x710] sm:$0xff]  }
  0xf9   :  { %25853 = vmatprep.subr.bf16.mxu0 %v28548_v38 }
  0xfa   :  { %25874 = vmatpush3.bf16.msra.mxu1 %v28547_v36  ;;  %v28582_v36 = vld [vmem:[#allocation5 + $0x7d0] sm:$0xff]  }
  0xfb   :  { %25875 = vmatprep.subr.bf16.mxu1 %v28550_v41 }
  0xfc   :  { %25854 = vmatpush3.bf16.msra.mxu0 %v28549_v39 }
  0xfd   :  { %25855 = vmatprep.subr.bf16.mxu0 %v28552_v48 }
  0xfe   :  { %25876 = vmatpush3.bf16.msra.mxu1 %v28551_v46  ;;  %v28585_v46 = vld [vmem:[#allocation5 + $0x708] sm:$0xff]  }
  0xff   :  { %25877 = vmatprep.subr.bf16.mxu1 %v28554_v54  ;;  %v335_v54 = vadd.s32 3968, %v30458_v22 }
 0x100   :  { %25856 = vmatpush3.bf16.msra.mxu0 %v28553_v51 }
 0x101   :  { %25857 = vmatprep.subr.bf16.mxu0 %v28556_v59  ;;  %v28589_v59 = vld [vmem:[#allocation5 + $0x700] sm:$0xff]   ;;  %v585_v63 = vand.u32 31, %v335_v54 }
 0x102   :  { %25878 = vmatpush3.bf16.msra.mxu1 %v28555_v57  ;;  %v334_v57 = vadd.s32 3840, %v30458_v22 }
 0x103   :  { %25879 = vmatprep.subr.bf16.mxu1 %v28558_v0  ;;  %v28591_v0 = vld [vmem:[#allocation5 + $0x780] sm:$0xff]   ;;  %vm835_vm12 = vcmp.eq.s32.totalorder %v585_v63, %v84_v4  ;;  %v28625_v63 = vld [vmem:[#allocation5 + $0x938] sm:$0xff]   ;;  %v28629_v4 = vld [vmem:[#allocation5 + $0x930] sm:$0xff]  }
 0x104   :  { %25858 = vmatpush3.bf16.msra.mxu0 %v28557_v62  ;;  %v82_v62 = vld [vmem:[#allocation2 + $0xe8] sm:$0xff]  ;;  %v584_v2 = vand.u32 31, %v334_v57  ;;  %vm25139_vm13 = vmpackc.low %vm835_vm12, %vm835_vm12 }
 0x105   :  { %25887 = vmatprep.subr.bf16.mxu0 %v28560_v5  ;;  %v28593_v5 = vld [vmem:[#allocation5 + $0x838] sm:$0xff]  }
 0x106   :  { %25880 = vmatpush3.bf16.msra.mxu1 %v28559_v3  ;;  %v28592_v3 = vld [vmem:[#allocation5 + $0x878] sm:$0xff]   ;;  %vm834_vm14 = vcmp.eq.s32.totalorder %v584_v2, %v83_v6  ;;  %v28631_v6 = vld [vmem:[#allocation5 + $0x9b0] sm:$0xff]  }
 0x107   :  { %v25595_v37 = vpop.f32.mrf.mxu0  ;;  %25130 = vmatmul.mubr.msk.bf16.vlgmr.msra.gmra.mxu0 %vm25129_vm3, %v30427_v44  ;;  %25909 = vmatprep.subr.bf16.mxu1 %v28562_v12  ;;  %vm25141_vm15 = vmpackc.low %vm834_vm14, %vm834_vm14  ;;  %v28599_v12 = vld [vmem:[#allocation5 + $0x8b0] sm:$0xff]   ;;  %v28627_v2 = vld [vmem:[#allocation5 + $0x9b8] sm:$0xff]  }
 0x108   :  { %25888 = vmatpush3.bf16.msra.mxu0 %v28561_v8  ;;  %v28595_v8 = vld [vmem:[#allocation5 + $0x8b8] sm:$0xff]  }
 0x109   :  { %v25596_v40 = vpop.f32.mrf.mxu0  ;;  %v25617_v45 = vpop.f32.mrf.mxu1  ;;  %25134 = vmatmul.mubr.msk.bf16.vlgmr.msra.gmra.mxu1 %vm25133_vm7, %v30427_v44  ;;  %25889 = vmatprep.subr.bf16.mxu0 %v28564_v15  ;;  %v28602_v15 = vld [vmem:[#allocation5 + $0x8e8] sm:$0xff]  }
 0x10a   :  { %v25597_v43 = vadd.f32 %v25596_v40, %v25595_v37  ;;  %25910 = vmatpush3.bf16.msra.mxu1 %v28563_v13  ;;  %v333_v37 = vadd.s32 3712, %v30458_v22  ;;  %v28583_v40 = vld [vmem:[#allocation5 + $0x790] sm:$0xff]   ;;  %25140 = vmatprep.mubr.msk.bf16.mxu1 %vm25139_vm13, %v30427_v44  ;;  %v28600_v13 = vld [vmem:[#allocation5 + $0x868] sm:$0xff]  }
 0x10b   :  { %v25598_v47 = vpop.f32.mrf.mxu0  ;;  %v25618_v50 = vpop.f32.mrf.mxu1  ;;  %25911 = vmatprep.subr.bf16.mxu1 %v28566_v17  ;;  %v28604_v17 = vld [vmem:[#allocation5 + $0x860] sm:$0xff]  }
 0x10c   :  { %v25619_v52 = vadd.f32 %v25618_v50, %v25617_v45  ;;  %v17846_v10 = vadd.f32 %v25597_v43, %v23078_v9  ;;  %25890 = vmatpush3.bf16.msra.mxu0 %v28565_v16  ;;  %v332_v47 = vadd.s32 3584, %v30458_v22  ;;  %v28586_v50 = vld [vmem:[#allocation5 + $0x7c8] sm:$0xff]   ;;  %v583_v51 = vand.u32 31, %v333_v37  ;;  %v28596_v9 = vld [vmem:[#allocation5 + $0x870] sm:$0xff]  }
 0x10d   :  { %v25599_v53 = vpop.f32.mrf.mxu0  ;;  %v25620_v56 = vpop.f32.mrf.mxu1  ;;  %25891 = vmatprep.subr.bf16.mxu0 %v28568_v19  ;;  %v28603_v16 = vld [vmem:[#allocation5 + $0x8a8] sm:$0xff]   ;;  %v28606_v19 = vld [vmem:[#allocation5 + $0x8e0] sm:$0xff]  }
 0x10e   :  { %v17886_v14 = vadd.f32 %v25619_v52, %v17846_v10  ;;  %25912 = vmatpush3.bf16.msra.mxu1 %v28567_v18  ;;  %v28587_v53 = vld [vmem:[#allocation5 + $0x788] sm:$0xff]   ;;  %v28588_v56 = vld [vmem:[#allocation5 + $0x740] sm:$0xff]   ;;  %v582_v60 = vand.u32 31, %v332_v47  ;;  %vm833_vm8 = vcmp.eq.s32.totalorder %v583_v51, %v82_v62  ;;  %v28597_v10 = vld [vmem:[#allocation5 + $0x830] sm:$0xff]   ;;  %v338_v51 = vadd.s32 4352, %v30458_v22 }
 0x10f   :  { %v25621_v61 = vpop.f32.mrf.mxu1  ;;  %25913 = vmatprep.subr.bf16.mxu1 %v28570_v21  ;;  %vm25135_vm9 = vmpackc.low %vm833_vm8, %vm833_vm8  ;;  %v28605_v18 = vld [vmem:[#allocation5 + $0x820] sm:$0xff]   ;;  %v28608_v21 = vld [vmem:[#allocation5 + $0x858] sm:$0xff]  }
 0x110   :  { %25892 = vmatpush3.bf16.msra.mxu0 %v28569_v20  ;;  %v28590_v61 = vld [vmem:[#allocation5 + $0x7c0] sm:$0xff]   ;;  %vm832_vm10 = vcmp.eq.s32.totalorder %v582_v60, %v81_v1  ;;  %25136 = vmatprep.mubr.msk.bf16.mxu0 %vm25135_vm9, %v30427_v44  ;;  %v28616_v37 = vld [vmem:[#allocation5 + $0x848] sm:$0xff]   ;;  %v588_v60 = vand.u32 31, %v338_v51  ;;  %v28626_v1 = vld [vmem:[#allocation5 + $0x9f8] sm:$0xff]  }
 0x111   :  { %25893 = vmatprep.subr.bf16.mxu0 %v28572_v24  ;;  %vm25137_vm11 = vmpackc.low %vm832_vm10, %vm832_vm10  ;;  %v28607_v20 = vld [vmem:[#allocation5 + $0x8a0] sm:$0xff]   ;;  %v28610_v24 = vld [vmem:[#allocation5 + $0x8d8] sm:$0xff]  }
 0x112   :  { %25914 = vmatpush3.bf16.msra.mxu1 %v28571_v23  ;;  %v28609_v23 = vld [vmem:[#allocation5 + $0x818] sm:$0xff]   ;;  %v28619_v47 = vld [vmem:[#allocation5 + $0x888] sm:$0xff]  }
 0x113   :  { %25915 = vmatprep.subr.bf16.mxu1 %v28574_v26  ;;  %v28611_v26 = vld [vmem:[#allocation5 + $0x898] sm:$0xff]   ;;  %v88_v62 = vld [vmem:[#allocation2 + $0x118] sm:$0xff] }
 0x114   :  { %25894 = vmatpush3.bf16.msra.mxu0 %v28573_v25 }
 0x115   :  { %25895 = vmatprep.subr.bf16.mxu0 %v28576_v28 }
 0x116   :  { %25916 = vmatpush3.bf16.msra.mxu1 %v28575_v27  ;;  %v28612_v27 = vld [vmem:[#allocation5 + $0x850] sm:$0xff]  }
 0x117   :  { %25917 = vmatprep.subr.bf16.mxu1 %v28578_v30 }
 0x118   :  { %25896 = vmatpush3.bf16.msra.mxu0 %v28577_v29  ;;  %v28613_v29 = vld [vmem:[#allocation5 + $0x810] sm:$0xff]  }
 0x119   :  { %25897 = vmatprep.subr.bf16.mxu0 %v28580_v33 }
 0x11a   :  { %25918 = vmatpush3.bf16.msra.mxu1 %v28579_v31  ;;  %v28614_v31 = vld [vmem:[#allocation5 + $0x8d0] sm:$0xff]  }
 0x11b   :  { %25919 = vmatprep.subr.bf16.mxu1 %v28582_v36 }
 0x11c   :  { %25898 = vmatpush3.bf16.msra.mxu0 %v28581_v34  ;;  %v28615_v34 = vld [vmem:[#allocation5 + $0x890] sm:$0xff]  }
 0x11d   :  { %25899 = vmatprep.subr.bf16.mxu0 %v28584_v42 }
 0x11e   :  { %25920 = vmatpush3.bf16.msra.mxu1 %v28583_v40  ;;  %v28617_v40 = vld [vmem:[#allocation5 + $0x808] sm:$0xff]  }
 0x11f   :  { %25921 = vmatprep.subr.bf16.mxu1 %v28586_v50  ;;  %v28620_v50 = vld [vmem:[#allocation5 + $0x840] sm:$0xff]  }
 0x120   :  { %25900 = vmatpush3.bf16.msra.mxu0 %v28585_v46 }
 0x121   :  { %25901 = vmatprep.subr.bf16.mxu0 %v28588_v56  ;;  %v86_v56 = vld [vmem:[#allocation2 + $0x108] sm:$0xff] }
 0x122   :  { %25922 = vmatpush3.bf16.msra.mxu1 %v28587_v53  ;;  %v28621_v53 = vld [vmem:[#allocation5 + $0x800] sm:$0xff]  }
 0x123   :  { %25923 = vmatprep.subr.bf16.mxu1 %v28590_v61  ;;  %v28624_v61 = vld [vmem:[#allocation5 + $0x978] sm:$0xff]  }
 0x124   :  { %25902 = vmatpush3.bf16.msra.mxu0 %v28589_v59  ;;  %v85_v59 = vld [vmem:[#allocation2 + $0x100] sm:$0xff] }
 0x125   :  { %25931 = vmatprep.subr.bf16.mxu0 %v28592_v3  ;;  %v28628_v3 = vld [vmem:[#allocation5 + $0x970] sm:$0xff]  }
 0x126   :  { %25924 = vmatpush3.bf16.msra.mxu1 %v28591_v0  ;;  %v87_v0 = vld [vmem:[#allocation2 + $0x110] sm:$0xff] }
 0x127   :  { %v25639_v32 = vpop.f32.mrf.mxu0  ;;  %25138 = vmatmul.mubr.msk.bf16.vlgmr.msra.gmra.mxu0 %vm25137_vm11, %v30427_v44  ;;  %25953 = vmatprep.subr.bf16.mxu1 %v28594_v7  ;;  %vm838_vm6 = vcmp.eq.s32.totalorder %v588_v60, %v87_v0  ;;  %v28632_v7 = vld [vmem:[#allocation5 + $0x968] sm:$0xff]   ;;  %v28659_v60 = vld [vmem:[#allocation5 + $0xab8] sm:$0xff]   ;;  %v28663_v0 = vld [vmem:[#allocation5 + $0xab0] sm:$0xff]  }
 0x128   :  { %25932 = vmatpush3.bf16.msra.mxu0 %v28593_v5  ;;  %vm25149_vm7 = vmpackc.low %vm838_vm6, %vm838_vm6  ;;  %v28630_v5 = vld [vmem:[#allocation5 + $0x9f0] sm:$0xff]  }
 0x129   :  { %v25640_v35 = vpop.f32.mrf.mxu0  ;;  %v25661_v39 = vpop.f32.mrf.mxu1  ;;  %25142 = vmatmul.mubr.msk.bf16.vlgmr.msra.gmra.mxu1 %vm25141_vm15, %v30427_v44  ;;  %25933 = vmatprep.subr.bf16.mxu0 %v28596_v9  ;;  %v28634_v9 = vld [vmem:[#allocation5 + $0x9e8] sm:$0xff]  }
 0x12a   :  { %v25641_v38 = vadd.f32 %v25640_v35, %v25639_v32  ;;  %25954 = vmatpush3.bf16.msra.mxu1 %v28595_v8  ;;  %v337_v35 = vadd.s32 4224, %v30458_v22  ;;  %v28633_v8 = vld [vmem:[#allocation5 + $0x928] sm:$0xff]  }
 0x12b   :  { %v25642_v41 = vpop.f32.mrf.mxu0  ;;  %v25662_v45 = vpop.f32.mrf.mxu1  ;;  %25955 = vmatprep.subr.bf16.mxu1 %v28598_v11  ;;  %v28636_v11 = vld [vmem:[#allocation5 + $0x960] sm:$0xff]  }
 0x12c   :  { %v17926_v43 = vadd.f32 %v25641_v38, %v17886_v14  ;;  %v25663_v48 = vadd.f32 %v25662_v45, %v25661_v39  ;;  %25934 = vmatpush3.bf16.msra.mxu0 %v28597_v10  ;;  %v28601_v14 = vld [vmem:[#allocation5 + $0x828] sm:$0xff]   ;;  %v336_v41 = vadd.s32 4096, %v30458_v22  ;;  %v339_v45 = vadd.s32 4480, %v30458_v22 }
 0x12d   :  { %v25643_v49 = vpop.f32.mrf.mxu0  ;;  %v25664_v52 = vpop.f32.mrf.mxu1  ;;  %25935 = vmatprep.subr.bf16.mxu0 %v28600_v13  ;;  %v28635_v10 = vld [vmem:[#allocation5 + $0x9a8] sm:$0xff]   ;;  %v28638_v13 = vld [vmem:[#allocation5 + $0x9e0] sm:$0xff]  }
 0x12e   :  { %v30519_v55 = vadd.f32 %v25663_v48, %v17926_v43  ;;  %25956 = vmatpush3.bf16.msra.mxu1 %v28599_v12  ;;  %v28618_v43 = vld [vmem:[#allocation5 + $0x8c8] sm:$0xff]   ;;  %v587_v48 = vand.u32 31, %v337_v35  ;;  %v586_v54 = vand.u32 31, %v336_v41  ;;  %v589_v57 = vand.u32 31, %v339_v45  ;;  %v28637_v12 = vld [vmem:[#allocation5 + $0x920] sm:$0xff]  }
 0x12f   :  { %v25665_v58 = vpop.f32.mrf.mxu1  ;;  %25957 = vmatprep.subr.bf16.mxu1 %v28602_v15  ;;  %v28640_v15 = vld [vmem:[#allocation5 + $0x958] sm:$0xff]  }
 0x130   :  { %25936 = vmatpush3.bf16.msra.mxu0 %v28601_v14  ;;  %vm837_vm0 = vcmp.eq.s32.totalorder %v587_v48, %v86_v56  ;;  %v28623_v58 = vld [vmem:[#allocation5 + $0x880] sm:$0xff]   ;;  %vm836_vm2 = vcmp.eq.s32.totalorder %v586_v54, %v85_v59  ;;  %vm839_vm4 = vcmp.eq.s32.totalorder %v589_v57, %v88_v62  ;;  %v92_v56 = vld [vmem:[#allocation2 + $0x138] sm:$0xff]  ;;  %v28657_v57 = vld [vmem:[#allocation5 + $0xa38] sm:$0xff]  }
 0x131   :  { %25937 = vmatprep.subr.bf16.mxu0 %v28604_v17  ;;  %vm25143_vm1 = vmpackc.low %vm837_vm0, %vm837_vm0  ;;  %v28639_v14 = vld [vmem:[#allocation5 + $0x9a0] sm:$0xff]   ;;  %v28642_v17 = vld [vmem:[#allocation5 + $0x9d8] sm:$0xff]  }
 0x132   :  { %25958 = vmatpush3.bf16.msra.mxu1 %v28603_v16  ;;  %25144 = vmatprep.mubr.msk.bf16.mxu0 %vm25143_vm1, %v30427_v44  ;;  %vm25145_vm3 = vmpackc.low %vm836_vm2, %vm836_vm2  ;;  %v28641_v16 = vld [vmem:[#allocation5 + $0x918] sm:$0xff]   ;;  %v28653_v48 = vld [vmem:[#allocation5 + $0x900] sm:$0xff]  }
 0x133   :  { %25959 = vmatprep.subr.bf16.mxu1 %v28606_v19  ;;  %vm25147_vm5 = vmpackc.low %vm839_vm4, %vm839_vm4  ;;  %v28643_v19 = vld [vmem:[#allocation5 + $0x998] sm:$0xff]   ;;  %v28661_v62 = vld [vmem:[#allocation5 + $0xa30] sm:$0xff]  }
 0x134   :  { %25938 = vmatpush3.bf16.msra.mxu0 %v28605_v18  ;;  %25148 = vmatprep.mubr.msk.bf16.mxu1 %vm25147_vm5, %v30427_v44  ;;  %v28658_v59 = vld [vmem:[#allocation5 + $0xaf8] sm:$0xff]  }
 0x135   :  { %25939 = vmatprep.subr.bf16.mxu0 %v28608_v21 }
 0x136   :  { %25960 = vmatpush3.bf16.msra.mxu1 %v28607_v20  ;;  %v28644_v20 = vld [vmem:[#allocation5 + $0x950] sm:$0xff]  }
 0x137   :  { %25961 = vmatprep.subr.bf16.mxu1 %v28610_v24  ;;  %v341_v24 = vadd.s32 4736, %v30458_v22 }
 0x138   :  { %25940 = vmatpush3.bf16.msra.mxu0 %v28609_v23  ;;  %v28645_v23 = vld [vmem:[#allocation5 + $0x910] sm:$0xff]  }
 0x139   :  { %25941 = vmatprep.subr.bf16.mxu0 %v28612_v27  ;;  %v28646_v27 = vld [vmem:[#allocation5 + $0x9d0] sm:$0xff]  }
 0x13a   :  { %25962 = vmatpush3.bf16.msra.mxu1 %v28611_v26 }
 0x13b   :  { %25963 = vmatprep.subr.bf16.mxu1 %v28614_v31 }
 0x13c   :  { %25942 = vmatpush3.bf16.msra.mxu0 %v28613_v29  ;;  %v28647_v29 = vld [vmem:[#allocation5 + $0x990] sm:$0xff]  }
 0x13d   :  { %25943 = vmatprep.subr.bf16.mxu0 %v28616_v37  ;;  %v591_v37 = vand.u32 31, %v341_v24  ;;  %v28680_v24 = vld [vmem:[#allocation5 + $0xa48] sm:$0xff]  }
 0x13e   :  { %25964 = vmatpush3.bf16.msra.mxu1 %v28615_v34 }
 0x13f   :  { %25965 = vmatprep.subr.bf16.mxu1 %v28618_v43 }
 0x140   :  { %25944 = vmatpush3.bf16.msra.mxu0 %v28617_v40  ;;  %v343_v40 = vadd.s32 4992, %v30458_v22 }
 0x141   :  { %25945 = vmatprep.subr.bf16.mxu0 %v28620_v50  ;;  %v90_v50 = vld [vmem:[#allocation2 + $0x128] sm:$0xff] }
 0x142   :  { %25966 = vmatpush3.bf16.msra.mxu1 %v28619_v47  ;;  %v342_v47 = vadd.s32 4864, %v30458_v22  ;;  %v593_v51 = vand.u32 31, %v343_v40  ;;  %vm841_vm8 = vcmp.eq.s32.totalorder %v591_v37, %v90_v50  ;;  %v28684_v37 = vld [vmem:[#allocation5 + $0xa40] sm:$0xff]   ;;  %v96_v50 = vld [vmem:[#allocation2 + $0x158] sm:$0xff] }
 0x143   :  { %vm25151_vm9 = vmpackc.low %vm841_vm8, %vm841_vm8  ;;  %v28685_v40 = vld [vmem:[#allocation5 + $0xa00] sm:$0xff]  }
 0x144   :  { %25946 = vmatpush3.bf16.msra.mxu0 %v28621_v53  ;;  %v89_v53 = vld [vmem:[#allocation2 + $0x120] sm:$0xff]  ;;  %v592_v54 = vand.u32 31, %v342_v47  ;;  %vm843_vm12 = vcmp.eq.s32.totalorder %v593_v51, %v92_v56  ;;  %v28689_v51 = vld [vmem:[#allocation5 + $0xb38] sm:$0xff]  }
 0x145   :  { %25975 = vmatprep.subr.bf16.mxu0 %v28624_v61  ;;  %vm25155_vm13 = vmpackc.low %vm843_vm12, %vm843_vm12  ;;  %v28660_v61 = vld [vmem:[#allocation5 + $0xa70] sm:$0xff]  }
 0x146   :  { %v93_v47 = vld [vmem:[#allocation2 + $0x140] sm:$0xff] }
 0x147   :  { %v25683_v25 = vpop.f32.mrf.mxu0  ;;  %25146 = vmatmul.mubr.msk.bf16.vlgmr.msra.gmra.mxu0 %vm25145_vm3, %v30427_v44  ;;  %v28693_v56 = vld [vmem:[#allocation5 + $0xb30] sm:$0xff]  }
 0x148   :  { %25976 = vmatpush3.bf16.msra.mxu0 %v28625_v63  ;;  %25152 = vmatprep.mubr.msk.bf16.mxu0 %vm25151_vm9, %v30427_v44  ;;  %v28662_v63 = vld [vmem:[#allocation5 + $0xaf0] sm:$0xff]  }
 0x149   :  { %v25684_v28 = vpop.f32.mrf.mxu0  ;;  %v25705_v32 = vpop.f32.mrf.mxu1  ;;  %25977 = vmatprep.subr.bf16.mxu0 %v28628_v3  ;;  %v28666_v3 = vld [vmem:[#allocation5 + $0xae8] sm:$0xff]  }
 0x14a   :  { %v25685_v30 = vadd.f32 %v25684_v28, %v25683_v25 }
 0x14b   :  { %v25686_v33 = vpop.f32.mrf.mxu0  ;;  %v25706_v38 = vpop.f32.mrf.mxu1 }
 0x14c   :  { %v18006_v36 = vadd.f32 %v25685_v30, %v30519_v55  ;;  %v25707_v42 = vadd.f32 %v25706_v38, %v25705_v32  ;;  %v28622_v55 = vld [vmem:[#allocation5 + $0x8c0] sm:$0xff]   ;;  %25978 = vmatpush3.bf16.msra.mxu0 %v28629_v4  ;;  %v340_v30 = vadd.s32 4608, %v30458_v22  ;;  %v28648_v33 = vld [vmem:[#allocation5 + $0x948] sm:$0xff]  }
 0x14d   :  { %v25687_v39 = vpop.f32.mrf.mxu0  ;;  %v25708_v46 = vpop.f32.mrf.mxu1  ;;  %25967 = vmatprep.subr.bf16.mxu1 %v28622_v55  ;;  %25979 = vmatprep.subr.bf16.mxu0 %v28632_v7  ;;  %v28656_v55 = vld [vmem:[#allocation5 + $0xa78] sm:$0xff]   ;;  %v28667_v4 = vld [vmem:[#allocation5 + $0xaa8] sm:$0xff]   ;;  %v28670_v7 = vld [vmem:[#allocation5 + $0xae0] sm:$0xff]  }
 0x14e   :  { %v30530_v49 = vadd.f32 %v25707_v42, %v18006_v36  ;;  %25968 = vmatpush3.bf16.msra.mxu1 %v28623_v58  ;;  %v28649_v36 = vld [vmem:[#allocation5 + $0x908] sm:$0xff]   ;;  %v590_v43 = vand.u32 31, %v340_v30  ;;  %v28652_v46 = vld [vmem:[#allocation5 + $0x940] sm:$0xff]  }
 0x14f   :  { %v25709_v52 = vpop.f32.mrf.mxu1  ;;  %25997 = vmatprep.subr.bf16.mxu1 %v28626_v1  ;;  %v28650_v39 = vld [vmem:[#allocation5 + $0x9c8] sm:$0xff]   ;;  %v91_v58 = vld [vmem:[#allocation2 + $0x130] sm:$0xff] }
 0x150   :  { %25980 = vmatpush3.bf16.msra.mxu0 %v28633_v8  ;;  %v28651_v42 = vld [vmem:[#allocation5 + $0x988] sm:$0xff]   ;;  %v28655_v52 = vld [vmem:[#allocation5 + $0x980] sm:$0xff]   ;;  %vm840_vm10 = vcmp.eq.s32.totalorder %v590_v43, %v89_v53  ;;  %vm842_vm14 = vcmp.eq.s32.totalorder %v592_v54, %v91_v58  ;;  %v94_v43 = vld [vmem:[#allocation2 + $0x148] sm:$0xff] }
 0x151   :  { %25150 = vmatmul.mubr.msk.bf16.vlgmr.msra.gmra.mxu1 %vm25149_vm7, %v30427_v44  ;;  %25981 = vmatprep.subr.bf16.mxu0 %v28636_v11  ;;  %vm25153_vm11 = vmpackc.low %vm840_vm10, %vm840_vm10  ;;  %v28664_v1 = vld [vmem:[#allocation5 + $0xa68] sm:$0xff]   ;;  %v28671_v8 = vld [vmem:[#allocation5 + $0xaa0] sm:$0xff]  }
 0x152   :  { %25998 = vmatpush3.bf16.msra.mxu1 %v28627_v2  ;;  %25156 = vmatprep.mubr.msk.bf16.mxu1 %vm25155_vm13, %v30427_v44  ;;  %vm25157_vm15 = vmpackc.low %vm842_vm14, %vm842_vm14  ;;  %v28665_v2 = vld [vmem:[#allocation5 + $0xa28] sm:$0xff]   ;;  %v28674_v11 = vld [vmem:[#allocation5 + $0xad8] sm:$0xff]  }
 0x153   :  { %25999 = vmatprep.subr.bf16.mxu1 %v28630_v5  ;;  %v28668_v5 = vld [vmem:[#allocation5 + $0xa60] sm:$0xff]   ;;  %v28690_v53 = vld [vmem:[#allocation5 + $0xbf8] sm:$0xff]   ;;  %v28695_v58 = vld [vmem:[#allocation5 + $0xbb0] sm:$0xff]  }
 0x154   :  { %25982 = vmatpush3.bf16.msra.mxu0 %v28637_v12  ;;  %v28675_v12 = vld [vmem:[#allocation5 + $0xa98] sm:$0xff]  }
 0x155   :  { %25983 = vmatprep.subr.bf16.mxu0 %v28640_v15  ;;  %v28677_v15 = vld [vmem:[#allocation5 + $0xa10] sm:$0xff]   ;;  %v28691_v54 = vld [vmem:[#allocation5 + $0xbb8] sm:$0xff]  }
 0x156   :  { %26000 = vmatpush3.bf16.msra.mxu1 %v28631_v6  ;;  %v28669_v6 = vld [vmem:[#allocation5 + $0xa20] sm:$0xff]  }
 0x157   :  { %26001 = vmatprep.subr.bf16.mxu1 %v28634_v9  ;;  %v28672_v9 = vld [vmem:[#allocation5 + $0xa58] sm:$0xff]  }
 0x158   :  { %25984 = vmatpush3.bf16.msra.mxu0 %v28641_v16 }
 0x159   :  { %25985 = vmatprep.subr.bf16.mxu0 %v28644_v20 }
 0x15a   :  { %26002 = vmatpush3.bf16.msra.mxu1 %v28635_v10  ;;  %v28673_v10 = vld [vmem:[#allocation5 + $0xa18] sm:$0xff]  }
 0x15b   :  { %26003 = vmatprep.subr.bf16.mxu1 %v28638_v13 }
 0x15c   :  { %25986 = vmatpush3.bf16.msra.mxu0 %v28645_v23 }
 0x15d   :  { %25987 = vmatprep.subr.bf16.mxu0 %v28648_v33 }
 0x15e   :  { %26004 = vmatpush3.bf16.msra.mxu1 %v28639_v14  ;;  %v28676_v14 = vld [vmem:[#allocation5 + $0xa50] sm:$0xff]  }
 0x15f   :  { %26005 = vmatprep.subr.bf16.mxu1 %v28642_v17  ;;  %v28678_v17 = vld [vmem:[#allocation5 + $0xad0] sm:$0xff]  }
 0x160   :  { %25988 = vmatpush3.bf16.msra.mxu0 %v28649_v36 }
 0x161   :  { %25989 = vmatprep.subr.bf16.mxu0 %v28652_v46  ;;  %v28687_v46 = vld [vmem:[#allocation5 + $0xa80] sm:$0xff]  }
 0x162   :  { %26006 = vmatpush3.bf16.msra.mxu1 %v28643_v19 }
 0x163   :  { %26007 = vmatprep.subr.bf16.mxu1 %v28646_v27  ;;  %v28681_v27 = vld [vmem:[#allocation5 + $0xa08] sm:$0xff]  }
 0x164   :  { %25990 = vmatpush3.bf16.msra.mxu0 %v28653_v48 }
 0x165   :  { %26019 = vmatprep.subr.bf16.mxu0 %v28656_v55  ;;  %v28692_v55 = vld [vmem:[#allocation5 + $0xb70] sm:$0xff]  }
 0x166   :  { %26008 = vmatpush3.bf16.msra.mxu1 %v28647_v29 }
 0x167   :  { %v25727_v18 = vpop.f32.mrf.mxu0  ;;  %26009 = vmatprep.subr.bf16.mxu1 %v28650_v39  ;;  %25154 = vmatmul.mubr.msk.bf16.vlgmr.msra.gmra.mxu0 %vm25153_vm11, %v30427_v44 }
 0x168   :  { %26020 = vmatpush3.bf16.msra.mxu0 %v28657_v57  ;;  %v28694_v57 = vld [vmem:[#allocation5 + $0xbf0] sm:$0xff]  }
 0x169   :  { %v25728_v21 = vpop.f32.mrf.mxu0  ;;  %v25749_v26 = vpop.f32.mrf.mxu1  ;;  %26021 = vmatprep.subr.bf16.mxu0 %v28660_v61  ;;  %v28698_v61 = vld [vmem:[#allocation5 + $0xbe8] sm:$0xff]  }
 0x16a   :  { %v25729_v25 = vadd.f32 %v25728_v21, %v25727_v18  ;;  %26010 = vmatpush3.bf16.msra.mxu1 %v28651_v42  ;;  %v345_v18 = vadd.s32 5248, %v30458_v22  ;;  %v28679_v21 = vld [vmem:[#allocation5 + $0xa90] sm:$0xff]   ;;  %v28686_v42 = vld [vmem:[#allocation5 + $0xac0] sm:$0xff]  }
 0x16b   :  { %v25730_v28 = vpop.f32.mrf.mxu0  ;;  %v25750_v32 = vpop.f32.mrf.mxu1 }
 0x16c   :  { %v18086_v31 = vadd.f32 %v25729_v25, %v30530_v49  ;;  %v25751_v34 = vadd.f32 %v25750_v32, %v25749_v26  ;;  %v28654_v49 = vld [vmem:[#allocation5 + $0x9c0] sm:$0xff]   ;;  %26022 = vmatpush3.bf16.msra.mxu0 %v28661_v62  ;;  %v344_v28 = vadd.s32 5120, %v30458_v22  ;;  %v595_v32 = vand.u32 31, %v345_v18  ;;  %v28699_v62 = vld [vmem:[#allocation5 + $0xba8] sm:$0xff]  }
 0x16d   :  { %v25731_v35 = vpop.f32.mrf.mxu0  ;;  %v25752_v38 = vpop.f32.mrf.mxu1  ;;  %26011 = vmatprep.subr.bf16.mxu1 %v28654_v49  ;;  %26023 = vmatprep.subr.bf16.mxu0 %v28664_v1  ;;  %v28688_v49 = vld [vmem:[#allocation5 + $0xb78] sm:$0xff]   ;;  %v28702_v1 = vld [vmem:[#allocation5 + $0xbe0] sm:$0xff]   ;;  %v28712_v18 = vld [vmem:[#allocation5 + $0xb48] sm:$0xff]  }
 0x16e   :  { %v30541_v41 = vadd.f32 %v25751_v34, %v18086_v31  ;;  %26012 = vmatpush3.bf16.msra.mxu1 %v28655_v52  ;;  %v28682_v31 = vld [vmem:[#allocation5 + $0xac8] sm:$0xff]   ;;  %v347_v35 = vadd.s32 5504, %v30458_v22  ;;  %v346_v38 = vadd.s32 5376, %v30458_v22  ;;  %vm845_vm0 = vcmp.eq.s32.totalorder %v595_v32, %v94_v43  ;;  %v95_v52 = vld [vmem:[#allocation2 + $0x150] sm:$0xff] }
 0x16f   :  { %v25753_v45 = vpop.f32.mrf.mxu1  ;;  %26041 = vmatprep.subr.bf16.mxu1 %v28658_v59  ;;  %v28683_v34 = vld [vmem:[#allocation5 + $0xa88] sm:$0xff]   ;;  %vm25159_vm1 = vmpackc.low %vm845_vm0, %vm845_vm0  ;;  %v350_v32 = vadd.s32 5888, %v30458_v22 }
 0x170   :  { %26024 = vmatpush3.bf16.msra.mxu0 %v28665_v2  ;;  %v597_v45 = vand.u32 31, %v347_v35  ;;  %v596_v48 = vand.u32 31, %v346_v38  ;;  %25160 = vmatprep.mubr.msk.bf16.mxu0 %vm25159_vm1, %v30427_v44  ;;  %v28696_v59 = vld [vmem:[#allocation5 + $0xb68] sm:$0xff]   ;;  %v28703_v2 = vld [vmem:[#allocation5 + $0xba0] sm:$0xff]  }
 0x171   :  { %25158 = vmatmul.mubr.msk.bf16.vlgmr.msra.gmra.mxu1 %vm25157_vm15, %v30427_v44  ;;  %26025 = vmatprep.subr.bf16.mxu0 %v28668_v5  ;;  %v28706_v5 = vld [vmem:[#allocation5 + $0xbd8] sm:$0xff]   ;;  %v100_v43 = vld [vmem:[#allocation2 + $0x178] sm:$0xff] }
 0x172   :  { %26042 = vmatpush3.bf16.msra.mxu1 %v28659_v60  ;;  %vm847_vm4 = vcmp.eq.s32.totalorder %v597_v45, %v96_v50  ;;  %vm846_vm6 = vcmp.eq.s32.totalorder %v596_v48, %v95_v52  ;;  %v28697_v60 = vld [vmem:[#allocation5 + $0xb28] sm:$0xff]   ;;  %v28721_v45 = vld [vmem:[#allocation5 + $0xc38] sm:$0xff]   ;;  %v28725_v50 = vld [vmem:[#allocation5 + $0xc30] sm:$0xff]  }
 0x173   :  { %26043 = vmatprep.subr.bf16.mxu1 %v28662_v63  ;;  %vm25163_vm5 = vmpackc.low %vm847_vm4, %vm847_vm4  ;;  %v28700_v63 = vld [vmem:[#allocation5 + $0xb60] sm:$0xff]   ;;  %v28723_v48 = vld [vmem:[#allocation5 + $0xcb8] sm:$0xff]  }
 0x174   :  { %26026 = vmatpush3.bf16.msra.mxu0 %v28669_v6  ;;  %25164 = vmatprep.mubr.msk.bf16.mxu1 %vm25163_vm5, %v30427_v44  ;;  %vm25165_vm7 = vmpackc.low %vm846_vm6, %vm846_vm6  ;;  %v28727_v52 = vld [vmem:[#allocation5 + $0xcb0] sm:$0xff]  }
 0x175   :  { %26027 = vmatprep.subr.bf16.mxu0 %v28672_v9 }
 0x176   :  { %26044 = vmatpush3.bf16.msra.mxu1 %v28663_v0  ;;  %v28701_v0 = vld [vmem:[#allocation5 + $0xb20] sm:$0xff]  }
 0x177   :  { %26045 = vmatprep.subr.bf16.mxu1 %v28666_v3  ;;  %v28704_v3 = vld [vmem:[#allocation5 + $0xb58] sm:$0xff]  }
 0x178   :  { %26028 = vmatpush3.bf16.msra.mxu0 %v28673_v10  ;;  %v28709_v10 = vld [vmem:[#allocation5 + $0xb10] sm:$0xff]  }
 0x179   :  { %26029 = vmatprep.subr.bf16.mxu0 %v28676_v14 }
 0x17a   :  { %26046 = vmatpush3.bf16.msra.mxu1 %v28667_v4  ;;  %v28705_v4 = vld [vmem:[#allocation5 + $0xb18] sm:$0xff]  }
 0x17b   :  { %26047 = vmatprep.subr.bf16.mxu1 %v28670_v7  ;;  %v28707_v7 = vld [vmem:[#allocation5 + $0xb98] sm:$0xff]  }
 0x17c   :  { %26030 = vmatpush3.bf16.msra.mxu0 %v28677_v15  ;;  %v28711_v15 = vld [vmem:[#allocation5 + $0xb90] sm:$0xff]  }
 0x17d   :  { %26031 = vmatprep.subr.bf16.mxu0 %v28680_v24 }
 0x17e   :  { %26048 = vmatpush3.bf16.msra.mxu1 %v28671_v8  ;;  %v28708_v8 = vld [vmem:[#allocation5 + $0xb50] sm:$0xff]  }
 0x17f   :  { %26049 = vmatprep.subr.bf16.mxu1 %v28674_v11 }
 0x180   :  { %26032 = vmatpush3.bf16.msra.mxu0 %v28681_v27 }
 0x181   :  { %26033 = vmatprep.subr.bf16.mxu0 %v28684_v37  ;;  %v98_v37 = vld [vmem:[#allocation2 + $0x168] sm:$0xff] }
 0x182   :  { %26050 = vmatpush3.bf16.msra.mxu1 %v28675_v12  ;;  %v28710_v12 = vld [vmem:[#allocation5 + $0xbd0] sm:$0xff]  }
 0x183   :  { %26051 = vmatprep.subr.bf16.mxu1 %v28678_v17 }
 0x184   :  { %26034 = vmatpush3.bf16.msra.mxu0 %v28685_v40  ;;  %v97_v40 = vld [vmem:[#allocation2 + $0x160] sm:$0xff] }
 0x185   :  { %26063 = vmatprep.subr.bf16.mxu0 %v28688_v49  ;;  %v28724_v49 = vld [vmem:[#allocation5 + $0xc70] sm:$0xff]  }
 0x186   :  { %26052 = vmatpush3.bf16.msra.mxu1 %v28679_v21  ;;  %v28713_v21 = vld [vmem:[#allocation5 + $0xb08] sm:$0xff]  }
 0x187   :  { %v25771_v13 = vpop.f32.mrf.mxu0  ;;  %26053 = vmatprep.subr.bf16.mxu1 %v28682_v31  ;;  %v28716_v31 = vld [vmem:[#allocation5 + $0xb40] sm:$0xff]  }
 0x189   :  { %v25772_v16 = vpop.f32.mrf.mxu0  ;;  %v25793_v20 = vpop.f32.mrf.mxu1 }
 0x18a   :  { %v25773_v19 = vadd.f32 %v25772_v16, %v25771_v13  ;;  %26054 = vmatpush3.bf16.msra.mxu1 %v28683_v34  ;;  %v349_v16 = vadd.s32 5760, %v30458_v22  ;;  %v28717_v34 = vld [vmem:[#allocation5 + $0xb00] sm:$0xff]  }
 0x18b   :  { %v25774_v23 = vpop.f32.mrf.mxu0  ;;  %v25794_v26 = vpop.f32.mrf.mxu1  ;;  %26055 = vmatprep.subr.bf16.mxu1 %v28686_v42  ;;  %v28720_v42 = vld [vmem:[#allocation5 + $0xc78] sm:$0xff]  }
 0x18c   :  { %v18166_v25 = vadd.f32 %v25773_v19, %v30541_v41  ;;  %v25795_v29 = vadd.f32 %v25794_v26, %v25793_v20  ;;  %v594_v41 = vand.u32 31, %v344_v28  ;;  %v348_v23 = vadd.s32 5632, %v30458_v22  ;;  %v28715_v28 = vld [vmem:[#allocation5 + $0xb88] sm:$0xff]  }
 0x18d   :  { %v25775_v30 = vpop.f32.mrf.mxu0  ;;  %v25796_v33 = vpop.f32.mrf.mxu1  ;;  %v351_v26 = vadd.s32 6016, %v30458_v22 }
 0x18e   :  { %v30552_v36 = vadd.f32 %v25795_v29, %v18166_v25  ;;  %vm844_vm2 = vcmp.eq.s32.totalorder %v594_v41, %v93_v47  ;;  %26056 = vmatpush3.bf16.msra.mxu1 %v28687_v46  ;;  %v28714_v25 = vld [vmem:[#allocation5 + $0xbc8] sm:$0xff]   ;;  %v599_v29 = vand.u32 31, %v349_v16  ;;  %v598_v35 = vand.u32 31, %v348_v23  ;;  %v99_v46 = vld [vmem:[#allocation2 + $0x170] sm:$0xff]  ;;  %v28722_v47 = vld [vmem:[#allocation5 + $0xcf8] sm:$0xff]  }
 0x18f   :  { %v25797_v39 = vpop.f32.mrf.mxu1  ;;  %vm25161_vm3 = vmpackc.low %vm844_vm2, %vm844_vm2  ;;  %26085 = vmatprep.subr.bf16.mxu1 %v28690_v53  ;;  %v601_v38 = vand.u32 31, %v351_v26  ;;  %v600_v41 = vand.u32 31, %v350_v32  ;;  %v28728_v53 = vld [vmem:[#allocation5 + $0xc68] sm:$0xff]   ;;  %v28748_v26 = vld [vmem:[#allocation5 + $0xc40] sm:$0xff]  }
 0x190   :  { %25162 = vmatmul.mubr.msk.bf16.vlgmr.msra.gmra.mxu0 %vm25161_vm3, %v30427_v44  ;;  %vm849_vm8 = vcmp.eq.s32.totalorder %v599_v29, %v98_v37  ;;  %v28719_v39 = vld [vmem:[#allocation5 + $0xb80] sm:$0xff]   ;;  %vm848_vm10 = vcmp.eq.s32.totalorder %v598_v35, %v97_v40  ;;  %v28745_v16 = vld [vmem:[#allocation5 + $0xc08] sm:$0xff]   ;;  %v28754_v40 = vld [vmem:[#allocation5 + $0xdf8] sm:$0xff]  }
 0x191   :  { %26064 = vmatpush3.bf16.msra.mxu0 %v28689_v51  ;;  %25166 = vmatmul.mubr.msk.bf16.vlgmr.msra.gmra.mxu1 %vm25165_vm7, %v30427_v44  ;;  %vm25167_vm9 = vmpackc.low %vm849_vm8, %vm849_vm8  ;;  %vm851_vm12 = vcmp.eq.s32.totalorder %v601_v38, %v100_v43  ;;  %vm850_vm14 = vcmp.eq.s32.totalorder %v600_v41, %v99_v46  ;;  %v28726_v51 = vld [vmem:[#allocation5 + $0xcf0] sm:$0xff]   ;;  %v28747_v23 = vld [vmem:[#allocation5 + $0xc88] sm:$0xff]  }
 0x192   :  { %26086 = vmatpush3.bf16.msra.mxu1 %v28691_v54  ;;  %26065 = vmatprep.subr.bf16.mxu0 %v28692_v55  ;;  %vm25169_vm11 = vmpackc.low %vm848_vm10, %vm848_vm10  ;;  %v28729_v54 = vld [vmem:[#allocation5 + $0xc28] sm:$0xff]   ;;  %v28749_v29 = vld [vmem:[#allocation5 + $0xc00] sm:$0xff]  }
 0x193   :  { %26087 = vmatprep.subr.bf16.mxu1 %v28694_v57  ;;  %25168 = vmatprep.mubr.msk.bf16.mxu0 %vm25167_vm9, %v30427_v44  ;;  %vm25171_vm13 = vmpackc.low %vm851_vm12, %vm851_vm12  ;;  %v28730_v55 = vld [vmem:[#allocation5 + $0xce8] sm:$0xff]   ;;  %v28732_v57 = vld [vmem:[#allocation5 + $0xc60] sm:$0xff]  }
 0x194   :  { %25172 = vmatprep.mubr.msk.bf16.mxu1 %vm25171_vm13, %v30427_v44  ;;  %vm25173_vm15 = vmpackc.low %vm850_vm14, %vm850_vm14  ;;  %v104_v37 = vld [vmem:[#allocation2 + $0x198] sm:$0xff]  ;;  %v28753_v38 = vld [vmem:[#allocation5 + $0xd38] sm:$0xff]  }
 0x195   :  { %26066 = vmatpush3.bf16.msra.mxu0 %v28693_v56  ;;  %v28731_v56 = vld [vmem:[#allocation5 + $0xca8] sm:$0xff]   ;;  %v28755_v41 = vld [vmem:[#allocation5 + $0xdb8] sm:$0xff]   ;;  %v28757_v43 = vld [vmem:[#allocation5 + $0xd30] sm:$0xff]  }
 0x196   :  { %26088 = vmatpush3.bf16.msra.mxu1 %v28695_v58  ;;  %26067 = vmatprep.subr.bf16.mxu0 %v28696_v59  ;;  %v28733_v58 = vld [vmem:[#allocation5 + $0xc20] sm:$0xff]   ;;  %v28759_v46 = vld [vmem:[#allocation5 + $0xdb0] sm:$0xff]  }
 0x197   :  { %26089 = vmatprep.subr.bf16.mxu1 %v28698_v61  ;;  %v28734_v59 = vld [vmem:[#allocation5 + $0xce0] sm:$0xff]   ;;  %v28736_v61 = vld [vmem:[#allocation5 + $0xc58] sm:$0xff]  }
 0x199   :  { %26068 = vmatpush3.bf16.msra.mxu0 %v28697_v60  ;;  %v28735_v60 = vld [vmem:[#allocation5 + $0xca0] sm:$0xff]  }
 0x19a   :  { %26090 = vmatpush3.bf16.msra.mxu1 %v28699_v62  ;;  %26069 = vmatprep.subr.bf16.mxu0 %v28700_v63  ;;  %v28737_v62 = vld [vmem:[#allocation5 + $0xc18] sm:$0xff]  }
 0x19b   :  { %26091 = vmatprep.subr.bf16.mxu1 %v28702_v1  ;;  %v28738_v63 = vld [vmem:[#allocation5 + $0xcd8] sm:$0xff]  }
 0x19c   :  { %v28739_v1 = vld [vmem:[#allocation5 + $0xc98] sm:$0xff]  }
 0x19d   :  { %26070 = vmatpush3.bf16.msra.mxu0 %v28701_v0 }
 0x19e   :  { %26092 = vmatpush3.bf16.msra.mxu1 %v28703_v2  ;;  %26071 = vmatprep.subr.bf16.mxu0 %v28704_v3  ;;  %v28740_v2 = vld [vmem:[#allocation5 + $0xc50] sm:$0xff]  }
 0x19f   :  { %26093 = vmatprep.subr.bf16.mxu1 %v28706_v5  ;;  %v353_v5 = vadd.s32 6272, %v30458_v22 }
 0x1a1   :  { %26072 = vmatpush3.bf16.msra.mxu0 %v28705_v4  ;;  %v28741_v4 = vld [vmem:[#allocation5 + $0xc10] sm:$0xff]  }
 0x1a2   :  { %26094 = vmatpush3.bf16.msra.mxu1 %v28707_v7  ;;  %26073 = vmatprep.subr.bf16.mxu0 %v28708_v8  ;;  %v28742_v7 = vld [vmem:[#allocation5 + $0xcd0] sm:$0xff]  }
 0x1a3   :  { %26095 = vmatprep.subr.bf16.mxu1 %v28710_v12 }
 0x1a5   :  { %26074 = vmatpush3.bf16.msra.mxu0 %v28709_v10  ;;  %v28743_v10 = vld [vmem:[#allocation5 + $0xc90] sm:$0xff]  }
 0x1a6   :  { %26096 = vmatpush3.bf16.msra.mxu1 %v28711_v15  ;;  %26075 = vmatprep.subr.bf16.mxu0 %v28712_v18 }
 0x1a7   :  { %v25815_v6 = vpop.f32.mrf.mxu0  ;;  %26097 = vmatprep.subr.bf16.mxu1 %v28714_v25 }
 0x1a9   :  { %v25816_v9 = vpop.f32.mrf.mxu0  ;;  %v25837_v13 = vpop.f32.mrf.mxu1  ;;  %26076 = vmatpush3.bf16.msra.mxu0 %v28713_v21 }
 0x1aa   :  { %v25817_v11 = vadd.f32 %v25816_v9, %v25815_v6  ;;  %26098 = vmatpush3.bf16.msra.mxu1 %v28715_v28  ;;  %26077 = vmatprep.subr.bf16.mxu0 %v28716_v31  ;;  %v102_v31 = vld [vmem:[#allocation2 + $0x188] sm:$0xff] }
 0x1ab   :  { %v25818_v14 = vpop.f32.mrf.mxu0  ;;  %v25838_v19 = vpop.f32.mrf.mxu1 }
 0x1ac   :  { %v18246_v17 = vadd.f32 %v25817_v11, %v30552_v36  ;;  %v25839_v24 = vadd.f32 %v25838_v19, %v25837_v13  ;;  %v28718_v36 = vld [vmem:[#allocation5 + $0xbc0] sm:$0xff]   ;;  %v352_v11 = vadd.s32 6144, %v30458_v22  ;;  %v28744_v13 = vld [vmem:[#allocation5 + $0xc48] sm:$0xff]  }
 0x1ad   :  { %v25819_v20 = vpop.f32.mrf.mxu0  ;;  %v25840_v27 = vpop.f32.mrf.mxu1  ;;  %26078 = vmatpush3.bf16.msra.mxu0 %v28717_v34  ;;  %26099 = vmatprep.subr.bf16.mxu1 %v28718_v36  ;;  %v28746_v19 = vld [vmem:[#allocation5 + $0xcc8] sm:$0xff]   ;;  %v101_v34 = vld [vmem:[#allocation2 + $0x180] sm:$0xff]  ;;  %v28752_v36 = vld [vmem:[#allocation5 + $0xd78] sm:$0xff]  }
 0x1ae   :  { %v30563_v30 = vadd.f32 %v25839_v24, %v18246_v17  ;;  %26100 = vmatpush3.bf16.msra.mxu1 %v28719_v39  ;;  %26107 = vmatprep.subr.bf16.mxu0 %v28720_v42  ;;  %v603_v17 = vand.u32 31, %v353_v5  ;;  %v355_v20 = vadd.s32 6528, %v30458_v22  ;;  %v602_v24 = vand.u32 31, %v352_v11  ;;  %v103_v39 = vld [vmem:[#allocation2 + $0x190] sm:$0xff]  ;;  %v28756_v42 = vld [vmem:[#allocation5 + $0xd70] sm:$0xff]   ;;  %v28776_v5 = vld [vmem:[#allocation5 + $0xd48] sm:$0xff]  }
 0x1af   :  { %v25841_v33 = vpop.f32.mrf.mxu1  ;;  %26129 = vmatprep.subr.bf16.mxu1 %v28722_v47  ;;  %v354_v27 = vadd.s32 6400, %v30458_v22  ;;  %v28760_v47 = vld [vmem:[#allocation5 + $0xd68] sm:$0xff]  }
 0x1b0   :  { %25170 = vmatmul.mubr.msk.bf16.vlgmr.msra.gmra.mxu0 %vm25169_vm11, %v30427_v44  ;;  %v605_v32 = vand.u32 31, %v355_v20  ;;  %vm853_vm0 = vcmp.eq.s32.totalorder %v603_v17, %v102_v31  ;;  %v28751_v33 = vld [vmem:[#allocation5 + $0xc80] sm:$0xff]   ;;  %vm852_vm2 = vcmp.eq.s32.totalorder %v602_v24, %v101_v34  ;;  %v108_v31 = vld [vmem:[#allocation2 + $0x1b8] sm:$0xff]  ;;  %v28786_v34 = vld [vmem:[#allocation5 + $0xef8] sm:$0xff]  }
 0x1b1   :  { %26108 = vmatpush3.bf16.msra.mxu0 %v28721_v45  ;;  %25174 = vmatmul.mubr.msk.bf16.vlgmr.msra.gmra.mxu1 %vm25173_vm15, %v30427_v44  ;;  %vm25175_vm1 = vmpackc.low %vm853_vm0, %vm853_vm0  ;;  %v604_v35 = vand.u32 31, %v354_v27  ;;  %v28758_v45 = vld [vmem:[#allocation5 + $0xdf0] sm:$0xff]   ;;  %v28782_v24 = vld [vmem:[#allocation5 + $0xdc0] sm:$0xff]  }
 0x1b2   :  { %26130 = vmatpush3.bf16.msra.mxu1 %v28723_v48  ;;  %26109 = vmatprep.subr.bf16.mxu0 %v28724_v49  ;;  %vm25177_vm3 = vmpackc.low %vm852_vm2, %vm852_vm2  ;;  %vm855_vm4 = vcmp.eq.s32.totalorder %v605_v32, %v104_v37  ;;  %v28761_v48 = vld [vmem:[#allocation5 + $0xd28] sm:$0xff]   ;;  %v28783_v27 = vld [vmem:[#allocation5 + $0xd80] sm:$0xff]  }
 0x1b3   :  { %26131 = vmatprep.subr.bf16.mxu1 %v28726_v51  ;;  %25176 = vmatprep.mubr.msk.bf16.mxu0 %vm25175_vm1, %v30427_v44  ;;  %vm25179_vm5 = vmpackc.low %vm855_vm4, %vm855_vm4  ;;  %vm854_vm6 = vcmp.eq.s32.totalorder %v604_v35, %v103_v39  ;;  %v28762_v49 = vld [vmem:[#allocation5 + $0xde8] sm:$0xff]   ;;  %v28764_v51 = vld [vmem:[#allocation5 + $0xd60] sm:$0xff]  }
 0x1b4   :  { %25180 = vmatprep.mubr.msk.bf16.mxu1 %vm25179_vm5, %v30427_v44  ;;  %vm25181_vm7 = vmpackc.low %vm854_vm6, %vm854_vm6  ;;  %v28785_v32 = vld [vmem:[#allocation5 + $0xe38] sm:$0xff]   ;;  %v28789_v37 = vld [vmem:[#allocation5 + $0xe30] sm:$0xff]  }
 0x1b5   :  { %26110 = vmatpush3.bf16.msra.mxu0 %v28725_v50  ;;  %v28763_v50 = vld [vmem:[#allocation5 + $0xda8] sm:$0xff]   ;;  %v28787_v35 = vld [vmem:[#allocation5 + $0xeb8] sm:$0xff]   ;;  %v28791_v39 = vld [vmem:[#allocation5 + $0xeb0] sm:$0xff]  }
 0x1b6   :  { %26132 = vmatpush3.bf16.msra.mxu1 %v28727_v52  ;;  %26111 = vmatprep.subr.bf16.mxu0 %v28728_v53  ;;  %v28765_v52 = vld [vmem:[#allocation5 + $0xd20] sm:$0xff]  }
 0x1b7   :  { %26133 = vmatprep.subr.bf16.mxu1 %v28730_v55  ;;  %v28766_v53 = vld [vmem:[#allocation5 + $0xde0] sm:$0xff]   ;;  %v28768_v55 = vld [vmem:[#allocation5 + $0xd58] sm:$0xff]  }
 0x1b9   :  { %26112 = vmatpush3.bf16.msra.mxu0 %v28729_v54  ;;  %v28767_v54 = vld [vmem:[#allocation5 + $0xda0] sm:$0xff]  }
 0x1ba   :  { %26134 = vmatpush3.bf16.msra.mxu1 %v28731_v56  ;;  %26113 = vmatprep.subr.bf16.mxu0 %v28732_v57  ;;  %v28769_v56 = vld [vmem:[#allocation5 + $0xd18] sm:$0xff]  }
 0x1bb   :  { %26135 = vmatprep.subr.bf16.mxu1 %v28734_v59  ;;  %v28770_v57 = vld [vmem:[#allocation5 + $0xdd8] sm:$0xff]  }
 0x1bd   :  { %26114 = vmatpush3.bf16.msra.mxu0 %v28733_v58  ;;  %v28771_v58 = vld [vmem:[#allocation5 + $0xd98] sm:$0xff]  }
 0x1be   :  { %26136 = vmatpush3.bf16.msra.mxu1 %v28735_v60  ;;  %26115 = vmatprep.subr.bf16.mxu0 %v28736_v61  ;;  %v28772_v60 = vld [vmem:[#allocation5 + $0xd50] sm:$0xff]  }
 0x1bf   :  { %26137 = vmatprep.subr.bf16.mxu1 %v28738_v63  ;;  %v28773_v61 = vld [vmem:[#allocation5 + $0xd10] sm:$0xff]  }
 0x1c0   :  { %v28774_v63 = vld [vmem:[#allocation5 + $0xdd0] sm:$0xff]  }
 0x1c1   :  { %26116 = vmatpush3.bf16.msra.mxu0 %v28737_v62 }
 0x1c2   :  { %26138 = vmatpush3.bf16.msra.mxu1 %v28739_v1  ;;  %26117 = vmatprep.subr.bf16.mxu0 %v28740_v2 }
 0x1c3   :  { %26139 = vmatprep.subr.bf16.mxu1 %v28742_v7 }
 0x1c5   :  { %26118 = vmatpush3.bf16.msra.mxu0 %v28741_v4 }
 0x1c6   :  { %26140 = vmatpush3.bf16.msra.mxu1 %v28743_v10  ;;  %26119 = vmatprep.subr.bf16.mxu0 %v28744_v13 }
 0x1c7   :  { %v25859_v0 = vpop.f32.mrf.mxu0  ;;  %26141 = vmatprep.subr.bf16.mxu1 %v28746_v19  ;;  %v358_v19 = vadd.s32 6912, %v30458_v22 }
 0x1c9   :  { %v25860_v3 = vpop.f32.mrf.mxu0  ;;  %v25881_v8 = vpop.f32.mrf.mxu1  ;;  %26120 = vmatpush3.bf16.msra.mxu0 %v28745_v16  ;;  %v359_v16 = vadd.s32 7040, %v30458_v22 }
 0x1ca   :  { %v25861_v6 = vadd.f32 %v25860_v3, %v25859_v0  ;;  %26142 = vmatpush3.bf16.msra.mxu1 %v28747_v23  ;;  %26121 = vmatprep.subr.bf16.mxu0 %v28748_v26  ;;  %v357_v0 = vadd.s32 6784, %v30458_v22  ;;  %v28775_v3 = vld [vmem:[#allocation5 + $0xd90] sm:$0xff]  }
 0x1cb   :  { %v25862_v9 = vpop.f32.mrf.mxu0  ;;  %v25882_v14 = vpop.f32.mrf.mxu1  ;;  %v609_v26 = vand.u32 31, %v359_v16 }
 0x1cc   :  { %v18326_v12 = vadd.f32 %v25861_v6, %v30563_v30  ;;  %v25883_v18 = vadd.f32 %v25882_v14, %v25881_v8  ;;  %v28750_v30 = vld [vmem:[#allocation5 + $0xcc0] sm:$0xff]   ;;  %v28777_v8 = vld [vmem:[#allocation5 + $0xd08] sm:$0xff]   ;;  %v356_v9 = vadd.s32 6656, %v30458_v22  ;;  %v607_v13 = vand.u32 31, %v357_v0 }
 0x1cd   :  { %v25863_v15 = vpop.f32.mrf.mxu0  ;;  %v25884_v21 = vpop.f32.mrf.mxu1  ;;  %26122 = vmatpush3.bf16.msra.mxu0 %v28749_v29  ;;  %26143 = vmatprep.subr.bf16.mxu1 %v28750_v30  ;;  %v608_v29 = vand.u32 31, %v358_v19  ;;  %v28784_v30 = vld [vmem:[#allocation5 + $0xe78] sm:$0xff]   ;;  %vm859_vm12 = vcmp.eq.s32.totalorder %v609_v26, %v108_v31  ;;  %v28821_v31 = vld [vmem:[#allocation5 + $0xf30] sm:$0xff]  }
 0x1ce   :  { %v30574_v25 = vadd.f32 %v25883_v18, %v18326_v12  ;;  %26144 = vmatpush3.bf16.msra.mxu1 %v28751_v33  ;;  %26151 = vmatprep.subr.bf16.mxu0 %v28752_v36  ;;  %v28778_v12 = vld [vmem:[#allocation5 + $0xdc8] sm:$0xff]   ;;  %v28780_v18 = vld [vmem:[#allocation5 + $0xd40] sm:$0xff]   ;;  %v606_v23 = vand.u32 31, %v356_v9  ;;  %vm25187_vm13 = vmpackc.low %vm859_vm12, %vm859_vm12 }
 0x1cf   :  { %v25885_v28 = vpop.f32.mrf.mxu1  ;;  %26173 = vmatprep.subr.bf16.mxu1 %v28754_v40  ;;  %v28779_v15 = vld [vmem:[#allocation5 + $0xd88] sm:$0xff]   ;;  %v28781_v21 = vld [vmem:[#allocation5 + $0xd00] sm:$0xff]   ;;  %v28788_v36 = vld [vmem:[#allocation5 + $0xe70] sm:$0xff]  }
 0x1d0   :  { %25178 = vmatmul.mubr.msk.bf16.vlgmr.msra.gmra.mxu0 %vm25177_vm3, %v30427_v44  ;;  %v105_v28 = vld [vmem:[#allocation2 + $0x1a0] sm:$0xff]  ;;  %v107_v33 = vld [vmem:[#allocation2 + $0x1b0] sm:$0xff]  ;;  %v28792_v40 = vld [vmem:[#allocation5 + $0xe68] sm:$0xff]  }
 0x1d1   :  { %26152 = vmatpush3.bf16.msra.mxu0 %v28753_v38  ;;  %25182 = vmatmul.mubr.msk.bf16.vlgmr.msra.gmra.mxu1 %vm25181_vm7, %v30427_v44  ;;  %vm856_vm10 = vcmp.eq.s32.totalorder %v606_v23, %v105_v28  ;;  %vm858_vm14 = vcmp.eq.s32.totalorder %v608_v29, %v107_v33  ;;  %v28790_v38 = vld [vmem:[#allocation5 + $0xef0] sm:$0xff]   ;;  %v28811_v9 = vld [vmem:[#allocation5 + $0xe88] sm:$0xff]   ;;  %v28817_v26 = vld [vmem:[#allocation5 + $0xf38] sm:$0xff]  }
 0x1d2   :  { %26174 = vmatpush3.bf16.msra.mxu1 %v28755_v41  ;;  %26153 = vmatprep.subr.bf16.mxu0 %v28756_v42  ;;  %vm25185_vm11 = vmpackc.low %vm856_vm10, %vm856_vm10  ;;  %v28793_v41 = vld [vmem:[#allocation5 + $0xe28] sm:$0xff]   ;;  %v28818_v28 = vld [vmem:[#allocation5 + $0xff8] sm:$0xff]  }
 0x1d3   :  { %26175 = vmatprep.subr.bf16.mxu1 %v28758_v45  ;;  %25188 = vmatprep.mubr.msk.bf16.mxu1 %vm25187_vm13, %v30427_v44  ;;  %vm25189_vm15 = vmpackc.low %vm858_vm14, %vm858_vm14  ;;  %v28794_v42 = vld [vmem:[#allocation5 + $0xee8] sm:$0xff]   ;;  %v28796_v45 = vld [vmem:[#allocation5 + $0xe60] sm:$0xff]  }
 0x1d4   :  { %v28819_v29 = vld [vmem:[#allocation5 + $0xfb8] sm:$0xff]   ;;  %v28823_v33 = vld [vmem:[#allocation5 + $0xfb0] sm:$0xff]  }
 0x1d5   :  { %26154 = vmatpush3.bf16.msra.mxu0 %v28757_v43  ;;  %v28795_v43 = vld [vmem:[#allocation5 + $0xea8] sm:$0xff]  }
 0x1d6   :  { %26176 = vmatpush3.bf16.msra.mxu1 %v28759_v46  ;;  %26155 = vmatprep.subr.bf16.mxu0 %v28760_v47  ;;  %v28797_v46 = vld [vmem:[#allocation5 + $0xe20] sm:$0xff]  }
 0x1d7   :  { %26177 = vmatprep.subr.bf16.mxu1 %v28762_v49  ;;  %v28798_v47 = vld [vmem:[#allocation5 + $0xee0] sm:$0xff]   ;;  %v28800_v49 = vld [vmem:[#allocation5 + $0xe58] sm:$0xff]  }
 0x1d9   :  { %26156 = vmatpush3.bf16.msra.mxu0 %v28761_v48  ;;  %v28799_v48 = vld [vmem:[#allocation5 + $0xea0] sm:$0xff]  }
 0x1da   :  { %26178 = vmatpush3.bf16.msra.mxu1 %v28763_v50  ;;  %26157 = vmatprep.subr.bf16.mxu0 %v28764_v51  ;;  %v28801_v50 = vld [vmem:[#allocation5 + $0xe18] sm:$0xff]  }
 0x1db   :  { %26179 = vmatprep.subr.bf16.mxu1 %v28766_v53  ;;  %v28802_v51 = vld [vmem:[#allocation5 + $0xed8] sm:$0xff]  }
 0x1dd   :  { %26158 = vmatpush3.bf16.msra.mxu0 %v28765_v52  ;;  %v28803_v52 = vld [vmem:[#allocation5 + $0xe98] sm:$0xff]  }
 0x1de   :  { %26180 = vmatpush3.bf16.msra.mxu1 %v28767_v54  ;;  %26159 = vmatprep.subr.bf16.mxu0 %v28768_v55  ;;  %v28804_v54 = vld [vmem:[#allocation5 + $0xe50] sm:$0xff]  }
 0x1df   :  { %26181 = vmatprep.subr.bf16.mxu1 %v28770_v57  ;;  %v28805_v55 = vld [vmem:[#allocation5 + $0xe10] sm:$0xff]  }
 0x1e0   :  { %v28806_v57 = vld [vmem:[#allocation5 + $0xed0] sm:$0xff]  }
 0x1e1   :  { %26160 = vmatpush3.bf16.msra.mxu0 %v28769_v56 }
 0x1e2   :  { %26182 = vmatpush3.bf16.msra.mxu1 %v28771_v58  ;;  %26161 = vmatprep.subr.bf16.mxu0 %v28772_v60  ;;  %v28807_v60 = vld [vmem:[#allocation5 + $0xe90] sm:$0xff]  }
 0x1e3   :  { %26183 = vmatprep.subr.bf16.mxu1 %v28774_v63  ;;  %v28808_v63 = vld [vmem:[#allocation5 + $0xe48] sm:$0xff]  }
 0x1e5   :  { %26162 = vmatpush3.bf16.msra.mxu0 %v28773_v61  ;;  %v361_v61 = vadd.s32 7296, %v30458_v22 }
 0x1e6   :  { %26184 = vmatpush3.bf16.msra.mxu1 %v28775_v3  ;;  %26163 = vmatprep.subr.bf16.mxu0 %v28776_v5  ;;  %v360_v3 = vadd.s32 7168, %v30458_v22 }
 0x1e7   :  { %v25903_v59 = vpop.f32.mrf.mxu0  ;;  %26185 = vmatprep.subr.bf16.mxu1 %v28778_v12  ;;  %v28812_v12 = vld [vmem:[#allocation5 + $0xe40] sm:$0xff]  }
 0x1e8   :  { %v610_v16 = vand.u32 31, %v360_v3 }
 0x1e9   :  { %v25904_v62 = vpop.f32.mrf.mxu0  ;;  %v25925_v2 = vpop.f32.mrf.mxu1  ;;  %26164 = vmatpush3.bf16.msra.mxu0 %v28777_v8 }
 0x1ea   :  { %v25905_v1 = vadd.f32 %v25904_v62, %v25903_v59  ;;  %26186 = vmatpush3.bf16.msra.mxu1 %v28779_v15  ;;  %26165 = vmatprep.subr.bf16.mxu0 %v28780_v18  ;;  %v28813_v15 = vld [vmem:[#allocation5 + $0xe00] sm:$0xff]   ;;  %v110_v18 = vld [vmem:[#allocation2 + $0x1c8] sm:$0xff] }
 0x1eb   :  { %v25906_v4 = vpop.f32.mrf.mxu0  ;;  %v25926_v7 = vpop.f32.mrf.mxu1  ;;  %26187 = vmatprep.subr.bf16.mxu1 %v28782_v24  ;;  %v28816_v24 = vld [vmem:[#allocation5 + $0xf78] sm:$0xff]  }
 0x1ec   :  { %v18406_v6 = vadd.f32 %v25905_v1, %v30574_v25  ;;  %v25927_v10 = vadd.f32 %v25926_v7, %v25925_v2  ;;  %v106_v25 = vld [vmem:[#allocation2 + $0x1a8] sm:$0xff]  ;;  %v28809_v2 = vld [vmem:[#allocation5 + $0xe08] sm:$0xff]   ;;  %v363_v7 = vadd.s32 7552, %v30458_v22 }
 0x1ed   :  { %v25907_v11 = vpop.f32.mrf.mxu0  ;;  %v25928_v14 = vpop.f32.mrf.mxu1  ;;  %26166 = vmatpush3.bf16.msra.mxu0 %v28781_v21  ;;  %vm857_vm8 = vcmp.eq.s32.totalorder %v607_v13, %v106_v25  ;;  %v362_v13 = vadd.s32 7424, %v30458_v22  ;;  %v109_v21 = vld [vmem:[#allocation2 + $0x1c0] sm:$0xff]  ;;  %v112_v25 = vld [vmem:[#allocation2 + $0x1d8] sm:$0xff] }
 0x1ee   :  { %v30585_v17 = vadd.f32 %v25927_v10, %v18406_v6  ;;  %vm25183_vm9 = vmpackc.low %vm857_vm8, %vm857_vm8  ;;  %26188 = vmatpush3.bf16.msra.mxu1 %v28783_v27  ;;  %26195 = vmatprep.subr.bf16.mxu0 %v28784_v30  ;;  %v28810_v6 = vld [vmem:[#allocation5 + $0xec8] sm:$0xff]   ;;  %v611_v10 = vand.u32 31, %v361_v61  ;;  %v613_v19 = vand.u32 31, %v363_v7  ;;  %vm860_vm2 = vcmp.eq.s32.totalorder %v610_v16, %v109_v21  ;;  %v111_v27 = vld [vmem:[#allocation2 + $0x1d0] sm:$0xff] }
 0x1ef   :  { %v25929_v20 = vpop.f32.mrf.mxu1  ;;  %25184 = vmatprep.mubr.msk.bf16.mxu0 %vm25183_vm9, %v30427_v44  ;;  %26217 = vmatprep.subr.bf16.mxu1 %v28786_v34  ;;  %v612_v23 = vand.u32 31, %v362_v13  ;;  %vm25193_vm3 = vmpackc.low %vm860_vm2, %vm860_vm2  ;;  %v28820_v30 = vld [vmem:[#allocation5 + $0xf70] sm:$0xff]   ;;  %v28824_v34 = vld [vmem:[#allocation5 + $0xf68] sm:$0xff]  }
 0x1f0   :  { %25186 = vmatmul.mubr.msk.bf16.vlgmr.msra.gmra.mxu0 %vm25185_vm11, %v30427_v44  ;;  %vm861_vm0 = vcmp.eq.s32.totalorder %v611_v10, %v110_v18  ;;  %v28815_v20 = vld [vmem:[#allocation5 + $0xe80] sm:$0xff]   ;;  %vm863_vm4 = vcmp.eq.s32.totalorder %v613_v19, %v112_v25  ;;  %v116_v18 = vld [vmem:[#allocation2 + $0x1f8] sm:$0xff]  ;;  %v28849_v19 = vld [vmem:[#allocation5 + $0x1038] sm:$0xff]  }
 0x1f1   :  { %26196 = vmatpush3.bf16.msra.mxu0 %v28785_v32  ;;  %25190 = vmatmul.mubr.msk.bf16.vlgmr.msra.gmra.mxu1 %vm25189_vm15, %v30427_v44  ;;  %vm25191_vm1 = vmpackc.low %vm861_vm0, %vm861_vm0  ;;  %vm862_vm6 = vcmp.eq.s32.totalorder %v612_v23, %v111_v27  ;;  %v28822_v32 = vld [vmem:[#allocation5 + $0xff0] sm:$0xff]   ;;  %v28844_v7 = vld [vmem:[#allocation5 + $0xf40] sm:$0xff]  }
 0x1f2   :  { %26218 = vmatpush3.bf16.msra.mxu1 %v28787_v35  ;;  %26197 = vmatprep.subr.bf16.mxu0 %v28788_v36  ;;  %vm25195_vm5 = vmpackc.low %vm863_vm4, %vm863_vm4  ;;  %v28825_v35 = vld [vmem:[#allocation5 + $0xf28] sm:$0xff]   ;;  %v28845_v10 = vld [vmem:[#allocation5 + $0xf00] sm:$0xff]  }
 0x1f3   :  { %26219 = vmatprep.subr.bf16.mxu1 %v28790_v38  ;;  %25192 = vmatprep.mubr.msk.bf16.mxu0 %vm25191_vm1, %v30427_v44  ;;  %vm25197_vm7 = vmpackc.low %vm862_vm6, %vm862_vm6  ;;  %v28826_v36 = vld [vmem:[#allocation5 + $0xfe8] sm:$0xff]   ;;  %v28828_v38 = vld [vmem:[#allocation5 + $0xf60] sm:$0xff]  }
 0x1f4   :  { %25196 = vmatprep.mubr.msk.bf16.mxu1 %vm25195_vm5, %v30427_v44  ;;  %v28850_v21 = vld [vmem:[#allocation5 + $0x10f8] sm:$0xff]   ;;  %v28853_v25 = vld [vmem:[#allocation5 + $0x1030] sm:$0xff]  }
 0x1f5   :  { %26198 = vmatpush3.bf16.msra.mxu0 %v28789_v37  ;;  %v28827_v37 = vld [vmem:[#allocation5 + $0xfa8] sm:$0xff]   ;;  %v28851_v23 = vld [vmem:[#allocation5 + $0x10b8] sm:$0xff]   ;;  %v28855_v27 = vld [vmem:[#allocation5 + $0x10b0] sm:$0xff]  }
 0x1f6   :  { %26220 = vmatpush3.bf16.msra.mxu1 %v28791_v39  ;;  %26199 = vmatprep.subr.bf16.mxu0 %v28792_v40  ;;  %v28829_v39 = vld [vmem:[#allocation5 + $0xf20] sm:$0xff]  }
 0x1f7   :  { %26221 = vmatprep.subr.bf16.mxu1 %v28794_v42  ;;  %v28830_v40 = vld [vmem:[#allocation5 + $0xfe0] sm:$0xff]   ;;  %v28832_v42 = vld [vmem:[#allocation5 + $0xf58] sm:$0xff]  }
 0x1f9   :  { %26200 = vmatpush3.bf16.msra.mxu0 %v28793_v41  ;;  %v28831_v41 = vld [vmem:[#allocation5 + $0xfa0] sm:$0xff]  }
 0x1fa   :  { %26222 = vmatpush3.bf16.msra.mxu1 %v28795_v43  ;;  %26201 = vmatprep.subr.bf16.mxu0 %v28796_v45  ;;  %v28833_v43 = vld [vmem:[#allocation5 + $0xf18] sm:$0xff]  }
 0x1fb   :  { %26223 = vmatprep.subr.bf16.mxu1 %v28798_v47  ;;  %v28834_v45 = vld [vmem:[#allocation5 + $0xfd8] sm:$0xff]  }
 0x1fc   :  { %v28835_v47 = vld [vmem:[#allocation5 + $0xf98] sm:$0xff]  }
 0x1fd   :  { %26202 = vmatpush3.bf16.msra.mxu0 %v28797_v46 }
 0x1fe   :  { %26224 = vmatpush3.bf16.msra.mxu1 %v28799_v48  ;;  %26203 = vmatprep.subr.bf16.mxu0 %v28800_v49  ;;  %v28836_v48 = vld [vmem:[#allocation5 + $0xf50] sm:$0xff]  }
 0x1ff   :  { %26225 = vmatprep.subr.bf16.mxu1 %v28802_v51  ;;  %v365_v51 = vadd.s32 7808, %v30458_v22 }
 0x201   :  { %26204 = vmatpush3.bf16.msra.mxu0 %v28801_v50  ;;  %v28837_v50 = vld [vmem:[#allocation5 + $0xf10] sm:$0xff]  }
 0x202   :  { %26226 = vmatpush3.bf16.msra.mxu1 %v28803_v52  ;;  %26205 = vmatprep.subr.bf16.mxu0 %v28804_v54 }
 0x203   :  { %26227 = vmatprep.subr.bf16.mxu1 %v28806_v57  ;;  %v364_v57 = vadd.s32 7680, %v30458_v22 }
 0x205   :  { %26206 = vmatpush3.bf16.msra.mxu0 %v28805_v55 }
 0x206   :  { %26228 = vmatpush3.bf16.msra.mxu1 %v28807_v60  ;;  %26207 = vmatprep.subr.bf16.mxu0 %v28808_v63  ;;  %v615_v63 = vand.u32 31, %v365_v51  ;;  %v28872_v51 = vld [vmem:[#allocation5 + $0x1048] sm:$0xff]  }
 0x207   :  { %v25947_v53 = vpop.f32.mrf.mxu0  ;;  %26229 = vmatprep.subr.bf16.mxu1 %v28810_v6 }
 0x209   :  { %v25948_v56 = vpop.f32.mrf.mxu0  ;;  %26208 = vmatpush3.bf16.msra.mxu0 %v28809_v2  ;;  %v367_v2 = vadd.s32 8064, %v30458_v22 }
 0x20a   :  { %v25949_v58 = vadd.f32 %v25948_v56, %v25947_v53  ;;  %26230 = vmatpush3.bf16.msra.mxu1 %v28811_v9  ;;  %26209 = vmatprep.subr.bf16.mxu0 %v28812_v12  ;;  %v28838_v53 = vld [vmem:[#allocation5 + $0xfd0] sm:$0xff]   ;;  %v114_v12 = vld [vmem:[#allocation2 + $0x1e8] sm:$0xff] }
 0x20b   :  { %v25950_v62 = vpop.f32.mrf.mxu0  ;;  %v28839_v56 = vld [vmem:[#allocation5 + $0xf90] sm:$0xff]   ;;  %v617_v13 = vand.u32 31, %v367_v2  ;;  %vm865_vm8 = vcmp.eq.s32.totalorder %v615_v63, %v114_v12  ;;  %v120_v12 = vld [vmem:[#allocation2 + $0x218] sm:$0xff] }
 0x20c   :  { %v18486_v0 = vadd.f32 %v25949_v58, %v30585_v17  ;;  %v28814_v17 = vld [vmem:[#allocation5 + $0xec0] sm:$0xff]   ;;  %v28841_v62 = vld [vmem:[#allocation5 + $0xf08] sm:$0xff]   ;;  %vm25199_vm9 = vmpackc.low %vm865_vm8, %vm865_vm8 }
 0x20d   :  { %v25951_v5 = vpop.f32.mrf.mxu0  ;;  %26210 = vmatpush3.bf16.msra.mxu0 %v28813_v15  ;;  %26231 = vmatprep.subr.bf16.mxu1 %v28814_v17  ;;  %v113_v15 = vld [vmem:[#allocation2 + $0x1e0] sm:$0xff]  ;;  %v28848_v17 = vld [vmem:[#allocation5 + $0x1078] sm:$0xff]   ;;  %vm867_vm12 = vcmp.eq.s32.totalorder %v617_v13, %v116_v18 }
 0x20e   :  { %26232 = vmatpush3.bf16.msra.mxu1 %v28815_v20  ;;  %26239 = vmatprep.subr.bf16.mxu0 %v28816_v24  ;;  %v614_v5 = vand.u32 31, %v364_v57  ;;  %vm25203_vm13 = vmpackc.low %vm867_vm12, %vm867_vm12  ;;  %v115_v20 = vld [vmem:[#allocation2 + $0x1f0] sm:$0xff]  ;;  %v28852_v24 = vld [vmem:[#allocation5 + $0x1070] sm:$0xff]  }
 0x20f   :  { %26261 = vmatprep.subr.bf16.mxu1 %v28818_v28  ;;  %v28856_v28 = vld [vmem:[#allocation5 + $0x1068] sm:$0xff]   ;;  %v28881_v13 = vld [vmem:[#allocation5 + $0x1138] sm:$0xff]   ;;  %v28885_v18 = vld [vmem:[#allocation5 + $0x1130] sm:$0xff]  }
 0x210   :  { %25194 = vmatmul.mubr.msk.bf16.vlgmr.msra.gmra.mxu0 %vm25193_vm3, %v30427_v44  ;;  %vm864_vm10 = vcmp.eq.s32.totalorder %v614_v5, %v113_v15  ;;  %v28878_v5 = vld [vmem:[#allocation5 + $0x10c0] sm:$0xff]   ;;  %v28882_v15 = vld [vmem:[#allocation5 + $0x11f8] sm:$0xff]  }
 0x211   :  { %v25969_v59 = vpop.f32.mrf.mxu1  ;;  %26240 = vmatpush3.bf16.msra.mxu0 %v28817_v26  ;;  %25198 = vmatmul.mubr.msk.bf16.vlgmr.msra.gmra.mxu1 %vm25197_vm7, %v30427_v44  ;;  %vm25201_vm11 = vmpackc.low %vm864_vm10, %vm864_vm10  ;;  %v28854_v26 = vld [vmem:[#allocation5 + $0x10f0] sm:$0xff]  }
 0x212   :  { %26262 = vmatpush3.bf16.msra.mxu1 %v28819_v29  ;;  %26241 = vmatprep.subr.bf16.mxu0 %v28820_v30  ;;  %v28857_v29 = vld [vmem:[#allocation5 + $0x1028] sm:$0xff]  }
 0x213   :  { %v25970_v1 = vpop.f32.mrf.mxu1  ;;  %26263 = vmatprep.subr.bf16.mxu1 %v28822_v32  ;;  %25200 = vmatprep.mubr.msk.bf16.mxu0 %vm25199_vm9, %v30427_v44  ;;  %v28858_v30 = vld [vmem:[#allocation5 + $0x10e8] sm:$0xff]   ;;  %v28860_v32 = vld [vmem:[#allocation5 + $0x1060] sm:$0xff]  }
 0x214   :  { %v25971_v4 = vadd.f32 %v25970_v1, %v25969_v59  ;;  %v28840_v59 = vld [vmem:[#allocation5 + $0xf48] sm:$0xff]   ;;  %25204 = vmatprep.mubr.msk.bf16.mxu1 %vm25203_vm13, %v30427_v44 }
 0x215   :  { %v25972_v8 = vpop.f32.mrf.mxu1  ;;  %26242 = vmatpush3.bf16.msra.mxu0 %v28821_v31  ;;  %v28842_v1 = vld [vmem:[#allocation5 + $0xfc8] sm:$0xff]  }
 0x216   :  { %v30596_v11 = vadd.f32 %v25971_v4, %v18486_v0  ;;  %26264 = vmatpush3.bf16.msra.mxu1 %v28823_v33  ;;  %26243 = vmatprep.subr.bf16.mxu0 %v28824_v34  ;;  %v28843_v4 = vld [vmem:[#allocation5 + $0xf88] sm:$0xff]   ;;  %v366_v8 = vadd.s32 7936, %v30458_v22  ;;  %v28861_v33 = vld [vmem:[#allocation5 + $0x1020] sm:$0xff]  }
 0x217   :  { %v25973_v14 = vpop.f32.mrf.mxu1  ;;  %26265 = vmatprep.subr.bf16.mxu1 %v28826_v36  ;;  %v28859_v31 = vld [vmem:[#allocation5 + $0x10a8] sm:$0xff]   ;;  %v28862_v34 = vld [vmem:[#allocation5 + $0x10e0] sm:$0xff]   ;;  %v28864_v36 = vld [vmem:[#allocation5 + $0x1058] sm:$0xff]  }
 0x218   :  { %v28847_v14 = vld [vmem:[#allocation5 + $0xf80] sm:$0xff]   ;;  %v616_v16 = vand.u32 31, %v366_v8 }
 0x219   :  { %26244 = vmatpush3.bf16.msra.mxu0 %v28825_v35  ;;  %v28863_v35 = vld [vmem:[#allocation5 + $0x10a0] sm:$0xff]  }
 0x21a   :  { %26266 = vmatpush3.bf16.msra.mxu1 %v28827_v37  ;;  %26245 = vmatprep.subr.bf16.mxu0 %v28828_v38  ;;  %vm866_vm14 = vcmp.eq.s32.totalorder %v616_v16, %v115_v20  ;;  %v28865_v37 = vld [vmem:[#allocation5 + $0x1018] sm:$0xff]   ;;  %v28879_v8 = vld [vmem:[#allocation5 + $0x1080] sm:$0xff]   ;;  %v28887_v20 = vld [vmem:[#allocation5 + $0x11b0] sm:$0xff]  }
 0x21b   :  { %26267 = vmatprep.subr.bf16.mxu1 %v28830_v40  ;;  %vm25205_vm15 = vmpackc.low %vm866_vm14, %vm866_vm14  ;;  %v28866_v38 = vld [vmem:[#allocation5 + $0x10d8] sm:$0xff]  }
 0x21c   :  { %v28883_v16 = vld [vmem:[#allocation5 + $0x11b8] sm:$0xff]  }
 0x21d   :  { %26246 = vmatpush3.bf16.msra.mxu0 %v28829_v39  ;;  %v28867_v39 = vld [vmem:[#allocation5 + $0x1098] sm:$0xff]  }
 0x21e   :  { %26268 = vmatpush3.bf16.msra.mxu1 %v28831_v41  ;;  %26247 = vmatprep.subr.bf16.mxu0 %v28832_v42  ;;  %v28868_v41 = vld [vmem:[#allocation5 + $0x1050] sm:$0xff]  }
 0x21f   :  { %26269 = vmatprep.subr.bf16.mxu1 %v28834_v45  ;;  %v28869_v42 = vld [vmem:[#allocation5 + $0x1010] sm:$0xff]  }
 0x220   :  { %v28870_v45 = vld [vmem:[#allocation5 + $0x10d0] sm:$0xff]  }
 0x221   :  { %26248 = vmatpush3.bf16.msra.mxu0 %v28833_v43 }
 0x222   :  { %26270 = vmatpush3.bf16.msra.mxu1 %v28835_v47  ;;  %26249 = vmatprep.subr.bf16.mxu0 %v28836_v48 }
 0x223   :  { %26271 = vmatprep.subr.bf16.mxu1 %v28838_v53 }
 0x225   :  { %26250 = vmatpush3.bf16.msra.mxu0 %v28837_v50 }
 0x226   :  { %26272 = vmatpush3.bf16.msra.mxu1 %v28839_v56  ;;  %26251 = vmatprep.subr.bf16.mxu0 %v28840_v59 }
 0x227   :  { %v25991_v46 = vpop.f32.mrf.mxu0  ;;  %26273 = vmatprep.subr.bf16.mxu1 %v28842_v1  ;;  %v370_v1 = vadd.s32 8448, %v30458_v22 }
 0x229   :  { %v25992_v49 = vpop.f32.mrf.mxu0  ;;  %26252 = vmatpush3.bf16.msra.mxu0 %v28841_v62  ;;  %v371_v62 = vadd.s32 8576, %v30458_v22 }
 0x22a   :  { %v25993_v52 = vadd.f32 %v25992_v49, %v25991_v46  ;;  %26274 = vmatpush3.bf16.msra.mxu1 %v28843_v4  ;;  %26253 = vmatprep.subr.bf16.mxu0 %v28844_v7  ;;  %v369_v46 = vadd.s32 8320, %v30458_v22  ;;  %v28871_v49 = vld [vmem:[#allocation5 + $0x1090] sm:$0xff]  }
 0x22b   :  { %v25994_v55 = vpop.f32.mrf.mxu0  ;;  %v621_v7 = vand.u32 31, %v371_v62 }
 0x22c   :  { %v18566_v58 = vadd.f32 %v25993_v52, %v30596_v11  ;;  %v28846_v11 = vld [vmem:[#allocation5 + $0xfc0] sm:$0xff]   ;;  %v368_v55 = vadd.s32 8192, %v30458_v22  ;;  %v619_v59 = vand.u32 31, %v369_v46 }
 0x22d   :  { %v25995_v61 = vpop.f32.mrf.mxu0  ;;  %26254 = vmatpush3.bf16.msra.mxu0 %v28845_v10  ;;  %26275 = vmatprep.subr.bf16.mxu1 %v28846_v11  ;;  %v620_v10 = vand.u32 31, %v370_v1  ;;  %v28880_v11 = vld [vmem:[#allocation5 + $0x1178] sm:$0xff]   ;;  %vm871_vm4 = vcmp.eq.s32.totalorder %v621_v7, %v120_v12  ;;  %v28917_v12 = vld [vmem:[#allocation5 + $0x1230] sm:$0xff]  }
 0x22e   :  { %26276 = vmatpush3.bf16.msra.mxu1 %v28847_v14  ;;  %26283 = vmatprep.subr.bf16.mxu0 %v28848_v17  ;;  %v28875_v61 = vld [vmem:[#allocation5 + $0x1088] sm:$0xff]   ;;  %v618_v4 = vand.u32 31, %v368_v55  ;;  %v119_v14 = vld [vmem:[#allocation2 + $0x210] sm:$0xff]  ;;  %vm25211_vm5 = vmpackc.low %vm871_vm4, %vm871_vm4 }
 0x22f   :  { %26305 = vmatprep.subr.bf16.mxu1 %v28850_v21  ;;  %vm870_vm6 = vcmp.eq.s32.totalorder %v620_v10, %v119_v14  ;;  %v28884_v17 = vld [vmem:[#allocation5 + $0x1170] sm:$0xff]   ;;  %v28888_v21 = vld [vmem:[#allocation5 + $0x1168] sm:$0xff]   ;;  %v28913_v7 = vld [vmem:[#allocation5 + $0x1238] sm:$0xff]  }
 0x230   :  { %25202 = vmatmul.mubr.msk.bf16.vlgmr.msra.gmra.mxu0 %vm25201_vm11, %v30427_v44  ;;  %vm25213_vm7 = vmpackc.low %vm870_vm6, %vm870_vm6  ;;  %v28907_v55 = vld [vmem:[#allocation5 + $0x1188] sm:$0xff]   ;;  %v28915_v10 = vld [vmem:[#allocation5 + $0x12b8] sm:$0xff]  }
 0x231   :  { %v26013_v54 = vpop.f32.mrf.mxu1  ;;  %26284 = vmatpush3.bf16.msra.mxu0 %v28849_v19  ;;  %25206 = vmatmul.mubr.msk.bf16.vlgmr.msra.gmra.mxu1 %vm25205_vm15, %v30427_v44  ;;  %v28886_v19 = vld [vmem:[#allocation5 + $0x11f0] sm:$0xff]  }
 0x232   :  { %26306 = vmatpush3.bf16.msra.mxu1 %v28851_v23  ;;  %26285 = vmatprep.subr.bf16.mxu0 %v28852_v24  ;;  %v28889_v23 = vld [vmem:[#allocation5 + $0x1128] sm:$0xff]   ;;  %v28919_v14 = vld [vmem:[#allocation5 + $0x12b0] sm:$0xff]  }
 0x233   :  { %v26014_v60 = vpop.f32.mrf.mxu1  ;;  %26307 = vmatprep.subr.bf16.mxu1 %v28854_v26  ;;  %25212 = vmatprep.mubr.msk.bf16.mxu1 %vm25211_vm5, %v30427_v44  ;;  %v28890_v24 = vld [vmem:[#allocation5 + $0x11e8] sm:$0xff]   ;;  %v28892_v26 = vld [vmem:[#allocation5 + $0x1160] sm:$0xff]  }
 0x234   :  { %v26015_v0 = vadd.f32 %v26014_v60, %v26013_v54  ;;  %v28873_v54 = vld [vmem:[#allocation5 + $0x1008] sm:$0xff]  }
 0x235   :  { %v26016_v3 = vpop.f32.mrf.mxu1  ;;  %26286 = vmatpush3.bf16.msra.mxu0 %v28853_v25  ;;  %v28891_v25 = vld [vmem:[#allocation5 + $0x11a8] sm:$0xff]  }
 0x236   :  { %v30607_v6 = vadd.f32 %v26015_v0, %v18566_v58  ;;  %26308 = vmatpush3.bf16.msra.mxu1 %v28855_v27  ;;  %26287 = vmatprep.subr.bf16.mxu0 %v28856_v28  ;;  %v28874_v58 = vld [vmem:[#allocation5 + $0x10c8] sm:$0xff]   ;;  %v28876_v0 = vld [vmem:[#allocation5 + $0x1040] sm:$0xff]  }
 0x237   :  { %v26017_v9 = vpop.f32.mrf.mxu1  ;;  %26309 = vmatprep.subr.bf16.mxu1 %v28858_v30  ;;  %v28877_v3 = vld [vmem:[#allocation5 + $0x1000] sm:$0xff]   ;;  %v28896_v30 = vld [vmem:[#allocation5 + $0x1158] sm:$0xff]  }
 0x238   :  { %v117_v9 = vld [vmem:[#allocation2 + $0x200] sm:$0xff]  ;;  %v28893_v27 = vld [vmem:[#allocation5 + $0x1120] sm:$0xff]  }
 0x239   :  { %26288 = vmatpush3.bf16.msra.mxu0 %v28857_v29  ;;  %vm868_vm2 = vcmp.eq.s32.totalorder %v618_v4, %v117_v9  ;;  %v28894_v28 = vld [vmem:[#allocation5 + $0x11e0] sm:$0xff]   ;;  %v28914_v9 = vld [vmem:[#allocation5 + $0x12f8] sm:$0xff]  }
 0x23a   :  { %26310 = vmatpush3.bf16.msra.mxu1 %v28859_v31  ;;  %26289 = vmatprep.subr.bf16.mxu0 %v28860_v32  ;;  %vm25209_vm3 = vmpackc.low %vm868_vm2, %vm868_vm2  ;;  %v28895_v29 = vld [vmem:[#allocation5 + $0x11a0] sm:$0xff]   ;;  %v28897_v31 = vld [vmem:[#allocation5 + $0x1118] sm:$0xff]  }
 0x23b   :  { %26311 = vmatprep.subr.bf16.mxu1 %v28862_v34  ;;  %v28898_v32 = vld [vmem:[#allocation5 + $0x11d8] sm:$0xff]  }
 0x23d   :  { %26290 = vmatpush3.bf16.msra.mxu0 %v28861_v33  ;;  %v28899_v33 = vld [vmem:[#allocation5 + $0x1198] sm:$0xff]  }
 0x23e   :  { %26312 = vmatpush3.bf16.msra.mxu1 %v28863_v35  ;;  %26291 = vmatprep.subr.bf16.mxu0 %v28864_v36  ;;  %v28900_v35 = vld [vmem:[#allocation5 + $0x1150] sm:$0xff]  }
 0x23f   :  { %26313 = vmatprep.subr.bf16.mxu1 %v28866_v38  ;;  %v28901_v36 = vld [vmem:[#allocation5 + $0x1110] sm:$0xff]  }
 0x240   :  { %v28902_v38 = vld [vmem:[#allocation5 + $0x11d0] sm:$0xff]  }
 0x241   :  { %26292 = vmatpush3.bf16.msra.mxu0 %v28865_v37 }
 0x242   :  { %26314 = vmatpush3.bf16.msra.mxu1 %v28867_v39  ;;  %26293 = vmatprep.subr.bf16.mxu0 %v28868_v41  ;;  %v28903_v41 = vld [vmem:[#allocation5 + $0x1190] sm:$0xff]  }
 0x243   :  { %26315 = vmatprep.subr.bf16.mxu1 %v28870_v45  ;;  %v28904_v45 = vld [vmem:[#allocation5 + $0x1148] sm:$0xff]  }
 0x245   :  { %26294 = vmatpush3.bf16.msra.mxu0 %v28869_v42  ;;  %v373_v42 = vadd.s32 8832, %v30458_v22 }
 0x246   :  { %26316 = vmatpush3.bf16.msra.mxu1 %v28871_v49  ;;  %26295 = vmatprep.subr.bf16.mxu0 %v28872_v51  ;;  %v372_v49 = vadd.s32 8704, %v30458_v22 }
 0x247   :  { %26317 = vmatprep.subr.bf16.mxu1 %v28874_v58  ;;  %v28908_v58 = vld [vmem:[#allocation5 + $0x1140] sm:$0xff]  }
 0x248   :  { %v622_v62 = vand.u32 31, %v372_v49 }
 0x249   :  { %26296 = vmatpush3.bf16.msra.mxu0 %v28873_v54 }
 0x24a   :  { %26318 = vmatpush3.bf16.msra.mxu1 %v28875_v61  ;;  %26297 = vmatprep.subr.bf16.mxu0 %v28876_v0  ;;  %v28909_v61 = vld [vmem:[#allocation5 + $0x1100] sm:$0xff]   ;;  %v122_v0 = vld [vmem:[#allocation2 + $0x228] sm:$0xff] }
 0x24b   :  { %26319 = vmatprep.subr.bf16.mxu1 %v28878_v5  ;;  %v28912_v5 = vld [vmem:[#allocation5 + $0x1278] sm:$0xff]  }
 0x24d   :  { %26298 = vmatpush3.bf16.msra.mxu0 %v28877_v3  ;;  %v121_v3 = vld [vmem:[#allocation2 + $0x220] sm:$0xff] }
 0x24e   :  { %26320 = vmatpush3.bf16.msra.mxu1 %v28879_v8  ;;  %26327 = vmatprep.subr.bf16.mxu0 %v28880_v11  ;;  %vm872_vm10 = vcmp.eq.s32.totalorder %v622_v62, %v121_v3  ;;  %v123_v8 = vld [vmem:[#allocation2 + $0x230] sm:$0xff]  ;;  %v28916_v11 = vld [vmem:[#allocation5 + $0x1270] sm:$0xff]   ;;  %v28946_v3 = vld [vmem:[#allocation5 + $0x13f8] sm:$0xff]  }
 0x24f   :  { %26349 = vmatprep.subr.bf16.mxu1 %v28882_v15  ;;  %vm25217_vm11 = vmpackc.low %vm872_vm10, %vm872_vm10  ;;  %v28920_v15 = vld [vmem:[#allocation5 + $0x1268] sm:$0xff]  }
 0x250   :  { %v26035_v40 = vpop.f32.mrf.mxu0 }
 0x251   :  { %v26057_v48 = vpop.f32.mrf.mxu1  ;;  %25214 = vmatmul.mubr.msk.bf16.vlgmr.msra.gmra.mxu1 %vm25213_vm7, %v30427_v44 }
 0x252   :  { %v26036_v43 = vpop.f32.mrf.mxu0  ;;  %26350 = vmatpush3.bf16.msra.mxu1 %v28883_v16  ;;  %v28921_v16 = vld [vmem:[#allocation5 + $0x1228] sm:$0xff]  }
 0x253   :  { %v26037_v47 = vadd.f32 %v26036_v43, %v26035_v40  ;;  %v26058_v53 = vpop.f32.mrf.mxu1  ;;  %26351 = vmatprep.subr.bf16.mxu1 %v28886_v19  ;;  %v28924_v19 = vld [vmem:[#allocation5 + $0x1260] sm:$0xff]  }
 0x254   :  { %v26038_v50 = vpop.f32.mrf.mxu0  ;;  %v26059_v56 = vadd.f32 %v26058_v53, %v26057_v48  ;;  %v28905_v48 = vld [vmem:[#allocation5 + $0x1108] sm:$0xff]   ;;  %v375_v53 = vadd.s32 9088, %v30458_v22 }
 0x255   :  { %v18646_v52 = vadd.f32 %v26037_v47, %v30607_v6  ;;  %v26060_v60 = vpop.f32.mrf.mxu1  ;;  %v118_v6 = vld [vmem:[#allocation2 + $0x208] sm:$0xff] }
 0x256   :  { %v26039_v57 = vpop.f32.mrf.mxu0  ;;  %vm869_vm0 = vcmp.eq.s32.totalorder %v619_v59, %v118_v6  ;;  %26352 = vmatpush3.bf16.msra.mxu1 %v28887_v20  ;;  %v374_v59 = vadd.s32 8960, %v30458_v22  ;;  %v625_v1 = vand.u32 31, %v375_v53  ;;  %v124_v6 = vld [vmem:[#allocation2 + $0x238] sm:$0xff]  ;;  %v28925_v20 = vld [vmem:[#allocation5 + $0x1220] sm:$0xff]  }
 0x257   :  { %v30618_v63 = vadd.f32 %v26059_v56, %v18646_v52  ;;  %v26061_v2 = vpop.f32.mrf.mxu1  ;;  %vm25207_vm1 = vmpackc.low %vm869_vm0, %vm869_vm0  ;;  %26353 = vmatprep.subr.bf16.mxu1 %v28890_v24  ;;  %v28906_v52 = vld [vmem:[#allocation5 + $0x11c8] sm:$0xff]   ;;  %v623_v56 = vand.u32 31, %v373_v42  ;;  %v28928_v24 = vld [vmem:[#allocation5 + $0x1258] sm:$0xff]  }
 0x258   :  { %25208 = vmatprep.mubr.msk.bf16.mxu0 %vm25207_vm1, %v30427_v44  ;;  %v28911_v2 = vld [vmem:[#allocation5 + $0x1180] sm:$0xff]   ;;  %v624_v4 = vand.u32 31, %v374_v59  ;;  %vm875_vm12 = vcmp.eq.s32.totalorder %v625_v1, %v124_v6  ;;  %v28945_v1 = vld [vmem:[#allocation5 + $0x1338] sm:$0xff]   ;;  %v28949_v6 = vld [vmem:[#allocation5 + $0x1330] sm:$0xff]  }
 0x259   :  { %25210 = vmatmul.mubr.msk.bf16.vlgmr.msra.gmra.mxu0 %vm25209_vm3, %v30427_v44  ;;  %vm873_vm8 = vcmp.eq.s32.totalorder %v623_v56, %v122_v0  ;;  %vm25219_vm13 = vmpackc.low %vm875_vm12, %vm875_vm12  ;;  %v28940_v53 = vld [vmem:[#allocation5 + $0x1240] sm:$0xff]   ;;  %v128_v0 = vld [vmem:[#allocation2 + $0x258] sm:$0xff] }
 0x25a   :  { %26328 = vmatpush3.bf16.msra.mxu0 %v28881_v13  ;;  %26354 = vmatpush3.bf16.msra.mxu1 %v28891_v25  ;;  %vm25215_vm9 = vmpackc.low %vm873_vm8, %vm873_vm8  ;;  %vm874_vm14 = vcmp.eq.s32.totalorder %v624_v4, %v123_v8  ;;  %v28918_v13 = vld [vmem:[#allocation5 + $0x12f0] sm:$0xff]   ;;  %v28929_v25 = vld [vmem:[#allocation5 + $0x1218] sm:$0xff]  }
 0x25b   :  { %26329 = vmatprep.subr.bf16.mxu0 %v28884_v17  ;;  %26355 = vmatprep.subr.bf16.mxu1 %v28894_v28  ;;  %vm25221_vm15 = vmpackc.low %vm874_vm14, %vm874_vm14  ;;  %v28922_v17 = vld [vmem:[#allocation5 + $0x12e8] sm:$0xff]   ;;  %v28931_v28 = vld [vmem:[#allocation5 + $0x1298] sm:$0xff]  }
 0x25c   :  { %25216 = vmatprep.mubr.msk.bf16.mxu0 %vm25215_vm9, %v30427_v44  ;;  %25220 = vmatprep.mubr.msk.bf16.mxu1 %vm25219_vm13, %v30427_v44  ;;  %v28941_v56 = vld [vmem:[#allocation5 + $0x1200] sm:$0xff]   ;;  %v28947_v4 = vld [vmem:[#allocation5 + $0x13b8] sm:$0xff]   ;;  %v28951_v8 = vld [vmem:[#allocation5 + $0x13b0] sm:$0xff]  }
 0x25e   :  { %26330 = vmatpush3.bf16.msra.mxu0 %v28885_v18  ;;  %26356 = vmatpush3.bf16.msra.mxu1 %v28895_v29  ;;  %v28923_v18 = vld [vmem:[#allocation5 + $0x12a8] sm:$0xff]   ;;  %v28932_v29 = vld [vmem:[#allocation5 + $0x1250] sm:$0xff]  }
 0x25f   :  { %26331 = vmatprep.subr.bf16.mxu0 %v28888_v21  ;;  %26357 = vmatprep.subr.bf16.mxu1 %v28898_v32  ;;  %v28926_v21 = vld [vmem:[#allocation5 + $0x12e0] sm:$0xff]   ;;  %v377_v32 = vadd.s32 9344, %v30458_v22 }
 0x262   :  { %26332 = vmatpush3.bf16.msra.mxu0 %v28889_v23  ;;  %26358 = vmatpush3.bf16.msra.mxu1 %v28899_v33  ;;  %v28927_v23 = vld [vmem:[#allocation5 + $0x12a0] sm:$0xff]  }
 0x263   :  { %26333 = vmatprep.subr.bf16.mxu0 %v28892_v26  ;;  %26359 = vmatprep.subr.bf16.mxu1 %v28902_v38  ;;  %v28930_v26 = vld [vmem:[#allocation5 + $0x12d8] sm:$0xff]   ;;  %v376_v38 = vadd.s32 9216, %v30458_v22 }
 0x266   :  { %26334 = vmatpush3.bf16.msra.mxu0 %v28893_v27  ;;  %26360 = vmatpush3.bf16.msra.mxu1 %v28903_v41 }
 0x267   :  { %26335 = vmatprep.subr.bf16.mxu0 %v28896_v30  ;;  %26361 = vmatprep.subr.bf16.mxu1 %v28906_v52 }
 0x26a   :  { %26336 = vmatpush3.bf16.msra.mxu0 %v28897_v31  ;;  %26362 = vmatpush3.bf16.msra.mxu1 %v28907_v55  ;;  %v28933_v31 = vld [vmem:[#allocation5 + $0x1210] sm:$0xff]  }
 0x26b   :  { %26337 = vmatprep.subr.bf16.mxu0 %v28900_v35 }
 0x26e   :  { %26338 = vmatpush3.bf16.msra.mxu0 %v28901_v36 }
 0x26f   :  { %26339 = vmatprep.subr.bf16.mxu0 %v28904_v45  ;;  %v627_v45 = vand.u32 31, %v377_v32  ;;  %v28968_v32 = vld [vmem:[#allocation5 + $0x1348] sm:$0xff]  }
 0x270   :  { %v26079_v34 = vpop.f32.mrf.mxu0 }
 0x271   :  { %v26101_v40 = vpop.f32.mrf.mxu1 }
 0x272   :  { %v26080_v37 = vpop.f32.mrf.mxu0  ;;  %26340 = vmatpush3.bf16.msra.mxu0 %v28905_v48  ;;  %v379_v48 = vadd.s32 9600, %v30458_v22 }
 0x273   :  { %v26081_v39 = vadd.f32 %v26080_v37, %v26079_v34  ;;  %v26102_v47 = vpop.f32.mrf.mxu1  ;;  %26341 = vmatprep.subr.bf16.mxu0 %v28908_v58  ;;  %v28934_v34 = vld [vmem:[#allocation5 + $0x12d0] sm:$0xff]   ;;  %v126_v58 = vld [vmem:[#allocation2 + $0x248] sm:$0xff] }
 0x274   :  { %v26082_v43 = vpop.f32.mrf.mxu0  ;;  %v26103_v50 = vadd.f32 %v26102_v47, %v26101_v40  ;;  %v28935_v37 = vld [vmem:[#allocation5 + $0x1290] sm:$0xff]   ;;  %v28936_v40 = vld [vmem:[#allocation5 + $0x1248] sm:$0xff]   ;;  %v629_v59 = vand.u32 31, %v379_v48  ;;  %vm877_vm0 = vcmp.eq.s32.totalorder %v627_v45, %v126_v58 }
 0x275   :  { %v18726_v46 = vadd.f32 %v26081_v39, %v30618_v63  ;;  %v26104_v54 = vpop.f32.mrf.mxu1  ;;  %v28910_v63 = vld [vmem:[#allocation5 + $0x11c0] sm:$0xff]   ;;  %v28937_v43 = vld [vmem:[#allocation5 + $0x1208] sm:$0xff]   ;;  %vm25223_vm1 = vmpackc.low %vm877_vm0, %vm877_vm0 }
 0x276   :  { %v26083_v51 = vpop.f32.mrf.mxu0  ;;  %26342 = vmatpush3.bf16.msra.mxu0 %v28909_v61  ;;  %26363 = vmatprep.subr.bf16.mxu1 %v28910_v63  ;;  %v28938_v47 = vld [vmem:[#allocation5 + $0x12c8] sm:$0xff]   ;;  %v378_v54 = vadd.s32 9472, %v30458_v22  ;;  %v125_v61 = vld [vmem:[#allocation2 + $0x240] sm:$0xff]  ;;  %v28944_v63 = vld [vmem:[#allocation5 + $0x1378] sm:$0xff]   ;;  %vm879_vm4 = vcmp.eq.s32.totalorder %v629_v59, %v128_v0 }
 0x277   :  { %v30629_v57 = vadd.f32 %v26103_v50, %v18726_v46  ;;  %v26105_v60 = vpop.f32.mrf.mxu1  ;;  %26364 = vmatpush3.bf16.msra.mxu1 %v28911_v2  ;;  %26371 = vmatprep.subr.bf16.mxu0 %v28912_v5  ;;  %v28939_v50 = vld [vmem:[#allocation5 + $0x1288] sm:$0xff]   ;;  %v626_v51 = vand.u32 31, %v376_v38  ;;  %vm25227_vm5 = vmpackc.low %vm879_vm4, %vm879_vm4  ;;  %v127_v2 = vld [vmem:[#allocation2 + $0x250] sm:$0xff] }
 0x278   :  { %26393 = vmatprep.subr.bf16.mxu1 %v28914_v9  ;;  %v28943_v60 = vld [vmem:[#allocation5 + $0x1280] sm:$0xff]   ;;  %v628_v62 = vand.u32 31, %v378_v54  ;;  %v28948_v5 = vld [vmem:[#allocation5 + $0x1370] sm:$0xff]   ;;  %v28952_v9 = vld [vmem:[#allocation5 + $0x1368] sm:$0xff]  }
 0x279   :  { %25218 = vmatmul.mubr.msk.bf16.vlgmr.msra.gmra.mxu0 %vm25217_vm11, %v30427_v44  ;;  %vm876_vm2 = vcmp.eq.s32.totalorder %v626_v51, %v125_v61  ;;  %v28974_v51 = vld [vmem:[#allocation5 + $0x13c0] sm:$0xff]   ;;  %v132_v58 = vld [vmem:[#allocation2 + $0x278] sm:$0xff]  ;;  %v28977_v59 = vld [vmem:[#allocation5 + $0x1438] sm:$0xff]  }
 0x27a   :  { %26372 = vmatpush3.bf16.msra.mxu0 %v28913_v7  ;;  %25222 = vmatmul.mubr.msk.bf16.vlgmr.msra.gmra.mxu1 %vm25221_vm15, %v30427_v44  ;;  %vm25225_vm3 = vmpackc.low %vm876_vm2, %vm876_vm2  ;;  %vm878_vm6 = vcmp.eq.s32.totalorder %v628_v62, %v127_v2  ;;  %v28950_v7 = vld [vmem:[#allocation5 + $0x13f0] sm:$0xff]   ;;  %v28975_v54 = vld [vmem:[#allocation5 + $0x1380] sm:$0xff]  }
 0x27b   :  { %26394 = vmatpush3.bf16.msra.mxu1 %v28915_v10  ;;  %26373 = vmatprep.subr.bf16.mxu0 %v28916_v11  ;;  %vm25229_vm7 = vmpackc.low %vm878_vm6, %vm878_vm6  ;;  %v28953_v10 = vld [vmem:[#allocation5 + $0x1328] sm:$0xff]   ;;  %v28978_v61 = vld [vmem:[#allocation5 + $0x14f8] sm:$0xff]  }
 0x27c   :  { %26395 = vmatprep.subr.bf16.mxu1 %v28918_v13  ;;  %25224 = vmatprep.mubr.msk.bf16.mxu0 %vm25223_vm1, %v30427_v44  ;;  %v28954_v11 = vld [vmem:[#allocation5 + $0x13e8] sm:$0xff]   ;;  %v28956_v13 = vld [vmem:[#allocation5 + $0x1360] sm:$0xff]   ;;  %v28979_v62 = vld [vmem:[#allocation5 + $0x14b8] sm:$0xff]  }
 0x27d   :  { %25228 = vmatprep.mubr.msk.bf16.mxu1 %vm25227_vm5, %v30427_v44  ;;  %v28981_v0 = vld [vmem:[#allocation5 + $0x1430] sm:$0xff]  }
 0x27e   :  { %26374 = vmatpush3.bf16.msra.mxu0 %v28917_v12  ;;  %v28955_v12 = vld [vmem:[#allocation5 + $0x13a8] sm:$0xff]   ;;  %v28983_v2 = vld [vmem:[#allocation5 + $0x14b0] sm:$0xff]  }
 0x27f   :  { %26396 = vmatpush3.bf16.msra.mxu1 %v28919_v14  ;;  %26375 = vmatprep.subr.bf16.mxu0 %v28920_v15  ;;  %v28957_v14 = vld [vmem:[#allocation5 + $0x1320] sm:$0xff]  }
 0x280   :  { %26397 = vmatprep.subr.bf16.mxu1 %v28922_v17  ;;  %v28958_v15 = vld [vmem:[#allocation5 + $0x13e0] sm:$0xff]   ;;  %v28960_v17 = vld [vmem:[#allocation5 + $0x1358] sm:$0xff]  }
 0x282   :  { %26376 = vmatpush3.bf16.msra.mxu0 %v28921_v16  ;;  %v28959_v16 = vld [vmem:[#allocation5 + $0x13a0] sm:$0xff]  }
 0x283   :  { %26398 = vmatpush3.bf16.msra.mxu1 %v28923_v18  ;;  %26377 = vmatprep.subr.bf16.mxu0 %v28924_v19  ;;  %v28961_v18 = vld [vmem:[#allocation5 + $0x1318] sm:$0xff]  }
 0x284   :  { %26399 = vmatprep.subr.bf16.mxu1 %v28926_v21  ;;  %v28962_v19 = vld [vmem:[#allocation5 + $0x13d8] sm:$0xff]  }
 0x286   :  { %26378 = vmatpush3.bf16.msra.mxu0 %v28925_v20  ;;  %v28963_v20 = vld [vmem:[#allocation5 + $0x1398] sm:$0xff]  }
 0x287   :  { %26400 = vmatpush3.bf16.msra.mxu1 %v28927_v23  ;;  %26379 = vmatprep.subr.bf16.mxu0 %v28928_v24  ;;  %v28964_v23 = vld [vmem:[#allocation5 + $0x1350] sm:$0xff]  }
 0x288   :  { %26401 = vmatprep.subr.bf16.mxu1 %v28930_v26  ;;  %v28965_v24 = vld [vmem:[#allocation5 + $0x1310] sm:$0xff]  }
 0x289   :  { %v28966_v26 = vld [vmem:[#allocation5 + $0x13d0] sm:$0xff]  }
 0x28a   :  { %26380 = vmatpush3.bf16.msra.mxu0 %v28929_v25 }
 0x28b   :  { %26402 = vmatpush3.bf16.msra.mxu1 %v28931_v28  ;;  %26381 = vmatprep.subr.bf16.mxu0 %v28932_v29 }
 0x28c   :  { %26403 = vmatprep.subr.bf16.mxu1 %v28934_v34 }
 0x28e   :  { %26382 = vmatpush3.bf16.msra.mxu0 %v28933_v31 }
 0x28f   :  { %26404 = vmatpush3.bf16.msra.mxu1 %v28935_v37  ;;  %26383 = vmatprep.subr.bf16.mxu0 %v28936_v40 }
 0x290   :  { %v26123_v27 = vpop.f32.mrf.mxu0  ;;  %26405 = vmatprep.subr.bf16.mxu1 %v28938_v47  ;;  %v382_v47 = vadd.s32 9984, %v30458_v22 }
 0x291   :  { %v26145_v35 = vpop.f32.mrf.mxu1 }
 0x292   :  { %v26124_v30 = vpop.f32.mrf.mxu0  ;;  %26384 = vmatpush3.bf16.msra.mxu0 %v28937_v43  ;;  %v383_v43 = vadd.s32 10112, %v30458_v22 }
 0x293   :  { %v26125_v33 = vadd.f32 %v26124_v30, %v26123_v27  ;;  %v26146_v41 = vpop.f32.mrf.mxu1  ;;  %26406 = vmatpush3.bf16.msra.mxu1 %v28939_v50  ;;  %26385 = vmatprep.subr.bf16.mxu0 %v28940_v53  ;;  %v381_v27 = vadd.s32 9856, %v30458_v22  ;;  %v28967_v30 = vld [vmem:[#allocation5 + $0x1390] sm:$0xff]  }
 0x294   :  { %v26126_v36 = vpop.f32.mrf.mxu0  ;;  %v26147_v46 = vadd.f32 %v26146_v41, %v26145_v35  ;;  %v28969_v35 = vld [vmem:[#allocation5 + $0x1308] sm:$0xff]   ;;  %v633_v53 = vand.u32 31, %v383_v43 }
 0x295   :  { %v18806_v39 = vadd.f32 %v26125_v33, %v30629_v57  ;;  %v26148_v49 = vpop.f32.mrf.mxu1  ;;  %v28942_v57 = vld [vmem:[#allocation5 + $0x12c0] sm:$0xff]   ;;  %v380_v36 = vadd.s32 9728, %v30458_v22  ;;  %v631_v40 = vand.u32 31, %v381_v27 }
 0x296   :  { %v26127_v42 = vpop.f32.mrf.mxu0  ;;  %26386 = vmatpush3.bf16.msra.mxu0 %v28941_v56  ;;  %26407 = vmatprep.subr.bf16.mxu1 %v28942_v57  ;;  %v28973_v49 = vld [vmem:[#allocation5 + $0x1300] sm:$0xff]   ;;  %v632_v56 = vand.u32 31, %v382_v47  ;;  %v28976_v57 = vld [vmem:[#allocation5 + $0x1478] sm:$0xff]   ;;  %vm883_vm12 = vcmp.eq.s32.totalorder %v633_v53, %v132_v58  ;;  %v29013_v58 = vld [vmem:[#allocation5 + $0x1530] sm:$0xff]  }
 0x297   :  { %v30640_v52 = vadd.f32 %v26147_v46, %v18806_v39  ;;  %v26149_v55 = vpop.f32.mrf.mxu1  ;;  %26408 = vmatpush3.bf16.msra.mxu1 %v28943_v60  ;;  %26415 = vmatprep.subr.bf16.mxu0 %v28944_v63  ;;  %v28970_v39 = vld [vmem:[#allocation5 + $0x13c8] sm:$0xff]   ;;  %v28972_v46 = vld [vmem:[#allocation5 + $0x1340] sm:$0xff]   ;;  %v630_v50 = vand.u32 31, %v380_v36  ;;  %vm25235_vm13 = vmpackc.low %vm883_vm12, %vm883_vm12 }
 0x298   :  { %26437 = vmatprep.subr.bf16.mxu1 %v28946_v3  ;;  %v28971_v42 = vld [vmem:[#allocation5 + $0x1388] sm:$0xff]   ;;  %v129_v55 = vld [vmem:[#allocation2 + $0x260] sm:$0xff]  ;;  %v131_v60 = vld [vmem:[#allocation2 + $0x270] sm:$0xff] }
 0x299   :  { %25226 = vmatmul.mubr.msk.bf16.vlgmr.msra.gmra.mxu0 %vm25225_vm3, %v30427_v44  ;;  %vm880_vm10 = vcmp.eq.s32.totalorder %v630_v50, %v129_v55  ;;  %vm882_vm14 = vcmp.eq.s32.totalorder %v632_v56, %v131_v60  ;;  %v28980_v63 = vld [vmem:[#allocation5 + $0x1470] sm:$0xff]   ;;  %v28984_v3 = vld [vmem:[#allocation5 + $0x1468] sm:$0xff]   ;;  %v29009_v53 = vld [vmem:[#allocation5 + $0x1538] sm:$0xff]  }
 0x29a   :  { %26416 = vmatpush3.bf16.msra.mxu0 %v28945_v1  ;;  %25230 = vmatmul.mubr.msk.bf16.vlgmr.msra.gmra.mxu1 %vm25229_vm7, %v30427_v44  ;;  %vm25233_vm11 = vmpackc.low %vm880_vm10, %vm880_vm10  ;;  %v28982_v1 = vld [vmem:[#allocation5 + $0x14f0] sm:$0xff]   ;;  %v29003_v36 = vld [vmem:[#allocation5 + $0x1488] sm:$0xff]  }
 0x29b   :  { %26438 = vmatpush3.bf16.msra.mxu1 %v28947_v4  ;;  %26417 = vmatprep.subr.bf16.mxu0 %v28948_v5  ;;  %vm25237_vm15 = vmpackc.low %vm882_vm14, %vm882_vm14  ;;  %v28985_v4 = vld [vmem:[#allocation5 + $0x1428] sm:$0xff]   ;;  %v29010_v55 = vld [vmem:[#allocation5 + $0x15f8] sm:$0xff]  }
 0x29c   :  { %26439 = vmatprep.subr.bf16.mxu1 %v28950_v7  ;;  %25236 = vmatprep.mubr.msk.bf16.mxu1 %vm25235_vm13, %v30427_v44  ;;  %v28986_v5 = vld [vmem:[#allocation5 + $0x14e8] sm:$0xff]   ;;  %v28988_v7 = vld [vmem:[#allocation5 + $0x1460] sm:$0xff]   ;;  %v29011_v56 = vld [vmem:[#allocation5 + $0x15b8] sm:$0xff]  }
 0x29d   :  { %v29015_v60 = vld [vmem:[#allocation5 + $0x15b0] sm:$0xff]  }
 0x29e   :  { %26418 = vmatpush3.bf16.msra.mxu0 %v28949_v6  ;;  %v28987_v6 = vld [vmem:[#allocation5 + $0x14a8] sm:$0xff]  }
 0x29f   :  { %26440 = vmatpush3.bf16.msra.mxu1 %v28951_v8  ;;  %26419 = vmatprep.subr.bf16.mxu0 %v28952_v9  ;;  %v28989_v8 = vld [vmem:[#allocation5 + $0x1420] sm:$0xff]  }
 0x2a0   :  { %26441 = vmatprep.subr.bf16.mxu1 %v28954_v11  ;;  %v28990_v9 = vld [vmem:[#allocation5 + $0x14e0] sm:$0xff]   ;;  %v28992_v11 = vld [vmem:[#allocation5 + $0x1458] sm:$0xff]  }
 0x2a2   :  { %26420 = vmatpush3.bf16.msra.mxu0 %v28953_v10  ;;  %v28991_v10 = vld [vmem:[#allocation5 + $0x14a0] sm:$0xff]  }
 0x2a3   :  { %26442 = vmatpush3.bf16.msra.mxu1 %v28955_v12  ;;  %26421 = vmatprep.subr.bf16.mxu0 %v28956_v13  ;;  %v28993_v12 = vld [vmem:[#allocation5 + $0x1418] sm:$0xff]  }
 0x2a4   :  { %26443 = vmatprep.subr.bf16.mxu1 %v28958_v15  ;;  %v28994_v13 = vld [vmem:[#allocation5 + $0x14d8] sm:$0xff]  }
 0x2a6   :  { %26422 = vmatpush3.bf16.msra.mxu0 %v28957_v14  ;;  %v28995_v14 = vld [vmem:[#allocation5 + $0x1498] sm:$0xff]  }
 0x2a7   :  { %26444 = vmatpush3.bf16.msra.mxu1 %v28959_v16  ;;  %26423 = vmatprep.subr.bf16.mxu0 %v28960_v17  ;;  %v28996_v16 = vld [vmem:[#allocation5 + $0x1450] sm:$0xff]  }
 0x2a8   :  { %26445 = vmatprep.subr.bf16.mxu1 %v28962_v19  ;;  %v28997_v17 = vld [vmem:[#allocation5 + $0x1410] sm:$0xff]  }
 0x2a9   :  { %v28998_v19 = vld [vmem:[#allocation5 + $0x14d0] sm:$0xff]  }
 0x2aa   :  { %26424 = vmatpush3.bf16.msra.mxu0 %v28961_v18 }
 0x2ab   :  { %26446 = vmatpush3.bf16.msra.mxu1 %v28963_v20  ;;  %26425 = vmatprep.subr.bf16.mxu0 %v28964_v23  ;;  %v28999_v23 = vld [vmem:[#allocation5 + $0x1490] sm:$0xff]  }
 0x2ac   :  { %26447 = vmatprep.subr.bf16.mxu1 %v28966_v26  ;;  %v29000_v26 = vld [vmem:[#allocation5 + $0x1448] sm:$0xff]  }
 0x2ae   :  { %26426 = vmatpush3.bf16.msra.mxu0 %v28965_v24  ;;  %v385_v24 = vadd.s32 10368, %v30458_v22 }
 0x2af   :  { %26448 = vmatpush3.bf16.msra.mxu1 %v28967_v30  ;;  %26427 = vmatprep.subr.bf16.mxu0 %v28968_v32  ;;  %v384_v30 = vadd.s32 10240, %v30458_v22 }
 0x2b0   :  { %v26167_v21 = vpop.f32.mrf.mxu0  ;;  %26449 = vmatprep.subr.bf16.mxu1 %v28970_v39  ;;  %v29004_v39 = vld [vmem:[#allocation5 + $0x1440] sm:$0xff]  }
 0x2b1   :  { %v26189_v29 = vpop.f32.mrf.mxu1  ;;  %v634_v43 = vand.u32 31, %v384_v30 }
 0x2b2   :  { %v26168_v25 = vpop.f32.mrf.mxu0  ;;  %26428 = vmatpush3.bf16.msra.mxu0 %v28969_v35 }
 0x2b3   :  { %v26169_v28 = vadd.f32 %v26168_v25, %v26167_v21  ;;  %v26190_v34 = vpop.f32.mrf.mxu1  ;;  %26450 = vmatpush3.bf16.msra.mxu1 %v28971_v42  ;;  %26429 = vmatprep.subr.bf16.mxu0 %v28972_v46  ;;  %v29005_v42 = vld [vmem:[#allocation5 + $0x1400] sm:$0xff]   ;;  %v134_v46 = vld [vmem:[#allocation2 + $0x288] sm:$0xff] }
 0x2b4   :  { %v26170_v31 = vpop.f32.mrf.mxu0  ;;  %v26191_v37 = vadd.f32 %v26190_v34, %v26189_v29  ;;  %26451 = vmatprep.subr.bf16.mxu1 %v28974_v51  ;;  %v29001_v29 = vld [vmem:[#allocation5 + $0x1408] sm:$0xff]   ;;  %v387_v34 = vadd.s32 10624, %v30458_v22  ;;  %v29008_v51 = vld [vmem:[#allocation5 + $0x1578] sm:$0xff]  }
 0x2b5   :  { %v18886_v33 = vadd.f32 %v26169_v28, %v30640_v52  ;;  %v26192_v41 = vpop.f32.mrf.mxu1  ;;  %v130_v52 = vld [vmem:[#allocation2 + $0x268] sm:$0xff] }
 0x2b6   :  { %v26171_v38 = vpop.f32.mrf.mxu0  ;;  %26430 = vmatpush3.bf16.msra.mxu0 %v28973_v49  ;;  %vm881_vm8 = vcmp.eq.s32.totalorder %v631_v40, %v130_v52  ;;  %v386_v40 = vadd.s32 10496, %v30458_v22  ;;  %v637_v47 = vand.u32 31, %v387_v34  ;;  %v133_v49 = vld [vmem:[#allocation2 + $0x280] sm:$0xff]  ;;  %v136_v52 = vld [vmem:[#allocation2 + $0x298] sm:$0xff]  ;;  %v29036_v34 = vld [vmem:[#allocation5 + $0x1540] sm:$0xff]  }
 0x2b7   :  { %v30651_v45 = vadd.f32 %v26191_v37, %v18886_v33  ;;  %v26193_v48 = vpop.f32.mrf.mxu1  ;;  %vm25231_vm9 = vmpackc.low %vm881_vm8, %vm881_vm8  ;;  %26452 = vmatpush3.bf16.msra.mxu1 %v28975_v54  ;;  %26459 = vmatprep.subr.bf16.mxu0 %v28976_v57  ;;  %v29002_v33 = vld [vmem:[#allocation5 + $0x14c8] sm:$0xff]   ;;  %v635_v37 = vand.u32 31, %v385_v24  ;;  %vm884_vm2 = vcmp.eq.s32.totalorder %v634_v43, %v133_v49  ;;  %v135_v54 = vld [vmem:[#allocation2 + $0x290] sm:$0xff] }
 0x2b8   :  { %25232 = vmatprep.mubr.msk.bf16.mxu0 %vm25231_vm9, %v30427_v44  ;;  %26481 = vmatprep.subr.bf16.mxu1 %v28978_v61  ;;  %v29007_v48 = vld [vmem:[#allocation5 + $0x1480] sm:$0xff]   ;;  %v636_v50 = vand.u32 31, %v386_v40  ;;  %vm25241_vm3 = vmpackc.low %vm884_vm2, %vm884_vm2  ;;  %vm887_vm4 = vcmp.eq.s32.totalorder %v637_v47, %v136_v52  ;;  %v29012_v57 = vld [vmem:[#allocation5 + $0x1570] sm:$0xff]  }
 0x2b9   :  { %25234 = vmatmul.mubr.msk.bf16.vlgmr.msra.gmra.mxu0 %vm25233_vm11, %v30427_v44  ;;  %vm885_vm0 = vcmp.eq.s32.totalorder %v635_v37, %v134_v46  ;;  %vm25243_vm5 = vmpackc.low %vm887_vm4, %vm887_vm4  ;;  %v29016_v61 = vld [vmem:[#allocation5 + $0x1568] sm:$0xff]   ;;  %v29037_v37 = vld [vmem:[#allocation5 + $0x1500] sm:$0xff]  }
 0x2ba   :  { %26460 = vmatpush3.bf16.msra.mxu0 %v28977_v59  ;;  %25238 = vmatmul.mubr.msk.bf16.vlgmr.msra.gmra.mxu1 %vm25237_vm15, %v30427_v44  ;;  %vm25239_vm1 = vmpackc.low %vm885_vm0, %vm885_vm0  ;;  %vm886_vm6 = vcmp.eq.s32.totalorder %v636_v50, %v135_v54  ;;  %v29014_v59 = vld [vmem:[#allocation5 + $0x15f0] sm:$0xff]   ;;  %v140_v46 = vld [vmem:[#allocation2 + $0x2b8] sm:$0xff] }
 0x2bb   :  { %26482 = vmatpush3.bf16.msra.mxu1 %v28979_v62  ;;  %26461 = vmatprep.subr.bf16.mxu0 %v28980_v63  ;;  %vm25245_vm7 = vmpackc.low %vm886_vm6, %vm886_vm6  ;;  %v29017_v62 = vld [vmem:[#allocation5 + $0x1528] sm:$0xff]   ;;  %v29041_v47 = vld [vmem:[#allocation5 + $0x1638] sm:$0xff]  }
 0x2bc   :  { %26483 = vmatprep.subr.bf16.mxu1 %v28982_v1  ;;  %25240 = vmatprep.mubr.msk.bf16.mxu0 %vm25239_vm1, %v30427_v44  ;;  %v29018_v63 = vld [vmem:[#allocation5 + $0x15e8] sm:$0xff]   ;;  %v29020_v1 = vld [vmem:[#allocation5 + $0x1560] sm:$0xff]   ;;  %v29042_v49 = vld [vmem:[#allocation5 + $0x16f8] sm:$0xff]  }
 0x2bd   :  { %25244 = vmatprep.mubr.msk.bf16.mxu1 %vm25243_vm5, %v30427_v44  ;;  %v29043_v50 = vld [vmem:[#allocation5 + $0x16b8] sm:$0xff]   ;;  %v29045_v52 = vld [vmem:[#allocation5 + $0x1630] sm:$0xff]  }
 0x2be   :  { %26462 = vmatpush3.bf16.msra.mxu0 %v28981_v0  ;;  %v29019_v0 = vld [vmem:[#allocation5 + $0x15a8] sm:$0xff]   ;;  %v29047_v54 = vld [vmem:[#allocation5 + $0x16b0] sm:$0xff]  }
 0x2bf   :  { %26484 = vmatpush3.bf16.msra.mxu1 %v28983_v2  ;;  %26463 = vmatprep.subr.bf16.mxu0 %v28984_v3  ;;  %v29021_v2 = vld [vmem:[#allocation5 + $0x1520] sm:$0xff]  }
 0x2c0   :  { %26485 = vmatprep.subr.bf16.mxu1 %v28986_v5  ;;  %v29022_v3 = vld [vmem:[#allocation5 + $0x15e0] sm:$0xff]   ;;  %v29024_v5 = vld [vmem:[#allocation5 + $0x1558] sm:$0xff]  }
 0x2c2   :  { %26464 = vmatpush3.bf16.msra.mxu0 %v28985_v4  ;;  %v29023_v4 = vld [vmem:[#allocation5 + $0x15a0] sm:$0xff]  }
 0x2c3   :  { %26486 = vmatpush3.bf16.msra.mxu1 %v28987_v6  ;;  %26465 = vmatprep.subr.bf16.mxu0 %v28988_v7  ;;  %v29025_v6 = vld [vmem:[#allocation5 + $0x1518] sm:$0xff]  }
 0x2c4   :  { %26487 = vmatprep.subr.bf16.mxu1 %v28990_v9  ;;  %v29026_v7 = vld [vmem:[#allocation5 + $0x15d8] sm:$0xff]  }
 0x2c5   :  { %v29027_v9 = vld [vmem:[#allocation5 + $0x1598] sm:$0xff]  }
 0x2c6   :  { %26466 = vmatpush3.bf16.msra.mxu0 %v28989_v8 }
 0x2c7   :  { %26488 = vmatpush3.bf16.msra.mxu1 %v28991_v10  ;;  %26467 = vmatprep.subr.bf16.mxu0 %v28992_v11  ;;  %v29028_v10 = vld [vmem:[#allocation5 + $0x1550] sm:$0xff]  }
 0x2c8   :  { %26489 = vmatprep.subr.bf16.mxu1 %v28994_v13  ;;  %v389_v13 = vadd.s32 10880, %v30458_v22 }
 0x2ca   :  { %26468 = vmatpush3.bf16.msra.mxu0 %v28993_v12  ;;  %v29029_v12 = vld [vmem:[#allocation5 + $0x1510] sm:$0xff]  }
 0x2cb   :  { %26490 = vmatpush3.bf16.msra.mxu1 %v28995_v14  ;;  %26469 = vmatprep.subr.bf16.mxu0 %v28996_v16 }
 0x2cc   :  { %26491 = vmatprep.subr.bf16.mxu1 %v28998_v19  ;;  %v388_v19 = vadd.s32 10752, %v30458_v22 }
 0x2ce   :  { %26470 = vmatpush3.bf16.msra.mxu0 %v28997_v17 }
 0x2cf   :  { %26492 = vmatpush3.bf16.msra.mxu1 %v28999_v23  ;;  %26471 = vmatprep.subr.bf16.mxu0 %v29000_v26  ;;  %v639_v26 = vand.u32 31, %v389_v13  ;;  %v29064_v13 = vld [vmem:[#allocation5 + $0x1648] sm:$0xff]  }
 0x2d0   :  { %v26211_v15 = vpop.f32.mrf.mxu0  ;;  %26493 = vmatprep.subr.bf16.mxu1 %v29002_v33 }
 0x2d1   :  { %v26233_v21 = vpop.f32.mrf.mxu1 }
 0x2d2   :  { %v26212_v18 = vpop.f32.mrf.mxu0  ;;  %26472 = vmatpush3.bf16.msra.mxu0 %v29001_v29  ;;  %v391_v29 = vadd.s32 11136, %v30458_v22 }
 0x2d3   :  { %v26213_v20 = vadd.f32 %v26212_v18, %v26211_v15  ;;  %v26234_v28 = vpop.f32.mrf.mxu1  ;;  %26494 = vmatpush3.bf16.msra.mxu1 %v29003_v36  ;;  %26473 = vmatprep.subr.bf16.mxu0 %v29004_v39  ;;  %v29030_v15 = vld [vmem:[#allocation5 + $0x15d0] sm:$0xff]   ;;  %v138_v39 = vld [vmem:[#allocation2 + $0x2a8] sm:$0xff] }
 0x2d4   :  { %v26214_v25 = vpop.f32.mrf.mxu0  ;;  %v26235_v31 = vadd.f32 %v26234_v28, %v26233_v21  ;;  %v29031_v18 = vld [vmem:[#allocation5 + $0x1590] sm:$0xff]   ;;  %v29032_v21 = vld [vmem:[#allocation5 + $0x1548] sm:$0xff]   ;;  %v641_v40 = vand.u32 31, %v391_v29  ;;  %vm889_vm8 = vcmp.eq.s32.totalorder %v639_v26, %v138_v39 }
 0x2d5   :  { %v18966_v27 = vadd.f32 %v26213_v20, %v30651_v45  ;;  %v26236_v35 = vpop.f32.mrf.mxu1  ;;  %v29006_v45 = vld [vmem:[#allocation5 + $0x14c0] sm:$0xff]   ;;  %v29033_v25 = vld [vmem:[#allocation5 + $0x1508] sm:$0xff]   ;;  %vm25247_vm9 = vmpackc.low %vm889_vm8, %vm889_vm8 }
 0x2d6   :  { %v26215_v32 = vpop.f32.mrf.mxu0  ;;  %26474 = vmatpush3.bf16.msra.mxu0 %v29005_v42  ;;  %26495 = vmatprep.subr.bf16.mxu1 %v29006_v45  ;;  %v29034_v28 = vld [vmem:[#allocation5 + $0x15c8] sm:$0xff]   ;;  %v390_v35 = vadd.s32 11008, %v30458_v22  ;;  %v137_v42 = vld [vmem:[#allocation2 + $0x2a0] sm:$0xff]  ;;  %v29040_v45 = vld [vmem:[#allocation5 + $0x1678] sm:$0xff]   ;;  %vm891_vm12 = vcmp.eq.s32.totalorder %v641_v40, %v140_v46 }
 0x2d7   :  { %v30662_v38 = vadd.f32 %v26235_v31, %v18966_v27  ;;  %v26237_v41 = vpop.f32.mrf.mxu1  ;;  %26496 = vmatpush3.bf16.msra.mxu1 %v29007_v48  ;;  %26503 = vmatprep.subr.bf16.mxu0 %v29008_v51  ;;  %v29035_v31 = vld [vmem:[#allocation5 + $0x1588] sm:$0xff]   ;;  %v638_v32 = vand.u32 31, %v388_v19  ;;  %vm25251_vm13 = vmpackc.low %vm891_vm12, %vm891_vm12  ;;  %v139_v48 = vld [vmem:[#allocation2 + $0x2b0] sm:$0xff] }
 0x2d8   :  { %26525 = vmatprep.subr.bf16.mxu1 %v29010_v55  ;;  %v29039_v41 = vld [vmem:[#allocation5 + $0x1580] sm:$0xff]   ;;  %v640_v43 = vand.u32 31, %v390_v35  ;;  %v29044_v51 = vld [vmem:[#allocation5 + $0x1670] sm:$0xff]   ;;  %v29048_v55 = vld [vmem:[#allocation5 + $0x1668] sm:$0xff]  }
 0x2d9   :  { %25242 = vmatmul.mubr.msk.bf16.vlgmr.msra.gmra.mxu0 %vm25241_vm3, %v30427_v44  ;;  %vm888_vm10 = vcmp.eq.s32.totalorder %v638_v32, %v137_v42  ;;  %v29070_v32 = vld [vmem:[#allocation5 + $0x16c0] sm:$0xff]   ;;  %v144_v39 = vld [vmem:[#allocation2 + $0x2d8] sm:$0xff]  ;;  %v29073_v40 = vld [vmem:[#allocation5 + $0x1738] sm:$0xff]  }
 0x2da   :  { %26504 = vmatpush3.bf16.msra.mxu0 %v29009_v53  ;;  %25246 = vmatmul.mubr.msk.bf16.vlgmr.msra.gmra.mxu1 %vm25245_vm7, %v30427_v44  ;;  %vm25249_vm11 = vmpackc.low %vm888_vm10, %vm888_vm10  ;;  %vm890_vm14 = vcmp.eq.s32.totalorder %v640_v43, %v139_v48  ;;  %v29046_v53 = vld [vmem:[#allocation5 + $0x16f0] sm:$0xff]   ;;  %v29071_v35 = vld [vmem:[#allocation5 + $0x1680] sm:$0xff]  }
 0x2db   :  { %26526 = vmatpush3.bf16.msra.mxu1 %v29011_v56  ;;  %26505 = vmatprep.subr.bf16.mxu0 %v29012_v57  ;;  %vm25253_vm15 = vmpackc.low %vm890_vm14, %vm890_vm14  ;;  %v29049_v56 = vld [vmem:[#allocation5 + $0x1628] sm:$0xff]   ;;  %v29074_v42 = vld [vmem:[#allocation5 + $0x17f8] sm:$0xff]  }
 0x2dc   :  { %26527 = vmatprep.subr.bf16.mxu1 %v29014_v59  ;;  %25248 = vmatprep.mubr.msk.bf16.mxu0 %vm25247_vm9, %v30427_v44  ;;  %v29050_v57 = vld [vmem:[#allocation5 + $0x16e8] sm:$0xff]   ;;  %v29052_v59 = vld [vmem:[#allocation5 + $0x1660] sm:$0xff]   ;;  %v29075_v43 = vld [vmem:[#allocation5 + $0x17b8] sm:$0xff]  }
 0x2dd   :  { %25252 = vmatprep.mubr.msk.bf16.mxu1 %vm25251_vm13, %v30427_v44  ;;  %v29077_v46 = vld [vmem:[#allocation5 + $0x1730] sm:$0xff]  }
 0x2de   :  { %26506 = vmatpush3.bf16.msra.mxu0 %v29013_v58  ;;  %v29051_v58 = vld [vmem:[#allocation5 + $0x16a8] sm:$0xff]   ;;  %v29079_v48 = vld [vmem:[#allocation5 + $0x17b0] sm:$0xff]  }
 0x2df   :  { %26528 = vmatpush3.bf16.msra.mxu1 %v29015_v60  ;;  %26507 = vmatprep.subr.bf16.mxu0 %v29016_v61  ;;  %v29053_v60 = vld [vmem:[#allocation5 + $0x1620] sm:$0xff]  }
 0x2e0   :  { %26529 = vmatprep.subr.bf16.mxu1 %v29018_v63  ;;  %v29054_v61 = vld [vmem:[#allocation5 + $0x16e0] sm:$0xff]   ;;  %v29056_v63 = vld [vmem:[#allocation5 + $0x1658] sm:$0xff]  }
 0x2e2   :  { %26508 = vmatpush3.bf16.msra.mxu0 %v29017_v62  ;;  %v29055_v62 = vld [vmem:[#allocation5 + $0x16a0] sm:$0xff]  }
 0x2e3   :  { %26530 = vmatpush3.bf16.msra.mxu1 %v29019_v0  ;;  %26509 = vmatprep.subr.bf16.mxu0 %v29020_v1  ;;  %v29057_v0 = vld [vmem:[#allocation5 + $0x1618] sm:$0xff]  }
 0x2e4   :  { %26531 = vmatprep.subr.bf16.mxu1 %v29022_v3  ;;  %v29058_v1 = vld [vmem:[#allocation5 + $0x16d8] sm:$0xff]  }
 0x2e6   :  { %26510 = vmatpush3.bf16.msra.mxu0 %v29021_v2  ;;  %v29059_v2 = vld [vmem:[#allocation5 + $0x1698] sm:$0xff]  }
 0x2e7   :  { %26532 = vmatpush3.bf16.msra.mxu1 %v29023_v4  ;;  %26511 = vmatprep.subr.bf16.mxu0 %v29024_v5  ;;  %v29060_v4 = vld [vmem:[#allocation5 + $0x1650] sm:$0xff]  }
 0x2e8   :  { %26533 = vmatprep.subr.bf16.mxu1 %v29026_v7  ;;  %v29061_v5 = vld [vmem:[#allocation5 + $0x1610] sm:$0xff]  }
 0x2e9   :  { %v29062_v7 = vld [vmem:[#allocation5 + $0x16d0] sm:$0xff]  }
 0x2ea   :  { %26512 = vmatpush3.bf16.msra.mxu0 %v29025_v6 }
 0x2eb   :  { %26534 = vmatpush3.bf16.msra.mxu1 %v29027_v9  ;;  %26513 = vmatprep.subr.bf16.mxu0 %v29028_v10 }
 0x2ec   :  { %26535 = vmatprep.subr.bf16.mxu1 %v29030_v15 }
 0x2ee   :  { %26514 = vmatpush3.bf16.msra.mxu0 %v29029_v12 }
 0x2ef   :  { %26536 = vmatpush3.bf16.msra.mxu1 %v29031_v18  ;;  %26515 = vmatprep.subr.bf16.mxu0 %v29032_v21 }
 0x2f0   :  { %v26255_v8 = vpop.f32.mrf.mxu0  ;;  %26537 = vmatprep.subr.bf16.mxu1 %v29034_v28  ;;  %v394_v28 = vadd.s32 11520, %v30458_v22 }
 0x2f1   :  { %v26277_v16 = vpop.f32.mrf.mxu1 }
 0x2f2   :  { %v26256_v11 = vpop.f32.mrf.mxu0  ;;  %26516 = vmatpush3.bf16.msra.mxu0 %v29033_v25  ;;  %v395_v25 = vadd.s32 11648, %v30458_v22 }
 0x2f3   :  { %v26257_v14 = vadd.f32 %v26256_v11, %v26255_v8  ;;  %v26278_v23 = vpop.f32.mrf.mxu1  ;;  %26538 = vmatpush3.bf16.msra.mxu1 %v29035_v31  ;;  %26517 = vmatprep.subr.bf16.mxu0 %v29036_v34  ;;  %v393_v8 = vadd.s32 11392, %v30458_v22  ;;  %v29063_v11 = vld [vmem:[#allocation5 + $0x1690] sm:$0xff]  }
 0x2f4   :  { %v26258_v17 = vpop.f32.mrf.mxu0  ;;  %v26279_v27 = vadd.f32 %v26278_v23, %v26277_v16  ;;  %v29065_v16 = vld [vmem:[#allocation5 + $0x1608] sm:$0xff]   ;;  %v645_v34 = vand.u32 31, %v395_v25 }
 0x2f5   :  { %v19046_v20 = vadd.f32 %v26257_v14, %v30662_v38  ;;  %v26280_v30 = vpop.f32.mrf.mxu1  ;;  %v29038_v38 = vld [vmem:[#allocation5 + $0x15c0] sm:$0xff]   ;;  %v392_v17 = vadd.s32 11264, %v30458_v22  ;;  %v643_v21 = vand.u32 31, %v393_v8 }
 0x2f6   :  { %v26259_v24 = vpop.f32.mrf.mxu0  ;;  %26518 = vmatpush3.bf16.msra.mxu0 %v29037_v37  ;;  %26539 = vmatprep.subr.bf16.mxu1 %v29038_v38  ;;  %v29069_v30 = vld [vmem:[#allocation5 + $0x1600] sm:$0xff]   ;;  %v644_v37 = vand.u32 31, %v394_v28  ;;  %v29072_v38 = vld [vmem:[#allocation5 + $0x1778] sm:$0xff]   ;;  %vm895_vm4 = vcmp.eq.s32.totalorder %v645_v34, %v144_v39  ;;  %v29109_v39 = vld [vmem:[#allocation5 + $0x1830] sm:$0xff]  }
 0x2f7   :  { %v30673_v33 = vadd.f32 %v26279_v27, %v19046_v20  ;;  %v26281_v36 = vpop.f32.mrf.mxu1  ;;  %26540 = vmatpush3.bf16.msra.mxu1 %v29039_v41  ;;  %26547 = vmatprep.subr.bf16.mxu0 %v29040_v45  ;;  %v29066_v20 = vld [vmem:[#allocation5 + $0x16c8] sm:$0xff]   ;;  %v29068_v27 = vld [vmem:[#allocation5 + $0x1640] sm:$0xff]   ;;  %v642_v31 = vand.u32 31, %v392_v17  ;;  %vm25259_vm5 = vmpackc.low %vm895_vm4, %vm895_vm4 }
 0x2f8   :  { %26569 = vmatprep.subr.bf16.mxu1 %v29042_v49  ;;  %v29067_v24 = vld [vmem:[#allocation5 + $0x1688] sm:$0xff]   ;;  %v141_v36 = vld [vmem:[#allocation2 + $0x2c0] sm:$0xff]  ;;  %v143_v41 = vld [vmem:[#allocation2 + $0x2d0] sm:$0xff] }
 0x2f9   :  { %25250 = vmatmul.mubr.msk.bf16.vlgmr.msra.gmra.mxu0 %vm25249_vm11, %v30427_v44  ;;  %vm892_vm2 = vcmp.eq.s32.totalorder %v642_v31, %v141_v36  ;;  %vm894_vm6 = vcmp.eq.s32.totalorder %v644_v37, %v143_v41  ;;  %v29076_v45 = vld [vmem:[#allocation5 + $0x1770] sm:$0xff]   ;;  %v29080_v49 = vld [vmem:[#allocation5 + $0x1768] sm:$0xff]   ;;  %v29105_v34 = vld [vmem:[#allocation5 + $0x1838] sm:$0xff]  }
 0x2fa   :  { %26548 = vmatpush3.bf16.msra.mxu0 %v29041_v47  ;;  %25254 = vmatmul.mubr.msk.bf16.vlgmr.msra.gmra.mxu1 %vm25253_vm15, %v30427_v44  ;;  %vm25257_vm3 = vmpackc.low %vm892_vm2, %vm892_vm2  ;;  %v29078_v47 = vld [vmem:[#allocation5 + $0x17f0] sm:$0xff]   ;;  %v29099_v17 = vld [vmem:[#allocation5 + $0x1788] sm:$0xff]  }
 0x2fb   :  { %26570 = vmatpush3.bf16.msra.mxu1 %v29043_v50  ;;  %26549 = vmatprep.subr.bf16.mxu0 %v29044_v51  ;;  %vm25261_vm7 = vmpackc.low %vm894_vm6, %vm894_vm6  ;;  %v29081_v50 = vld [vmem:[#allocation5 + $0x1728] sm:$0xff]   ;;  %v29106_v36 = vld [vmem:[#allocation5 + $0x18f8] sm:$0xff]  }
 0x2fc   :  { %26571 = vmatprep.subr.bf16.mxu1 %v29046_v53  ;;  %25260 = vmatprep.mubr.msk.bf16.mxu1 %vm25259_vm5, %v30427_v44  ;;  %v29082_v51 = vld [vmem:[#allocation5 + $0x17e8] sm:$0xff]   ;;  %v29084_v53 = vld [vmem:[#allocation5 + $0x1760] sm:$0xff]   ;;  %v29107_v37 = vld [vmem:[#allocation5 + $0x18b8] sm:$0xff]  }
 0x2fd   :  { %v29111_v41 = vld [vmem:[#allocation5 + $0x18b0] sm:$0xff]  }
 0x2fe   :  { %26550 = vmatpush3.bf16.msra.mxu0 %v29045_v52  ;;  %v29083_v52 = vld [vmem:[#allocation5 + $0x17a8] sm:$0xff]  }
 0x2ff   :  { %26572 = vmatpush3.bf16.msra.mxu1 %v29047_v54  ;;  %26551 = vmatprep.subr.bf16.mxu0 %v29048_v55  ;;  %v29085_v54 = vld [vmem:[#allocation5 + $0x1720] sm:$0xff]  }
 0x300   :  { %26573 = vmatprep.subr.bf16.mxu1 %v29050_v57  ;;  %v29086_v55 = vld [vmem:[#allocation5 + $0x17e0] sm:$0xff]   ;;  %v29088_v57 = vld [vmem:[#allocation5 + $0x1758] sm:$0xff]  }
 0x302   :  { %26552 = vmatpush3.bf16.msra.mxu0 %v29049_v56  ;;  %v29087_v56 = vld [vmem:[#allocation5 + $0x17a0] sm:$0xff]  }
 0x303   :  { %26574 = vmatpush3.bf16.msra.mxu1 %v29051_v58  ;;  %26553 = vmatprep.subr.bf16.mxu0 %v29052_v59  ;;  %v29089_v58 = vld [vmem:[#allocation5 + $0x1718] sm:$0xff]  }
 0x304   :  { %26575 = vmatprep.subr.bf16.mxu1 %v29054_v61  ;;  %v29090_v59 = vld [vmem:[#allocation5 + $0x17d8] sm:$0xff]  }
 0x306   :  { %26554 = vmatpush3.bf16.msra.mxu0 %v29053_v60  ;;  %v29091_v60 = vld [vmem:[#allocation5 + $0x1798] sm:$0xff]  }
 0x307   :  { %26576 = vmatpush3.bf16.msra.mxu1 %v29055_v62  ;;  %26555 = vmatprep.subr.bf16.mxu0 %v29056_v63  ;;  %v29092_v62 = vld [vmem:[#allocation5 + $0x1750] sm:$0xff]  }
 0x308   :  { %26577 = vmatprep.subr.bf16.mxu1 %v29058_v1  ;;  %v29093_v63 = vld [vmem:[#allocation5 + $0x1710] sm:$0xff]  }
 0x309   :  { %v29094_v1 = vld [vmem:[#allocation5 + $0x17d0] sm:$0xff]  }
 0x30a   :  { %26556 = vmatpush3.bf16.msra.mxu0 %v29057_v0 }
 0x30b   :  { %26578 = vmatpush3.bf16.msra.mxu1 %v29059_v2  ;;  %26557 = vmatprep.subr.bf16.mxu0 %v29060_v4  ;;  %v29095_v4 = vld [vmem:[#allocation5 + $0x1790] sm:$0xff]  }
 0x30c   :  { %26579 = vmatprep.subr.bf16.mxu1 %v29062_v7  ;;  %v29096_v7 = vld [vmem:[#allocation5 + $0x1748] sm:$0xff]  }
 0x30e   :  { %26558 = vmatpush3.bf16.msra.mxu0 %v29061_v5  ;;  %v397_v5 = vadd.s32 11904, %v30458_v22 }
 0x30f   :  { %26580 = vmatpush3.bf16.msra.mxu1 %v29063_v11  ;;  %26559 = vmatprep.subr.bf16.mxu0 %v29064_v13  ;;  %v396_v11 = vadd.s32 11776, %v30458_v22 }
 0x310   :  { %26581 = vmatprep.subr.bf16.mxu1 %v29066_v20  ;;  %v29100_v20 = vld [vmem:[#allocation5 + $0x1740] sm:$0xff]  }
 0x311   :  { %v26321_v10 = vpop.f32.mrf.mxu1  ;;  %v646_v25 = vand.u32 31, %v396_v11 }
 0x312   :  { %26560 = vmatpush3.bf16.msra.mxu0 %v29065_v16 }
 0x313   :  { %v26322_v15 = vpop.f32.mrf.mxu1  ;;  %26582 = vmatpush3.bf16.msra.mxu1 %v29067_v24  ;;  %26561 = vmatprep.subr.bf16.mxu0 %v29068_v27  ;;  %v29101_v24 = vld [vmem:[#allocation5 + $0x1700] sm:$0xff]   ;;  %v146_v27 = vld [vmem:[#allocation2 + $0x2e8] sm:$0xff] }
 0x314   :  { %v26323_v18 = vadd.f32 %v26322_v15, %v26321_v10  ;;  %26583 = vmatprep.subr.bf16.mxu1 %v29070_v32  ;;  %v29097_v10 = vld [vmem:[#allocation5 + $0x1708] sm:$0xff]   ;;  %v399_v15 = vadd.s32 12160, %v30458_v22  ;;  %v29104_v32 = vld [vmem:[#allocation5 + $0x1878] sm:$0xff]  }
 0x315   :  { %v26324_v23 = vpop.f32.mrf.mxu1 }
 0x316   :  { %26562 = vmatpush3.bf16.msra.mxu0 %v29069_v30  ;;  %v649_v28 = vand.u32 31, %v399_v15  ;;  %v145_v30 = vld [vmem:[#allocation2 + $0x2e0] sm:$0xff]  ;;  %v29132_v15 = vld [vmem:[#allocation5 + $0x1840] sm:$0xff]  }
 0x317   :  { %v26325_v29 = vpop.f32.mrf.mxu1  ;;  %26584 = vmatpush3.bf16.msra.mxu1 %v29071_v35  ;;  %26591 = vmatprep.subr.bf16.mxu0 %v29072_v38  ;;  %vm896_vm10 = vcmp.eq.s32.totalorder %v646_v25, %v145_v30  ;;  %v147_v35 = vld [vmem:[#allocation2 + $0x2f0] sm:$0xff]  ;;  %v29108_v38 = vld [vmem:[#allocation5 + $0x1870] sm:$0xff]   ;;  %v29138_v30 = vld [vmem:[#allocation5 + $0x19f8] sm:$0xff]  }
 0x318   :  { %26613 = vmatprep.subr.bf16.mxu1 %v29074_v42  ;;  %v29103_v29 = vld [vmem:[#allocation5 + $0x1780] sm:$0xff]   ;;  %vm25265_vm11 = vmpackc.low %vm896_vm10, %vm896_vm10  ;;  %v29112_v42 = vld [vmem:[#allocation5 + $0x1868] sm:$0xff]  }
 0x319   :  { %v26299_v3 = vpop.f32.mrf.mxu0 }
 0x31a   :  { %25262 = vmatmul.mubr.msk.bf16.vlgmr.msra.gmra.mxu1 %vm25261_vm7, %v30427_v44 }
 0x31b   :  { %v26300_v6 = vpop.f32.mrf.mxu0  ;;  %26614 = vmatpush3.bf16.msra.mxu1 %v29075_v43  ;;  %v29113_v43 = vld [vmem:[#allocation5 + $0x1828] sm:$0xff]  }
 0x31c   :  { %v26301_v9 = vadd.f32 %v26300_v6, %v26299_v3  ;;  %26615 = vmatprep.subr.bf16.mxu1 %v29078_v47  ;;  %v29116_v47 = vld [vmem:[#allocation5 + $0x1860] sm:$0xff]  }
 0x31d   :  { %v26302_v12 = vpop.f32.mrf.mxu0 }
 0x31e   :  { %v19126_v14 = vadd.f32 %v26301_v9, %v30673_v33  ;;  %v142_v33 = vld [vmem:[#allocation2 + $0x2c8] sm:$0xff] }
 0x31f   :  { %v26303_v19 = vpop.f32.mrf.mxu0  ;;  %vm893_vm0 = vcmp.eq.s32.totalorder %v643_v21, %v142_v33  ;;  %26616 = vmatpush3.bf16.msra.mxu1 %v29079_v48  ;;  %v398_v21 = vadd.s32 12032, %v30458_v22  ;;  %v148_v33 = vld [vmem:[#allocation2 + $0x2f8] sm:$0xff]  ;;  %v29117_v48 = vld [vmem:[#allocation5 + $0x1820] sm:$0xff]  }
 0x320   :  { %v30684_v26 = vadd.f32 %v26323_v18, %v19126_v14  ;;  %vm25255_vm1 = vmpackc.low %vm893_vm0, %vm893_vm0  ;;  %26617 = vmatprep.subr.bf16.mxu1 %v29082_v51  ;;  %v29098_v14 = vld [vmem:[#allocation5 + $0x17c8] sm:$0xff]   ;;  %v647_v18 = vand.u32 31, %v397_v5  ;;  %vm899_vm12 = vcmp.eq.s32.totalorder %v649_v28, %v148_v33  ;;  %v29120_v51 = vld [vmem:[#allocation5 + $0x1858] sm:$0xff]  }
 0x321   :  { %25256 = vmatprep.mubr.msk.bf16.mxu0 %vm25255_vm1, %v30427_v44  ;;  %v648_v31 = vand.u32 31, %v398_v21  ;;  %vm25267_vm13 = vmpackc.low %vm899_vm12, %vm899_vm12  ;;  %v29137_v28 = vld [vmem:[#allocation5 + $0x1938] sm:$0xff]   ;;  %v29141_v33 = vld [vmem:[#allocation5 + $0x1930] sm:$0xff]  }
 0x322   :  { %25258 = vmatmul.mubr.msk.bf16.vlgmr.msra.gmra.mxu0 %vm25257_vm3, %v30427_v44  ;;  %vm897_vm8 = vcmp.eq.s32.totalorder %v647_v18, %v146_v27  ;;  %25268 = vmatprep.mubr.msk.bf16.mxu1 %vm25267_vm13, %v30427_v44  ;;  %v29133_v18 = vld [vmem:[#allocation5 + $0x1800] sm:$0xff]   ;;  %v152_v27 = vld [vmem:[#allocation2 + $0x318] sm:$0xff] }
 0x323   :  { %26592 = vmatpush3.bf16.msra.mxu0 %v29073_v40  ;;  %26618 = vmatpush3.bf16.msra.mxu1 %v29083_v52  ;;  %vm25263_vm9 = vmpackc.low %vm897_vm8, %vm897_vm8  ;;  %vm898_vm14 = vcmp.eq.s32.totalorder %v648_v31, %v147_v35  ;;  %v29110_v40 = vld [vmem:[#allocation5 + $0x18f0] sm:$0xff]   ;;  %v29121_v52 = vld [vmem:[#allocation5 + $0x1818] sm:$0xff]  }
 0x324   :  { %26593 = vmatprep.subr.bf16.mxu0 %v29076_v45  ;;  %26619 = vmatprep.subr.bf16.mxu1 %v29086_v55  ;;  %vm25269_vm15 = vmpackc.low %vm898_vm14, %vm898_vm14  ;;  %v29114_v45 = vld [vmem:[#allocation5 + $0x18e8] sm:$0xff]   ;;  %v29123_v55 = vld [vmem:[#allocation5 + $0x1898] sm:$0xff]  }
 0x325   :  { %25264 = vmatprep.mubr.msk.bf16.mxu0 %vm25263_vm9, %v30427_v44  ;;  %v29139_v31 = vld [vmem:[#allocation5 + $0x19b8] sm:$0xff]   ;;  %v29143_v35 = vld [vmem:[#allocation5 + $0x19b0] sm:$0xff]  }
 0x327   :  { %26594 = vmatpush3.bf16.msra.mxu0 %v29077_v46  ;;  %26620 = vmatpush3.bf16.msra.mxu1 %v29087_v56  ;;  %v29115_v46 = vld [vmem:[#allocation5 + $0x18a8] sm:$0xff]   ;;  %v29124_v56 = vld [vmem:[#allocation5 + $0x1850] sm:$0xff]  }
 0x328   :  { %26595 = vmatprep.subr.bf16.mxu0 %v29080_v49  ;;  %26621 = vmatprep.subr.bf16.mxu1 %v29090_v59  ;;  %v29118_v49 = vld [vmem:[#allocation5 + $0x18e0] sm:$0xff]   ;;  %v401_v59 = vadd.s32 12416, %v30458_v22 }
 0x32b   :  { %26596 = vmatpush3.bf16.msra.mxu0 %v29081_v50  ;;  %26622 = vmatpush3.bf16.msra.mxu1 %v29091_v60  ;;  %v29119_v50 = vld [vmem:[#allocation5 + $0x18a0] sm:$0xff]  }
 0x32c   :  { %26597 = vmatprep.subr.bf16.mxu0 %v29084_v53  ;;  %26623 = vmatprep.subr.bf16.mxu1 %v29094_v1  ;;  %v29122_v53 = vld [vmem:[#allocation5 + $0x18d8] sm:$0xff]   ;;  %v400_v1 = vadd.s32 12288, %v30458_v22 }
 0x32f   :  { %26598 = vmatpush3.bf16.msra.mxu0 %v29085_v54  ;;  %26624 = vmatpush3.bf16.msra.mxu1 %v29095_v4 }
 0x330   :  { %26599 = vmatprep.subr.bf16.mxu0 %v29088_v57  ;;  %26625 = vmatprep.subr.bf16.mxu1 %v29098_v14 }
 0x333   :  { %26600 = vmatpush3.bf16.msra.mxu0 %v29089_v58  ;;  %26626 = vmatpush3.bf16.msra.mxu1 %v29099_v17  ;;  %v29125_v58 = vld [vmem:[#allocation5 + $0x1810] sm:$0xff]  }
 0x334   :  { %26601 = vmatprep.subr.bf16.mxu0 %v29092_v62 }
 0x337   :  { %26602 = vmatpush3.bf16.msra.mxu0 %v29093_v63 }
 0x338   :  { %26603 = vmatprep.subr.bf16.mxu0 %v29096_v7  ;;  %v651_v7 = vand.u32 31, %v401_v59  ;;  %v29160_v59 = vld [vmem:[#allocation5 + $0x1948] sm:$0xff]  }
 0x339   :  { %v26343_v61 = vpop.f32.mrf.mxu0 }
 0x33a   :  { %v26365_v3 = vpop.f32.mrf.mxu1 }
 0x33b   :  { %v26344_v0 = vpop.f32.mrf.mxu0  ;;  %26604 = vmatpush3.bf16.msra.mxu0 %v29097_v10  ;;  %v403_v10 = vadd.s32 12672, %v30458_v22 }
 0x33c   :  { %v26345_v2 = vadd.f32 %v26344_v0, %v26343_v61  ;;  %v26366_v9 = vpop.f32.mrf.mxu1  ;;  %26605 = vmatprep.subr.bf16.mxu0 %v29100_v20  ;;  %v29126_v61 = vld [vmem:[#allocation5 + $0x18d0] sm:$0xff]   ;;  %v150_v20 = vld [vmem:[#allocation2 + $0x308] sm:$0xff] }
 0x33d   :  { %v26346_v6 = vpop.f32.mrf.mxu0  ;;  %v26367_v12 = vadd.f32 %v26366_v9, %v26365_v3  ;;  %v29127_v0 = vld [vmem:[#allocation5 + $0x1890] sm:$0xff]   ;;  %v29128_v3 = vld [vmem:[#allocation5 + $0x1848] sm:$0xff]   ;;  %v653_v21 = vand.u32 31, %v403_v10  ;;  %vm901_vm0 = vcmp.eq.s32.totalorder %v651_v7, %v150_v20 }
 0x33e   :  { %v19206_v8 = vadd.f32 %v26345_v2, %v30684_v26  ;;  %v26368_v16 = vpop.f32.mrf.mxu1  ;;  %v29102_v26 = vld [vmem:[#allocation5 + $0x17c0] sm:$0xff]   ;;  %v29129_v6 = vld [vmem:[#allocation5 + $0x1808] sm:$0xff]   ;;  %vm25271_vm1 = vmpackc.low %vm901_vm0, %vm901_vm0 }
 0x33f   :  { %v26347_v13 = vpop.f32.mrf.mxu0  ;;  %26606 = vmatpush3.bf16.msra.mxu0 %v29101_v24  ;;  %26627 = vmatprep.subr.bf16.mxu1 %v29102_v26  ;;  %v29130_v9 = vld [vmem:[#allocation5 + $0x18c8] sm:$0xff]   ;;  %v402_v16 = vadd.s32 12544, %v30458_v22  ;;  %v149_v24 = vld [vmem:[#allocation2 + $0x300] sm:$0xff]  ;;  %v29136_v26 = vld [vmem:[#allocation5 + $0x1978] sm:$0xff]   ;;  %vm903_vm4 = vcmp.eq.s32.totalorder %v653_v21, %v152_v27 }
 0x340   :  { %v30695_v19 = vadd.f32 %v26367_v12, %v19206_v8  ;;  %v26369_v23 = vpop.f32.mrf.mxu1  ;;  %26628 = vmatpush3.bf16.msra.mxu1 %v29103_v29  ;;  %26635 = vmatprep.subr.bf16.mxu0 %v29104_v32  ;;  %v29131_v12 = vld [vmem:[#allocation5 + $0x1888] sm:$0xff]   ;;  %v650_v13 = vand.u32 31, %v400_v1  ;;  %vm25275_vm5 = vmpackc.low %vm903_vm4, %vm903_vm4  ;;  %v151_v29 = vld [vmem:[#allocation2 + $0x310] sm:$0xff] }
 0x341   :  { %26657 = vmatprep.subr.bf16.mxu1 %v29106_v36  ;;  %v29135_v23 = vld [vmem:[#allocation5 + $0x1880] sm:$0xff]   ;;  %v652_v25 = vand.u32 31, %v402_v16  ;;  %v29140_v32 = vld [vmem:[#allocation5 + $0x1970] sm:$0xff]   ;;  %v29144_v36 = vld [vmem:[#allocation5 + $0x1968] sm:$0xff]  }
 0x342   :  { %25266 = vmatmul.mubr.msk.bf16.vlgmr.msra.gmra.mxu0 %vm25265_vm11, %v30427_v44  ;;  %vm900_vm2 = vcmp.eq.s32.totalorder %v650_v13, %v149_v24  ;;  %v29166_v13 = vld [vmem:[#allocation5 + $0x19c0] sm:$0xff]   ;;  %v156_v20 = vld [vmem:[#allocation2 + $0x338] sm:$0xff]  ;;  %v29169_v21 = vld [vmem:[#allocation5 + $0x1a38] sm:$0xff]  }
 0x343   :  { %26636 = vmatpush3.bf16.msra.mxu0 %v29105_v34  ;;  %25270 = vmatmul.mubr.msk.bf16.vlgmr.msra.gmra.mxu1 %vm25269_vm15, %v30427_v44  ;;  %vm25273_vm3 = vmpackc.low %vm900_vm2, %vm900_vm2  ;;  %vm902_vm6 = vcmp.eq.s32.totalorder %v652_v25, %v151_v29  ;;  %v29142_v34 = vld [vmem:[#allocation5 + $0x19f0] sm:$0xff]   ;;  %v29167_v16 = vld [vmem:[#allocation5 + $0x1980] sm:$0xff]  }
 0x344   :  { %26658 = vmatpush3.bf16.msra.mxu1 %v29107_v37  ;;  %26637 = vmatprep.subr.bf16.mxu0 %v29108_v38  ;;  %vm25277_vm7 = vmpackc.low %vm902_vm6, %vm902_vm6  ;;  %v29145_v37 = vld [vmem:[#allocation5 + $0x1928] sm:$0xff]   ;;  %v29170_v24 = vld [vmem:[#allocation5 + $0x1af8] sm:$0xff]  }
 0x345   :  { %26659 = vmatprep.subr.bf16.mxu1 %v29110_v40  ;;  %25272 = vmatprep.mubr.msk.bf16.mxu0 %vm25271_vm1, %v30427_v44  ;;  %v29146_v38 = vld [vmem:[#allocation5 + $0x19e8] sm:$0xff]   ;;  %v29148_v40 = vld [vmem:[#allocation5 + $0x1960] sm:$0xff]   ;;  %v29171_v25 = vld [vmem:[#allocation5 + $0x1ab8] sm:$0xff]  }
 0x346   :  { %25276 = vmatprep.mubr.msk.bf16.mxu1 %vm25275_vm5, %v30427_v44  ;;  %v29173_v27 = vld [vmem:[#allocation5 + $0x1a30] sm:$0xff]  }
 0x347   :  { %26638 = vmatpush3.bf16.msra.mxu0 %v29109_v39  ;;  %v29147_v39 = vld [vmem:[#allocation5 + $0x19a8] sm:$0xff]   ;;  %v29175_v29 = vld [vmem:[#allocation5 + $0x1ab0] sm:$0xff]  }
 0x348   :  { %26660 = vmatpush3.bf16.msra.mxu1 %v29111_v41  ;;  %26639 = vmatprep.subr.bf16.mxu0 %v29112_v42  ;;  %v29149_v41 = vld [vmem:[#allocation5 + $0x1920] sm:$0xff]  }
 0x349   :  { %26661 = vmatprep.subr.bf16.mxu1 %v29114_v45  ;;  %v29150_v42 = vld [vmem:[#allocation5 + $0x19e0] sm:$0xff]   ;;  %v29152_v45 = vld [vmem:[#allocation5 + $0x1958] sm:$0xff]  }
 0x34b   :  { %26640 = vmatpush3.bf16.msra.mxu0 %v29113_v43  ;;  %v29151_v43 = vld [vmem:[#allocation5 + $0x19a0] sm:$0xff]  }
 0x34c   :  { %26662 = vmatpush3.bf16.msra.mxu1 %v29115_v46  ;;  %26641 = vmatprep.subr.bf16.mxu0 %v29116_v47  ;;  %v29153_v46 = vld [vmem:[#allocation5 + $0x1918] sm:$0xff]  }
 0x34d   :  { %26663 = vmatprep.subr.bf16.mxu1 %v29118_v49  ;;  %v29154_v47 = vld [vmem:[#allocation5 + $0x19d8] sm:$0xff]  }
 0x34f   :  { %26642 = vmatpush3.bf16.msra.mxu0 %v29117_v48  ;;  %v29155_v48 = vld [vmem:[#allocation5 + $0x1998] sm:$0xff]  }
 0x350   :  { %26664 = vmatpush3.bf16.msra.mxu1 %v29119_v50  ;;  %26643 = vmatprep.subr.bf16.mxu0 %v29120_v51  ;;  %v29156_v50 = vld [vmem:[#allocation5 + $0x1950] sm:$0xff]  }
 0x351   :  { %26665 = vmatprep.subr.bf16.mxu1 %v29122_v53  ;;  %v29157_v51 = vld [vmem:[#allocation5 + $0x1910] sm:$0xff]  }
 0x352   :  { %v29158_v53 = vld [vmem:[#allocation5 + $0x19d0] sm:$0xff]  }
 0x353   :  { %26644 = vmatpush3.bf16.msra.mxu0 %v29121_v52 }
 0x354   :  { %26666 = vmatpush3.bf16.msra.mxu1 %v29123_v55  ;;  %26645 = vmatprep.subr.bf16.mxu0 %v29124_v56 }
 0x355   :  { %26667 = vmatprep.subr.bf16.mxu1 %v29126_v61 }
 0x357   :  { %26646 = vmatpush3.bf16.msra.mxu0 %v29125_v58 }
 0x358   :  { %26668 = vmatpush3.bf16.msra.mxu1 %v29127_v0  ;;  %26647 = vmatprep.subr.bf16.mxu0 %v29128_v3 }
 0x359   :  { %v26387_v54 = vpop.f32.mrf.mxu0  ;;  %26669 = vmatprep.subr.bf16.mxu1 %v29130_v9  ;;  %v406_v9 = vadd.s32 13056, %v30458_v22 }
 0x35a   :  { %v26409_v62 = vpop.f32.mrf.mxu1 }
 0x35b   :  { %v26388_v57 = vpop.f32.mrf.mxu0  ;;  %26648 = vmatpush3.bf16.msra.mxu0 %v29129_v6  ;;  %v407_v6 = vadd.s32 13184, %v30458_v22 }
 0x35c   :  { %v26389_v60 = vadd.f32 %v26388_v57, %v26387_v54  ;;  %v26410_v4 = vpop.f32.mrf.mxu1  ;;  %26670 = vmatpush3.bf16.msra.mxu1 %v29131_v12  ;;  %26649 = vmatprep.subr.bf16.mxu0 %v29132_v15  ;;  %v405_v54 = vadd.s32 12928, %v30458_v22  ;;  %v29159_v57 = vld [vmem:[#allocation5 + $0x1990] sm:$0xff]  }
 0x35d   :  { %v26390_v63 = vpop.f32.mrf.mxu0  ;;  %v26411_v8 = vadd.f32 %v26410_v4, %v26409_v62  ;;  %v29161_v62 = vld [vmem:[#allocation5 + $0x1908] sm:$0xff]   ;;  %v657_v15 = vand.u32 31, %v407_v6 }
 0x35e   :  { %v19286_v2 = vadd.f32 %v26389_v60, %v30695_v19  ;;  %v26412_v11 = vpop.f32.mrf.mxu1  ;;  %v29134_v19 = vld [vmem:[#allocation5 + $0x18c0] sm:$0xff]   ;;  %v404_v63 = vadd.s32 12800, %v30458_v22  ;;  %v655_v3 = vand.u32 31, %v405_v54 }
 0x35f   :  { %v26391_v5 = vpop.f32.mrf.mxu0  ;;  %26650 = vmatpush3.bf16.msra.mxu0 %v29133_v18  ;;  %26671 = vmatprep.subr.bf16.mxu1 %v29134_v19  ;;  %v29165_v11 = vld [vmem:[#allocation5 + $0x1900] sm:$0xff]   ;;  %v656_v18 = vand.u32 31, %v406_v9  ;;  %v29168_v19 = vld [vmem:[#allocation5 + $0x1a78] sm:$0xff]   ;;  %vm907_vm12 = vcmp.eq.s32.totalorder %v657_v15, %v156_v20  ;;  %v29205_v20 = vld [vmem:[#allocation5 + $0x1b30] sm:$0xff]  }
 0x360   :  { %v30706_v14 = vadd.f32 %v26411_v8, %v19286_v2  ;;  %v26413_v17 = vpop.f32.mrf.mxu1  ;;  %26672 = vmatpush3.bf16.msra.mxu1 %v29135_v23  ;;  %26679 = vmatprep.subr.bf16.mxu0 %v29136_v26  ;;  %v29162_v2 = vld [vmem:[#allocation5 + $0x19c8] sm:$0xff]   ;;  %v29164_v8 = vld [vmem:[#allocation5 + $0x1940] sm:$0xff]   ;;  %v654_v12 = vand.u32 31, %v404_v63  ;;  %vm25283_vm13 = vmpackc.low %vm907_vm12, %vm907_vm12 }
 0x361   :  { %26701 = vmatprep.subr.bf16.mxu1 %v29138_v30  ;;  %v29163_v5 = vld [vmem:[#allocation5 + $0x1988] sm:$0xff]   ;;  %v153_v17 = vld [vmem:[#allocation2 + $0x320] sm:$0xff]  ;;  %v155_v23 = vld [vmem:[#allocation2 + $0x330] sm:$0xff] }
 0x362   :  { %25274 = vmatmul.mubr.msk.bf16.vlgmr.msra.gmra.mxu0 %vm25273_vm3, %v30427_v44  ;;  %vm904_vm10 = vcmp.eq.s32.totalorder %v654_v12, %v153_v17  ;;  %vm906_vm14 = vcmp.eq.s32.totalorder %v656_v18, %v155_v23  ;;  %v29172_v26 = vld [vmem:[#allocation5 + $0x1a70] sm:$0xff]   ;;  %v29176_v30 = vld [vmem:[#allocation5 + $0x1a68] sm:$0xff]   ;;  %v29201_v15 = vld [vmem:[#allocation5 + $0x1b38] sm:$0xff]  }
 0x363   :  { %26680 = vmatpush3.bf16.msra.mxu0 %v29137_v28  ;;  %25278 = vmatmul.mubr.msk.bf16.vlgmr.msra.gmra.mxu1 %vm25277_vm7, %v30427_v44  ;;  %vm25281_vm11 = vmpackc.low %vm904_vm10, %vm904_vm10  ;;  %v29174_v28 = vld [vmem:[#allocation5 + $0x1af0] sm:$0xff]   ;;  %v29195_v63 = vld [vmem:[#allocation5 + $0x1a88] sm:$0xff]  }
 0x364   :  { %26702 = vmatpush3.bf16.msra.mxu1 %v29139_v31  ;;  %26681 = vmatprep.subr.bf16.mxu0 %v29140_v32  ;;  %vm25285_vm15 = vmpackc.low %vm906_vm14, %vm906_vm14  ;;  %v29177_v31 = vld [vmem:[#allocation5 + $0x1a28] sm:$0xff]   ;;  %v29202_v17 = vld [vmem:[#allocation5 + $0x1bf8] sm:$0xff]  }
 0x365   :  { %26703 = vmatprep.subr.bf16.mxu1 %v29142_v34  ;;  %25284 = vmatprep.mubr.msk.bf16.mxu1 %vm25283_vm13, %v30427_v44  ;;  %v29178_v32 = vld [vmem:[#allocation5 + $0x1ae8] sm:$0xff]   ;;  %v29180_v34 = vld [vmem:[#allocation5 + $0x1a60] sm:$0xff]   ;;  %v29203_v18 = vld [vmem:[#allocation5 + $0x1bb8] sm:$0xff]  }
 0x366   :  { %v29207_v23 = vld [vmem:[#allocation5 + $0x1bb0] sm:$0xff]  }
 0x367   :  { %26682 = vmatpush3.bf16.msra.mxu0 %v29141_v33  ;;  %v29179_v33 = vld [vmem:[#allocation5 + $0x1aa8] sm:$0xff]  }
 0x368   :  { %26704 = vmatpush3.bf16.msra.mxu1 %v29143_v35  ;;  %26683 = vmatprep.subr.bf16.mxu0 %v29144_v36  ;;  %v29181_v35 = vld [vmem:[#allocation5 + $0x1a20] sm:$0xff]  }
 0x369   :  { %26705 = vmatprep.subr.bf16.mxu1 %v29146_v38  ;;  %v29182_v36 = vld [vmem:[#allocation5 + $0x1ae0] sm:$0xff]   ;;  %v29184_v38 = vld [vmem:[#allocation5 + $0x1a58] sm:$0xff]  }
 0x36b   :  { %26684 = vmatpush3.bf16.msra.mxu0 %v29145_v37  ;;  %v29183_v37 = vld [vmem:[#allocation5 + $0x1aa0] sm:$0xff]  }
 0x36c   :  { %26706 = vmatpush3.bf16.msra.mxu1 %v29147_v39  ;;  %26685 = vmatprep.subr.bf16.mxu0 %v29148_v40  ;;  %v29185_v39 = vld [vmem:[#allocation5 + $0x1a18] sm:$0xff]  }
 0x36d   :  { %26707 = vmatprep.subr.bf16.mxu1 %v29150_v42  ;;  %v29186_v40 = vld [vmem:[#allocation5 + $0x1ad8] sm:$0xff]  }
 0x36f   :  { %26686 = vmatpush3.bf16.msra.mxu0 %v29149_v41  ;;  %v29187_v41 = vld [vmem:[#allocation5 + $0x1a98] sm:$0xff]  }
 0x370   :  { %26708 = vmatpush3.bf16.msra.mxu1 %v29151_v43  ;;  %26687 = vmatprep.subr.bf16.mxu0 %v29152_v45  ;;  %v29188_v43 = vld [vmem:[#allocation5 + $0x1a50] sm:$0xff]  }
 0x371   :  { %26709 = vmatprep.subr.bf16.mxu1 %v29154_v47  ;;  %v29189_v45 = vld [vmem:[#allocation5 + $0x1a10] sm:$0xff]  }
 0x372   :  { %v29190_v47 = vld [vmem:[#allocation5 + $0x1ad0] sm:$0xff]  }
 0x373   :  { %26688 = vmatpush3.bf16.msra.mxu0 %v29153_v46 }
 0x374   :  { %26710 = vmatpush3.bf16.msra.mxu1 %v29155_v48  ;;  %26689 = vmatprep.subr.bf16.mxu0 %v29156_v50  ;;  %v29191_v50 = vld [vmem:[#allocation5 + $0x1a90] sm:$0xff]  }
 0x375   :  { %26711 = vmatprep.subr.bf16.mxu1 %v29158_v53  ;;  %v29192_v53 = vld [vmem:[#allocation5 + $0x1a48] sm:$0xff]  }
 0x377   :  { %26690 = vmatpush3.bf16.msra.mxu0 %v29157_v51  ;;  %v409_v51 = vadd.s32 13440, %v30458_v22 }
 0x378   :  { %26712 = vmatpush3.bf16.msra.mxu1 %v29159_v57  ;;  %26691 = vmatprep.subr.bf16.mxu0 %v29160_v59  ;;  %v408_v57 = vadd.s32 13312, %v30458_v22 }
 0x379   :  { %v26431_v49 = vpop.f32.mrf.mxu0  ;;  %26713 = vmatprep.subr.bf16.mxu1 %v29162_v2  ;;  %v29196_v2 = vld [vmem:[#allocation5 + $0x1a40] sm:$0xff]  }
 0x37a   :  { %v26453_v56 = vpop.f32.mrf.mxu1  ;;  %v658_v6 = vand.u32 31, %v408_v57 }
 0x37b   :  { %v26432_v52 = vpop.f32.mrf.mxu0  ;;  %26692 = vmatpush3.bf16.msra.mxu0 %v29161_v62 }
 0x37c   :  { %v26433_v55 = vadd.f32 %v26432_v52, %v26431_v49  ;;  %v26454_v61 = vpop.f32.mrf.mxu1  ;;  %26714 = vmatpush3.bf16.msra.mxu1 %v29163_v5  ;;  %26693 = vmatprep.subr.bf16.mxu0 %v29164_v8  ;;  %v29197_v5 = vld [vmem:[#allocation5 + $0x1a00] sm:$0xff]   ;;  %v158_v8 = vld [vmem:[#allocation2 + $0x348] sm:$0xff] }
 0x37d   :  { %v26434_v58 = vpop.f32.mrf.mxu0  ;;  %v26455_v0 = vadd.f32 %v26454_v61, %v26453_v56  ;;  %26715 = vmatprep.subr.bf16.mxu1 %v29166_v13  ;;  %v29193_v56 = vld [vmem:[#allocation5 + $0x1a08] sm:$0xff]   ;;  %v411_v61 = vadd.s32 13696, %v30458_v22  ;;  %v29200_v13 = vld [vmem:[#allocation5 + $0x1b78] sm:$0xff]  }
 0x37e   :  { %v19366_v60 = vadd.f32 %v26433_v55, %v30706_v14  ;;  %v26456_v4 = vpop.f32.mrf.mxu1  ;;  %v154_v14 = vld [vmem:[#allocation2 + $0x328] sm:$0xff] }
 0x37f   :  { %v26435_v1 = vpop.f32.mrf.mxu0  ;;  %26694 = vmatpush3.bf16.msra.mxu0 %v29165_v11  ;;  %vm905_vm8 = vcmp.eq.s32.totalorder %v655_v3, %v154_v14  ;;  %v410_v3 = vadd.s32 13568, %v30458_v22  ;;  %v661_v9 = vand.u32 31, %v411_v61  ;;  %v157_v11 = vld [vmem:[#allocation2 + $0x340] sm:$0xff]  ;;  %v160_v14 = vld [vmem:[#allocation2 + $0x358] sm:$0xff]  ;;  %v29228_v61 = vld [vmem:[#allocation5 + $0x1b40] sm:$0xff]  }
 0x380   :  { %v30717_v7 = vadd.f32 %v26455_v0, %v19366_v60  ;;  %v26457_v10 = vpop.f32.mrf.mxu1  ;;  %vm25279_vm9 = vmpackc.low %vm905_vm8, %vm905_vm8  ;;  %26716 = vmatpush3.bf16.msra.mxu1 %v29167_v16  ;;  %26723 = vmatprep.subr.bf16.mxu0 %v29168_v19  ;;  %v29194_v60 = vld [vmem:[#allocation5 + $0x1ac8] sm:$0xff]   ;;  %v659_v0 = vand.u32 31, %v409_v51  ;;  %vm908_vm2 = vcmp.eq.s32.totalorder %v658_v6, %v157_v11  ;;  %v159_v16 = vld [vmem:[#allocation2 + $0x350] sm:$0xff] }
 0x381   :  { %25280 = vmatprep.mubr.msk.bf16.mxu0 %vm25279_vm9, %v30427_v44  ;;  %26745 = vmatprep.subr.bf16.mxu1 %v29170_v24  ;;  %v29199_v10 = vld [vmem:[#allocation5 + $0x1a80] sm:$0xff]   ;;  %v660_v12 = vand.u32 31, %v410_v3  ;;  %vm25289_vm3 = vmpackc.low %vm908_vm2, %vm908_vm2  ;;  %vm911_vm4 = vcmp.eq.s32.totalorder %v661_v9, %v160_v14  ;;  %v29204_v19 = vld [vmem:[#allocation5 + $0x1b70] sm:$0xff]  }
 0x382   :  { %25282 = vmatmul.mubr.msk.bf16.vlgmr.msra.gmra.mxu0 %vm25281_vm11, %v30427_v44  ;;  %vm909_vm0 = vcmp.eq.s32.totalorder %v659_v0, %v158_v8  ;;  %vm25291_vm5 = vmpackc.low %vm911_vm4, %vm911_vm4  ;;  %v29208_v24 = vld [vmem:[#allocation5 + $0x1b68] sm:$0xff]   ;;  %v29229_v0 = vld [vmem:[#allocation5 + $0x1b00] sm:$0xff]  }
 0x383   :  { %26724 = vmatpush3.bf16.msra.mxu0 %v29169_v21  ;;  %25286 = vmatmul.mubr.msk.bf16.vlgmr.msra.gmra.mxu1 %vm25285_vm15, %v30427_v44  ;;  %vm25287_vm1 = vmpackc.low %vm909_vm0, %vm909_vm0  ;;  %vm910_vm6 = vcmp.eq.s32.totalorder %v660_v12, %v159_v16  ;;  %v29206_v21 = vld [vmem:[#allocation5 + $0x1bf0] sm:$0xff]   ;;  %v164_v8 = vld [vmem:[#allocation2 + $0x378] sm:$0xff] }
 0x384   :  { %26746 = vmatpush3.bf16.msra.mxu1 %v29171_v25  ;;  %26725 = vmatprep.subr.bf16.mxu0 %v29172_v26  ;;  %vm25293_vm7 = vmpackc.low %vm910_vm6, %vm910_vm6  ;;  %v29209_v25 = vld [vmem:[#allocation5 + $0x1b28] sm:$0xff]   ;;  %v29233_v9 = vld [vmem:[#allocation5 + $0x1c38] sm:$0xff]  }
 0x385   :  { %26747 = vmatprep.subr.bf16.mxu1 %v29174_v28  ;;  %25288 = vmatprep.mubr.msk.bf16.mxu0 %vm25287_vm1, %v30427_v44  ;;  %v29210_v26 = vld [vmem:[#allocation5 + $0x1be8] sm:$0xff]   ;;  %v29212_v28 = vld [vmem:[#allocation5 + $0x1b60] sm:$0xff]   ;;  %v29234_v11 = vld [vmem:[#allocation5 + $0x1cf8] sm:$0xff]  }
 0x386   :  { %25292 = vmatprep.mubr.msk.bf16.mxu1 %vm25291_vm5, %v30427_v44  ;;  %v29235_v12 = vld [vmem:[#allocation5 + $0x1cb8] sm:$0xff]   ;;  %v29237_v14 = vld [vmem:[#allocation5 + $0x1c30] sm:$0xff]  }
 0x387   :  { %26726 = vmatpush3.bf16.msra.mxu0 %v29173_v27  ;;  %v29211_v27 = vld [vmem:[#allocation5 + $0x1ba8] sm:$0xff]   ;;  %v29239_v16 = vld [vmem:[#allocation5 + $0x1cb0] sm:$0xff]  }
 0x388   :  { %26748 = vmatpush3.bf16.msra.mxu1 %v29175_v29  ;;  %26727 = vmatprep.subr.bf16.mxu0 %v29176_v30  ;;  %v29213_v29 = vld [vmem:[#allocation5 + $0x1b20] sm:$0xff]  }
 0x389   :  { %26749 = vmatprep.subr.bf16.mxu1 %v29178_v32  ;;  %v29214_v30 = vld [vmem:[#allocation5 + $0x1be0] sm:$0xff]   ;;  %v29216_v32 = vld [vmem:[#allocation5 + $0x1b58] sm:$0xff]  }
 0x38b   :  { %26728 = vmatpush3.bf16.msra.mxu0 %v29177_v31  ;;  %v29215_v31 = vld [vmem:[#allocation5 + $0x1ba0] sm:$0xff]  }
 0x38c   :  { %26750 = vmatpush3.bf16.msra.mxu1 %v29179_v33  ;;  %26729 = vmatprep.subr.bf16.mxu0 %v29180_v34  ;;  %v29217_v33 = vld [vmem:[#allocation5 + $0x1b18] sm:$0xff]  }
 0x38d   :  { %26751 = vmatprep.subr.bf16.mxu1 %v29182_v36  ;;  %v29218_v34 = vld [vmem:[#allocation5 + $0x1bd8] sm:$0xff]  }
 0x38e   :  { %v29219_v36 = vld [vmem:[#allocation5 + $0x1b98] sm:$0xff]  }
 0x38f   :  { %26730 = vmatpush3.bf16.msra.mxu0 %v29181_v35 }
 0x390   :  { %26752 = vmatpush3.bf16.msra.mxu1 %v29183_v37  ;;  %26731 = vmatprep.subr.bf16.mxu0 %v29184_v38  ;;  %v29220_v37 = vld [vmem:[#allocation5 + $0x1b50] sm:$0xff]  }
 0x391   :  { %26753 = vmatprep.subr.bf16.mxu1 %v29186_v40  ;;  %v413_v40 = vadd.s32 13952, %v30458_v22 }
 0x393   :  { %26732 = vmatpush3.bf16.msra.mxu0 %v29185_v39  ;;  %v29221_v39 = vld [vmem:[#allocation5 + $0x1b10] sm:$0xff]  }
 0x394   :  { %26754 = vmatpush3.bf16.msra.mxu1 %v29187_v41  ;;  %26733 = vmatprep.subr.bf16.mxu0 %v29188_v43 }
 0x395   :  { %26755 = vmatprep.subr.bf16.mxu1 %v29190_v47  ;;  %v412_v47 = vadd.s32 13824, %v30458_v22 }
 0x397   :  { %26734 = vmatpush3.bf16.msra.mxu0 %v29189_v45 }
 0x398   :  { %26756 = vmatpush3.bf16.msra.mxu1 %v29191_v50  ;;  %26735 = vmatprep.subr.bf16.mxu0 %v29192_v53  ;;  %v663_v53 = vand.u32 31, %v413_v40  ;;  %v29256_v40 = vld [vmem:[#allocation5 + $0x1c48] sm:$0xff]  }
 0x399   :  { %v26475_v42 = vpop.f32.mrf.mxu0  ;;  %26757 = vmatprep.subr.bf16.mxu1 %v29194_v60 }
 0x39a   :  { %v26497_v49 = vpop.f32.mrf.mxu1 }
 0x39b   :  { %v26476_v46 = vpop.f32.mrf.mxu0  ;;  %26736 = vmatpush3.bf16.msra.mxu0 %v29193_v56  ;;  %v415_v56 = vadd.s32 14208, %v30458_v22 }
 0x39c   :  { %v26477_v48 = vadd.f32 %v26476_v46, %v26475_v42  ;;  %v26498_v55 = vpop.f32.mrf.mxu1  ;;  %26758 = vmatpush3.bf16.msra.mxu1 %v29195_v63  ;;  %26737 = vmatprep.subr.bf16.mxu0 %v29196_v2  ;;  %v29222_v42 = vld [vmem:[#allocation5 + $0x1bd0] sm:$0xff]   ;;  %v162_v2 = vld [vmem:[#allocation2 + $0x368] sm:$0xff] }
 0x39d   :  { %v26478_v52 = vpop.f32.mrf.mxu0  ;;  %v26499_v58 = vadd.f32 %v26498_v55, %v26497_v49  ;;  %v29223_v46 = vld [vmem:[#allocation5 + $0x1b90] sm:$0xff]   ;;  %v29224_v49 = vld [vmem:[#allocation5 + $0x1b48] sm:$0xff]   ;;  %v665_v3 = vand.u32 31, %v415_v56  ;;  %vm913_vm8 = vcmp.eq.s32.totalorder %v663_v53, %v162_v2 }
 0x39e   :  { %v19446_v54 = vadd.f32 %v26477_v48, %v30717_v7  ;;  %v26500_v62 = vpop.f32.mrf.mxu1  ;;  %v29198_v7 = vld [vmem:[#allocation5 + $0x1ac0] sm:$0xff]   ;;  %v29225_v52 = vld [vmem:[#allocation5 + $0x1b08] sm:$0xff]   ;;  %vm25295_vm9 = vmpackc.low %vm913_vm8, %vm913_vm8 }
 0x39f   :  { %v26479_v59 = vpop.f32.mrf.mxu0  ;;  %26738 = vmatpush3.bf16.msra.mxu0 %v29197_v5  ;;  %26759 = vmatprep.subr.bf16.mxu1 %v29198_v7  ;;  %v29226_v55 = vld [vmem:[#allocation5 + $0x1bc8] sm:$0xff]   ;;  %v414_v62 = vadd.s32 14080, %v30458_v22  ;;  %v161_v5 = vld [vmem:[#allocation2 + $0x360] sm:$0xff]  ;;  %v29232_v7 = vld [vmem:[#allocation5 + $0x1c78] sm:$0xff]   ;;  %vm915_vm12 = vcmp.eq.s32.totalorder %v665_v3, %v164_v8 }
 0x3a0   :  { %v30728_v1 = vadd.f32 %v26499_v58, %v19446_v54  ;;  %v26501_v4 = vpop.f32.mrf.mxu1  ;;  %26760 = vmatpush3.bf16.msra.mxu1 %v29199_v10  ;;  %26767 = vmatprep.subr.bf16.mxu0 %v29200_v13  ;;  %v29227_v58 = vld [vmem:[#allocation5 + $0x1b88] sm:$0xff]   ;;  %v662_v59 = vand.u32 31, %v412_v47  ;;  %vm25299_vm13 = vmpackc.low %vm915_vm12, %vm915_vm12  ;;  %v163_v10 = vld [vmem:[#allocation2 + $0x370] sm:$0xff] }
 0x3a1   :  { %26789 = vmatprep.subr.bf16.mxu1 %v29202_v17  ;;  %v29231_v4 = vld [vmem:[#allocation5 + $0x1b80] sm:$0xff]   ;;  %v664_v6 = vand.u32 31, %v414_v62  ;;  %v29236_v13 = vld [vmem:[#allocation5 + $0x1c70] sm:$0xff]   ;;  %v29240_v17 = vld [vmem:[#allocation5 + $0x1c68] sm:$0xff]  }
 0x3a2   :  { %25290 = vmatmul.mubr.msk.bf16.vlgmr.msra.gmra.mxu0 %vm25289_vm3, %v30427_v44  ;;  %vm912_vm10 = vcmp.eq.s32.totalorder %v662_v59, %v161_v5  ;;  %v29262_v59 = vld [vmem:[#allocation5 + $0x1cc0] sm:$0xff]   ;;  %v168_v2 = vld [vmem:[#allocation2 + $0x398] sm:$0xff]  ;;  %v29265_v3 = vld [vmem:[#allocation5 + $0x1d38] sm:$0xff]  }
 0x3a3   :  { %26768 = vmatpush3.bf16.msra.mxu0 %v29201_v15  ;;  %25294 = vmatmul.mubr.msk.bf16.vlgmr.msra.gmra.mxu1 %vm25293_vm7, %v30427_v44  ;;  %vm25297_vm11 = vmpackc.low %vm912_vm10, %vm912_vm10  ;;  %vm914_vm14 = vcmp.eq.s32.totalorder %v664_v6, %v163_v10  ;;  %v29238_v15 = vld [vmem:[#allocation5 + $0x1cf0] sm:$0xff]   ;;  %v29263_v62 = vld [vmem:[#allocation5 + $0x1c80] sm:$0xff]  }
 0x3a4   :  { %26790 = vmatpush3.bf16.msra.mxu1 %v29203_v18  ;;  %26769 = vmatprep.subr.bf16.mxu0 %v29204_v19  ;;  %vm25301_vm15 = vmpackc.low %vm914_vm14, %vm914_vm14  ;;  %v29241_v18 = vld [vmem:[#allocation5 + $0x1c28] sm:$0xff]   ;;  %v29266_v5 = vld [vmem:[#allocation5 + $0x1df8] sm:$0xff]  }
 0x3a5   :  { %26791 = vmatprep.subr.bf16.mxu1 %v29206_v21  ;;  %25296 = vmatprep.mubr.msk.bf16.mxu0 %vm25295_vm9, %v30427_v44  ;;  %v29242_v19 = vld [vmem:[#allocation5 + $0x1ce8] sm:$0xff]   ;;  %v29244_v21 = vld [vmem:[#allocation5 + $0x1c60] sm:$0xff]   ;;  %v29267_v6 = vld [vmem:[#allocation5 + $0x1db8] sm:$0xff]  }
 0x3a6   :  { %25300 = vmatprep.mubr.msk.bf16.mxu1 %vm25299_vm13, %v30427_v44  ;;  %v29269_v8 = vld [vmem:[#allocation5 + $0x1d30] sm:$0xff]  }
 0x3a7   :  { %26770 = vmatpush3.bf16.msra.mxu0 %v29205_v20  ;;  %v29243_v20 = vld [vmem:[#allocation5 + $0x1ca8] sm:$0xff]   ;;  %v29271_v10 = vld [vmem:[#allocation5 + $0x1db0] sm:$0xff]  }
 0x3a8   :  { %26792 = vmatpush3.bf16.msra.mxu1 %v29207_v23  ;;  %26771 = vmatprep.subr.bf16.mxu0 %v29208_v24  ;;  %v29245_v23 = vld [vmem:[#allocation5 + $0x1c20] sm:$0xff]  }
 0x3a9   :  { %26793 = vmatprep.subr.bf16.mxu1 %v29210_v26  ;;  %v29246_v24 = vld [vmem:[#allocation5 + $0x1ce0] sm:$0xff]   ;;  %v29248_v26 = vld [vmem:[#allocation5 + $0x1c58] sm:$0xff]  }
 0x3ab   :  { %26772 = vmatpush3.bf16.msra.mxu0 %v29209_v25  ;;  %v29247_v25 = vld [vmem:[#allocation5 + $0x1ca0] sm:$0xff]  }
 0x3ac   :  { %26794 = vmatpush3.bf16.msra.mxu1 %v29211_v27  ;;  %26773 = vmatprep.subr.bf16.mxu0 %v29212_v28  ;;  %v29249_v27 = vld [vmem:[#allocation5 + $0x1c18] sm:$0xff]  }
 0x3ad   :  { %26795 = vmatprep.subr.bf16.mxu1 %v29214_v30  ;;  %v29250_v28 = vld [vmem:[#allocation5 + $0x1cd8] sm:$0xff]  }
 0x3af   :  { %26774 = vmatpush3.bf16.msra.mxu0 %v29213_v29  ;;  %v29251_v29 = vld [vmem:[#allocation5 + $0x1c98] sm:$0xff]  }
 0x3b0   :  { %26796 = vmatpush3.bf16.msra.mxu1 %v29215_v31  ;;  %26775 = vmatprep.subr.bf16.mxu0 %v29216_v32  ;;  %v29252_v31 = vld [vmem:[#allocation5 + $0x1c50] sm:$0xff]  }
 0x3b1   :  { %26797 = vmatprep.subr.bf16.mxu1 %v29218_v34  ;;  %v29253_v32 = vld [vmem:[#allocation5 + $0x1c10] sm:$0xff]  }
 0x3b2   :  { %v29254_v34 = vld [vmem:[#allocation5 + $0x1cd0] sm:$0xff]  }
 0x3b3   :  { %26776 = vmatpush3.bf16.msra.mxu0 %v29217_v33 }
 0x3b4   :  { %26798 = vmatpush3.bf16.msra.mxu1 %v29219_v36  ;;  %26777 = vmatprep.subr.bf16.mxu0 %v29220_v37 }
 0x3b5   :  { %26799 = vmatprep.subr.bf16.mxu1 %v29222_v42 }
 0x3b7   :  { %26778 = vmatpush3.bf16.msra.mxu0 %v29221_v39 }
 0x3b8   :  { %26800 = vmatpush3.bf16.msra.mxu1 %v29223_v46  ;;  %26779 = vmatprep.subr.bf16.mxu0 %v29224_v49 }
 0x3b9   :  { %v26519_v35 = vpop.f32.mrf.mxu0  ;;  %26801 = vmatprep.subr.bf16.mxu1 %v29226_v55  ;;  %v418_v55 = vadd.s32 14592, %v30458_v22 }
 0x3ba   :  { %v26541_v43 = vpop.f32.mrf.mxu1 }
 0x3bb   :  { %v26520_v38 = vpop.f32.mrf.mxu0  ;;  %26780 = vmatpush3.bf16.msra.mxu0 %v29225_v52  ;;  %v419_v52 = vadd.s32 14720, %v30458_v22 }
 0x3bc   :  { %v26521_v41 = vadd.f32 %v26520_v38, %v26519_v35  ;;  %v26542_v50 = vpop.f32.mrf.mxu1  ;;  %26802 = vmatpush3.bf16.msra.mxu1 %v29227_v58  ;;  %26781 = vmatprep.subr.bf16.mxu0 %v29228_v61  ;;  %v417_v35 = vadd.s32 14464, %v30458_v22  ;;  %v29255_v38 = vld [vmem:[#allocation5 + $0x1c90] sm:$0xff]  }
 0x3bd   :  { %v26522_v45 = vpop.f32.mrf.mxu0  ;;  %v26543_v54 = vadd.f32 %v26542_v50, %v26541_v43  ;;  %v29257_v43 = vld [vmem:[#allocation5 + $0x1c08] sm:$0xff]   ;;  %v669_v61 = vand.u32 31, %v419_v52 }
 0x3be   :  { %v19526_v48 = vadd.f32 %v26521_v41, %v30728_v1  ;;  %v26544_v57 = vpop.f32.mrf.mxu1  ;;  %v29230_v1 = vld [vmem:[#allocation5 + $0x1bc0] sm:$0xff]   ;;  %v416_v45 = vadd.s32 14336, %v30458_v22  ;;  %v667_v49 = vand.u32 31, %v417_v35 }
 0x3bf   :  { %v26523_v51 = vpop.f32.mrf.mxu0  ;;  %26782 = vmatpush3.bf16.msra.mxu0 %v29229_v0  ;;  %26803 = vmatprep.subr.bf16.mxu1 %v29230_v1  ;;  %v29261_v57 = vld [vmem:[#allocation5 + $0x1c00] sm:$0xff]   ;;  %v668_v0 = vand.u32 31, %v418_v55  ;;  %v29264_v1 = vld [vmem:[#allocation5 + $0x1d78] sm:$0xff]   ;;  %vm919_vm4 = vcmp.eq.s32.totalorder %v669_v61, %v168_v2  ;;  %v29301_v2 = vld [vmem:[#allocation5 + $0x1e30] sm:$0xff]  }
 0x3c0   :  { %v30739_v60 = vadd.f32 %v26543_v54, %v19526_v48  ;;  %v26545_v63 = vpop.f32.mrf.mxu1  ;;  %26804 = vmatpush3.bf16.msra.mxu1 %v29231_v4  ;;  %26811 = vmatprep.subr.bf16.mxu0 %v29232_v7  ;;  %v29258_v48 = vld [vmem:[#allocation5 + $0x1cc8] sm:$0xff]   ;;  %v29260_v54 = vld [vmem:[#allocation5 + $0x1c40] sm:$0xff]   ;;  %v666_v58 = vand.u32 31, %v416_v45  ;;  %vm25307_vm5 = vmpackc.low %vm919_vm4, %vm919_vm4 }
 0x3c1   :  { %26833 = vmatprep.subr.bf16.mxu1 %v29234_v11  ;;  %v29259_v51 = vld [vmem:[#allocation5 + $0x1c88] sm:$0xff]   ;;  %v165_v63 = vld [vmem:[#allocation2 + $0x380] sm:$0xff]  ;;  %v167_v4 = vld [vmem:[#allocation2 + $0x390] sm:$0xff] }
 0x3c2   :  { %25298 = vmatmul.mubr.msk.bf16.vlgmr.msra.gmra.mxu0 %vm25297_vm11, %v30427_v44  ;;  %vm916_vm2 = vcmp.eq.s32.totalorder %v666_v58, %v165_v63  ;;  %vm918_vm6 = vcmp.eq.s32.totalorder %v668_v0, %v167_v4  ;;  %v29268_v7 = vld [vmem:[#allocation5 + $0x1d70] sm:$0xff]   ;;  %v29272_v11 = vld [vmem:[#allocation5 + $0x1d68] sm:$0xff]   ;;  %v29297_v61 = vld [vmem:[#allocation5 + $0x1e38] sm:$0xff]  }
 0x3c3   :  { %26812 = vmatpush3.bf16.msra.mxu0 %v29233_v9  ;;  %25302 = vmatmul.mubr.msk.bf16.vlgmr.msra.gmra.mxu1 %vm25301_vm15, %v30427_v44  ;;  %vm25305_vm3 = vmpackc.low %vm916_vm2, %vm916_vm2  ;;  %v29270_v9 = vld [vmem:[#allocation5 + $0x1df0] sm:$0xff]   ;;  %v29291_v45 = vld [vmem:[#allocation5 + $0x1d88] sm:$0xff]  }
 0x3c4   :  { %26834 = vmatpush3.bf16.msra.mxu1 %v29235_v12  ;;  %26813 = vmatprep.subr.bf16.mxu0 %v29236_v13  ;;  %vm25309_vm7 = vmpackc.low %vm918_vm6, %vm918_vm6  ;;  %v29273_v12 = vld [vmem:[#allocation5 + $0x1d28] sm:$0xff]   ;;  %v29298_v63 = vld [vmem:[#allocation5 + $0x1ef8] sm:$0xff]  }
 0x3c5   :  { %26835 = vmatprep.subr.bf16.mxu1 %v29238_v15  ;;  %25308 = vmatprep.mubr.msk.bf16.mxu1 %vm25307_vm5, %v30427_v44  ;;  %v29274_v13 = vld [vmem:[#allocation5 + $0x1de8] sm:$0xff]   ;;  %v29276_v15 = vld [vmem:[#allocation5 + $0x1d60] sm:$0xff]   ;;  %v29299_v0 = vld [vmem:[#allocation5 + $0x1eb8] sm:$0xff]  }
 0x3c6   :  { %v29303_v4 = vld [vmem:[#allocation5 + $0x1eb0] sm:$0xff]  }
 0x3c7   :  { %26814 = vmatpush3.bf16.msra.mxu0 %v29237_v14  ;;  %v29275_v14 = vld [vmem:[#allocation5 + $0x1da8] sm:$0xff]  }
 0x3c8   :  { %26836 = vmatpush3.bf16.msra.mxu1 %v29239_v16  ;;  %26815 = vmatprep.subr.bf16.mxu0 %v29240_v17  ;;  %v29277_v16 = vld [vmem:[#allocation5 + $0x1d20] sm:$0xff]  }
 0x3c9   :  { %26837 = vmatprep.subr.bf16.mxu1 %v29242_v19  ;;  %v29278_v17 = vld [vmem:[#allocation5 + $0x1de0] sm:$0xff]   ;;  %v29280_v19 = vld [vmem:[#allocation5 + $0x1d58] sm:$0xff]  }
 0x3cb   :  { %26816 = vmatpush3.bf16.msra.mxu0 %v29241_v18  ;;  %v29279_v18 = vld [vmem:[#allocation5 + $0x1da0] sm:$0xff]  }
 0x3cc   :  { %26838 = vmatpush3.bf16.msra.mxu1 %v29243_v20  ;;  %26817 = vmatprep.subr.bf16.mxu0 %v29244_v21  ;;  %v29281_v20 = vld [vmem:[#allocation5 + $0x1d18] sm:$0xff]  }
 0x3cd   :  { %26839 = vmatprep.subr.bf16.mxu1 %v29246_v24  ;;  %v29282_v21 = vld [vmem:[#allocation5 + $0x1dd8] sm:$0xff]  }
 0x3cf   :  { %26818 = vmatpush3.bf16.msra.mxu0 %v29245_v23  ;;  %v29283_v23 = vld [vmem:[#allocation5 + $0x1d98] sm:$0xff]  }
 0x3d0   :  { %26840 = vmatpush3.bf16.msra.mxu1 %v29247_v25  ;;  %26819 = vmatprep.subr.bf16.mxu0 %v29248_v26  ;;  %v29284_v25 = vld [vmem:[#allocation5 + $0x1d50] sm:$0xff]  }
 0x3d1   :  { %26841 = vmatprep.subr.bf16.mxu1 %v29250_v28  ;;  %v29285_v26 = vld [vmem:[#allocation5 + $0x1d10] sm:$0xff]  }
 0x3d2   :  { %v29286_v28 = vld [vmem:[#allocation5 + $0x1dd0] sm:$0xff]  }
 0x3d3   :  { %26820 = vmatpush3.bf16.msra.mxu0 %v29249_v27 }
 0x3d4   :  { %26842 = vmatpush3.bf16.msra.mxu1 %v29251_v29  ;;  %26821 = vmatprep.subr.bf16.mxu0 %v29252_v31  ;;  %v29287_v31 = vld [vmem:[#allocation5 + $0x1d90] sm:$0xff]  }
 0x3d5   :  { %26843 = vmatprep.subr.bf16.mxu1 %v29254_v34  ;;  %v29288_v34 = vld [vmem:[#allocation5 + $0x1d48] sm:$0xff]  }
 0x3d7   :  { %26822 = vmatpush3.bf16.msra.mxu0 %v29253_v32  ;;  %v421_v32 = vadd.s32 14976, %v30458_v22 }
 0x3d8   :  { %26844 = vmatpush3.bf16.msra.mxu1 %v29255_v38  ;;  %26823 = vmatprep.subr.bf16.mxu0 %v29256_v40  ;;  %v420_v38 = vadd.s32 14848, %v30458_v22 }
 0x3d9   :  { %26845 = vmatprep.subr.bf16.mxu1 %v29258_v48  ;;  %v29292_v48 = vld [vmem:[#allocation5 + $0x1d40] sm:$0xff]  }
 0x3da   :  { %v26585_v37 = vpop.f32.mrf.mxu1  ;;  %v670_v52 = vand.u32 31, %v420_v38 }
 0x3db   :  { %26824 = vmatpush3.bf16.msra.mxu0 %v29257_v43 }
 0x3dc   :  { %v26586_v42 = vpop.f32.mrf.mxu1  ;;  %26846 = vmatpush3.bf16.msra.mxu1 %v29259_v51  ;;  %26825 = vmatprep.subr.bf16.mxu0 %v29260_v54  ;;  %v29293_v51 = vld [vmem:[#allocation5 + $0x1d00] sm:$0xff]   ;;  %v170_v54 = vld [vmem:[#allocation2 + $0x3a8] sm:$0xff] }
 0x3dd   :  { %v26587_v46 = vadd.f32 %v26586_v42, %v26585_v37  ;;  %26847 = vmatprep.subr.bf16.mxu1 %v29262_v59  ;;  %v29289_v37 = vld [vmem:[#allocation5 + $0x1d08] sm:$0xff]   ;;  %v423_v42 = vadd.s32 15232, %v30458_v22  ;;  %v29296_v59 = vld [vmem:[#allocation5 + $0x1e78] sm:$0xff]  }
 0x3de   :  { %v26588_v50 = vpop.f32.mrf.mxu1 }
 0x3df   :  { %26826 = vmatpush3.bf16.msra.mxu0 %v29261_v57  ;;  %v673_v55 = vand.u32 31, %v423_v42  ;;  %v169_v57 = vld [vmem:[#allocation2 + $0x3a0] sm:$0xff]  ;;  %v29324_v42 = vld [vmem:[#allocation5 + $0x1e40] sm:$0xff]  }
 0x3e0   :  { %v26589_v56 = vpop.f32.mrf.mxu1  ;;  %26848 = vmatpush3.bf16.msra.mxu1 %v29263_v62  ;;  %26855 = vmatprep.subr.bf16.mxu0 %v29264_v1  ;;  %vm920_vm10 = vcmp.eq.s32.totalorder %v670_v52, %v169_v57  ;;  %v171_v62 = vld [vmem:[#allocation2 + $0x3b0] sm:$0xff]  ;;  %v29300_v1 = vld [vmem:[#allocation5 + $0x1e70] sm:$0xff]   ;;  %v29330_v57 = vld [vmem:[#allocation5 + $0x1ff8] sm:$0xff]  }
 0x3e1   :  { %26877 = vmatprep.subr.bf16.mxu1 %v29266_v5  ;;  %v29295_v56 = vld [vmem:[#allocation5 + $0x1d80] sm:$0xff]   ;;  %vm25313_vm11 = vmpackc.low %vm920_vm10, %vm920_vm10  ;;  %v29304_v5 = vld [vmem:[#allocation5 + $0x1e68] sm:$0xff]  }
 0x3e2   :  { %v26563_v30 = vpop.f32.mrf.mxu0 }
 0x3e3   :  { %25310 = vmatmul.mubr.msk.bf16.vlgmr.msra.gmra.mxu1 %vm25309_vm7, %v30427_v44 }
 0x3e4   :  { %v26564_v33 = vpop.f32.mrf.mxu0  ;;  %26878 = vmatpush3.bf16.msra.mxu1 %v29267_v6  ;;  %v29305_v6 = vld [vmem:[#allocation5 + $0x1e28] sm:$0xff]  }
 0x3e5   :  { %v26565_v36 = vadd.f32 %v26564_v33, %v26563_v30  ;;  %26879 = vmatprep.subr.bf16.mxu1 %v29270_v9  ;;  %v29308_v9 = vld [vmem:[#allocation5 + $0x1e60] sm:$0xff]  }
 0x3e6   :  { %v26566_v39 = vpop.f32.mrf.mxu0 }
 0x3e7   :  { %v19606_v41 = vadd.f32 %v26565_v36, %v30739_v60  ;;  %v166_v60 = vld [vmem:[#allocation2 + $0x388] sm:$0xff] }
 0x3e8   :  { %v26567_v47 = vpop.f32.mrf.mxu0  ;;  %vm917_vm0 = vcmp.eq.s32.totalorder %v667_v49, %v166_v60  ;;  %26880 = vmatpush3.bf16.msra.mxu1 %v29271_v10  ;;  %v422_v49 = vadd.s32 15104, %v30458_v22  ;;  %v172_v60 = vld [vmem:[#allocation2 + $0x3b8] sm:$0xff]  ;;  %v29309_v10 = vld [vmem:[#allocation5 + $0x1e20] sm:$0xff]  }
 0x3e9   :  { %v30750_v53 = vadd.f32 %v26587_v46, %v19606_v41  ;;  %vm25303_vm1 = vmpackc.low %vm917_vm0, %vm917_vm0  ;;  %26881 = vmatprep.subr.bf16.mxu1 %v29274_v13  ;;  %v29290_v41 = vld [vmem:[#allocation5 + $0x1dc8] sm:$0xff]   ;;  %v671_v46 = vand.u32 31, %v421_v32  ;;  %vm923_vm12 = vcmp.eq.s32.totalorder %v673_v55, %v172_v60  ;;  %v29312_v13 = vld [vmem:[#allocation5 + $0x1e58] sm:$0xff]  }
 0x3ea   :  { %25304 = vmatprep.mubr.msk.bf16.mxu0 %vm25303_vm1, %v30427_v44  ;;  %v672_v58 = vand.u32 31, %v422_v49  ;;  %vm25315_vm13 = vmpackc.low %vm923_vm12, %vm923_vm12  ;;  %v29329_v55 = vld [vmem:[#allocation5 + $0x1f38] sm:$0xff]   ;;  %v29333_v60 = vld [vmem:[#allocation5 + $0x1f30] sm:$0xff]  }
 0x3eb   :  { %25306 = vmatmul.mubr.msk.bf16.vlgmr.msra.gmra.mxu0 %vm25305_vm3, %v30427_v44  ;;  %vm921_vm8 = vcmp.eq.s32.totalorder %v671_v46, %v170_v54  ;;  %25316 = vmatprep.mubr.msk.bf16.mxu1 %vm25315_vm13, %v30427_v44  ;;  %v29325_v46 = vld [vmem:[#allocation5 + $0x1e00] sm:$0xff]   ;;  %v176_v54 = vld [vmem:[#allocation2 + $0x3d8] sm:$0xff] }
 0x3ec   :  { %26856 = vmatpush3.bf16.msra.mxu0 %v29265_v3  ;;  %26882 = vmatpush3.bf16.msra.mxu1 %v29275_v14  ;;  %vm25311_vm9 = vmpackc.low %vm921_vm8, %vm921_vm8  ;;  %vm922_vm14 = vcmp.eq.s32.totalorder %v672_v58, %v171_v62  ;;  %v29302_v3 = vld [vmem:[#allocation5 + $0x1ef0] sm:$0xff]   ;;  %v29313_v14 = vld [vmem:[#allocation5 + $0x1e18] sm:$0xff]  }
 0x3ed   :  { %26857 = vmatprep.subr.bf16.mxu0 %v29268_v7  ;;  %26883 = vmatprep.subr.bf16.mxu1 %v29278_v17  ;;  %vm25317_vm15 = vmpackc.low %vm922_vm14, %vm922_vm14  ;;  %v29306_v7 = vld [vmem:[#allocation5 + $0x1ee8] sm:$0xff]   ;;  %v29315_v17 = vld [vmem:[#allocation5 + $0x1e98] sm:$0xff]  }
 0x3ee   :  { %25312 = vmatprep.mubr.msk.bf16.mxu0 %vm25311_vm9, %v30427_v44  ;;  %v29331_v58 = vld [vmem:[#allocation5 + $0x1fb8] sm:$0xff]   ;;  %v29335_v62 = vld [vmem:[#allocation5 + $0x1fb0] sm:$0xff]  }
 0x3f0   :  { %26858 = vmatpush3.bf16.msra.mxu0 %v29269_v8  ;;  %26884 = vmatpush3.bf16.msra.mxu1 %v29279_v18  ;;  %v29307_v8 = vld [vmem:[#allocation5 + $0x1ea8] sm:$0xff]   ;;  %v29316_v18 = vld [vmem:[#allocation5 + $0x1e50] sm:$0xff]  }
 0x3f1   :  { %26859 = vmatprep.subr.bf16.mxu0 %v29272_v11  ;;  %26885 = vmatprep.subr.bf16.mxu1 %v29282_v21  ;;  %v29310_v11 = vld [vmem:[#allocation5 + $0x1ee0] sm:$0xff]   ;;  %v425_v21 = vadd.s32 15488, %v30458_v22 }
 0x3f4   :  { %26860 = vmatpush3.bf16.msra.mxu0 %v29273_v12  ;;  %26886 = vmatpush3.bf16.msra.mxu1 %v29283_v23  ;;  %v29311_v12 = vld [vmem:[#allocation5 + $0x1ea0] sm:$0xff]  }
 0x3f5   :  { %26861 = vmatprep.subr.bf16.mxu0 %v29276_v15  ;;  %26887 = vmatprep.subr.bf16.mxu1 %v29286_v28  ;;  %v29314_v15 = vld [vmem:[#allocation5 + $0x1ed8] sm:$0xff]   ;;  %v424_v28 = vadd.s32 15360, %v30458_v22 }
 0x3f8   :  { %26862 = vmatpush3.bf16.msra.mxu0 %v29277_v16  ;;  %26888 = vmatpush3.bf16.msra.mxu1 %v29287_v31 }
 0x3f9   :  { %26863 = vmatprep.subr.bf16.mxu0 %v29280_v19  ;;  %26889 = vmatprep.subr.bf16.mxu1 %v29290_v41 }
 0x3fc   :  { %26864 = vmatpush3.bf16.msra.mxu0 %v29281_v20  ;;  %26890 = vmatpush3.bf16.msra.mxu1 %v29291_v45  ;;  %v29317_v20 = vld [vmem:[#allocation5 + $0x1e10] sm:$0xff]  }
 0x3fd   :  { %26865 = vmatprep.subr.bf16.mxu0 %v29284_v25 }
 0x400   :  { %26866 = vmatpush3.bf16.msra.mxu0 %v29285_v26 }
 0x401   :  { %26867 = vmatprep.subr.bf16.mxu0 %v29288_v34  ;;  %v675_v34 = vand.u32 31, %v425_v21  ;;  %v29352_v21 = vld [vmem:[#allocation5 + $0x1f48] sm:$0xff]  }
 0x402   :  { %v26607_v24 = vpop.f32.mrf.mxu0 }
 0x403   :  { %v26629_v30 = vpop.f32.mrf.mxu1 }
 0x404   :  { %v26608_v27 = vpop.f32.mrf.mxu0  ;;  %26868 = vmatpush3.bf16.msra.mxu0 %v29289_v37  ;;  %v427_v37 = vadd.s32 15744, %v30458_v22 }
 0x405   :  { %v26609_v29 = vadd.f32 %v26608_v27, %v26607_v24  ;;  %v26630_v36 = vpop.f32.mrf.mxu1  ;;  %26869 = vmatprep.subr.bf16.mxu0 %v29292_v48  ;;  %v29318_v24 = vld [vmem:[#allocation5 + $0x1ed0] sm:$0xff]   ;;  %v174_v48 = vld [vmem:[#allocation2 + $0x3c8] sm:$0xff] }
 0x406   :  { %v26610_v33 = vpop.f32.mrf.mxu0  ;;  %v26631_v39 = vadd.f32 %v26630_v36, %v26629_v30  ;;  %v29319_v27 = vld [vmem:[#allocation5 + $0x1e90] sm:$0xff]   ;;  %v29320_v30 = vld [vmem:[#allocation5 + $0x1e48] sm:$0xff]   ;;  %v677_v49 = vand.u32 31, %v427_v37  ;;  %vm925_vm0 = vcmp.eq.s32.totalorder %v675_v34, %v174_v48 }
 0x407   :  { %v19686_v35 = vadd.f32 %v26609_v29, %v30750_v53  ;;  %v26632_v43 = vpop.f32.mrf.mxu1  ;;  %v29294_v53 = vld [vmem:[#allocation5 + $0x1dc0] sm:$0xff]   ;;  %v29321_v33 = vld [vmem:[#allocation5 + $0x1e08] sm:$0xff]   ;;  %vm25319_vm1 = vmpackc.low %vm925_vm0, %vm925_vm0 }
 0x408   :  { %v26611_v40 = vpop.f32.mrf.mxu0  ;;  %26870 = vmatpush3.bf16.msra.mxu0 %v29293_v51  ;;  %26891 = vmatprep.subr.bf16.mxu1 %v29294_v53  ;;  %v29322_v36 = vld [vmem:[#allocation5 + $0x1ec8] sm:$0xff]   ;;  %v426_v43 = vadd.s32 15616, %v30458_v22  ;;  %v173_v51 = vld [vmem:[#allocation2 + $0x3c0] sm:$0xff]  ;;  %v29328_v53 = vld [vmem:[#allocation5 + $0x1f78] sm:$0xff]   ;;  %vm927_vm4 = vcmp.eq.s32.totalorder %v677_v49, %v176_v54 }
 0x409   :  { %v30761_v47 = vadd.f32 %v26631_v39, %v19686_v35  ;;  %v26633_v50 = vpop.f32.mrf.mxu1  ;;  %26892 = vmatpush3.bf16.msra.mxu1 %v29295_v56  ;;  %26899 = vmatprep.subr.bf16.mxu0 %v29296_v59  ;;  %v29323_v39 = vld [vmem:[#allocation5 + $0x1e88] sm:$0xff]   ;;  %v674_v40 = vand.u32 31, %v424_v28  ;;  %vm25323_vm5 = vmpackc.low %vm927_vm4, %vm927_vm4  ;;  %v175_v56 = vld [vmem:[#allocation2 + $0x3d0] sm:$0xff] }
 0x40a   :  { %26921 = vmatprep.subr.bf16.mxu1 %v29298_v63  ;;  %v29327_v50 = vld [vmem:[#allocation5 + $0x1e80] sm:$0xff]   ;;  %v676_v52 = vand.u32 31, %v426_v43  ;;  %v29332_v59 = vld [vmem:[#allocation5 + $0x1f70] sm:$0xff]   ;;  %v29336_v63 = vld [vmem:[#allocation5 + $0x1f68] sm:$0xff]  }
 0x40b   :  { %25314 = vmatmul.mubr.msk.bf16.vlgmr.msra.gmra.mxu0 %vm25313_vm11, %v30427_v44  ;;  %vm924_vm2 = vcmp.eq.s32.totalorder %v674_v40, %v173_v51  ;;  %v29358_v40 = vld [vmem:[#allocation5 + $0x1fc0] sm:$0xff]   ;;  %v180_v48 = vld [vmem:[#allocation2 + $0x3f8] sm:$0xff]  ;;  %v29361_v49 = vld [vmem:[#allocation5 + $0x2038] sm:$0xff]  }
 0x40c   :  { %26900 = vmatpush3.bf16.msra.mxu0 %v29297_v61  ;;  %25318 = vmatmul.mubr.msk.bf16.vlgmr.msra.gmra.mxu1 %vm25317_vm15, %v30427_v44  ;;  %vm25321_vm3 = vmpackc.low %vm924_vm2, %vm924_vm2  ;;  %vm926_vm6 = vcmp.eq.s32.totalorder %v676_v52, %v175_v56  ;;  %v29334_v61 = vld [vmem:[#allocation5 + $0x1ff0] sm:$0xff]   ;;  %v29359_v43 = vld [vmem:[#allocation5 + $0x1f80] sm:$0xff]  }
 0x40d   :  { %26922 = vmatpush3.bf16.msra.mxu1 %v29299_v0  ;;  %26901 = vmatprep.subr.bf16.mxu0 %v29300_v1  ;;  %vm25325_vm7 = vmpackc.low %vm926_vm6, %vm926_vm6  ;;  %v29337_v0 = vld [vmem:[#allocation5 + $0x1f28] sm:$0xff]   ;;  %v29362_v51 = vld [vmem:[#allocation5 + $0x20f8] sm:$0xff]  }
 0x40e   :  { %26923 = vmatprep.subr.bf16.mxu1 %v29302_v3  ;;  %25320 = vmatprep.mubr.msk.bf16.mxu0 %vm25319_vm1, %v30427_v44  ;;  %v29338_v1 = vld [vmem:[#allocation5 + $0x1fe8] sm:$0xff]   ;;  %v29340_v3 = vld [vmem:[#allocation5 + $0x1f60] sm:$0xff]   ;;  %v29363_v52 = vld [vmem:[#allocation5 + $0x20b8] sm:$0xff]  }
 0x40f   :  { %25324 = vmatprep.mubr.msk.bf16.mxu1 %vm25323_vm5, %v30427_v44  ;;  %v29365_v54 = vld [vmem:[#allocation5 + $0x2030] sm:$0xff]  }
 0x410   :  { %26902 = vmatpush3.bf16.msra.mxu0 %v29301_v2  ;;  %v29339_v2 = vld [vmem:[#allocation5 + $0x1fa8] sm:$0xff]   ;;  %v29367_v56 = vld [vmem:[#allocation5 + $0x20b0] sm:$0xff]  }
 0x411   :  { %26924 = vmatpush3.bf16.msra.mxu1 %v29303_v4  ;;  %26903 = vmatprep.subr.bf16.mxu0 %v29304_v5  ;;  %v29341_v4 = vld [vmem:[#allocation5 + $0x1f20] sm:$0xff]  }
 0x412   :  { %26925 = vmatprep.subr.bf16.mxu1 %v29306_v7  ;;  %v29342_v5 = vld [vmem:[#allocation5 + $0x1fe0] sm:$0xff]   ;;  %v29344_v7 = vld [vmem:[#allocation5 + $0x1f58] sm:$0xff]  }
 0x414   :  { %26904 = vmatpush3.bf16.msra.mxu0 %v29305_v6  ;;  %v29343_v6 = vld [vmem:[#allocation5 + $0x1fa0] sm:$0xff]  }
 0x415   :  { %26926 = vmatpush3.bf16.msra.mxu1 %v29307_v8  ;;  %26905 = vmatprep.subr.bf16.mxu0 %v29308_v9  ;;  %v29345_v8 = vld [vmem:[#allocation5 + $0x1f18] sm:$0xff]  }
 0x416   :  { %26927 = vmatprep.subr.bf16.mxu1 %v29310_v11  ;;  %v29346_v9 = vld [vmem:[#allocation5 + $0x1fd8] sm:$0xff]  }
 0x418   :  { %26906 = vmatpush3.bf16.msra.mxu0 %v29309_v10  ;;  %v29347_v10 = vld [vmem:[#allocation5 + $0x1f98] sm:$0xff]  }
 0x419   :  { %26928 = vmatpush3.bf16.msra.mxu1 %v29311_v12  ;;  %26907 = vmatprep.subr.bf16.mxu0 %v29312_v13  ;;  %v29348_v12 = vld [vmem:[#allocation5 + $0x1f50] sm:$0xff]  }
 0x41a   :  { %26929 = vmatprep.subr.bf16.mxu1 %v29314_v15  ;;  %v29349_v13 = vld [vmem:[#allocation5 + $0x1f10] sm:$0xff]  }
 0x41b   :  { %v29350_v15 = vld [vmem:[#allocation5 + $0x1fd0] sm:$0xff]  }
 0x41c   :  { %26908 = vmatpush3.bf16.msra.mxu0 %v29313_v14 }
 0x41d   :  { %26930 = vmatpush3.bf16.msra.mxu1 %v29315_v17  ;;  %26909 = vmatprep.subr.bf16.mxu0 %v29316_v18 }
 0x41e   :  { %26931 = vmatprep.subr.bf16.mxu1 %v29318_v24 }
 0x420   :  { %26910 = vmatpush3.bf16.msra.mxu0 %v29317_v20 }
 0x421   :  { %26932 = vmatpush3.bf16.msra.mxu1 %v29319_v27  ;;  %26911 = vmatprep.subr.bf16.mxu0 %v29320_v30 }
 0x422   :  { %v26651_v16 = vpop.f32.mrf.mxu0  ;;  %26933 = vmatprep.subr.bf16.mxu1 %v29322_v36  ;;  %v430_v36 = vadd.s32 16128, %v30458_v22 }
 0x423   :  { %v26673_v25 = vpop.f32.mrf.mxu1 }
 0x424   :  { %v26652_v19 = vpop.f32.mrf.mxu0  ;;  %26912 = vmatpush3.bf16.msra.mxu0 %v29321_v33  ;;  %v431_v33 = vadd.s32 16256, %v30458_v22 }
 0x425   :  { %v26653_v23 = vadd.f32 %v26652_v19, %v26651_v16  ;;  %v26674_v31 = vpop.f32.mrf.mxu1  ;;  %26934 = vmatpush3.bf16.msra.mxu1 %v29323_v39  ;;  %26913 = vmatprep.subr.bf16.mxu0 %v29324_v42  ;;  %v429_v16 = vadd.s32 16000, %v30458_v22  ;;  %v29351_v19 = vld [vmem:[#allocation5 + $0x1f90] sm:$0xff]  }
 0x426   :  { %v26654_v26 = vpop.f32.mrf.mxu0  ;;  %v26675_v35 = vadd.f32 %v26674_v31, %v26673_v25  ;;  %v29353_v25 = vld [vmem:[#allocation5 + $0x1f08] sm:$0xff]   ;;  %v681_v42 = vand.u32 31, %v431_v33 }
 0x427   :  { %v19766_v29 = vadd.f32 %v26653_v23, %v30761_v47  ;;  %v26676_v38 = vpop.f32.mrf.mxu1  ;;  %v29326_v47 = vld [vmem:[#allocation5 + $0x1ec0] sm:$0xff]   ;;  %v428_v26 = vadd.s32 15872, %v30458_v22  ;;  %v679_v30 = vand.u32 31, %v429_v16 }
 0x428   :  { %v26655_v32 = vpop.f32.mrf.mxu0  ;;  %26914 = vmatpush3.bf16.msra.mxu0 %v29325_v46  ;;  %26935 = vmatprep.subr.bf16.mxu1 %v29326_v47  ;;  %v29357_v38 = vld [vmem:[#allocation5 + $0x1f00] sm:$0xff]   ;;  %v680_v46 = vand.u32 31, %v430_v36  ;;  %v29360_v47 = vld [vmem:[#allocation5 + $0x2078] sm:$0xff]   ;;  %vm931_vm12 = vcmp.eq.s32.totalorder %v681_v42, %v180_v48  ;;  %v29397_v48 = vld [vmem:[#allocation5 + $0x2130] sm:$0xff]  }
 0x429   :  { %v30772_v41 = vadd.f32 %v26675_v35, %v19766_v29  ;;  %v26677_v45 = vpop.f32.mrf.mxu1  ;;  %26936 = vmatpush3.bf16.msra.mxu1 %v29327_v50  ;;  %26943 = vmatprep.subr.bf16.mxu0 %v29328_v53  ;;  %v29354_v29 = vld [vmem:[#allocation5 + $0x1fc8] sm:$0xff]   ;;  %v29356_v35 = vld [vmem:[#allocation5 + $0x1f40] sm:$0xff]   ;;  %v678_v39 = vand.u32 31, %v428_v26  ;;  %vm25331_vm13 = vmpackc.low %vm931_vm12, %vm931_vm12 }
 0x42a   :  { %26965 = vmatprep.subr.bf16.mxu1 %v29330_v57  ;;  %v29355_v32 = vld [vmem:[#allocation5 + $0x1f88] sm:$0xff]   ;;  %v177_v45 = vld [vmem:[#allocation2 + $0x3e0] sm:$0xff]  ;;  %v179_v50 = vld [vmem:[#allocation2 + $0x3f0] sm:$0xff] }
 0x42b   :  { %25322 = vmatmul.mubr.msk.bf16.vlgmr.msra.gmra.mxu0 %vm25321_vm3, %v30427_v44  ;;  %vm928_vm10 = vcmp.eq.s32.totalorder %v678_v39, %v177_v45  ;;  %vm930_vm14 = vcmp.eq.s32.totalorder %v680_v46, %v179_v50  ;;  %v29364_v53 = vld [vmem:[#allocation5 + $0x2070] sm:$0xff]   ;;  %v29368_v57 = vld [vmem:[#allocation5 + $0x2068] sm:$0xff]   ;;  %v29393_v42 = vld [vmem:[#allocation5 + $0x2138] sm:$0xff]  }
 0x42c   :  { %26944 = vmatpush3.bf16.msra.mxu0 %v29329_v55  ;;  %25326 = vmatmul.mubr.msk.bf16.vlgmr.msra.gmra.mxu1 %vm25325_vm7, %v30427_v44  ;;  %vm25329_vm11 = vmpackc.low %vm928_vm10, %vm928_vm10  ;;  %v29366_v55 = vld [vmem:[#allocation5 + $0x20f0] sm:$0xff]   ;;  %v29387_v26 = vld [vmem:[#allocation5 + $0x2088] sm:$0xff]  }
 0x42d   :  { %26966 = vmatpush3.bf16.msra.mxu1 %v29331_v58  ;;  %26945 = vmatprep.subr.bf16.mxu0 %v29332_v59  ;;  %vm25333_vm15 = vmpackc.low %vm930_vm14, %vm930_vm14  ;;  %v29369_v58 = vld [vmem:[#allocation5 + $0x2028] sm:$0xff]   ;;  %v29394_v45 = vld [vmem:[#allocation5 + $0x21f8] sm:$0xff]  }
 0x42e   :  { %26967 = vmatprep.subr.bf16.mxu1 %v29334_v61  ;;  %25332 = vmatprep.mubr.msk.bf16.mxu1 %vm25331_vm13, %v30427_v44  ;;  %v29370_v59 = vld [vmem:[#allocation5 + $0x20e8] sm:$0xff]   ;;  %v29372_v61 = vld [vmem:[#allocation5 + $0x2060] sm:$0xff]   ;;  %v29395_v46 = vld [vmem:[#allocation5 + $0x21b8] sm:$0xff]  }
 0x42f   :  { %v29399_v50 = vld [vmem:[#allocation5 + $0x21b0] sm:$0xff]  }
 0x430   :  { %26946 = vmatpush3.bf16.msra.mxu0 %v29333_v60  ;;  %v29371_v60 = vld [vmem:[#allocation5 + $0x20a8] sm:$0xff]  }
 0x431   :  { %26968 = vmatpush3.bf16.msra.mxu1 %v29335_v62  ;;  %26947 = vmatprep.subr.bf16.mxu0 %v29336_v63  ;;  %v29373_v62 = vld [vmem:[#allocation5 + $0x2020] sm:$0xff]  }
 0x432   :  { %26969 = vmatprep.subr.bf16.mxu1 %v29338_v1  ;;  %v29374_v63 = vld [vmem:[#allocation5 + $0x20e0] sm:$0xff]   ;;  %v29376_v1 = vld [vmem:[#allocation5 + $0x2058] sm:$0xff]  }
 0x434   :  { %26948 = vmatpush3.bf16.msra.mxu0 %v29337_v0  ;;  %v29375_v0 = vld [vmem:[#allocation5 + $0x20a0] sm:$0xff]  }
 0x435   :  { %26970 = vmatpush3.bf16.msra.mxu1 %v29339_v2  ;;  %26949 = vmatprep.subr.bf16.mxu0 %v29340_v3  ;;  %v29377_v2 = vld [vmem:[#allocation5 + $0x2018] sm:$0xff]  }
 0x436   :  { %26971 = vmatprep.subr.bf16.mxu1 %v29342_v5  ;;  %v29378_v3 = vld [vmem:[#allocation5 + $0x20d8] sm:$0xff]  }
 0x438   :  { %26950 = vmatpush3.bf16.msra.mxu0 %v29341_v4  ;;  %v29379_v4 = vld [vmem:[#allocation5 + $0x2098] sm:$0xff]  }
 0x439   :  { %26972 = vmatpush3.bf16.msra.mxu1 %v29343_v6  ;;  %26951 = vmatprep.subr.bf16.mxu0 %v29344_v7  ;;  %v29380_v6 = vld [vmem:[#allocation5 + $0x2050] sm:$0xff]  }
 0x43a   :  { %26973 = vmatprep.subr.bf16.mxu1 %v29346_v9  ;;  %v29381_v7 = vld [vmem:[#allocation5 + $0x2010] sm:$0xff]  }
 0x43b   :  { %v29382_v9 = vld [vmem:[#allocation5 + $0x20d0] sm:$0xff]  }
 0x43c   :  { %26952 = vmatpush3.bf16.msra.mxu0 %v29345_v8 }
 0x43d   :  { %26974 = vmatpush3.bf16.msra.mxu1 %v29347_v10  ;;  %26953 = vmatprep.subr.bf16.mxu0 %v29348_v12  ;;  %v29383_v12 = vld [vmem:[#allocation5 + $0x2090] sm:$0xff]  }
 0x43e   :  { %26975 = vmatprep.subr.bf16.mxu1 %v29350_v15  ;;  %v29384_v15 = vld [vmem:[#allocation5 + $0x2048] sm:$0xff]  }
 0x440   :  { %26954 = vmatpush3.bf16.msra.mxu0 %v29349_v13  ;;  %v433_v13 = vadd.s32 16512, %v30458_v22 }
 0x441   :  { %26976 = vmatpush3.bf16.msra.mxu1 %v29351_v19  ;;  %26955 = vmatprep.subr.bf16.mxu0 %v29352_v21  ;;  %v432_v19 = vadd.s32 16384, %v30458_v22 }
 0x442   :  { %v26695_v11 = vpop.f32.mrf.mxu0  ;;  %26977 = vmatprep.subr.bf16.mxu1 %v29354_v29  ;;  %v29388_v29 = vld [vmem:[#allocation5 + $0x2040] sm:$0xff]  }
 0x443   :  { %v26717_v18 = vpop.f32.mrf.mxu1  ;;  %v682_v33 = vand.u32 31, %v432_v19 }
 0x444   :  { %v26696_v14 = vpop.f32.mrf.mxu0  ;;  %26956 = vmatpush3.bf16.msra.mxu0 %v29353_v25 }
 0x445   :  { %v26697_v17 = vadd.f32 %v26696_v14, %v26695_v11  ;;  %v26718_v24 = vpop.f32.mrf.mxu1  ;;  %26978 = vmatpush3.bf16.msra.mxu1 %v29355_v32  ;;  %26957 = vmatprep.subr.bf16.mxu0 %v29356_v35  ;;  %v29389_v32 = vld [vmem:[#allocation5 + $0x2000] sm:$0xff]   ;;  %v182_v35 = vld [vmem:[#allocation2 + $0x408] sm:$0xff] }
 0x446   :  { %v26698_v20 = vpop.f32.mrf.mxu0  ;;  %v26719_v27 = vadd.f32 %v26718_v24, %v26717_v18  ;;  %26979 = vmatprep.subr.bf16.mxu1 %v29358_v40  ;;  %v29385_v18 = vld [vmem:[#allocation5 + $0x2008] sm:$0xff]   ;;  %v435_v24 = vadd.s32 16768, %v30458_v22  ;;  %v29392_v40 = vld [vmem:[#allocation5 + $0x2178] sm:$0xff]  }
 0x447   :  { %v19846_v23 = vadd.f32 %v26697_v17, %v30772_v41  ;;  %v26720_v31 = vpop.f32.mrf.mxu1  ;;  %v178_v41 = vld [vmem:[#allocation2 + $0x3e8] sm:$0xff] }
 0x448   :  { %v26699_v28 = vpop.f32.mrf.mxu0  ;;  %26958 = vmatpush3.bf16.msra.mxu0 %v29357_v38  ;;  %vm929_vm8 = vcmp.eq.s32.totalorder %v679_v30, %v178_v41  ;;  %v434_v30 = vadd.s32 16640, %v30458_v22  ;;  %v685_v36 = vand.u32 31, %v435_v24  ;;  %v181_v38 = vld [vmem:[#allocation2 + $0x400] sm:$0xff]  ;;  %v184_v41 = vld [vmem:[#allocation2 + $0x418] sm:$0xff]  ;;  %v29420_v24 = vld [vmem:[#allocation5 + $0x2140] sm:$0xff]  }
 0x449   :  { %v30783_v34 = vadd.f32 %v26719_v27, %v19846_v23  ;;  %v26721_v37 = vpop.f32.mrf.mxu1  ;;  %vm25327_vm9 = vmpackc.low %vm929_vm8, %vm929_vm8  ;;  %26980 = vmatpush3.bf16.msra.mxu1 %v29359_v43  ;;  %26987 = vmatprep.subr.bf16.mxu0 %v29360_v47  ;;  %v29386_v23 = vld [vmem:[#allocation5 + $0x20c8] sm:$0xff]   ;;  %v683_v27 = vand.u32 31, %v433_v13  ;;  %vm932_vm2 = vcmp.eq.s32.totalorder %v682_v33, %v181_v38  ;;  %v183_v43 = vld [vmem:[#allocation2 + $0x410] sm:$0xff] }
 0x44a   :  { %25328 = vmatprep.mubr.msk.bf16.mxu0 %vm25327_vm9, %v30427_v44  ;;  %27009 = vmatprep.subr.bf16.mxu1 %v29362_v51  ;;  %v29391_v37 = vld [vmem:[#allocation5 + $0x2080] sm:$0xff]   ;;  %v684_v39 = vand.u32 31, %v434_v30  ;;  %vm25337_vm3 = vmpackc.low %vm932_vm2, %vm932_vm2  ;;  %vm935_vm4 = vcmp.eq.s32.totalorder %v685_v36, %v184_v41  ;;  %v29396_v47 = vld [vmem:[#allocation5 + $0x2170] sm:$0xff]  }
 0x44b   :  { %25330 = vmatmul.mubr.msk.bf16.vlgmr.msra.gmra.mxu0 %vm25329_vm11, %v30427_v44  ;;  %vm933_vm0 = vcmp.eq.s32.totalorder %v683_v27, %v182_v35  ;;  %vm25339_vm5 = vmpackc.low %vm935_vm4, %vm935_vm4  ;;  %v29400_v51 = vld [vmem:[#allocation5 + $0x2168] sm:$0xff]   ;;  %v29421_v27 = vld [vmem:[#allocation5 + $0x2100] sm:$0xff]  }
 0x44c   :  { %26988 = vmatpush3.bf16.msra.mxu0 %v29361_v49  ;;  %25334 = vmatmul.mubr.msk.bf16.vlgmr.msra.gmra.mxu1 %vm25333_vm15, %v30427_v44  ;;  %vm25335_vm1 = vmpackc.low %vm933_vm0, %vm933_vm0  ;;  %vm934_vm6 = vcmp.eq.s32.totalorder %v684_v39, %v183_v43  ;;  %v29398_v49 = vld [vmem:[#allocation5 + $0x21f0] sm:$0xff]   ;;  %v188_v35 = vld [vmem:[#allocation2 + $0x438] sm:$0xff] }
 0x44d   :  { %27010 = vmatpush3.bf16.msra.mxu1 %v29363_v52  ;;  %26989 = vmatprep.subr.bf16.mxu0 %v29364_v53  ;;  %vm25341_vm7 = vmpackc.low %vm934_vm6, %vm934_vm6  ;;  %v29401_v52 = vld [vmem:[#allocation5 + $0x2128] sm:$0xff]   ;;  %v29425_v36 = vld [vmem:[#allocation5 + $0x2238] sm:$0xff]  }
 0x44e   :  { %27011 = vmatprep.subr.bf16.mxu1 %v29366_v55  ;;  %25336 = vmatprep.mubr.msk.bf16.mxu0 %vm25335_vm1, %v30427_v44  ;;  %v29402_v53 = vld [vmem:[#allocation5 + $0x21e8] sm:$0xff]   ;;  %v29404_v55 = vld [vmem:[#allocation5 + $0x2160] sm:$0xff]   ;;  %v29426_v38 = vld [vmem:[#allocation5 + $0x22f8] sm:$0xff]  }
 0x44f   :  { %25340 = vmatprep.mubr.msk.bf16.mxu1 %vm25339_vm5, %v30427_v44  ;;  %v29427_v39 = vld [vmem:[#allocation5 + $0x22b8] sm:$0xff]   ;;  %v29429_v41 = vld [vmem:[#allocation5 + $0x2230] sm:$0xff]  }
 0x450   :  { %26990 = vmatpush3.bf16.msra.mxu0 %v29365_v54  ;;  %v29403_v54 = vld [vmem:[#allocation5 + $0x21a8] sm:$0xff]   ;;  %v29431_v43 = vld [vmem:[#allocation5 + $0x22b0] sm:$0xff]  }
 0x451   :  { %27012 = vmatpush3.bf16.msra.mxu1 %v29367_v56  ;;  %26991 = vmatprep.subr.bf16.mxu0 %v29368_v57  ;;  %v29405_v56 = vld [vmem:[#allocation5 + $0x2120] sm:$0xff]  }
 0x452   :  { %27013 = vmatprep.subr.bf16.mxu1 %v29370_v59  ;;  %v29406_v57 = vld [vmem:[#allocation5 + $0x21e0] sm:$0xff]   ;;  %v29408_v59 = vld [vmem:[#allocation5 + $0x2158] sm:$0xff]  }
 0x454   :  { %26992 = vmatpush3.bf16.msra.mxu0 %v29369_v58  ;;  %v29407_v58 = vld [vmem:[#allocation5 + $0x21a0] sm:$0xff]  }
 0x455   :  { %27014 = vmatpush3.bf16.msra.mxu1 %v29371_v60  ;;  %26993 = vmatprep.subr.bf16.mxu0 %v29372_v61  ;;  %v29409_v60 = vld [vmem:[#allocation5 + $0x2118] sm:$0xff]  }
 0x456   :  { %27015 = vmatprep.subr.bf16.mxu1 %v29374_v63  ;;  %v29410_v61 = vld [vmem:[#allocation5 + $0x21d8] sm:$0xff]  }
 0x457   :  { %v29411_v63 = vld [vmem:[#allocation5 + $0x2198] sm:$0xff]  }
 0x458   :  { %26994 = vmatpush3.bf16.msra.mxu0 %v29373_v62 }
 0x459   :  { %27016 = vmatpush3.bf16.msra.mxu1 %v29375_v0  ;;  %26995 = vmatprep.subr.bf16.mxu0 %v29376_v1  ;;  %v29412_v0 = vld [vmem:[#allocation5 + $0x2150] sm:$0xff]  }
 0x45a   :  { %27017 = vmatprep.subr.bf16.mxu1 %v29378_v3  ;;  %v437_v3 = vadd.s32 17024, %v30458_v22 }
 0x45c   :  { %26996 = vmatpush3.bf16.msra.mxu0 %v29377_v2  ;;  %v29413_v2 = vld [vmem:[#allocation5 + $0x2110] sm:$0xff]  }
 0x45d   :  { %27018 = vmatpush3.bf16.msra.mxu1 %v29379_v4  ;;  %26997 = vmatprep.subr.bf16.mxu0 %v29380_v6 }
 0x45e   :  { %27019 = vmatprep.subr.bf16.mxu1 %v29382_v9  ;;  %v436_v9 = vadd.s32 16896, %v30458_v22 }
 0x460   :  { %26998 = vmatpush3.bf16.msra.mxu0 %v29381_v7 }
 0x461   :  { %27020 = vmatpush3.bf16.msra.mxu1 %v29383_v12  ;;  %26999 = vmatprep.subr.bf16.mxu0 %v29384_v15  ;;  %v687_v15 = vand.u32 31, %v437_v3  ;;  %v29448_v3 = vld [vmem:[#allocation5 + $0x2248] sm:$0xff]  }
 0x462   :  { %v26739_v5 = vpop.f32.mrf.mxu0  ;;  %27021 = vmatprep.subr.bf16.mxu1 %v29386_v23 }
 0x463   :  { %v26761_v11 = vpop.f32.mrf.mxu1 }
 0x464   :  { %v26740_v8 = vpop.f32.mrf.mxu0  ;;  %27000 = vmatpush3.bf16.msra.mxu0 %v29385_v18  ;;  %v439_v18 = vadd.s32 17280, %v30458_v22 }
 0x465   :  { %v26741_v10 = vadd.f32 %v26740_v8, %v26739_v5  ;;  %v26762_v17 = vpop.f32.mrf.mxu1  ;;  %27022 = vmatpush3.bf16.msra.mxu1 %v29387_v26  ;;  %27001 = vmatprep.subr.bf16.mxu0 %v29388_v29  ;;  %v29414_v5 = vld [vmem:[#allocation5 + $0x21d0] sm:$0xff]   ;;  %v186_v29 = vld [vmem:[#allocation2 + $0x428] sm:$0xff] }
 0x466   :  { %v26742_v14 = vpop.f32.mrf.mxu0  ;;  %v26763_v20 = vadd.f32 %v26762_v17, %v26761_v11  ;;  %v29415_v8 = vld [vmem:[#allocation5 + $0x2190] sm:$0xff]   ;;  %v29416_v11 = vld [vmem:[#allocation5 + $0x2148] sm:$0xff]   ;;  %v689_v30 = vand.u32 31, %v439_v18  ;;  %vm937_vm8 = vcmp.eq.s32.totalorder %v687_v15, %v186_v29 }
 0x467   :  { %v19926_v16 = vadd.f32 %v26741_v10, %v30783_v34  ;;  %v26764_v25 = vpop.f32.mrf.mxu1  ;;  %v29390_v34 = vld [vmem:[#allocation5 + $0x20c0] sm:$0xff]   ;;  %v29417_v14 = vld [vmem:[#allocation5 + $0x2108] sm:$0xff]   ;;  %vm25343_vm9 = vmpackc.low %vm937_vm8, %vm937_vm8 }
 0x468   :  { %v26743_v21 = vpop.f32.mrf.mxu0  ;;  %27002 = vmatpush3.bf16.msra.mxu0 %v29389_v32  ;;  %27023 = vmatprep.subr.bf16.mxu1 %v29390_v34  ;;  %v29418_v17 = vld [vmem:[#allocation5 + $0x21c8] sm:$0xff]   ;;  %v438_v25 = vadd.s32 17152, %v30458_v22  ;;  %v185_v32 = vld [vmem:[#allocation2 + $0x420] sm:$0xff]  ;;  %v29424_v34 = vld [vmem:[#allocation5 + $0x2278] sm:$0xff]   ;;  %vm939_vm12 = vcmp.eq.s32.totalorder %v689_v30, %v188_v35 }
 0x469   :  { %v30794_v28 = vadd.f32 %v26763_v20, %v19926_v16  ;;  %v26765_v31 = vpop.f32.mrf.mxu1  ;;  %27024 = vmatpush3.bf16.msra.mxu1 %v29391_v37  ;;  %27031 = vmatprep.subr.bf16.mxu0 %v29392_v40  ;;  %v29419_v20 = vld [vmem:[#allocation5 + $0x2188] sm:$0xff]   ;;  %v686_v21 = vand.u32 31, %v436_v9  ;;  %vm25347_vm13 = vmpackc.low %vm939_vm12, %vm939_vm12  ;;  %v187_v37 = vld [vmem:[#allocation2 + $0x430] sm:$0xff] }
 0x46a   :  { %27053 = vmatprep.subr.bf16.mxu1 %v29394_v45  ;;  %v29423_v31 = vld [vmem:[#allocation5 + $0x2180] sm:$0xff]   ;;  %v688_v33 = vand.u32 31, %v438_v25  ;;  %v29428_v40 = vld [vmem:[#allocation5 + $0x2270] sm:$0xff]   ;;  %v29432_v45 = vld [vmem:[#allocation5 + $0x2268] sm:$0xff]  }
 0x46b   :  { %25338 = vmatmul.mubr.msk.bf16.vlgmr.msra.gmra.mxu0 %vm25337_vm3, %v30427_v44  ;;  %vm936_vm10 = vcmp.eq.s32.totalorder %v686_v21, %v185_v32  ;;  %v29454_v21 = vld [vmem:[#allocation5 + $0x22c0] sm:$0xff]   ;;  %v192_v29 = vld [vmem:[#allocation2 + $0x458] sm:$0xff]  ;;  %v29457_v30 = vld [vmem:[#allocation5 + $0x2338] sm:$0xff]  }
 0x46c   :  { %27032 = vmatpush3.bf16.msra.mxu0 %v29393_v42  ;;  %25342 = vmatmul.mubr.msk.bf16.vlgmr.msra.gmra.mxu1 %vm25341_vm7, %v30427_v44  ;;  %vm25345_vm11 = vmpackc.low %vm936_vm10, %vm936_vm10  ;;  %vm938_vm14 = vcmp.eq.s32.totalorder %v688_v33, %v187_v37  ;;  %v29430_v42 = vld [vmem:[#allocation5 + $0x22f0] sm:$0xff]   ;;  %v29455_v25 = vld [vmem:[#allocation5 + $0x2280] sm:$0xff]  }
 0x46d   :  { %27054 = vmatpush3.bf16.msra.mxu1 %v29395_v46  ;;  %27033 = vmatprep.subr.bf16.mxu0 %v29396_v47  ;;  %vm25349_vm15 = vmpackc.low %vm938_vm14, %vm938_vm14  ;;  %v29433_v46 = vld [vmem:[#allocation5 + $0x2228] sm:$0xff]   ;;  %v29458_v32 = vld [vmem:[#allocation5 + $0x23f8] sm:$0xff]  }
 0x46e   :  { %27055 = vmatprep.subr.bf16.mxu1 %v29398_v49  ;;  %25344 = vmatprep.mubr.msk.bf16.mxu0 %vm25343_vm9, %v30427_v44  ;;  %v29434_v47 = vld [vmem:[#allocation5 + $0x22e8] sm:$0xff]   ;;  %v29436_v49 = vld [vmem:[#allocation5 + $0x2260] sm:$0xff]   ;;  %v29459_v33 = vld [vmem:[#allocation5 + $0x23b8] sm:$0xff]  }
 0x46f   :  { %25348 = vmatprep.mubr.msk.bf16.mxu1 %vm25347_vm13, %v30427_v44  ;;  %v29461_v35 = vld [vmem:[#allocation5 + $0x2330] sm:$0xff]  }
 0x470   :  { %27034 = vmatpush3.bf16.msra.mxu0 %v29397_v48  ;;  %v29435_v48 = vld [vmem:[#allocation5 + $0x22a8] sm:$0xff]   ;;  %v29463_v37 = vld [vmem:[#allocation5 + $0x23b0] sm:$0xff]  }
 0x471   :  { %27056 = vmatpush3.bf16.msra.mxu1 %v29399_v50  ;;  %27035 = vmatprep.subr.bf16.mxu0 %v29400_v51  ;;  %v29437_v50 = vld [vmem:[#allocation5 + $0x2220] sm:$0xff]  }
 0x472   :  { %27057 = vmatprep.subr.bf16.mxu1 %v29402_v53  ;;  %v29438_v51 = vld [vmem:[#allocation5 + $0x22e0] sm:$0xff]   ;;  %v29440_v53 = vld [vmem:[#allocation5 + $0x2258] sm:$0xff]  }
 0x474   :  { %27036 = vmatpush3.bf16.msra.mxu0 %v29401_v52  ;;  %v29439_v52 = vld [vmem:[#allocation5 + $0x22a0] sm:$0xff]  }
 0x475   :  { %27058 = vmatpush3.bf16.msra.mxu1 %v29403_v54  ;;  %27037 = vmatprep.subr.bf16.mxu0 %v29404_v55  ;;  %v29441_v54 = vld [vmem:[#allocation5 + $0x2218] sm:$0xff]  }
 0x476   :  { %27059 = vmatprep.subr.bf16.mxu1 %v29406_v57  ;;  %v29442_v55 = vld [vmem:[#allocation5 + $0x22d8] sm:$0xff]  }
 0x478   :  { %27038 = vmatpush3.bf16.msra.mxu0 %v29405_v56  ;;  %v29443_v56 = vld [vmem:[#allocation5 + $0x2298] sm:$0xff]  }
 0x479   :  { %27060 = vmatpush3.bf16.msra.mxu1 %v29407_v58  ;;  %27039 = vmatprep.subr.bf16.mxu0 %v29408_v59  ;;  %v29444_v58 = vld [vmem:[#allocation5 + $0x2250] sm:$0xff]  }
 0x47a   :  { %27061 = vmatprep.subr.bf16.mxu1 %v29410_v61  ;;  %v29445_v59 = vld [vmem:[#allocation5 + $0x2210] sm:$0xff]  }
 0x47b   :  { %v29446_v61 = vld [vmem:[#allocation5 + $0x22d0] sm:$0xff]  }
 0x47c   :  { %27040 = vmatpush3.bf16.msra.mxu0 %v29409_v60 }
 0x47d   :  { %27062 = vmatpush3.bf16.msra.mxu1 %v29411_v63  ;;  %27041 = vmatprep.subr.bf16.mxu0 %v29412_v0 }
 0x47e   :  { %27063 = vmatprep.subr.bf16.mxu1 %v29414_v5 }
 0x480   :  { %27042 = vmatpush3.bf16.msra.mxu0 %v29413_v2 }
 0x481   :  { %27064 = vmatpush3.bf16.msra.mxu1 %v29415_v8  ;;  %27043 = vmatprep.subr.bf16.mxu0 %v29416_v11 }
 0x482   :  { %v26783_v62 = vpop.f32.mrf.mxu0  ;;  %27065 = vmatprep.subr.bf16.mxu1 %v29418_v17  ;;  %v442_v17 = vadd.s32 17664, %v30458_v22 }
 0x483   :  { %v26805_v6 = vpop.f32.mrf.mxu1 }
 0x484   :  { %v26784_v1 = vpop.f32.mrf.mxu0  ;;  %27044 = vmatpush3.bf16.msra.mxu0 %v29417_v14  ;;  %v443_v14 = vadd.s32 17792, %v30458_v22 }
 0x485   :  { %v26785_v4 = vadd.f32 %v26784_v1, %v26783_v62  ;;  %v26806_v12 = vpop.f32.mrf.mxu1  ;;  %27066 = vmatpush3.bf16.msra.mxu1 %v29419_v20  ;;  %27045 = vmatprep.subr.bf16.mxu0 %v29420_v24  ;;  %v441_v62 = vadd.s32 17536, %v30458_v22  ;;  %v29447_v1 = vld [vmem:[#allocation5 + $0x2290] sm:$0xff]  }
 0x486   :  { %v26786_v7 = vpop.f32.mrf.mxu0  ;;  %v26807_v16 = vadd.f32 %v26806_v12, %v26805_v6  ;;  %v29449_v6 = vld [vmem:[#allocation5 + $0x2208] sm:$0xff]   ;;  %v693_v24 = vand.u32 31, %v443_v14 }
 0x487   :  { %v20006_v10 = vadd.f32 %v26785_v4, %v30794_v28  ;;  %v26808_v19 = vpop.f32.mrf.mxu1  ;;  %v29422_v28 = vld [vmem:[#allocation5 + $0x21c0] sm:$0xff]   ;;  %v440_v7 = vadd.s32 17408, %v30458_v22  ;;  %v691_v11 = vand.u32 31, %v441_v62 }
 0x488   :  { %v26787_v13 = vpop.f32.mrf.mxu0  ;;  %27046 = vmatpush3.bf16.msra.mxu0 %v29421_v27  ;;  %27067 = vmatprep.subr.bf16.mxu1 %v29422_v28  ;;  %v29453_v19 = vld [vmem:[#allocation5 + $0x2200] sm:$0xff]   ;;  %v692_v27 = vand.u32 31, %v442_v17  ;;  %v29456_v28 = vld [vmem:[#allocation5 + $0x2378] sm:$0xff]   ;;  %vm943_vm4 = vcmp.eq.s32.totalorder %v693_v24, %v192_v29  ;;  %v29493_v29 = vld [vmem:[#allocation5 + $0x2430] sm:$0xff]  }
 0x489   :  { %v30805_v23 = vadd.f32 %v26807_v16, %v20006_v10  ;;  %v26809_v26 = vpop.f32.mrf.mxu1  ;;  %27068 = vmatpush3.bf16.msra.mxu1 %v29423_v31  ;;  %27075 = vmatprep.subr.bf16.mxu0 %v29424_v34  ;;  %v29450_v10 = vld [vmem:[#allocation5 + $0x22c8] sm:$0xff]   ;;  %v29452_v16 = vld [vmem:[#allocation5 + $0x2240] sm:$0xff]   ;;  %v690_v20 = vand.u32 31, %v440_v7  ;;  %vm25355_vm5 = vmpackc.low %vm943_vm4, %vm943_vm4 }
 0x48a   :  { %27097 = vmatprep.subr.bf16.mxu1 %v29426_v38  ;;  %v29451_v13 = vld [vmem:[#allocation5 + $0x2288] sm:$0xff]   ;;  %v189_v26 = vld [vmem:[#allocation2 + $0x440] sm:$0xff]  ;;  %v191_v31 = vld [vmem:[#allocation2 + $0x450] sm:$0xff] }
 0x48b   :  { %25346 = vmatmul.mubr.msk.bf16.vlgmr.msra.gmra.mxu0 %vm25345_vm11, %v30427_v44  ;;  %vm940_vm2 = vcmp.eq.s32.totalorder %v690_v20, %v189_v26  ;;  %vm942_vm6 = vcmp.eq.s32.totalorder %v692_v27, %v191_v31  ;;  %v29460_v34 = vld [vmem:[#allocation5 + $0x2370] sm:$0xff]   ;;  %v29464_v38 = vld [vmem:[#allocation5 + $0x2368] sm:$0xff]   ;;  %v29489_v24 = vld [vmem:[#allocation5 + $0x2438] sm:$0xff]  }
 0x48c   :  { %27076 = vmatpush3.bf16.msra.mxu0 %v29425_v36  ;;  %25350 = vmatmul.mubr.msk.bf16.vlgmr.msra.gmra.mxu1 %vm25349_vm15, %v30427_v44  ;;  %vm25353_vm3 = vmpackc.low %vm940_vm2, %vm940_vm2  ;;  %v29462_v36 = vld [vmem:[#allocation5 + $0x23f0] sm:$0xff]   ;;  %v29483_v7 = vld [vmem:[#allocation5 + $0x2388] sm:$0xff]  }
 0x48d   :  { %27098 = vmatpush3.bf16.msra.mxu1 %v29427_v39  ;;  %27077 = vmatprep.subr.bf16.mxu0 %v29428_v40  ;;  %vm25357_vm7 = vmpackc.low %vm942_vm6, %vm942_vm6  ;;  %v29465_v39 = vld [vmem:[#allocation5 + $0x2328] sm:$0xff]   ;;  %v29490_v26 = vld [vmem:[#allocation5 + $0x24f8] sm:$0xff]  }
 0x48e   :  { %27099 = vmatprep.subr.bf16.mxu1 %v29430_v42  ;;  %25356 = vmatprep.mubr.msk.bf16.mxu1 %vm25355_vm5, %v30427_v44  ;;  %v29466_v40 = vld [vmem:[#allocation5 + $0x23e8] sm:$0xff]   ;;  %v29468_v42 = vld [vmem:[#allocation5 + $0x2360] sm:$0xff]   ;;  %v29491_v27 = vld [vmem:[#allocation5 + $0x24b8] sm:$0xff]  }
 0x48f   :  { %v29495_v31 = vld [vmem:[#allocation5 + $0x24b0] sm:$0xff]  }
 0x490   :  { %27078 = vmatpush3.bf16.msra.mxu0 %v29429_v41  ;;  %v29467_v41 = vld [vmem:[#allocation5 + $0x23a8] sm:$0xff]  }
 0x491   :  { %27100 = vmatpush3.bf16.msra.mxu1 %v29431_v43  ;;  %27079 = vmatprep.subr.bf16.mxu0 %v29432_v45  ;;  %v29469_v43 = vld [vmem:[#allocation5 + $0x2320] sm:$0xff]  }
 0x492   :  { %27101 = vmatprep.subr.bf16.mxu1 %v29434_v47  ;;  %v29470_v45 = vld [vmem:[#allocation5 + $0x23e0] sm:$0xff]   ;;  %v29472_v47 = vld [vmem:[#allocation5 + $0x2358] sm:$0xff]  }
 0x494   :  { %27080 = vmatpush3.bf16.msra.mxu0 %v29433_v46  ;;  %v29471_v46 = vld [vmem:[#allocation5 + $0x23a0] sm:$0xff]  }
 0x495   :  { %27102 = vmatpush3.bf16.msra.mxu1 %v29435_v48  ;;  %27081 = vmatprep.subr.bf16.mxu0 %v29436_v49  ;;  %v29473_v48 = vld [vmem:[#allocation5 + $0x2318] sm:$0xff]  }
 0x496   :  { %27103 = vmatprep.subr.bf16.mxu1 %v29438_v51  ;;  %v29474_v49 = vld [vmem:[#allocation5 + $0x23d8] sm:$0xff]  }
 0x498   :  { %27082 = vmatpush3.bf16.msra.mxu0 %v29437_v50  ;;  %v29475_v50 = vld [vmem:[#allocation5 + $0x2398] sm:$0xff]  }
 0x499   :  { %27104 = vmatpush3.bf16.msra.mxu1 %v29439_v52  ;;  %27083 = vmatprep.subr.bf16.mxu0 %v29440_v53  ;;  %v29476_v52 = vld [vmem:[#allocation5 + $0x2350] sm:$0xff]  }
 0x49a   :  { %27105 = vmatprep.subr.bf16.mxu1 %v29442_v55  ;;  %v29477_v53 = vld [vmem:[#allocation5 + $0x2310] sm:$0xff]  }
 0x49b   :  { %v29478_v55 = vld [vmem:[#allocation5 + $0x23d0] sm:$0xff]  }
 0x49c   :  { %27084 = vmatpush3.bf16.msra.mxu0 %v29441_v54 }
 0x49d   :  { %27106 = vmatpush3.bf16.msra.mxu1 %v29443_v56  ;;  %27085 = vmatprep.subr.bf16.mxu0 %v29444_v58  ;;  %v29479_v58 = vld [vmem:[#allocation5 + $0x2390] sm:$0xff]  }
 0x49e   :  { %27107 = vmatprep.subr.bf16.mxu1 %v29446_v61  ;;  %v29480_v61 = vld [vmem:[#allocation5 + $0x2348] sm:$0xff]  }
 0x4a0   :  { %27086 = vmatpush3.bf16.msra.mxu0 %v29445_v59  ;;  %v445_v59 = vadd.s32 18048, %v30458_v22 }
 0x4a1   :  { %27108 = vmatpush3.bf16.msra.mxu1 %v29447_v1  ;;  %27087 = vmatprep.subr.bf16.mxu0 %v29448_v3  ;;  %v444_v1 = vadd.s32 17920, %v30458_v22 }
 0x4a2   :  { %27109 = vmatprep.subr.bf16.mxu1 %v29450_v10  ;;  %v29484_v10 = vld [vmem:[#allocation5 + $0x2340] sm:$0xff]  }
 0x4a3   :  { %v26849_v0 = vpop.f32.mrf.mxu1  ;;  %v694_v14 = vand.u32 31, %v444_v1 }
 0x4a4   :  { %27088 = vmatpush3.bf16.msra.mxu0 %v29449_v6 }
 0x4a5   :  { %v26850_v5 = vpop.f32.mrf.mxu1  ;;  %27110 = vmatpush3.bf16.msra.mxu1 %v29451_v13  ;;  %27089 = vmatprep.subr.bf16.mxu0 %v29452_v16  ;;  %v29485_v13 = vld [vmem:[#allocation5 + $0x2300] sm:$0xff]   ;;  %v194_v16 = vld [vmem:[#allocation2 + $0x468] sm:$0xff] }
 0x4a6   :  { %v26851_v8 = vadd.f32 %v26850_v5, %v26849_v0  ;;  %27111 = vmatprep.subr.bf16.mxu1 %v29454_v21  ;;  %v29481_v0 = vld [vmem:[#allocation5 + $0x2308] sm:$0xff]   ;;  %v447_v5 = vadd.s32 18304, %v30458_v22  ;;  %v29488_v21 = vld [vmem:[#allocation5 + $0x2478] sm:$0xff]  }
 0x4a7   :  { %v26852_v12 = vpop.f32.mrf.mxu1 }
 0x4a8   :  { %27090 = vmatpush3.bf16.msra.mxu0 %v29453_v19  ;;  %v697_v17 = vand.u32 31, %v447_v5  ;;  %v193_v19 = vld [vmem:[#allocation2 + $0x460] sm:$0xff]  ;;  %v29516_v5 = vld [vmem:[#allocation5 + $0x2440] sm:$0xff]  }
 0x4a9   :  { %v26853_v18 = vpop.f32.mrf.mxu1  ;;  %27112 = vmatpush3.bf16.msra.mxu1 %v29455_v25  ;;  %27119 = vmatprep.subr.bf16.mxu0 %v29456_v28  ;;  %vm944_vm10 = vcmp.eq.s32.totalorder %v694_v14, %v193_v19  ;;  %v195_v25 = vld [vmem:[#allocation2 + $0x470] sm:$0xff]  ;;  %v29492_v28 = vld [vmem:[#allocation5 + $0x2470] sm:$0xff]   ;;  %v29522_v19 = vld [vmem:[#allocation5 + $0x25f8] sm:$0xff]  }
 0x4aa   :  { %27141 = vmatprep.subr.bf16.mxu1 %v29458_v32  ;;  %v29487_v18 = vld [vmem:[#allocation5 + $0x2380] sm:$0xff]   ;;  %vm25361_vm11 = vmpackc.low %vm944_vm10, %vm944_vm10  ;;  %v29496_v32 = vld [vmem:[#allocation5 + $0x2468] sm:$0xff]  }
 0x4ab   :  { %v26827_v57 = vpop.f32.mrf.mxu0 }
 0x4ac   :  { %25358 = vmatmul.mubr.msk.bf16.vlgmr.msra.gmra.mxu1 %vm25357_vm7, %v30427_v44 }
 0x4ad   :  { %v26828_v60 = vpop.f32.mrf.mxu0  ;;  %27142 = vmatpush3.bf16.msra.mxu1 %v29459_v33  ;;  %v29497_v33 = vld [vmem:[#allocation5 + $0x2428] sm:$0xff]  }
 0x4ae   :  { %v26829_v63 = vadd.f32 %v26828_v60, %v26827_v57  ;;  %27143 = vmatprep.subr.bf16.mxu1 %v29462_v36  ;;  %v29500_v36 = vld [vmem:[#allocation5 + $0x2460] sm:$0xff]  }
 0x4af   :  { %v26830_v2 = vpop.f32.mrf.mxu0 }
 0x4b0   :  { %v20086_v4 = vadd.f32 %v26829_v63, %v30805_v23  ;;  %v190_v23 = vld [vmem:[#allocation2 + $0x448] sm:$0xff] }
 0x4b1   :  { %v26831_v9 = vpop.f32.mrf.mxu0  ;;  %vm941_vm0 = vcmp.eq.s32.totalorder %v691_v11, %v190_v23  ;;  %27144 = vmatpush3.bf16.msra.mxu1 %v29463_v37  ;;  %v446_v11 = vadd.s32 18176, %v30458_v22  ;;  %v196_v23 = vld [vmem:[#allocation2 + $0x478] sm:$0xff]  ;;  %v29501_v37 = vld [vmem:[#allocation5 + $0x2420] sm:$0xff]  }
 0x4b2   :  { %v30816_v15 = vadd.f32 %v26851_v8, %v20086_v4  ;;  %vm25351_vm1 = vmpackc.low %vm941_vm0, %vm941_vm0  ;;  %27145 = vmatprep.subr.bf16.mxu1 %v29466_v40  ;;  %v29482_v4 = vld [vmem:[#allocation5 + $0x23c8] sm:$0xff]   ;;  %v695_v8 = vand.u32 31, %v445_v59  ;;  %vm947_vm12 = vcmp.eq.s32.totalorder %v697_v17, %v196_v23  ;;  %v29504_v40 = vld [vmem:[#allocation5 + $0x2458] sm:$0xff]  }
 0x4b3   :  { %25352 = vmatprep.mubr.msk.bf16.mxu0 %vm25351_vm1, %v30427_v44  ;;  %v696_v20 = vand.u32 31, %v446_v11  ;;  %vm25363_vm13 = vmpackc.low %vm947_vm12, %vm947_vm12  ;;  %v29521_v17 = vld [vmem:[#allocation5 + $0x2538] sm:$0xff]   ;;  %v29525_v23 = vld [vmem:[#allocation5 + $0x2530] sm:$0xff]  }
 0x4b4   :  { %25354 = vmatmul.mubr.msk.bf16.vlgmr.msra.gmra.mxu0 %vm25353_vm3, %v30427_v44  ;;  %vm945_vm8 = vcmp.eq.s32.totalorder %v695_v8, %v194_v16  ;;  %25364 = vmatprep.mubr.msk.bf16.mxu1 %vm25363_vm13, %v30427_v44  ;;  %v29517_v8 = vld [vmem:[#allocation5 + $0x2400] sm:$0xff]   ;;  %v200_v16 = vld [vmem:[#allocation2 + $0x498] sm:$0xff] }
 0x4b5   :  { %27120 = vmatpush3.bf16.msra.mxu0 %v29457_v30  ;;  %27146 = vmatpush3.bf16.msra.mxu1 %v29467_v41  ;;  %vm25359_vm9 = vmpackc.low %vm945_vm8, %vm945_vm8  ;;  %vm946_vm14 = vcmp.eq.s32.totalorder %v696_v20, %v195_v25  ;;  %v29494_v30 = vld [vmem:[#allocation5 + $0x24f0] sm:$0xff]   ;;  %v29505_v41 = vld [vmem:[#allocation5 + $0x2418] sm:$0xff]  }
 0x4b6   :  { %27121 = vmatprep.subr.bf16.mxu0 %v29460_v34  ;;  %27147 = vmatprep.subr.bf16.mxu1 %v29470_v45  ;;  %vm25365_vm15 = vmpackc.low %vm946_vm14, %vm946_vm14  ;;  %v29498_v34 = vld [vmem:[#allocation5 + $0x24e8] sm:$0xff]   ;;  %v29507_v45 = vld [vmem:[#allocation5 + $0x2498] sm:$0xff]  }
 0x4b7   :  { %25360 = vmatprep.mubr.msk.bf16.mxu0 %vm25359_vm9, %v30427_v44  ;;  %v29523_v20 = vld [vmem:[#allocation5 + $0x25b8] sm:$0xff]   ;;  %v29527_v25 = vld [vmem:[#allocation5 + $0x25b0] sm:$0xff]  }
 0x4b9   :  { %27122 = vmatpush3.bf16.msra.mxu0 %v29461_v35  ;;  %27148 = vmatpush3.bf16.msra.mxu1 %v29471_v46  ;;  %v29499_v35 = vld [vmem:[#allocation5 + $0x24a8] sm:$0xff]   ;;  %v29508_v46 = vld [vmem:[#allocation5 + $0x2450] sm:$0xff]  }
 0x4ba   :  { %27123 = vmatprep.subr.bf16.mxu0 %v29464_v38  ;;  %27149 = vmatprep.subr.bf16.mxu1 %v29474_v49  ;;  %v29502_v38 = vld [vmem:[#allocation5 + $0x24e0] sm:$0xff]   ;;  %v449_v49 = vadd.s32 18560, %v30458_v22 }
 0x4bd   :  { %27124 = vmatpush3.bf16.msra.mxu0 %v29465_v39  ;;  %27150 = vmatpush3.bf16.msra.mxu1 %v29475_v50  ;;  %v29503_v39 = vld [vmem:[#allocation5 + $0x24a0] sm:$0xff]  }
 0x4be   :  { %27125 = vmatprep.subr.bf16.mxu0 %v29468_v42  ;;  %27151 = vmatprep.subr.bf16.mxu1 %v29478_v55  ;;  %v29506_v42 = vld [vmem:[#allocation5 + $0x24d8] sm:$0xff]   ;;  %v448_v55 = vadd.s32 18432, %v30458_v22 }
 0x4c1   :  { %27126 = vmatpush3.bf16.msra.mxu0 %v29469_v43  ;;  %27152 = vmatpush3.bf16.msra.mxu1 %v29479_v58 }
 0x4c2   :  { %27127 = vmatprep.subr.bf16.mxu0 %v29472_v47  ;;  %27153 = vmatprep.subr.bf16.mxu1 %v29482_v4 }
 0x4c5   :  { %27128 = vmatpush3.bf16.msra.mxu0 %v29473_v48  ;;  %27154 = vmatpush3.bf16.msra.mxu1 %v29483_v7  ;;  %v29509_v48 = vld [vmem:[#allocation5 + $0x2410] sm:$0xff]  }
 0x4c6   :  { %27129 = vmatprep.subr.bf16.mxu0 %v29476_v52 }
 0x4c9   :  { %27130 = vmatpush3.bf16.msra.mxu0 %v29477_v53 }
 0x4ca   :  { %27131 = vmatprep.subr.bf16.mxu0 %v29480_v61  ;;  %v699_v61 = vand.u32 31, %v449_v49  ;;  %v29544_v49 = vld [vmem:[#allocation5 + $0x2548] sm:$0xff]  }
 0x4cb   :  { %v26871_v51 = vpop.f32.mrf.mxu0 }
 0x4cc   :  { %v26893_v57 = vpop.f32.mrf.mxu1 }
 0x4cd   :  { %v26872_v54 = vpop.f32.mrf.mxu0  ;;  %27132 = vmatpush3.bf16.msra.mxu0 %v29481_v0  ;;  %v451_v0 = vadd.s32 18816, %v30458_v22 }
 0x4ce   :  { %v26873_v56 = vadd.f32 %v26872_v54, %v26871_v51  ;;  %v26894_v63 = vpop.f32.mrf.mxu1  ;;  %27133 = vmatprep.subr.bf16.mxu0 %v29484_v10  ;;  %v29510_v51 = vld [vmem:[#allocation5 + $0x24d0] sm:$0xff]   ;;  %v198_v10 = vld [vmem:[#allocation2 + $0x488] sm:$0xff] }
 0x4cf   :  { %v26874_v60 = vpop.f32.mrf.mxu0  ;;  %v26895_v2 = vadd.f32 %v26894_v63, %v26893_v57  ;;  %v29511_v54 = vld [vmem:[#allocation5 + $0x2490] sm:$0xff]   ;;  %v29512_v57 = vld [vmem:[#allocation5 + $0x2448] sm:$0xff]   ;;  %v701_v11 = vand.u32 31, %v451_v0  ;;  %vm949_vm0 = vcmp.eq.s32.totalorder %v699_v61, %v198_v10 }
 0x4d0   :  { %v20166_v62 = vadd.f32 %v26873_v56, %v30816_v15  ;;  %v26896_v6 = vpop.f32.mrf.mxu1  ;;  %v29486_v15 = vld [vmem:[#allocation5 + $0x23c0] sm:$0xff]   ;;  %v29513_v60 = vld [vmem:[#allocation5 + $0x2408] sm:$0xff]   ;;  %vm25367_vm1 = vmpackc.low %vm949_vm0, %vm949_vm0 }
 0x4d1   :  { %v26875_v3 = vpop.f32.mrf.mxu0  ;;  %27134 = vmatpush3.bf16.msra.mxu0 %v29485_v13  ;;  %27155 = vmatprep.subr.bf16.mxu1 %v29486_v15  ;;  %v29514_v63 = vld [vmem:[#allocation5 + $0x24c8] sm:$0xff]   ;;  %v450_v6 = vadd.s32 18688, %v30458_v22  ;;  %v197_v13 = vld [vmem:[#allocation2 + $0x480] sm:$0xff]  ;;  %v29520_v15 = vld [vmem:[#allocation5 + $0x2578] sm:$0xff]   ;;  %vm951_vm4 = vcmp.eq.s32.totalorder %v701_v11, %v200_v16 }
 0x4d2   :  { %v30827_v9 = vadd.f32 %v26895_v2, %v20166_v62  ;;  %v26897_v12 = vpop.f32.mrf.mxu1  ;;  %27156 = vmatpush3.bf16.msra.mxu1 %v29487_v18  ;;  %27163 = vmatprep.subr.bf16.mxu0 %v29488_v21  ;;  %v29515_v2 = vld [vmem:[#allocation5 + $0x2488] sm:$0xff]   ;;  %v698_v3 = vand.u32 31, %v448_v55  ;;  %vm25371_vm5 = vmpackc.low %vm951_vm4, %vm951_vm4  ;;  %v199_v18 = vld [vmem:[#allocation2 + $0x490] sm:$0xff] }
 0x4d3   :  { %27185 = vmatprep.subr.bf16.mxu1 %v29490_v26  ;;  %v29519_v12 = vld [vmem:[#allocation5 + $0x2480] sm:$0xff]   ;;  %v700_v14 = vand.u32 31, %v450_v6  ;;  %v29524_v21 = vld [vmem:[#allocation5 + $0x2570] sm:$0xff]   ;;  %v29528_v26 = vld [vmem:[#allocation5 + $0x2568] sm:$0xff]  }
 0x4d4   :  { %25362 = vmatmul.mubr.msk.bf16.vlgmr.msra.gmra.mxu0 %vm25361_vm11, %v30427_v44  ;;  %vm948_vm2 = vcmp.eq.s32.totalorder %v698_v3, %v197_v13  ;;  %v29550_v3 = vld [vmem:[#allocation5 + $0x25c0] sm:$0xff]   ;;  %v204_v10 = vld [vmem:[#allocation2 + $0x4b8] sm:$0xff]  ;;  %v29553_v11 = vld [vmem:[#allocation5 + $0x2638] sm:$0xff]  }
 0x4d5   :  { %27164 = vmatpush3.bf16.msra.mxu0 %v29489_v24  ;;  %25366 = vmatmul.mubr.msk.bf16.vlgmr.msra.gmra.mxu1 %vm25365_vm15, %v30427_v44  ;;  %vm25369_vm3 = vmpackc.low %vm948_vm2, %vm948_vm2  ;;  %vm950_vm6 = vcmp.eq.s32.totalorder %v700_v14, %v199_v18  ;;  %v29526_v24 = vld [vmem:[#allocation5 + $0x25f0] sm:$0xff]   ;;  %v29551_v6 = vld [vmem:[#allocation5 + $0x2580] sm:$0xff]  }
 0x4d6   :  { %27186 = vmatpush3.bf16.msra.mxu1 %v29491_v27  ;;  %27165 = vmatprep.subr.bf16.mxu0 %v29492_v28  ;;  %vm25373_vm7 = vmpackc.low %vm950_vm6, %vm950_vm6  ;;  %v29529_v27 = vld [vmem:[#allocation5 + $0x2528] sm:$0xff]   ;;  %v29554_v13 = vld [vmem:[#allocation5 + $0x26f8] sm:$0xff]  }
 0x4d7   :  { %27187 = vmatprep.subr.bf16.mxu1 %v29494_v30  ;;  %25368 = vmatprep.mubr.msk.bf16.mxu0 %vm25367_vm1, %v30427_v44  ;;  %v29530_v28 = vld [vmem:[#allocation5 + $0x25e8] sm:$0xff]   ;;  %v29532_v30 = vld [vmem:[#allocation5 + $0x2560] sm:$0xff]   ;;  %v29555_v14 = vld [vmem:[#allocation5 + $0x26b8] sm:$0xff]  }
 0x4d8   :  { %25372 = vmatprep.mubr.msk.bf16.mxu1 %vm25371_vm5, %v30427_v44  ;;  %v29557_v16 = vld [vmem:[#allocation5 + $0x2630] sm:$0xff]  }
 0x4d9   :  { %27166 = vmatpush3.bf16.msra.mxu0 %v29493_v29  ;;  %v29531_v29 = vld [vmem:[#allocation5 + $0x25a8] sm:$0xff]   ;;  %v29559_v18 = vld [vmem:[#allocation5 + $0x26b0] sm:$0xff]  }
 0x4da   :  { %27188 = vmatpush3.bf16.msra.mxu1 %v29495_v31  ;;  %27167 = vmatprep.subr.bf16.mxu0 %v29496_v32  ;;  %v29533_v31 = vld [vmem:[#allocation5 + $0x2520] sm:$0xff]  }
 0x4db   :  { %27189 = vmatprep.subr.bf16.mxu1 %v29498_v34  ;;  %v29534_v32 = vld [vmem:[#allocation5 + $0x25e0] sm:$0xff]   ;;  %v29536_v34 = vld [vmem:[#allocation5 + $0x2558] sm:$0xff]  }
 0x4dd   :  { %27168 = vmatpush3.bf16.msra.mxu0 %v29497_v33  ;;  %v29535_v33 = vld [vmem:[#allocation5 + $0x25a0] sm:$0xff]  }
 0x4de   :  { %27190 = vmatpush3.bf16.msra.mxu1 %v29499_v35  ;;  %27169 = vmatprep.subr.bf16.mxu0 %v29500_v36  ;;  %v29537_v35 = vld [vmem:[#allocation5 + $0x2518] sm:$0xff]  }
 0x4df   :  { %27191 = vmatprep.subr.bf16.mxu1 %v29502_v38  ;;  %v29538_v36 = vld [vmem:[#allocation5 + $0x25d8] sm:$0xff]  }
 0x4e1   :  { %27170 = vmatpush3.bf16.msra.mxu0 %v29501_v37  ;;  %v29539_v37 = vld [vmem:[#allocation5 + $0x2598] sm:$0xff]  }
 0x4e2   :  { %27192 = vmatpush3.bf16.msra.mxu1 %v29503_v39  ;;  %27171 = vmatprep.subr.bf16.mxu0 %v29504_v40  ;;  %v29540_v39 = vld [vmem:[#allocation5 + $0x2550] sm:$0xff]  }
 0x4e3   :  { %27193 = vmatprep.subr.bf16.mxu1 %v29506_v42  ;;  %v29541_v40 = vld [vmem:[#allocation5 + $0x2510] sm:$0xff]  }
 0x4e4   :  { %v29542_v42 = vld [vmem:[#allocation5 + $0x25d0] sm:$0xff]  }
 0x4e5   :  { %27172 = vmatpush3.bf16.msra.mxu0 %v29505_v41 }
 0x4e6   :  { %27194 = vmatpush3.bf16.msra.mxu1 %v29507_v45  ;;  %27173 = vmatprep.subr.bf16.mxu0 %v29508_v46 }
 0x4e7   :  { %27195 = vmatprep.subr.bf16.mxu1 %v29510_v51 }
 0x4e9   :  { %27174 = vmatpush3.bf16.msra.mxu0 %v29509_v48 }
 0x4ea   :  { %27196 = vmatpush3.bf16.msra.mxu1 %v29511_v54  ;;  %27175 = vmatprep.subr.bf16.mxu0 %v29512_v57 }
 0x4eb   :  { %v26915_v43 = vpop.f32.mrf.mxu0  ;;  %27197 = vmatprep.subr.bf16.mxu1 %v29514_v63  ;;  %v454_v63 = vadd.s32 19200, %v30458_v22 }
 0x4ec   :  { %v26937_v52 = vpop.f32.mrf.mxu1 }
 0x4ed   :  { %v26916_v47 = vpop.f32.mrf.mxu0  ;;  %27176 = vmatpush3.bf16.msra.mxu0 %v29513_v60  ;;  %v455_v60 = vadd.s32 19328, %v30458_v22 }
 0x4ee   :  { %v26917_v50 = vadd.f32 %v26916_v47, %v26915_v43  ;;  %v26938_v58 = vpop.f32.mrf.mxu1  ;;  %27198 = vmatpush3.bf16.msra.mxu1 %v29515_v2  ;;  %27177 = vmatprep.subr.bf16.mxu0 %v29516_v5  ;;  %v453_v43 = vadd.s32 19072, %v30458_v22  ;;  %v29543_v47 = vld [vmem:[#allocation5 + $0x2590] sm:$0xff]  }
 0x4ef   :  { %v26918_v53 = vpop.f32.mrf.mxu0  ;;  %v26939_v62 = vadd.f32 %v26938_v58, %v26937_v52  ;;  %v29545_v52 = vld [vmem:[#allocation5 + $0x2508] sm:$0xff]   ;;  %v705_v5 = vand.u32 31, %v455_v60 }
 0x4f0   :  { %v20246_v56 = vadd.f32 %v26917_v50, %v30827_v9  ;;  %v26940_v1 = vpop.f32.mrf.mxu1  ;;  %v29518_v9 = vld [vmem:[#allocation5 + $0x24c0] sm:$0xff]   ;;  %v452_v53 = vadd.s32 18944, %v30458_v22  ;;  %v703_v57 = vand.u32 31, %v453_v43 }
 0x4f1   :  { %v26919_v59 = vpop.f32.mrf.mxu0  ;;  %27178 = vmatpush3.bf16.msra.mxu0 %v29517_v8  ;;  %27199 = vmatprep.subr.bf16.mxu1 %v29518_v9  ;;  %v29549_v1 = vld [vmem:[#allocation5 + $0x2500] sm:$0xff]   ;;  %v704_v8 = vand.u32 31, %v454_v63  ;;  %v29552_v9 = vld [vmem:[#allocation5 + $0x2678] sm:$0xff]   ;;  %vm955_vm12 = vcmp.eq.s32.totalorder %v705_v5, %v204_v10  ;;  %v29589_v10 = vld [vmem:[#allocation5 + $0x2730] sm:$0xff]  }
 0x4f2   :  { %v30838_v4 = vadd.f32 %v26939_v62, %v20246_v56  ;;  %v26941_v7 = vpop.f32.mrf.mxu1  ;;  %27200 = vmatpush3.bf16.msra.mxu1 %v29519_v12  ;;  %27207 = vmatprep.subr.bf16.mxu0 %v29520_v15  ;;  %v29546_v56 = vld [vmem:[#allocation5 + $0x25c8] sm:$0xff]   ;;  %v29548_v62 = vld [vmem:[#allocation5 + $0x2540] sm:$0xff]   ;;  %v702_v2 = vand.u32 31, %v452_v53  ;;  %vm25379_vm13 = vmpackc.low %vm955_vm12, %vm955_vm12 }
 0x4f3   :  { %27229 = vmatprep.subr.bf16.mxu1 %v29522_v19  ;;  %v29547_v59 = vld [vmem:[#allocation5 + $0x2588] sm:$0xff]   ;;  %v201_v7 = vld [vmem:[#allocation2 + $0x4a0] sm:$0xff]  ;;  %v203_v12 = vld [vmem:[#allocation2 + $0x4b0] sm:$0xff] }
 0x4f4   :  { %25370 = vmatmul.mubr.msk.bf16.vlgmr.msra.gmra.mxu0 %vm25369_vm3, %v30427_v44  ;;  %vm952_vm10 = vcmp.eq.s32.totalorder %v702_v2, %v201_v7  ;;  %vm954_vm14 = vcmp.eq.s32.totalorder %v704_v8, %v203_v12  ;;  %v29556_v15 = vld [vmem:[#allocation5 + $0x2670] sm:$0xff]   ;;  %v29560_v19 = vld [vmem:[#allocation5 + $0x2668] sm:$0xff]   ;;  %v29585_v5 = vld [vmem:[#allocation5 + $0x2738] sm:$0xff]  }
 0x4f5   :  { %27208 = vmatpush3.bf16.msra.mxu0 %v29521_v17  ;;  %25374 = vmatmul.mubr.msk.bf16.vlgmr.msra.gmra.mxu1 %vm25373_vm7, %v30427_v44  ;;  %vm25377_vm11 = vmpackc.low %vm952_vm10, %vm952_vm10  ;;  %v29558_v17 = vld [vmem:[#allocation5 + $0x26f0] sm:$0xff]   ;;  %v29579_v53 = vld [vmem:[#allocation5 + $0x2688] sm:$0xff]  }
 0x4f6   :  { %27230 = vmatpush3.bf16.msra.mxu1 %v29523_v20  ;;  %27209 = vmatprep.subr.bf16.mxu0 %v29524_v21  ;;  %vm25381_vm15 = vmpackc.low %vm954_vm14, %vm954_vm14  ;;  %v29561_v20 = vld [vmem:[#allocation5 + $0x2628] sm:$0xff]   ;;  %v29586_v7 = vld [vmem:[#allocation5 + $0x27f8] sm:$0xff]  }
 0x4f7   :  { %27231 = vmatprep.subr.bf16.mxu1 %v29526_v24  ;;  %25380 = vmatprep.mubr.msk.bf16.mxu1 %vm25379_vm13, %v30427_v44  ;;  %v29562_v21 = vld [vmem:[#allocation5 + $0x26e8] sm:$0xff]   ;;  %v29564_v24 = vld [vmem:[#allocation5 + $0x2660] sm:$0xff]   ;;  %v29587_v8 = vld [vmem:[#allocation5 + $0x27b8] sm:$0xff]  }
 0x4f8   :  { %v29591_v12 = vld [vmem:[#allocation5 + $0x27b0] sm:$0xff]  }
 0x4f9   :  { %27210 = vmatpush3.bf16.msra.mxu0 %v29525_v23  ;;  %v29563_v23 = vld [vmem:[#allocation5 + $0x26a8] sm:$0xff]  }
 0x4fa   :  { %27232 = vmatpush3.bf16.msra.mxu1 %v29527_v25  ;;  %27211 = vmatprep.subr.bf16.mxu0 %v29528_v26  ;;  %v29565_v25 = vld [vmem:[#allocation5 + $0x2620] sm:$0xff]  }
 0x4fb   :  { %27233 = vmatprep.subr.bf16.mxu1 %v29530_v28  ;;  %v29566_v26 = vld [vmem:[#allocation5 + $0x26e0] sm:$0xff]   ;;  %v29568_v28 = vld [vmem:[#allocation5 + $0x2658] sm:$0xff]  }
 0x4fd   :  { %27212 = vmatpush3.bf16.msra.mxu0 %v29529_v27  ;;  %v29567_v27 = vld [vmem:[#allocation5 + $0x26a0] sm:$0xff]  }
 0x4fe   :  { %27234 = vmatpush3.bf16.msra.mxu1 %v29531_v29  ;;  %27213 = vmatprep.subr.bf16.mxu0 %v29532_v30  ;;  %v29569_v29 = vld [vmem:[#allocation5 + $0x2618] sm:$0xff]  }
 0x4ff   :  { %27235 = vmatprep.subr.bf16.mxu1 %v29534_v32  ;;  %v29570_v30 = vld [vmem:[#allocation5 + $0x26d8] sm:$0xff]  }
 0x501   :  { %27214 = vmatpush3.bf16.msra.mxu0 %v29533_v31  ;;  %v29571_v31 = vld [vmem:[#allocation5 + $0x2698] sm:$0xff]  }
 0x502   :  { %27236 = vmatpush3.bf16.msra.mxu1 %v29535_v33  ;;  %27215 = vmatprep.subr.bf16.mxu0 %v29536_v34  ;;  %v29572_v33 = vld [vmem:[#allocation5 + $0x2650] sm:$0xff]  }
 0x503   :  { %27237 = vmatprep.subr.bf16.mxu1 %v29538_v36  ;;  %v29573_v34 = vld [vmem:[#allocation5 + $0x2610] sm:$0xff]  }
 0x504   :  { %v29574_v36 = vld [vmem:[#allocation5 + $0x26d0] sm:$0xff]  }
 0x505   :  { %27216 = vmatpush3.bf16.msra.mxu0 %v29537_v35 }
 0x506   :  { %27238 = vmatpush3.bf16.msra.mxu1 %v29539_v37  ;;  %27217 = vmatprep.subr.bf16.mxu0 %v29540_v39  ;;  %v29575_v39 = vld [vmem:[#allocation5 + $0x2690] sm:$0xff]  }
 0x507   :  { %27239 = vmatprep.subr.bf16.mxu1 %v29542_v42  ;;  %v29576_v42 = vld [vmem:[#allocation5 + $0x2648] sm:$0xff]  }
 0x509   :  { %27218 = vmatpush3.bf16.msra.mxu0 %v29541_v40  ;;  %v457_v40 = vadd.s32 19584, %v30458_v22 }
 0x50a   :  { %27240 = vmatpush3.bf16.msra.mxu1 %v29543_v47  ;;  %27219 = vmatprep.subr.bf16.mxu0 %v29544_v49  ;;  %v456_v47 = vadd.s32 19456, %v30458_v22 }
 0x50b   :  { %v26959_v38 = vpop.f32.mrf.mxu0  ;;  %27241 = vmatprep.subr.bf16.mxu1 %v29546_v56  ;;  %v29580_v56 = vld [vmem:[#allocation5 + $0x2640] sm:$0xff]  }
 0x50c   :  { %v26981_v46 = vpop.f32.mrf.mxu1  ;;  %v706_v60 = vand.u32 31, %v456_v47 }
 0x50d   :  { %v26960_v41 = vpop.f32.mrf.mxu0  ;;  %27220 = vmatpush3.bf16.msra.mxu0 %v29545_v52 }
 0x50e   :  { %v26961_v45 = vadd.f32 %v26960_v41, %v26959_v38  ;;  %v26982_v51 = vpop.f32.mrf.mxu1  ;;  %27242 = vmatpush3.bf16.msra.mxu1 %v29547_v59  ;;  %27221 = vmatprep.subr.bf16.mxu0 %v29548_v62  ;;  %v29581_v59 = vld [vmem:[#allocation5 + $0x2600] sm:$0xff]   ;;  %v206_v62 = vld [vmem:[#allocation2 + $0x4c8] sm:$0xff] }
 0x50f   :  { %v26962_v48 = vpop.f32.mrf.mxu0  ;;  %v26983_v54 = vadd.f32 %v26982_v51, %v26981_v46  ;;  %27243 = vmatprep.subr.bf16.mxu1 %v29550_v3  ;;  %v29577_v46 = vld [vmem:[#allocation5 + $0x2608] sm:$0xff]   ;;  %v459_v51 = vadd.s32 19840, %v30458_v22  ;;  %v29584_v3 = vld [vmem:[#allocation5 + $0x2778] sm:$0xff]  }
 0x510   :  { %v20326_v50 = vadd.f32 %v26961_v45, %v30838_v4  ;;  %v26984_v58 = vpop.f32.mrf.mxu1  ;;  %v202_v4 = vld [vmem:[#allocation2 + $0x4a8] sm:$0xff] }
 0x511   :  { %v26963_v55 = vpop.f32.mrf.mxu0  ;;  %27222 = vmatpush3.bf16.msra.mxu0 %v29549_v1  ;;  %vm953_vm8 = vcmp.eq.s32.totalorder %v703_v57, %v202_v4  ;;  %v458_v57 = vadd.s32 19712, %v30458_v22  ;;  %v709_v63 = vand.u32 31, %v459_v51  ;;  %v205_v1 = vld [vmem:[#allocation2 + $0x4c0] sm:$0xff]  ;;  %v208_v4 = vld [vmem:[#allocation2 + $0x4d8] sm:$0xff]  ;;  %v29612_v51 = vld [vmem:[#allocation5 + $0x2740] sm:$0xff]  }
 0x512   :  { %v30849_v61 = vadd.f32 %v26983_v54, %v20326_v50  ;;  %v26985_v0 = vpop.f32.mrf.mxu1  ;;  %vm25375_vm9 = vmpackc.low %vm953_vm8, %vm953_vm8  ;;  %27244 = vmatpush3.bf16.msra.mxu1 %v29551_v6  ;;  %27251 = vmatprep.subr.bf16.mxu0 %v29552_v9  ;;  %v29578_v50 = vld [vmem:[#allocation5 + $0x26c8] sm:$0xff]   ;;  %v707_v54 = vand.u32 31, %v457_v40  ;;  %vm956_vm2 = vcmp.eq.s32.totalorder %v706_v60, %v205_v1  ;;  %v207_v6 = vld [vmem:[#allocation2 + $0x4d0] sm:$0xff] }
 0x513   :  { %25376 = vmatprep.mubr.msk.bf16.mxu0 %vm25375_vm9, %v30427_v44  ;;  %27273 = vmatprep.subr.bf16.mxu1 %v29554_v13  ;;  %v29583_v0 = vld [vmem:[#allocation5 + $0x2680] sm:$0xff]   ;;  %v708_v2 = vand.u32 31, %v458_v57  ;;  %vm25385_vm3 = vmpackc.low %vm956_vm2, %vm956_vm2  ;;  %vm959_vm4 = vcmp.eq.s32.totalorder %v709_v63, %v208_v4  ;;  %v29588_v9 = vld [vmem:[#allocation5 + $0x2770] sm:$0xff]  }
 0x514   :  { %25378 = vmatmul.mubr.msk.bf16.vlgmr.msra.gmra.mxu0 %vm25377_vm11, %v30427_v44  ;;  %vm957_vm0 = vcmp.eq.s32.totalorder %v707_v54, %v206_v62  ;;  %vm25387_vm5 = vmpackc.low %vm959_vm4, %vm959_vm4  ;;  %v29592_v13 = vld [vmem:[#allocation5 + $0x2768] sm:$0xff]   ;;  %v29613_v54 = vld [vmem:[#allocation5 + $0x2700] sm:$0xff]  }
 0x515   :  { %27252 = vmatpush3.bf16.msra.mxu0 %v29553_v11  ;;  %25382 = vmatmul.mubr.msk.bf16.vlgmr.msra.gmra.mxu1 %vm25381_vm15, %v30427_v44  ;;  %vm25383_vm1 = vmpackc.low %vm957_vm0, %vm957_vm0  ;;  %vm958_vm6 = vcmp.eq.s32.totalorder %v708_v2, %v207_v6  ;;  %v29590_v11 = vld [vmem:[#allocation5 + $0x27f0] sm:$0xff]   ;;  %v212_v62 = vld [vmem:[#allocation2 + $0x4f8] sm:$0xff] }
 0x516   :  { %27274 = vmatpush3.bf16.msra.mxu1 %v29555_v14  ;;  %27253 = vmatprep.subr.bf16.mxu0 %v29556_v15  ;;  %vm25389_vm7 = vmpackc.low %vm958_vm6, %vm958_vm6  ;;  %v29593_v14 = vld [vmem:[#allocation5 + $0x2728] sm:$0xff]   ;;  %v29617_v63 = vld [vmem:[#allocation5 + $0x2838] sm:$0xff]  }
 0x517   :  { %27275 = vmatprep.subr.bf16.mxu1 %v29558_v17  ;;  %25384 = vmatprep.mubr.msk.bf16.mxu0 %vm25383_vm1, %v30427_v44  ;;  %v29594_v15 = vld [vmem:[#allocation5 + $0x27e8] sm:$0xff]   ;;  %v29596_v17 = vld [vmem:[#allocation5 + $0x2760] sm:$0xff]   ;;  %v29618_v1 = vld [vmem:[#allocation5 + $0x28f8] sm:$0xff]  }
 0x518   :  { %25388 = vmatprep.mubr.msk.bf16.mxu1 %vm25387_vm5, %v30427_v44  ;;  %v29619_v2 = vld [vmem:[#allocation5 + $0x28b8] sm:$0xff]   ;;  %v29621_v4 = vld [vmem:[#allocation5 + $0x2830] sm:$0xff]  }
 0x519   :  { %27254 = vmatpush3.bf16.msra.mxu0 %v29557_v16  ;;  %v29595_v16 = vld [vmem:[#allocation5 + $0x27a8] sm:$0xff]   ;;  %v29623_v6 = vld [vmem:[#allocation5 + $0x28b0] sm:$0xff]  }
 0x51a   :  { %27276 = vmatpush3.bf16.msra.mxu1 %v29559_v18  ;;  %27255 = vmatprep.subr.bf16.mxu0 %v29560_v19  ;;  %v29597_v18 = vld [vmem:[#allocation5 + $0x2720] sm:$0xff]  }
 0x51b   :  { %27277 = vmatprep.subr.bf16.mxu1 %v29562_v21  ;;  %v29598_v19 = vld [vmem:[#allocation5 + $0x27e0] sm:$0xff]   ;;  %v29600_v21 = vld [vmem:[#allocation5 + $0x2758] sm:$0xff]  }
 0x51d   :  { %27256 = vmatpush3.bf16.msra.mxu0 %v29561_v20  ;;  %v29599_v20 = vld [vmem:[#allocation5 + $0x27a0] sm:$0xff]  }
 0x51e   :  { %27278 = vmatpush3.bf16.msra.mxu1 %v29563_v23  ;;  %27257 = vmatprep.subr.bf16.mxu0 %v29564_v24  ;;  %v29601_v23 = vld [vmem:[#allocation5 + $0x2718] sm:$0xff]  }
 0x51f   :  { %27279 = vmatprep.subr.bf16.mxu1 %v29566_v26  ;;  %v29602_v24 = vld [vmem:[#allocation5 + $0x27d8] sm:$0xff]  }
 0x520   :  { %v29603_v26 = vld [vmem:[#allocation5 + $0x2798] sm:$0xff]  }
 0x521   :  { %27258 = vmatpush3.bf16.msra.mxu0 %v29565_v25 }
 0x522   :  { %27280 = vmatpush3.bf16.msra.mxu1 %v29567_v27  ;;  %27259 = vmatprep.subr.bf16.mxu0 %v29568_v28  ;;  %v29604_v27 = vld [vmem:[#allocation5 + $0x2750] sm:$0xff]  }
 0x523   :  { %27281 = vmatprep.subr.bf16.mxu1 %v29570_v30  ;;  %v461_v30 = vadd.s32 20096, %v30458_v22 }
 0x525   :  { %27260 = vmatpush3.bf16.msra.mxu0 %v29569_v29  ;;  %v29605_v29 = vld [vmem:[#allocation5 + $0x2710] sm:$0xff]  }
 0x526   :  { %27282 = vmatpush3.bf16.msra.mxu1 %v29571_v31  ;;  %27261 = vmatprep.subr.bf16.mxu0 %v29572_v33 }
 0x527   :  { %27283 = vmatprep.subr.bf16.mxu1 %v29574_v36  ;;  %v460_v36 = vadd.s32 19968, %v30458_v22 }
 0x529   :  { %27262 = vmatpush3.bf16.msra.mxu0 %v29573_v34 }
 0x52a   :  { %27284 = vmatpush3.bf16.msra.mxu1 %v29575_v39  ;;  %27263 = vmatprep.subr.bf16.mxu0 %v29576_v42  ;;  %v711_v42 = vand.u32 31, %v461_v30  ;;  %v29640_v30 = vld [vmem:[#allocation5 + $0x2848] sm:$0xff]  }
 0x52b   :  { %v27003_v32 = vpop.f32.mrf.mxu0  ;;  %27285 = vmatprep.subr.bf16.mxu1 %v29578_v50 }
 0x52c   :  { %v27025_v38 = vpop.f32.mrf.mxu1 }
 0x52d   :  { %v27004_v35 = vpop.f32.mrf.mxu0  ;;  %27264 = vmatpush3.bf16.msra.mxu0 %v29577_v46  ;;  %v463_v46 = vadd.s32 20352, %v30458_v22 }
 0x52e   :  { %v27005_v37 = vadd.f32 %v27004_v35, %v27003_v32  ;;  %v27026_v45 = vpop.f32.mrf.mxu1  ;;  %27286 = vmatpush3.bf16.msra.mxu1 %v29579_v53  ;;  %27265 = vmatprep.subr.bf16.mxu0 %v29580_v56  ;;  %v29606_v32 = vld [vmem:[#allocation5 + $0x27d0] sm:$0xff]   ;;  %v210_v56 = vld [vmem:[#allocation2 + $0x4e8] sm:$0xff] }
 0x52f   :  { %v27006_v41 = vpop.f32.mrf.mxu0  ;;  %v27027_v48 = vadd.f32 %v27026_v45, %v27025_v38  ;;  %v29607_v35 = vld [vmem:[#allocation5 + $0x2790] sm:$0xff]   ;;  %v29608_v38 = vld [vmem:[#allocation5 + $0x2748] sm:$0xff]   ;;  %v713_v57 = vand.u32 31, %v463_v46  ;;  %vm961_vm8 = vcmp.eq.s32.totalorder %v711_v42, %v210_v56 }
 0x530   :  { %v20406_v43 = vadd.f32 %v27005_v37, %v30849_v61  ;;  %v27028_v52 = vpop.f32.mrf.mxu1  ;;  %v29582_v61 = vld [vmem:[#allocation5 + $0x26c0] sm:$0xff]   ;;  %v29609_v41 = vld [vmem:[#allocation5 + $0x2708] sm:$0xff]   ;;  %vm25391_vm9 = vmpackc.low %vm961_vm8, %vm961_vm8 }
 0x531   :  { %v27007_v49 = vpop.f32.mrf.mxu0  ;;  %27266 = vmatpush3.bf16.msra.mxu0 %v29581_v59  ;;  %27287 = vmatprep.subr.bf16.mxu1 %v29582_v61  ;;  %v29610_v45 = vld [vmem:[#allocation5 + $0x27c8] sm:$0xff]   ;;  %v462_v52 = vadd.s32 20224, %v30458_v22  ;;  %v209_v59 = vld [vmem:[#allocation2 + $0x4e0] sm:$0xff]  ;;  %v29616_v61 = vld [vmem:[#allocation5 + $0x2878] sm:$0xff]   ;;  %vm963_vm12 = vcmp.eq.s32.totalorder %v713_v57, %v212_v62 }
 0x532   :  { %v30860_v55 = vadd.f32 %v27027_v48, %v20406_v43  ;;  %v27029_v58 = vpop.f32.mrf.mxu1  ;;  %27288 = vmatpush3.bf16.msra.mxu1 %v29583_v0  ;;  %27295 = vmatprep.subr.bf16.mxu0 %v29584_v3  ;;  %v29611_v48 = vld [vmem:[#allocation5 + $0x2788] sm:$0xff]   ;;  %v710_v49 = vand.u32 31, %v460_v36  ;;  %vm25395_vm13 = vmpackc.low %vm963_vm12, %vm963_vm12  ;;  %v211_v0 = vld [vmem:[#allocation2 + $0x4f0] sm:$0xff] }
 0x533   :  { %27317 = vmatprep.subr.bf16.mxu1 %v29586_v7  ;;  %v29615_v58 = vld [vmem:[#allocation5 + $0x2780] sm:$0xff]   ;;  %v712_v60 = vand.u32 31, %v462_v52  ;;  %v29620_v3 = vld [vmem:[#allocation5 + $0x2870] sm:$0xff]   ;;  %v29624_v7 = vld [vmem:[#allocation5 + $0x2868] sm:$0xff]  }
 0x534   :  { %25386 = vmatmul.mubr.msk.bf16.vlgmr.msra.gmra.mxu0 %vm25385_vm3, %v30427_v44  ;;  %vm960_vm10 = vcmp.eq.s32.totalorder %v710_v49, %v209_v59  ;;  %v29646_v49 = vld [vmem:[#allocation5 + $0x28c0] sm:$0xff]   ;;  %v216_v56 = vld [vmem:[#allocation2 + $0x518] sm:$0xff]  ;;  %v29649_v57 = vld [vmem:[#allocation5 + $0x2938] sm:$0xff]  }
 0x535   :  { %27296 = vmatpush3.bf16.msra.mxu0 %v29585_v5  ;;  %25390 = vmatmul.mubr.msk.bf16.vlgmr.msra.gmra.mxu1 %vm25389_vm7, %v30427_v44  ;;  %vm25393_vm11 = vmpackc.low %vm960_vm10, %vm960_vm10  ;;  %vm962_vm14 = vcmp.eq.s32.totalorder %v712_v60, %v211_v0  ;;  %v29622_v5 = vld [vmem:[#allocation5 + $0x28f0] sm:$0xff]   ;;  %v29647_v52 = vld [vmem:[#allocation5 + $0x2880] sm:$0xff]  }
 0x536   :  { %27318 = vmatpush3.bf16.msra.mxu1 %v29587_v8  ;;  %27297 = vmatprep.subr.bf16.mxu0 %v29588_v9  ;;  %vm25397_vm15 = vmpackc.low %vm962_vm14, %vm962_vm14  ;;  %v29625_v8 = vld [vmem:[#allocation5 + $0x2828] sm:$0xff]   ;;  %v29650_v59 = vld [vmem:[#allocation5 + $0x29f8] sm:$0xff]  }
 0x537   :  { %27319 = vmatprep.subr.bf16.mxu1 %v29590_v11  ;;  %25392 = vmatprep.mubr.msk.bf16.mxu0 %vm25391_vm9, %v30427_v44  ;;  %v29626_v9 = vld [vmem:[#allocation5 + $0x28e8] sm:$0xff]   ;;  %v29628_v11 = vld [vmem:[#allocation5 + $0x2860] sm:$0xff]   ;;  %v29651_v60 = vld [vmem:[#allocation5 + $0x29b8] sm:$0xff]  }
 0x538   :  { %25396 = vmatprep.mubr.msk.bf16.mxu1 %vm25395_vm13, %v30427_v44  ;;  %v29653_v62 = vld [vmem:[#allocation5 + $0x2930] sm:$0xff]  }
 0x539   :  { %27298 = vmatpush3.bf16.msra.mxu0 %v29589_v10  ;;  %v29627_v10 = vld [vmem:[#allocation5 + $0x28a8] sm:$0xff]   ;;  %v29655_v0 = vld [vmem:[#allocation5 + $0x29b0] sm:$0xff]  }
 0x53a   :  { %27320 = vmatpush3.bf16.msra.mxu1 %v29591_v12  ;;  %27299 = vmatprep.subr.bf16.mxu0 %v29592_v13  ;;  %v29629_v12 = vld [vmem:[#allocation5 + $0x2820] sm:$0xff]  }
 0x53b   :  { %27321 = vmatprep.subr.bf16.mxu1 %v29594_v15  ;;  %v29630_v13 = vld [vmem:[#allocation5 + $0x28e0] sm:$0xff]   ;;  %v29632_v15 = vld [vmem:[#allocation5 + $0x2858] sm:$0xff]  }
 0x53d   :  { %27300 = vmatpush3.bf16.msra.mxu0 %v29593_v14  ;;  %v29631_v14 = vld [vmem:[#allocation5 + $0x28a0] sm:$0xff]  }
 0x53e   :  { %27322 = vmatpush3.bf16.msra.mxu1 %v29595_v16  ;;  %27301 = vmatprep.subr.bf16.mxu0 %v29596_v17  ;;  %v29633_v16 = vld [vmem:[#allocation5 + $0x2818] sm:$0xff]  }
 0x53f   :  { %27323 = vmatprep.subr.bf16.mxu1 %v29598_v19  ;;  %v29634_v17 = vld [vmem:[#allocation5 + $0x28d8] sm:$0xff]  }
 0x541   :  { %27302 = vmatpush3.bf16.msra.mxu0 %v29597_v18  ;;  %v29635_v18 = vld [vmem:[#allocation5 + $0x2898] sm:$0xff]  }
 0x542   :  { %27324 = vmatpush3.bf16.msra.mxu1 %v29599_v20  ;;  %27303 = vmatprep.subr.bf16.mxu0 %v29600_v21  ;;  %v29636_v20 = vld [vmem:[#allocation5 + $0x2850] sm:$0xff]  }
 0x543   :  { %27325 = vmatprep.subr.bf16.mxu1 %v29602_v24  ;;  %v29637_v21 = vld [vmem:[#allocation5 + $0x2810] sm:$0xff]  }
 0x544   :  { %v29638_v24 = vld [vmem:[#allocation5 + $0x28d0] sm:$0xff]  }
 0x545   :  { %27304 = vmatpush3.bf16.msra.mxu0 %v29601_v23 }
 0x546   :  { %27326 = vmatpush3.bf16.msra.mxu1 %v29603_v26  ;;  %27305 = vmatprep.subr.bf16.mxu0 %v29604_v27 }
 0x547   :  { %27327 = vmatprep.subr.bf16.mxu1 %v29606_v32 }
 0x549   :  { %27306 = vmatpush3.bf16.msra.mxu0 %v29605_v29 }
 0x54a   :  { %27328 = vmatpush3.bf16.msra.mxu1 %v29607_v35  ;;  %27307 = vmatprep.subr.bf16.mxu0 %v29608_v38 }
 0x54b   :  { %v27047_v25 = vpop.f32.mrf.mxu0  ;;  %27329 = vmatprep.subr.bf16.mxu1 %v29610_v45  ;;  %v466_v45 = vadd.s32 20736, %v30458_v22 }
 0x54c   :  { %v27069_v33 = vpop.f32.mrf.mxu1 }
 0x54d   :  { %v27048_v28 = vpop.f32.mrf.mxu0  ;;  %27308 = vmatpush3.bf16.msra.mxu0 %v29609_v41  ;;  %v467_v41 = vadd.s32 20864, %v30458_v22 }
 0x54e   :  { %v27049_v31 = vadd.f32 %v27048_v28, %v27047_v25  ;;  %v27070_v39 = vpop.f32.mrf.mxu1  ;;  %27330 = vmatpush3.bf16.msra.mxu1 %v29611_v48  ;;  %27309 = vmatprep.subr.bf16.mxu0 %v29612_v51  ;;  %v465_v25 = vadd.s32 20608, %v30458_v22  ;;  %v29639_v28 = vld [vmem:[#allocation5 + $0x2890] sm:$0xff]  }
 0x54f   :  { %v27050_v34 = vpop.f32.mrf.mxu0  ;;  %v27071_v43 = vadd.f32 %v27070_v39, %v27069_v33  ;;  %v29641_v33 = vld [vmem:[#allocation5 + $0x2808] sm:$0xff]   ;;  %v717_v51 = vand.u32 31, %v467_v41 }
 0x550   :  { %v20486_v37 = vadd.f32 %v27049_v31, %v30860_v55  ;;  %v27072_v47 = vpop.f32.mrf.mxu1  ;;  %v29614_v55 = vld [vmem:[#allocation5 + $0x27c0] sm:$0xff]   ;;  %v464_v34 = vadd.s32 20480, %v30458_v22  ;;  %v715_v38 = vand.u32 31, %v465_v25 }
 0x551   :  { %v27051_v40 = vpop.f32.mrf.mxu0  ;;  %27310 = vmatpush3.bf16.msra.mxu0 %v29613_v54  ;;  %27331 = vmatprep.subr.bf16.mxu1 %v29614_v55  ;;  %v29645_v47 = vld [vmem:[#allocation5 + $0x2800] sm:$0xff]   ;;  %v716_v54 = vand.u32 31, %v466_v45  ;;  %v29648_v55 = vld [vmem:[#allocation5 + $0x2978] sm:$0xff]   ;;  %vm967_vm4 = vcmp.eq.s32.totalorder %v717_v51, %v216_v56  ;;  %v29685_v56 = vld [vmem:[#allocation5 + $0x2a30] sm:$0xff]  }
 0x552   :  { %v30871_v50 = vadd.f32 %v27071_v43, %v20486_v37  ;;  %v27073_v53 = vpop.f32.mrf.mxu1  ;;  %27332 = vmatpush3.bf16.msra.mxu1 %v29615_v58  ;;  %27339 = vmatprep.subr.bf16.mxu0 %v29616_v61  ;;  %v29642_v37 = vld [vmem:[#allocation5 + $0x28c8] sm:$0xff]   ;;  %v29644_v43 = vld [vmem:[#allocation5 + $0x2840] sm:$0xff]   ;;  %v714_v48 = vand.u32 31, %v464_v34  ;;  %vm25403_vm5 = vmpackc.low %vm967_vm4, %vm967_vm4 }
 0x553   :  { %27361 = vmatprep.subr.bf16.mxu1 %v29618_v1  ;;  %v29643_v40 = vld [vmem:[#allocation5 + $0x2888] sm:$0xff]   ;;  %v213_v53 = vld [vmem:[#allocation2 + $0x500] sm:$0xff]  ;;  %v215_v58 = vld [vmem:[#allocation2 + $0x510] sm:$0xff] }
 0x554   :  { %25394 = vmatmul.mubr.msk.bf16.vlgmr.msra.gmra.mxu0 %vm25393_vm11, %v30427_v44  ;;  %vm964_vm2 = vcmp.eq.s32.totalorder %v714_v48, %v213_v53  ;;  %vm966_vm6 = vcmp.eq.s32.totalorder %v716_v54, %v215_v58  ;;  %v29652_v61 = vld [vmem:[#allocation5 + $0x2970] sm:$0xff]   ;;  %v29656_v1 = vld [vmem:[#allocation5 + $0x2968] sm:$0xff]   ;;  %v29681_v51 = vld [vmem:[#allocation5 + $0x2a38] sm:$0xff]  }
 0x555   :  { %27340 = vmatpush3.bf16.msra.mxu0 %v29617_v63  ;;  %25398 = vmatmul.mubr.msk.bf16.vlgmr.msra.gmra.mxu1 %vm25397_vm15, %v30427_v44  ;;  %vm25401_vm3 = vmpackc.low %vm964_vm2, %vm964_vm2  ;;  %v29654_v63 = vld [vmem:[#allocation5 + $0x29f0] sm:$0xff]   ;;  %v29675_v34 = vld [vmem:[#allocation5 + $0x2988] sm:$0xff]  }
 0x556   :  { %27362 = vmatpush3.bf16.msra.mxu1 %v29619_v2  ;;  %27341 = vmatprep.subr.bf16.mxu0 %v29620_v3  ;;  %vm25405_vm7 = vmpackc.low %vm966_vm6, %vm966_vm6  ;;  %v29657_v2 = vld [vmem:[#allocation5 + $0x2928] sm:$0xff]   ;;  %v29682_v53 = vld [vmem:[#allocation5 + $0x2af8] sm:$0xff]  }
 0x557   :  { %27363 = vmatprep.subr.bf16.mxu1 %v29622_v5  ;;  %25404 = vmatprep.mubr.msk.bf16.mxu1 %vm25403_vm5, %v30427_v44  ;;  %v29658_v3 = vld [vmem:[#allocation5 + $0x29e8] sm:$0xff]   ;;  %v29660_v5 = vld [vmem:[#allocation5 + $0x2960] sm:$0xff]   ;;  %v29683_v54 = vld [vmem:[#allocation5 + $0x2ab8] sm:$0xff]  }
 0x558   :  { %v29687_v58 = vld [vmem:[#allocation5 + $0x2ab0] sm:$0xff]  }
 0x559   :  { %27342 = vmatpush3.bf16.msra.mxu0 %v29621_v4  ;;  %v29659_v4 = vld [vmem:[#allocation5 + $0x29a8] sm:$0xff]  }
 0x55a   :  { %27364 = vmatpush3.bf16.msra.mxu1 %v29623_v6  ;;  %27343 = vmatprep.subr.bf16.mxu0 %v29624_v7  ;;  %v29661_v6 = vld [vmem:[#allocation5 + $0x2920] sm:$0xff]  }
 0x55b   :  { %27365 = vmatprep.subr.bf16.mxu1 %v29626_v9  ;;  %v29662_v7 = vld [vmem:[#allocation5 + $0x29e0] sm:$0xff]   ;;  %v29664_v9 = vld [vmem:[#allocation5 + $0x2958] sm:$0xff]  }
 0x55d   :  { %27344 = vmatpush3.bf16.msra.mxu0 %v29625_v8  ;;  %v29663_v8 = vld [vmem:[#allocation5 + $0x29a0] sm:$0xff]  }
 0x55e   :  { %27366 = vmatpush3.bf16.msra.mxu1 %v29627_v10  ;;  %27345 = vmatprep.subr.bf16.mxu0 %v29628_v11  ;;  %v29665_v10 = vld [vmem:[#allocation5 + $0x2918] sm:$0xff]  }
 0x55f   :  { %27367 = vmatprep.subr.bf16.mxu1 %v29630_v13  ;;  %v29666_v11 = vld [vmem:[#allocation5 + $0x29d8] sm:$0xff]  }
 0x561   :  { %27346 = vmatpush3.bf16.msra.mxu0 %v29629_v12  ;;  %v29667_v12 = vld [vmem:[#allocation5 + $0x2998] sm:$0xff]  }
 0x562   :  { %27368 = vmatpush3.bf16.msra.mxu1 %v29631_v14  ;;  %27347 = vmatprep.subr.bf16.mxu0 %v29632_v15  ;;  %v29668_v14 = vld [vmem:[#allocation5 + $0x2950] sm:$0xff]  }
 0x563   :  { %27369 = vmatprep.subr.bf16.mxu1 %v29634_v17  ;;  %v29669_v15 = vld [vmem:[#allocation5 + $0x2910] sm:$0xff]  }
 0x564   :  { %v29670_v17 = vld [vmem:[#allocation5 + $0x29d0] sm:$0xff]  }
 0x565   :  { %27348 = vmatpush3.bf16.msra.mxu0 %v29633_v16 }
 0x566   :  { %27370 = vmatpush3.bf16.msra.mxu1 %v29635_v18  ;;  %27349 = vmatprep.subr.bf16.mxu0 %v29636_v20  ;;  %v29671_v20 = vld [vmem:[#allocation5 + $0x2990] sm:$0xff]  }
 0x567   :  { %27371 = vmatprep.subr.bf16.mxu1 %v29638_v24  ;;  %v29672_v24 = vld [vmem:[#allocation5 + $0x2948] sm:$0xff]  }
 0x569   :  { %27350 = vmatpush3.bf16.msra.mxu0 %v29637_v21  ;;  %v469_v21 = vadd.s32 21120, %v30458_v22 }
 0x56a   :  { %27372 = vmatpush3.bf16.msra.mxu1 %v29639_v28  ;;  %27351 = vmatprep.subr.bf16.mxu0 %v29640_v30  ;;  %v468_v28 = vadd.s32 20992, %v30458_v22 }
 0x56b   :  { %27373 = vmatprep.subr.bf16.mxu1 %v29642_v37  ;;  %v29676_v37 = vld [vmem:[#allocation5 + $0x2940] sm:$0xff]  }
 0x56c   :  { %v27113_v27 = vpop.f32.mrf.mxu1  ;;  %v718_v41 = vand.u32 31, %v468_v28 }
 0x56d   :  { %27352 = vmatpush3.bf16.msra.mxu0 %v29641_v33 }
 0x56e   :  { %v27114_v32 = vpop.f32.mrf.mxu1  ;;  %27374 = vmatpush3.bf16.msra.mxu1 %v29643_v40  ;;  %27353 = vmatprep.subr.bf16.mxu0 %v29644_v43  ;;  %v29677_v40 = vld [vmem:[#allocation5 + $0x2900] sm:$0xff]   ;;  %v218_v43 = vld [vmem:[#allocation2 + $0x528] sm:$0xff] }
 0x56f   :  { %v27115_v35 = vadd.f32 %v27114_v32, %v27113_v27  ;;  %27375 = vmatprep.subr.bf16.mxu1 %v29646_v49  ;;  %v29673_v27 = vld [vmem:[#allocation5 + $0x2908] sm:$0xff]   ;;  %v471_v32 = vadd.s32 21376, %v30458_v22  ;;  %v29680_v49 = vld [vmem:[#allocation5 + $0x2a78] sm:$0xff]  }
 0x570   :  { %v27116_v39 = vpop.f32.mrf.mxu1 }
 0x571   :  { %27354 = vmatpush3.bf16.msra.mxu0 %v29645_v47  ;;  %v721_v45 = vand.u32 31, %v471_v32  ;;  %v217_v47 = vld [vmem:[#allocation2 + $0x520] sm:$0xff]  ;;  %v29708_v32 = vld [vmem:[#allocation5 + $0x2a40] sm:$0xff]  }
 0x572   :  { %v27117_v46 = vpop.f32.mrf.mxu1  ;;  %27376 = vmatpush3.bf16.msra.mxu1 %v29647_v52  ;;  %27383 = vmatprep.subr.bf16.mxu0 %v29648_v55  ;;  %vm968_vm10 = vcmp.eq.s32.totalorder %v718_v41, %v217_v47  ;;  %v219_v52 = vld [vmem:[#allocation2 + $0x530] sm:$0xff]  ;;  %v29684_v55 = vld [vmem:[#allocation5 + $0x2a70] sm:$0xff]   ;;  %v29714_v47 = vld [vmem:[#allocation5 + $0x2bf8] sm:$0xff]  }
 0x573   :  { %27405 = vmatprep.subr.bf16.mxu1 %v29650_v59  ;;  %v29679_v46 = vld [vmem:[#allocation5 + $0x2980] sm:$0xff]   ;;  %vm25409_vm11 = vmpackc.low %vm968_vm10, %vm968_vm10  ;;  %v29688_v59 = vld [vmem:[#allocation5 + $0x2a68] sm:$0xff]  }
 0x574   :  { %v27091_v19 = vpop.f32.mrf.mxu0 }
 0x575   :  { %25406 = vmatmul.mubr.msk.bf16.vlgmr.msra.gmra.mxu1 %vm25405_vm7, %v30427_v44 }
 0x576   :  { %v27092_v23 = vpop.f32.mrf.mxu0  ;;  %27406 = vmatpush3.bf16.msra.mxu1 %v29651_v60  ;;  %v29689_v60 = vld [vmem:[#allocation5 + $0x2a28] sm:$0xff]  }
 0x577   :  { %v27093_v26 = vadd.f32 %v27092_v23, %v27091_v19  ;;  %27407 = vmatprep.subr.bf16.mxu1 %v29654_v63  ;;  %v29692_v63 = vld [vmem:[#allocation5 + $0x2a60] sm:$0xff]  }
 0x578   :  { %v27094_v29 = vpop.f32.mrf.mxu0 }
 0x579   :  { %v20566_v31 = vadd.f32 %v27093_v26, %v30871_v50  ;;  %v214_v50 = vld [vmem:[#allocation2 + $0x508] sm:$0xff] }
 0x57a   :  { %v27095_v36 = vpop.f32.mrf.mxu0  ;;  %vm965_vm0 = vcmp.eq.s32.totalorder %v715_v38, %v214_v50  ;;  %27408 = vmatpush3.bf16.msra.mxu1 %v29655_v0  ;;  %v470_v38 = vadd.s32 21248, %v30458_v22  ;;  %v220_v50 = vld [vmem:[#allocation2 + $0x538] sm:$0xff]  ;;  %v29693_v0 = vld [vmem:[#allocation5 + $0x2a20] sm:$0xff]  }
 0x57b   :  { %v30882_v42 = vadd.f32 %v27115_v35, %v20566_v31  ;;  %vm25399_vm1 = vmpackc.low %vm965_vm0, %vm965_vm0  ;;  %27409 = vmatprep.subr.bf16.mxu1 %v29658_v3  ;;  %v29674_v31 = vld [vmem:[#allocation5 + $0x29c8] sm:$0xff]   ;;  %v719_v35 = vand.u32 31, %v469_v21  ;;  %vm971_vm12 = vcmp.eq.s32.totalorder %v721_v45, %v220_v50  ;;  %v29696_v3 = vld [vmem:[#allocation5 + $0x2a58] sm:$0xff]  }
 0x57c   :  { %25400 = vmatprep.mubr.msk.bf16.mxu0 %vm25399_vm1, %v30427_v44  ;;  %v720_v48 = vand.u32 31, %v470_v38  ;;  %vm25411_vm13 = vmpackc.low %vm971_vm12, %vm971_vm12  ;;  %v29713_v45 = vld [vmem:[#allocation5 + $0x2b38] sm:$0xff]   ;;  %v29717_v50 = vld [vmem:[#allocation5 + $0x2b30] sm:$0xff]  }
 0x57d   :  { %25402 = vmatmul.mubr.msk.bf16.vlgmr.msra.gmra.mxu0 %vm25401_vm3, %v30427_v44  ;;  %vm969_vm8 = vcmp.eq.s32.totalorder %v719_v35, %v218_v43  ;;  %25412 = vmatprep.mubr.msk.bf16.mxu1 %vm25411_vm13, %v30427_v44  ;;  %v29709_v35 = vld [vmem:[#allocation5 + $0x2a00] sm:$0xff]   ;;  %v224_v43 = vld [vmem:[#allocation2 + $0x558] sm:$0xff] }
 0x57e   :  { %27384 = vmatpush3.bf16.msra.mxu0 %v29649_v57  ;;  %27410 = vmatpush3.bf16.msra.mxu1 %v29659_v4  ;;  %vm25407_vm9 = vmpackc.low %vm969_vm8, %vm969_vm8  ;;  %vm970_vm14 = vcmp.eq.s32.totalorder %v720_v48, %v219_v52  ;;  %v29686_v57 = vld [vmem:[#allocation5 + $0x2af0] sm:$0xff]   ;;  %v29697_v4 = vld [vmem:[#allocation5 + $0x2a18] sm:$0xff]  }
 0x57f   :  { %27385 = vmatprep.subr.bf16.mxu0 %v29652_v61  ;;  %27411 = vmatprep.subr.bf16.mxu1 %v29662_v7  ;;  %vm25413_vm15 = vmpackc.low %vm970_vm14, %vm970_vm14  ;;  %v29690_v61 = vld [vmem:[#allocation5 + $0x2ae8] sm:$0xff]   ;;  %v29699_v7 = vld [vmem:[#allocation5 + $0x2a98] sm:$0xff]  }
 0x580   :  { %25408 = vmatprep.mubr.msk.bf16.mxu0 %vm25407_vm9, %v30427_v44  ;;  %v29715_v48 = vld [vmem:[#allocation5 + $0x2bb8] sm:$0xff]   ;;  %v29719_v52 = vld [vmem:[#allocation5 + $0x2bb0] sm:$0xff]  }
 0x582   :  { %27386 = vmatpush3.bf16.msra.mxu0 %v29653_v62  ;;  %27412 = vmatpush3.bf16.msra.mxu1 %v29663_v8  ;;  %v29691_v62 = vld [vmem:[#allocation5 + $0x2aa8] sm:$0xff]   ;;  %v29700_v8 = vld [vmem:[#allocation5 + $0x2a50] sm:$0xff]  }
 0x583   :  { %27387 = vmatprep.subr.bf16.mxu0 %v29656_v1  ;;  %27413 = vmatprep.subr.bf16.mxu1 %v29666_v11  ;;  %v29694_v1 = vld [vmem:[#allocation5 + $0x2ae0] sm:$0xff]   ;;  %v473_v11 = vadd.s32 21632, %v30458_v22 }
 0x586   :  { %27388 = vmatpush3.bf16.msra.mxu0 %v29657_v2  ;;  %27414 = vmatpush3.bf16.msra.mxu1 %v29667_v12  ;;  %v29695_v2 = vld [vmem:[#allocation5 + $0x2aa0] sm:$0xff]  }
 0x587   :  { %27389 = vmatprep.subr.bf16.mxu0 %v29660_v5  ;;  %27415 = vmatprep.subr.bf16.mxu1 %v29670_v17  ;;  %v29698_v5 = vld [vmem:[#allocation5 + $0x2ad8] sm:$0xff]   ;;  %v472_v17 = vadd.s32 21504, %v30458_v22 }
 0x58a   :  { %27390 = vmatpush3.bf16.msra.mxu0 %v29661_v6  ;;  %27416 = vmatpush3.bf16.msra.mxu1 %v29671_v20 }
 0x58b   :  { %27391 = vmatprep.subr.bf16.mxu0 %v29664_v9  ;;  %27417 = vmatprep.subr.bf16.mxu1 %v29674_v31 }
 0x58e   :  { %27392 = vmatpush3.bf16.msra.mxu0 %v29665_v10  ;;  %27418 = vmatpush3.bf16.msra.mxu1 %v29675_v34  ;;  %v29701_v10 = vld [vmem:[#allocation5 + $0x2a10] sm:$0xff]  }
 0x58f   :  { %27393 = vmatprep.subr.bf16.mxu0 %v29668_v14 }
 0x592   :  { %27394 = vmatpush3.bf16.msra.mxu0 %v29669_v15 }
 0x593   :  { %27395 = vmatprep.subr.bf16.mxu0 %v29672_v24  ;;  %v723_v24 = vand.u32 31, %v473_v11  ;;  %v29736_v11 = vld [vmem:[#allocation5 + $0x2b48] sm:$0xff]  }
 0x594   :  { %v27135_v13 = vpop.f32.mrf.mxu0 }
 0x595   :  { %v27157_v19 = vpop.f32.mrf.mxu1 }
 0x596   :  { %v27136_v16 = vpop.f32.mrf.mxu0  ;;  %27396 = vmatpush3.bf16.msra.mxu0 %v29673_v27  ;;  %v475_v27 = vadd.s32 21888, %v30458_v22 }
 0x597   :  { %v27137_v18 = vadd.f32 %v27136_v16, %v27135_v13  ;;  %v27158_v26 = vpop.f32.mrf.mxu1  ;;  %27397 = vmatprep.subr.bf16.mxu0 %v29676_v37  ;;  %v29702_v13 = vld [vmem:[#allocation5 + $0x2ad0] sm:$0xff]   ;;  %v222_v37 = vld [vmem:[#allocation2 + $0x548] sm:$0xff] }
 0x598   :  { %v27138_v23 = vpop.f32.mrf.mxu0  ;;  %v27159_v29 = vadd.f32 %v27158_v26, %v27157_v19  ;;  %v29703_v16 = vld [vmem:[#allocation5 + $0x2a90] sm:$0xff]   ;;  %v29704_v19 = vld [vmem:[#allocation5 + $0x2a48] sm:$0xff]   ;;  %v725_v38 = vand.u32 31, %v475_v27  ;;  %vm973_vm0 = vcmp.eq.s32.totalorder %v723_v24, %v222_v37 }
 0x599   :  { %v20646_v25 = vadd.f32 %v27137_v18, %v30882_v42  ;;  %v27160_v33 = vpop.f32.mrf.mxu1  ;;  %v29678_v42 = vld [vmem:[#allocation5 + $0x29c0] sm:$0xff]   ;;  %v29705_v23 = vld [vmem:[#allocation5 + $0x2a08] sm:$0xff]   ;;  %vm25415_vm1 = vmpackc.low %vm973_vm0, %vm973_vm0 }
 0x59a   :  { %v27139_v30 = vpop.f32.mrf.mxu0  ;;  %27398 = vmatpush3.bf16.msra.mxu0 %v29677_v40  ;;  %27419 = vmatprep.subr.bf16.mxu1 %v29678_v42  ;;  %v29706_v26 = vld [vmem:[#allocation5 + $0x2ac8] sm:$0xff]   ;;  %v474_v33 = vadd.s32 21760, %v30458_v22  ;;  %v221_v40 = vld [vmem:[#allocation2 + $0x540] sm:$0xff]  ;;  %v29712_v42 = vld [vmem:[#allocation5 + $0x2b78] sm:$0xff]   ;;  %vm975_vm4 = vcmp.eq.s32.totalorder %v725_v38, %v224_v43 }
 0x59b   :  { %v30893_v36 = vadd.f32 %v27159_v29, %v20646_v25  ;;  %v27161_v39 = vpop.f32.mrf.mxu1  ;;  %27420 = vmatpush3.bf16.msra.mxu1 %v29679_v46  ;;  %27427 = vmatprep.subr.bf16.mxu0 %v29680_v49  ;;  %v29707_v29 = vld [vmem:[#allocation5 + $0x2a88] sm:$0xff]   ;;  %v722_v30 = vand.u32 31, %v472_v17  ;;  %vm25419_vm5 = vmpackc.low %vm975_vm4, %vm975_vm4  ;;  %v223_v46 = vld [vmem:[#allocation2 + $0x550] sm:$0xff] }
 0x59c   :  { %27449 = vmatprep.subr.bf16.mxu1 %v29682_v53  ;;  %v29711_v39 = vld [vmem:[#allocation5 + $0x2a80] sm:$0xff]   ;;  %v724_v41 = vand.u32 31, %v474_v33  ;;  %v29716_v49 = vld [vmem:[#allocation5 + $0x2b70] sm:$0xff]   ;;  %v29720_v53 = vld [vmem:[#allocation5 + $0x2b68] sm:$0xff]  }
 0x59d   :  { %25410 = vmatmul.mubr.msk.bf16.vlgmr.msra.gmra.mxu0 %vm25409_vm11, %v30427_v44  ;;  %vm972_vm2 = vcmp.eq.s32.totalorder %v722_v30, %v221_v40  ;;  %v29742_v30 = vld [vmem:[#allocation5 + $0x2bc0] sm:$0xff]   ;;  %v228_v37 = vld [vmem:[#allocation2 + $0x578] sm:$0xff]  ;;  %v29745_v38 = vld [vmem:[#allocation5 + $0x2c38] sm:$0xff]  }
 0x59e   :  { %27428 = vmatpush3.bf16.msra.mxu0 %v29681_v51  ;;  %25414 = vmatmul.mubr.msk.bf16.vlgmr.msra.gmra.mxu1 %vm25413_vm15, %v30427_v44  ;;  %vm25417_vm3 = vmpackc.low %vm972_vm2, %vm972_vm2  ;;  %vm974_vm6 = vcmp.eq.s32.totalorder %v724_v41, %v223_v46  ;;  %v29718_v51 = vld [vmem:[#allocation5 + $0x2bf0] sm:$0xff]   ;;  %v29743_v33 = vld [vmem:[#allocation5 + $0x2b80] sm:$0xff]  }
 0x59f   :  { %27450 = vmatpush3.bf16.msra.mxu1 %v29683_v54  ;;  %27429 = vmatprep.subr.bf16.mxu0 %v29684_v55  ;;  %vm25421_vm7 = vmpackc.low %vm974_vm6, %vm974_vm6  ;;  %v29721_v54 = vld [vmem:[#allocation5 + $0x2b28] sm:$0xff]   ;;  %v29746_v40 = vld [vmem:[#allocation5 + $0x2cf8] sm:$0xff]  }
 0x5a0   :  { %27451 = vmatprep.subr.bf16.mxu1 %v29686_v57  ;;  %25416 = vmatprep.mubr.msk.bf16.mxu0 %vm25415_vm1, %v30427_v44  ;;  %v29722_v55 = vld [vmem:[#allocation5 + $0x2be8] sm:$0xff]   ;;  %v29724_v57 = vld [vmem:[#allocation5 + $0x2b60] sm:$0xff]   ;;  %v29747_v41 = vld [vmem:[#allocation5 + $0x2cb8] sm:$0xff]  }
 0x5a1   :  { %25420 = vmatprep.mubr.msk.bf16.mxu1 %vm25419_vm5, %v30427_v44  ;;  %v29749_v43 = vld [vmem:[#allocation5 + $0x2c30] sm:$0xff]  }
 0x5a2   :  { %27430 = vmatpush3.bf16.msra.mxu0 %v29685_v56  ;;  %v29723_v56 = vld [vmem:[#allocation5 + $0x2ba8] sm:$0xff]   ;;  %v29751_v46 = vld [vmem:[#allocation5 + $0x2cb0] sm:$0xff]  }
 0x5a3   :  { %27452 = vmatpush3.bf16.msra.mxu1 %v29687_v58  ;;  %27431 = vmatprep.subr.bf16.mxu0 %v29688_v59  ;;  %v29725_v58 = vld [vmem:[#allocation5 + $0x2b20] sm:$0xff]  }
 0x5a4   :  { %27453 = vmatprep.subr.bf16.mxu1 %v29690_v61  ;;  %v29726_v59 = vld [vmem:[#allocation5 + $0x2be0] sm:$0xff]   ;;  %v29728_v61 = vld [vmem:[#allocation5 + $0x2b58] sm:$0xff]  }
 0x5a6   :  { %27432 = vmatpush3.bf16.msra.mxu0 %v29689_v60  ;;  %v29727_v60 = vld [vmem:[#allocation5 + $0x2ba0] sm:$0xff]  }
 0x5a7   :  { %27454 = vmatpush3.bf16.msra.mxu1 %v29691_v62  ;;  %27433 = vmatprep.subr.bf16.mxu0 %v29692_v63  ;;  %v29729_v62 = vld [vmem:[#allocation5 + $0x2b18] sm:$0xff]  }
 0x5a8   :  { %27455 = vmatprep.subr.bf16.mxu1 %v29694_v1  ;;  %v29730_v63 = vld [vmem:[#allocation5 + $0x2bd8] sm:$0xff]  }
 0x5aa   :  { %27434 = vmatpush3.bf16.msra.mxu0 %v29693_v0  ;;  %v29731_v0 = vld [vmem:[#allocation5 + $0x2b98] sm:$0xff]  }
 0x5ab   :  { %27456 = vmatpush3.bf16.msra.mxu1 %v29695_v2  ;;  %27435 = vmatprep.subr.bf16.mxu0 %v29696_v3  ;;  %v29732_v2 = vld [vmem:[#allocation5 + $0x2b50] sm:$0xff]  }
 0x5ac   :  { %27457 = vmatprep.subr.bf16.mxu1 %v29698_v5  ;;  %v29733_v3 = vld [vmem:[#allocation5 + $0x2b10] sm:$0xff]  }
 0x5ad   :  { %v29734_v5 = vld [vmem:[#allocation5 + $0x2bd0] sm:$0xff]  }
 0x5ae   :  { %27436 = vmatpush3.bf16.msra.mxu0 %v29697_v4 }
 0x5af   :  { %27458 = vmatpush3.bf16.msra.mxu1 %v29699_v7  ;;  %27437 = vmatprep.subr.bf16.mxu0 %v29700_v8 }
 0x5b0   :  { %27459 = vmatprep.subr.bf16.mxu1 %v29702_v13 }
 0x5b2   :  { %27438 = vmatpush3.bf16.msra.mxu0 %v29701_v10 }
 0x5b3   :  { %27460 = vmatpush3.bf16.msra.mxu1 %v29703_v16  ;;  %27439 = vmatprep.subr.bf16.mxu0 %v29704_v19 }
 0x5b4   :  { %v27179_v6 = vpop.f32.mrf.mxu0  ;;  %27461 = vmatprep.subr.bf16.mxu1 %v29706_v26  ;;  %v478_v26 = vadd.s32 22272, %v30458_v22 }
 0x5b5   :  { %v27201_v14 = vpop.f32.mrf.mxu1 }
 0x5b6   :  { %v27180_v9 = vpop.f32.mrf.mxu0  ;;  %27440 = vmatpush3.bf16.msra.mxu0 %v29705_v23  ;;  %v479_v23 = vadd.s32 22400, %v30458_v22 }
 0x5b7   :  { %v27181_v12 = vadd.f32 %v27180_v9, %v27179_v6  ;;  %v27202_v20 = vpop.f32.mrf.mxu1  ;;  %27462 = vmatpush3.bf16.msra.mxu1 %v29707_v29  ;;  %27441 = vmatprep.subr.bf16.mxu0 %v29708_v32  ;;  %v477_v6 = vadd.s32 22144, %v30458_v22  ;;  %v29735_v9 = vld [vmem:[#allocation5 + $0x2b90] sm:$0xff]  }
 0x5b8   :  { %v27182_v15 = vpop.f32.mrf.mxu0  ;;  %v27203_v25 = vadd.f32 %v27202_v20, %v27201_v14  ;;  %v29737_v14 = vld [vmem:[#allocation5 + $0x2b08] sm:$0xff]   ;;  %v729_v32 = vand.u32 31, %v479_v23 }
 0x5b9   :  { %v20726_v18 = vadd.f32 %v27181_v12, %v30893_v36  ;;  %v27204_v28 = vpop.f32.mrf.mxu1  ;;  %v29710_v36 = vld [vmem:[#allocation5 + $0x2ac0] sm:$0xff]   ;;  %v476_v15 = vadd.s32 22016, %v30458_v22  ;;  %v727_v19 = vand.u32 31, %v477_v6 }
 0x5ba   :  { %v27183_v21 = vpop.f32.mrf.mxu0  ;;  %27442 = vmatpush3.bf16.msra.mxu0 %v29709_v35  ;;  %27463 = vmatprep.subr.bf16.mxu1 %v29710_v36  ;;  %v29741_v28 = vld [vmem:[#allocation5 + $0x2b00] sm:$0xff]   ;;  %v728_v35 = vand.u32 31, %v478_v26  ;;  %v29744_v36 = vld [vmem:[#allocation5 + $0x2c78] sm:$0xff]   ;;  %vm979_vm12 = vcmp.eq.s32.totalorder %v729_v32, %v228_v37  ;;  %v29781_v37 = vld [vmem:[#allocation5 + $0x2d30] sm:$0xff]  }
 0x5bb   :  { %v30904_v31 = vadd.f32 %v27203_v25, %v20726_v18  ;;  %v27205_v34 = vpop.f32.mrf.mxu1  ;;  %27464 = vmatpush3.bf16.msra.mxu1 %v29711_v39  ;;  %27471 = vmatprep.subr.bf16.mxu0 %v29712_v42  ;;  %v29738_v18 = vld [vmem:[#allocation5 + $0x2bc8] sm:$0xff]   ;;  %v29740_v25 = vld [vmem:[#allocation5 + $0x2b40] sm:$0xff]   ;;  %v726_v29 = vand.u32 31, %v476_v15  ;;  %vm25427_vm13 = vmpackc.low %vm979_vm12, %vm979_vm12 }
 0x5bc   :  { %27493 = vmatprep.subr.bf16.mxu1 %v29714_v47  ;;  %v29739_v21 = vld [vmem:[#allocation5 + $0x2b88] sm:$0xff]   ;;  %v225_v34 = vld [vmem:[#allocation2 + $0x560] sm:$0xff]  ;;  %v227_v39 = vld [vmem:[#allocation2 + $0x570] sm:$0xff] }
 0x5bd   :  { %25418 = vmatmul.mubr.msk.bf16.vlgmr.msra.gmra.mxu0 %vm25417_vm3, %v30427_v44  ;;  %vm976_vm10 = vcmp.eq.s32.totalorder %v726_v29, %v225_v34  ;;  %vm978_vm14 = vcmp.eq.s32.totalorder %v728_v35, %v227_v39  ;;  %v29748_v42 = vld [vmem:[#allocation5 + $0x2c70] sm:$0xff]   ;;  %v29752_v47 = vld [vmem:[#allocation5 + $0x2c68] sm:$0xff]   ;;  %v29777_v32 = vld [vmem:[#allocation5 + $0x2d38] sm:$0xff]  }
 0x5be   :  { %27472 = vmatpush3.bf16.msra.mxu0 %v29713_v45  ;;  %25422 = vmatmul.mubr.msk.bf16.vlgmr.msra.gmra.mxu1 %vm25421_vm7, %v30427_v44  ;;  %vm25425_vm11 = vmpackc.low %vm976_vm10, %vm976_vm10  ;;  %v29750_v45 = vld [vmem:[#allocation5 + $0x2cf0] sm:$0xff]   ;;  %v29771_v15 = vld [vmem:[#allocation5 + $0x2c88] sm:$0xff]  }
 0x5bf   :  { %27494 = vmatpush3.bf16.msra.mxu1 %v29715_v48  ;;  %27473 = vmatprep.subr.bf16.mxu0 %v29716_v49  ;;  %vm25429_vm15 = vmpackc.low %vm978_vm14, %vm978_vm14  ;;  %v29753_v48 = vld [vmem:[#allocation5 + $0x2c28] sm:$0xff]   ;;  %v29778_v34 = vld [vmem:[#allocation5 + $0x2df8] sm:$0xff]  }
 0x5c0   :  { %27495 = vmatprep.subr.bf16.mxu1 %v29718_v51  ;;  %25428 = vmatprep.mubr.msk.bf16.mxu1 %vm25427_vm13, %v30427_v44  ;;  %v29754_v49 = vld [vmem:[#allocation5 + $0x2ce8] sm:$0xff]   ;;  %v29756_v51 = vld [vmem:[#allocation5 + $0x2c60] sm:$0xff]   ;;  %v29779_v35 = vld [vmem:[#allocation5 + $0x2db8] sm:$0xff]  }
 0x5c1   :  { %v29783_v39 = vld [vmem:[#allocation5 + $0x2db0] sm:$0xff]  }
 0x5c2   :  { %27474 = vmatpush3.bf16.msra.mxu0 %v29717_v50  ;;  %v29755_v50 = vld [vmem:[#allocation5 + $0x2ca8] sm:$0xff]  }
 0x5c3   :  { %27496 = vmatpush3.bf16.msra.mxu1 %v29719_v52  ;;  %27475 = vmatprep.subr.bf16.mxu0 %v29720_v53  ;;  %v29757_v52 = vld [vmem:[#allocation5 + $0x2c20] sm:$0xff]  }
 0x5c4   :  { %27497 = vmatprep.subr.bf16.mxu1 %v29722_v55  ;;  %v29758_v53 = vld [vmem:[#allocation5 + $0x2ce0] sm:$0xff]   ;;  %v29760_v55 = vld [vmem:[#allocation5 + $0x2c58] sm:$0xff]  }
 0x5c6   :  { %27476 = vmatpush3.bf16.msra.mxu0 %v29721_v54  ;;  %v29759_v54 = vld [vmem:[#allocation5 + $0x2ca0] sm:$0xff]  }
 0x5c7   :  { %27498 = vmatpush3.bf16.msra.mxu1 %v29723_v56  ;;  %27477 = vmatprep.subr.bf16.mxu0 %v29724_v57  ;;  %v29761_v56 = vld [vmem:[#allocation5 + $0x2c18] sm:$0xff]  }
 0x5c8   :  { %27499 = vmatprep.subr.bf16.mxu1 %v29726_v59  ;;  %v29762_v57 = vld [vmem:[#allocation5 + $0x2cd8] sm:$0xff]  }
 0x5ca   :  { %27478 = vmatpush3.bf16.msra.mxu0 %v29725_v58  ;;  %v29763_v58 = vld [vmem:[#allocation5 + $0x2c98] sm:$0xff]  }
 0x5cb   :  { %27500 = vmatpush3.bf16.msra.mxu1 %v29727_v60  ;;  %27479 = vmatprep.subr.bf16.mxu0 %v29728_v61  ;;  %v29764_v60 = vld [vmem:[#allocation5 + $0x2c50] sm:$0xff]  }
 0x5cc   :  { %27501 = vmatprep.subr.bf16.mxu1 %v29730_v63  ;;  %v29765_v61 = vld [vmem:[#allocation5 + $0x2c10] sm:$0xff]  }
 0x5cd   :  { %v29766_v63 = vld [vmem:[#allocation5 + $0x2cd0] sm:$0xff]  }
 0x5ce   :  { %27480 = vmatpush3.bf16.msra.mxu0 %v29729_v62 }
 0x5cf   :  { %27502 = vmatpush3.bf16.msra.mxu1 %v29731_v0  ;;  %27481 = vmatprep.subr.bf16.mxu0 %v29732_v2  ;;  %v29767_v2 = vld [vmem:[#allocation5 + $0x2c90] sm:$0xff]  }
 0x5d0   :  { %27503 = vmatprep.subr.bf16.mxu1 %v29734_v5  ;;  %v29768_v5 = vld [vmem:[#allocation5 + $0x2c48] sm:$0xff]  }
 0x5d2   :  { %27482 = vmatpush3.bf16.msra.mxu0 %v29733_v3  ;;  %v481_v3 = vadd.s32 22656, %v30458_v22 }
 0x5d3   :  { %27504 = vmatpush3.bf16.msra.mxu1 %v29735_v9  ;;  %27483 = vmatprep.subr.bf16.mxu0 %v29736_v11  ;;  %v480_v9 = vadd.s32 22528, %v30458_v22 }
 0x5d4   :  { %v27223_v1 = vpop.f32.mrf.mxu0  ;;  %27505 = vmatprep.subr.bf16.mxu1 %v29738_v18  ;;  %v29772_v18 = vld [vmem:[#allocation5 + $0x2c40] sm:$0xff]  }
 0x5d5   :  { %v27245_v8 = vpop.f32.mrf.mxu1  ;;  %v730_v23 = vand.u32 31, %v480_v9 }
 0x5d6   :  { %v27224_v4 = vpop.f32.mrf.mxu0  ;;  %27484 = vmatpush3.bf16.msra.mxu0 %v29737_v14 }
 0x5d7   :  { %v27225_v7 = vadd.f32 %v27224_v4, %v27223_v1  ;;  %v27246_v13 = vpop.f32.mrf.mxu1  ;;  %27506 = vmatpush3.bf16.msra.mxu1 %v29739_v21  ;;  %27485 = vmatprep.subr.bf16.mxu0 %v29740_v25  ;;  %v29773_v21 = vld [vmem:[#allocation5 + $0x2c00] sm:$0xff]   ;;  %v230_v25 = vld [vmem:[#allocation2 + $0x588] sm:$0xff] }
 0x5d8   :  { %v27226_v10 = vpop.f32.mrf.mxu0  ;;  %v27247_v16 = vadd.f32 %v27246_v13, %v27245_v8  ;;  %27507 = vmatprep.subr.bf16.mxu1 %v29742_v30  ;;  %v29769_v8 = vld [vmem:[#allocation5 + $0x2c08] sm:$0xff]   ;;  %v483_v13 = vadd.s32 22912, %v30458_v22  ;;  %v29776_v30 = vld [vmem:[#allocation5 + $0x2d78] sm:$0xff]  }
 0x5d9   :  { %v20806_v12 = vadd.f32 %v27225_v7, %v30904_v31  ;;  %v27248_v20 = vpop.f32.mrf.mxu1  ;;  %v226_v31 = vld [vmem:[#allocation2 + $0x568] sm:$0xff] }
 0x5da   :  { %v27227_v17 = vpop.f32.mrf.mxu0  ;;  %27486 = vmatpush3.bf16.msra.mxu0 %v29741_v28  ;;  %vm977_vm8 = vcmp.eq.s32.totalorder %v727_v19, %v226_v31  ;;  %v482_v19 = vadd.s32 22784, %v30458_v22  ;;  %v733_v26 = vand.u32 31, %v483_v13  ;;  %v229_v28 = vld [vmem:[#allocation2 + $0x580] sm:$0xff]  ;;  %v232_v31 = vld [vmem:[#allocation2 + $0x598] sm:$0xff]  ;;  %v29804_v13 = vld [vmem:[#allocation5 + $0x2d40] sm:$0xff]  }
 0x5db   :  { %v30915_v24 = vadd.f32 %v27247_v16, %v20806_v12  ;;  %v27249_v27 = vpop.f32.mrf.mxu1  ;;  %vm25423_vm9 = vmpackc.low %vm977_vm8, %vm977_vm8  ;;  %27508 = vmatpush3.bf16.msra.mxu1 %v29743_v33  ;;  %27515 = vmatprep.subr.bf16.mxu0 %v29744_v36  ;;  %v29770_v12 = vld [vmem:[#allocation5 + $0x2cc8] sm:$0xff]   ;;  %v731_v16 = vand.u32 31, %v481_v3  ;;  %vm980_vm2 = vcmp.eq.s32.totalorder %v730_v23, %v229_v28  ;;  %v231_v33 = vld [vmem:[#allocation2 + $0x590] sm:$0xff] }
 0x5dc   :  { %25424 = vmatprep.mubr.msk.bf16.mxu0 %vm25423_vm9, %v30427_v44  ;;  %27537 = vmatprep.subr.bf16.mxu1 %v29746_v40  ;;  %v29775_v27 = vld [vmem:[#allocation5 + $0x2c80] sm:$0xff]   ;;  %v732_v29 = vand.u32 31, %v482_v19  ;;  %vm25433_vm3 = vmpackc.low %vm980_vm2, %vm980_vm2  ;;  %vm983_vm4 = vcmp.eq.s32.totalorder %v733_v26, %v232_v31  ;;  %v29780_v36 = vld [vmem:[#allocation5 + $0x2d70] sm:$0xff]  }
 0x5dd   :  { %25426 = vmatmul.mubr.msk.bf16.vlgmr.msra.gmra.mxu0 %vm25425_vm11, %v30427_v44  ;;  %vm981_vm0 = vcmp.eq.s32.totalorder %v731_v16, %v230_v25  ;;  %vm25435_vm5 = vmpackc.low %vm983_vm4, %vm983_vm4  ;;  %v29784_v40 = vld [vmem:[#allocation5 + $0x2d68] sm:$0xff]   ;;  %v29805_v16 = vld [vmem:[#allocation5 + $0x2d00] sm:$0xff]  }
 0x5de   :  { %27516 = vmatpush3.bf16.msra.mxu0 %v29745_v38  ;;  %25430 = vmatmul.mubr.msk.bf16.vlgmr.msra.gmra.mxu1 %vm25429_vm15, %v30427_v44  ;;  %vm25431_vm1 = vmpackc.low %vm981_vm0, %vm981_vm0  ;;  %vm982_vm6 = vcmp.eq.s32.totalorder %v732_v29, %v231_v33  ;;  %v29782_v38 = vld [vmem:[#allocation5 + $0x2df0] sm:$0xff]   ;;  %v236_v25 = vld [vmem:[#allocation2 + $0x5b8] sm:$0xff] }
 0x5df   :  { %27538 = vmatpush3.bf16.msra.mxu1 %v29747_v41  ;;  %27517 = vmatprep.subr.bf16.mxu0 %v29748_v42  ;;  %vm25437_vm7 = vmpackc.low %vm982_vm6, %vm982_vm6  ;;  %v29785_v41 = vld [vmem:[#allocation5 + $0x2d28] sm:$0xff]   ;;  %v29809_v26 = vld [vmem:[#allocation5 + $0x2e38] sm:$0xff]  }
 0x5e0   :  { %27539 = vmatprep.subr.bf16.mxu1 %v29750_v45  ;;  %25432 = vmatprep.mubr.msk.bf16.mxu0 %vm25431_vm1, %v30427_v44  ;;  %v29786_v42 = vld [vmem:[#allocation5 + $0x2de8] sm:$0xff]   ;;  %v29788_v45 = vld [vmem:[#allocation5 + $0x2d60] sm:$0xff]   ;;  %v29810_v28 = vld [vmem:[#allocation5 + $0x2ef8] sm:$0xff]  }
 0x5e1   :  { %25436 = vmatprep.mubr.msk.bf16.mxu1 %vm25435_vm5, %v30427_v44  ;;  %v29811_v29 = vld [vmem:[#allocation5 + $0x2eb8] sm:$0xff]   ;;  %v29813_v31 = vld [vmem:[#allocation5 + $0x2e30] sm:$0xff]  }
 0x5e2   :  { %27518 = vmatpush3.bf16.msra.mxu0 %v29749_v43  ;;  %v29787_v43 = vld [vmem:[#allocation5 + $0x2da8] sm:$0xff]   ;;  %v29815_v33 = vld [vmem:[#allocation5 + $0x2eb0] sm:$0xff]  }
 0x5e3   :  { %27540 = vmatpush3.bf16.msra.mxu1 %v29751_v46  ;;  %27519 = vmatprep.subr.bf16.mxu0 %v29752_v47  ;;  %v29789_v46 = vld [vmem:[#allocation5 + $0x2d20] sm:$0xff]  }
 0x5e4   :  { %27541 = vmatprep.subr.bf16.mxu1 %v29754_v49  ;;  %v29790_v47 = vld [vmem:[#allocation5 + $0x2de0] sm:$0xff]   ;;  %v29792_v49 = vld [vmem:[#allocation5 + $0x2d58] sm:$0xff]  }
 0x5e6   :  { %27520 = vmatpush3.bf16.msra.mxu0 %v29753_v48  ;;  %v29791_v48 = vld [vmem:[#allocation5 + $0x2da0] sm:$0xff]  }
 0x5e7   :  { %27542 = vmatpush3.bf16.msra.mxu1 %v29755_v50  ;;  %27521 = vmatprep.subr.bf16.mxu0 %v29756_v51  ;;  %v29793_v50 = vld [vmem:[#allocation5 + $0x2d18] sm:$0xff]  }
 0x5e8   :  { %27543 = vmatprep.subr.bf16.mxu1 %v29758_v53  ;;  %v29794_v51 = vld [vmem:[#allocation5 + $0x2dd8] sm:$0xff]  }
 0x5e9   :  { %v29795_v53 = vld [vmem:[#allocation5 + $0x2d98] sm:$0xff]  }
 0x5ea   :  { %27522 = vmatpush3.bf16.msra.mxu0 %v29757_v52 }
 0x5eb   :  { %27544 = vmatpush3.bf16.msra.mxu1 %v29759_v54  ;;  %27523 = vmatprep.subr.bf16.mxu0 %v29760_v55  ;;  %v29796_v54 = vld [vmem:[#allocation5 + $0x2d50] sm:$0xff]  }
 0x5ec   :  { %27545 = vmatprep.subr.bf16.mxu1 %v29762_v57  ;;  %v485_v57 = vadd.s32 23168, %v30458_v22 }
 0x5ee   :  { %27524 = vmatpush3.bf16.msra.mxu0 %v29761_v56  ;;  %v29797_v56 = vld [vmem:[#allocation5 + $0x2d10] sm:$0xff]  }
 0x5ef   :  { %27546 = vmatpush3.bf16.msra.mxu1 %v29763_v58  ;;  %27525 = vmatprep.subr.bf16.mxu0 %v29764_v60 }
 0x5f0   :  { %27547 = vmatprep.subr.bf16.mxu1 %v29766_v63  ;;  %v484_v63 = vadd.s32 23040, %v30458_v22 }
 0x5f2   :  { %27526 = vmatpush3.bf16.msra.mxu0 %v29765_v61 }
 0x5f3   :  { %27548 = vmatpush3.bf16.msra.mxu1 %v29767_v2  ;;  %27527 = vmatprep.subr.bf16.mxu0 %v29768_v5  ;;  %v735_v5 = vand.u32 31, %v485_v57  ;;  %v29832_v57 = vld [vmem:[#allocation5 + $0x2e48] sm:$0xff]  }
 0x5f4   :  { %v27267_v59 = vpop.f32.mrf.mxu0  ;;  %27549 = vmatprep.subr.bf16.mxu1 %v29770_v12 }
 0x5f5   :  { %v27289_v1 = vpop.f32.mrf.mxu1 }
 0x5f6   :  { %v27268_v62 = vpop.f32.mrf.mxu0  ;;  %27528 = vmatpush3.bf16.msra.mxu0 %v29769_v8  ;;  %v487_v8 = vadd.s32 23424, %v30458_v22 }
 0x5f7   :  { %v27269_v0 = vadd.f32 %v27268_v62, %v27267_v59  ;;  %v27290_v7 = vpop.f32.mrf.mxu1  ;;  %27550 = vmatpush3.bf16.msra.mxu1 %v29771_v15  ;;  %27529 = vmatprep.subr.bf16.mxu0 %v29772_v18  ;;  %v29798_v59 = vld [vmem:[#allocation5 + $0x2dd0] sm:$0xff]   ;;  %v234_v18 = vld [vmem:[#allocation2 + $0x5a8] sm:$0xff] }
 0x5f8   :  { %v27270_v4 = vpop.f32.mrf.mxu0  ;;  %v27291_v10 = vadd.f32 %v27290_v7, %v27289_v1  ;;  %v29799_v62 = vld [vmem:[#allocation5 + $0x2d90] sm:$0xff]   ;;  %v29800_v1 = vld [vmem:[#allocation5 + $0x2d48] sm:$0xff]   ;;  %v737_v19 = vand.u32 31, %v487_v8  ;;  %vm985_vm8 = vcmp.eq.s32.totalorder %v735_v5, %v234_v18 }
 0x5f9   :  { %v20886_v6 = vadd.f32 %v27269_v0, %v30915_v24  ;;  %v27292_v14 = vpop.f32.mrf.mxu1  ;;  %v29774_v24 = vld [vmem:[#allocation5 + $0x2cc0] sm:$0xff]   ;;  %v29801_v4 = vld [vmem:[#allocation5 + $0x2d08] sm:$0xff]   ;;  %vm25439_vm9 = vmpackc.low %vm985_vm8, %vm985_vm8 }
 0x5fa   :  { %v27271_v11 = vpop.f32.mrf.mxu0  ;;  %27530 = vmatpush3.bf16.msra.mxu0 %v29773_v21  ;;  %27551 = vmatprep.subr.bf16.mxu1 %v29774_v24  ;;  %v29802_v7 = vld [vmem:[#allocation5 + $0x2dc8] sm:$0xff]   ;;  %v486_v14 = vadd.s32 23296, %v30458_v22  ;;  %v233_v21 = vld [vmem:[#allocation2 + $0x5a0] sm:$0xff]  ;;  %v29808_v24 = vld [vmem:[#allocation5 + $0x2e78] sm:$0xff]   ;;  %vm987_vm12 = vcmp.eq.s32.totalorder %v737_v19, %v236_v25 }
 0x5fb   :  { %v30926_v17 = vadd.f32 %v27291_v10, %v20886_v6  ;;  %v27293_v20 = vpop.f32.mrf.mxu1  ;;  %27552 = vmatpush3.bf16.msra.mxu1 %v29775_v27  ;;  %27559 = vmatprep.subr.bf16.mxu0 %v29776_v30  ;;  %v29803_v10 = vld [vmem:[#allocation5 + $0x2d88] sm:$0xff]   ;;  %v734_v11 = vand.u32 31, %v484_v63  ;;  %vm25443_vm13 = vmpackc.low %vm987_vm12, %vm987_vm12  ;;  %v235_v27 = vld [vmem:[#allocation2 + $0x5b0] sm:$0xff] }
 0x5fc   :  { %27581 = vmatprep.subr.bf16.mxu1 %v29778_v34  ;;  %v29807_v20 = vld [vmem:[#allocation5 + $0x2d80] sm:$0xff]   ;;  %v736_v23 = vand.u32 31, %v486_v14  ;;  %v29812_v30 = vld [vmem:[#allocation5 + $0x2e70] sm:$0xff]   ;;  %v29816_v34 = vld [vmem:[#allocation5 + $0x2e68] sm:$0xff]  }
 0x5fd   :  { %25434 = vmatmul.mubr.msk.bf16.vlgmr.msra.gmra.mxu0 %vm25433_vm3, %v30427_v44  ;;  %vm984_vm10 = vcmp.eq.s32.totalorder %v734_v11, %v233_v21  ;;  %v29838_v11 = vld [vmem:[#allocation5 + $0x2ec0] sm:$0xff]   ;;  %v240_v18 = vld [vmem:[#allocation2 + $0x5d8] sm:$0xff]  ;;  %v29841_v19 = vld [vmem:[#allocation5 + $0x2f38] sm:$0xff]  }
 0x5fe   :  { %27560 = vmatpush3.bf16.msra.mxu0 %v29777_v32  ;;  %25438 = vmatmul.mubr.msk.bf16.vlgmr.msra.gmra.mxu1 %vm25437_vm7, %v30427_v44  ;;  %vm25441_vm11 = vmpackc.low %vm984_vm10, %vm984_vm10  ;;  %vm986_vm14 = vcmp.eq.s32.totalorder %v736_v23, %v235_v27  ;;  %v29814_v32 = vld [vmem:[#allocation5 + $0x2ef0] sm:$0xff]   ;;  %v29839_v14 = vld [vmem:[#allocation5 + $0x2e80] sm:$0xff]  }
 0x5ff   :  { %27582 = vmatpush3.bf16.msra.mxu1 %v29779_v35  ;;  %27561 = vmatprep.subr.bf16.mxu0 %v29780_v36  ;;  %vm25445_vm15 = vmpackc.low %vm986_vm14, %vm986_vm14  ;;  %v29817_v35 = vld [vmem:[#allocation5 + $0x2e28] sm:$0xff]   ;;  %v29842_v21 = vld [vmem:[#allocation5 + $0x2ff8] sm:$0xff]  }
 0x600   :  { %27583 = vmatprep.subr.bf16.mxu1 %v29782_v38  ;;  %25440 = vmatprep.mubr.msk.bf16.mxu0 %vm25439_vm9, %v30427_v44  ;;  %v29818_v36 = vld [vmem:[#allocation5 + $0x2ee8] sm:$0xff]   ;;  %v29820_v38 = vld [vmem:[#allocation5 + $0x2e60] sm:$0xff]   ;;  %v29843_v23 = vld [vmem:[#allocation5 + $0x2fb8] sm:$0xff]  }
 0x601   :  { %25444 = vmatprep.mubr.msk.bf16.mxu1 %vm25443_vm13, %v30427_v44  ;;  %v29845_v25 = vld [vmem:[#allocation5 + $0x2f30] sm:$0xff]  }
 0x602   :  { %27562 = vmatpush3.bf16.msra.mxu0 %v29781_v37  ;;  %v29819_v37 = vld [vmem:[#allocation5 + $0x2ea8] sm:$0xff]   ;;  %v29847_v27 = vld [vmem:[#allocation5 + $0x2fb0] sm:$0xff]  }
 0x603   :  { %27584 = vmatpush3.bf16.msra.mxu1 %v29783_v39  ;;  %27563 = vmatprep.subr.bf16.mxu0 %v29784_v40  ;;  %v29821_v39 = vld [vmem:[#allocation5 + $0x2e20] sm:$0xff]  }
 0x604   :  { %27585 = vmatprep.subr.bf16.mxu1 %v29786_v42  ;;  %v29822_v40 = vld [vmem:[#allocation5 + $0x2ee0] sm:$0xff]   ;;  %v29824_v42 = vld [vmem:[#allocation5 + $0x2e58] sm:$0xff]  }
 0x606   :  { %27564 = vmatpush3.bf16.msra.mxu0 %v29785_v41  ;;  %v29823_v41 = vld [vmem:[#allocation5 + $0x2ea0] sm:$0xff]  }
 0x607   :  { %27586 = vmatpush3.bf16.msra.mxu1 %v29787_v43  ;;  %27565 = vmatprep.subr.bf16.mxu0 %v29788_v45  ;;  %v29825_v43 = vld [vmem:[#allocation5 + $0x2e18] sm:$0xff]  }
 0x608   :  { %27587 = vmatprep.subr.bf16.mxu1 %v29790_v47  ;;  %v29826_v45 = vld [vmem:[#allocation5 + $0x2ed8] sm:$0xff]  }
 0x60a   :  { %27566 = vmatpush3.bf16.msra.mxu0 %v29789_v46  ;;  %v29827_v46 = vld [vmem:[#allocation5 + $0x2e98] sm:$0xff]  }
 0x60b   :  { %27588 = vmatpush3.bf16.msra.mxu1 %v29791_v48  ;;  %27567 = vmatprep.subr.bf16.mxu0 %v29792_v49  ;;  %v29828_v48 = vld [vmem:[#allocation5 + $0x2e50] sm:$0xff]  }
 0x60c   :  { %27589 = vmatprep.subr.bf16.mxu1 %v29794_v51  ;;  %v29829_v49 = vld [vmem:[#allocation5 + $0x2e10] sm:$0xff]  }
 0x60d   :  { %v29830_v51 = vld [vmem:[#allocation5 + $0x2ed0] sm:$0xff]  }
 0x60e   :  { %27568 = vmatpush3.bf16.msra.mxu0 %v29793_v50 }
 0x60f   :  { %27590 = vmatpush3.bf16.msra.mxu1 %v29795_v53  ;;  %27569 = vmatprep.subr.bf16.mxu0 %v29796_v54 }
 0x610   :  { %27591 = vmatprep.subr.bf16.mxu1 %v29798_v59 }
 0x612   :  { %27570 = vmatpush3.bf16.msra.mxu0 %v29797_v56 }
 0x613   :  { %27592 = vmatpush3.bf16.msra.mxu1 %v29799_v62  ;;  %27571 = vmatprep.subr.bf16.mxu0 %v29800_v1 }
 0x614   :  { %v27311_v52 = vpop.f32.mrf.mxu0  ;;  %27593 = vmatprep.subr.bf16.mxu1 %v29802_v7  ;;  %v490_v7 = vadd.s32 23808, %v30458_v22 }
 0x615   :  { %v27333_v60 = vpop.f32.mrf.mxu1 }
 0x616   :  { %v27312_v55 = vpop.f32.mrf.mxu0  ;;  %27572 = vmatpush3.bf16.msra.mxu0 %v29801_v4  ;;  %v491_v4 = vadd.s32 23936, %v30458_v22 }
 0x617   :  { %v27313_v58 = vadd.f32 %v27312_v55, %v27311_v52  ;;  %v27334_v2 = vpop.f32.mrf.mxu1  ;;  %27594 = vmatpush3.bf16.msra.mxu1 %v29803_v10  ;;  %27573 = vmatprep.subr.bf16.mxu0 %v29804_v13  ;;  %v489_v52 = vadd.s32 23680, %v30458_v22  ;;  %v29831_v55 = vld [vmem:[#allocation5 + $0x2e90] sm:$0xff]  }
 0x618   :  { %v27314_v61 = vpop.f32.mrf.mxu0  ;;  %v27335_v6 = vadd.f32 %v27334_v2, %v27333_v60  ;;  %v29833_v60 = vld [vmem:[#allocation5 + $0x2e08] sm:$0xff]   ;;  %v741_v13 = vand.u32 31, %v491_v4 }
 0x619   :  { %v20966_v0 = vadd.f32 %v27313_v58, %v30926_v17  ;;  %v27336_v9 = vpop.f32.mrf.mxu1  ;;  %v29806_v17 = vld [vmem:[#allocation5 + $0x2dc0] sm:$0xff]   ;;  %v488_v61 = vadd.s32 23552, %v30458_v22  ;;  %v739_v1 = vand.u32 31, %v489_v52 }
 0x61a   :  { %v27315_v3 = vpop.f32.mrf.mxu0  ;;  %27574 = vmatpush3.bf16.msra.mxu0 %v29805_v16  ;;  %27595 = vmatprep.subr.bf16.mxu1 %v29806_v17  ;;  %v29837_v9 = vld [vmem:[#allocation5 + $0x2e00] sm:$0xff]   ;;  %v740_v16 = vand.u32 31, %v490_v7  ;;  %v29840_v17 = vld [vmem:[#allocation5 + $0x2f78] sm:$0xff]   ;;  %vm991_vm4 = vcmp.eq.s32.totalorder %v741_v13, %v240_v18  ;;  %v29877_v18 = vld [vmem:[#allocation5 + $0x3030] sm:$0xff]  }
 0x61b   :  { %v30937_v12 = vadd.f32 %v27335_v6, %v20966_v0  ;;  %v27337_v15 = vpop.f32.mrf.mxu1  ;;  %27596 = vmatpush3.bf16.msra.mxu1 %v29807_v20  ;;  %27603 = vmatprep.subr.bf16.mxu0 %v29808_v24  ;;  %v29834_v0 = vld [vmem:[#allocation5 + $0x2ec8] sm:$0xff]   ;;  %v29836_v6 = vld [vmem:[#allocation5 + $0x2e40] sm:$0xff]   ;;  %v738_v10 = vand.u32 31, %v488_v61  ;;  %vm25451_vm5 = vmpackc.low %vm991_vm4, %vm991_vm4 }
 0x61c   :  { %27625 = vmatprep.subr.bf16.mxu1 %v29810_v28  ;;  %v29835_v3 = vld [vmem:[#allocation5 + $0x2e88] sm:$0xff]   ;;  %v237_v15 = vld [vmem:[#allocation2 + $0x5c0] sm:$0xff]  ;;  %v239_v20 = vld [vmem:[#allocation2 + $0x5d0] sm:$0xff] }
 0x61d   :  { %25442 = vmatmul.mubr.msk.bf16.vlgmr.msra.gmra.mxu0 %vm25441_vm11, %v30427_v44  ;;  %vm988_vm2 = vcmp.eq.s32.totalorder %v738_v10, %v237_v15  ;;  %vm990_vm6 = vcmp.eq.s32.totalorder %v740_v16, %v239_v20  ;;  %v29844_v24 = vld [vmem:[#allocation5 + $0x2f70] sm:$0xff]   ;;  %v29848_v28 = vld [vmem:[#allocation5 + $0x2f68] sm:$0xff]   ;;  %v29873_v13 = vld [vmem:[#allocation5 + $0x3038] sm:$0xff]  }
 0x61e   :  { %27604 = vmatpush3.bf16.msra.mxu0 %v29809_v26  ;;  %25446 = vmatmul.mubr.msk.bf16.vlgmr.msra.gmra.mxu1 %vm25445_vm15, %v30427_v44  ;;  %vm25449_vm3 = vmpackc.low %vm988_vm2, %vm988_vm2  ;;  %v29846_v26 = vld [vmem:[#allocation5 + $0x2ff0] sm:$0xff]   ;;  %v29867_v61 = vld [vmem:[#allocation5 + $0x2f88] sm:$0xff]  }
 0x61f   :  { %27626 = vmatpush3.bf16.msra.mxu1 %v29811_v29  ;;  %27605 = vmatprep.subr.bf16.mxu0 %v29812_v30  ;;  %vm25453_vm7 = vmpackc.low %vm990_vm6, %vm990_vm6  ;;  %v29849_v29 = vld [vmem:[#allocation5 + $0x2f28] sm:$0xff]   ;;  %v29874_v15 = vld [vmem:[#allocation5 + $0x30f8] sm:$0xff]  }
 0x620   :  { %27627 = vmatprep.subr.bf16.mxu1 %v29814_v32  ;;  %25452 = vmatprep.mubr.msk.bf16.mxu1 %vm25451_vm5, %v30427_v44  ;;  %v29850_v30 = vld [vmem:[#allocation5 + $0x2fe8] sm:$0xff]   ;;  %v29852_v32 = vld [vmem:[#allocation5 + $0x2f60] sm:$0xff]   ;;  %v29875_v16 = vld [vmem:[#allocation5 + $0x30b8] sm:$0xff]  }
 0x621   :  { %v29879_v20 = vld [vmem:[#allocation5 + $0x30b0] sm:$0xff]  }
 0x622   :  { %27606 = vmatpush3.bf16.msra.mxu0 %v29813_v31  ;;  %v29851_v31 = vld [vmem:[#allocation5 + $0x2fa8] sm:$0xff]  }
 0x623   :  { %27628 = vmatpush3.bf16.msra.mxu1 %v29815_v33  ;;  %27607 = vmatprep.subr.bf16.mxu0 %v29816_v34  ;;  %v29853_v33 = vld [vmem:[#allocation5 + $0x2f20] sm:$0xff]  }
 0x624   :  { %27629 = vmatprep.subr.bf16.mxu1 %v29818_v36  ;;  %v29854_v34 = vld [vmem:[#allocation5 + $0x2fe0] sm:$0xff]   ;;  %v29856_v36 = vld [vmem:[#allocation5 + $0x2f58] sm:$0xff]  }
 0x626   :  { %27608 = vmatpush3.bf16.msra.mxu0 %v29817_v35  ;;  %v29855_v35 = vld [vmem:[#allocation5 + $0x2fa0] sm:$0xff]  }
 0x627   :  { %27630 = vmatpush3.bf16.msra.mxu1 %v29819_v37  ;;  %27609 = vmatprep.subr.bf16.mxu0 %v29820_v38  ;;  %v29857_v37 = vld [vmem:[#allocation5 + $0x2f18] sm:$0xff]  }
 0x628   :  { %27631 = vmatprep.subr.bf16.mxu1 %v29822_v40  ;;  %v29858_v38 = vld [vmem:[#allocation5 + $0x2fd8] sm:$0xff]  }
 0x62a   :  { %27610 = vmatpush3.bf16.msra.mxu0 %v29821_v39  ;;  %v29859_v39 = vld [vmem:[#allocation5 + $0x2f98] sm:$0xff]  }
 0x62b   :  { %27632 = vmatpush3.bf16.msra.mxu1 %v29823_v41  ;;  %27611 = vmatprep.subr.bf16.mxu0 %v29824_v42  ;;  %v29860_v41 = vld [vmem:[#allocation5 + $0x2f50] sm:$0xff]  }
 0x62c   :  { %27633 = vmatprep.subr.bf16.mxu1 %v29826_v45  ;;  %v29861_v42 = vld [vmem:[#allocation5 + $0x2f10] sm:$0xff]  }
 0x62d   :  { %v29862_v45 = vld [vmem:[#allocation5 + $0x2fd0] sm:$0xff]  }
 0x62e   :  { %27612 = vmatpush3.bf16.msra.mxu0 %v29825_v43 }
 0x62f   :  { %27634 = vmatpush3.bf16.msra.mxu1 %v29827_v46  ;;  %27613 = vmatprep.subr.bf16.mxu0 %v29828_v48  ;;  %v29863_v48 = vld [vmem:[#allocation5 + $0x2f90] sm:$0xff]  }
 0x630   :  { %27635 = vmatprep.subr.bf16.mxu1 %v29830_v51  ;;  %v29864_v51 = vld [vmem:[#allocation5 + $0x2f48] sm:$0xff]  }
 0x632   :  { %27614 = vmatpush3.bf16.msra.mxu0 %v29829_v49  ;;  %v493_v49 = vadd.s32 24192, %v30458_v22 }
 0x633   :  { %27636 = vmatpush3.bf16.msra.mxu1 %v29831_v55  ;;  %27615 = vmatprep.subr.bf16.mxu0 %v29832_v57  ;;  %v492_v55 = vadd.s32 24064, %v30458_v22 }
 0x634   :  { %27637 = vmatprep.subr.bf16.mxu1 %v29834_v0  ;;  %v29868_v0 = vld [vmem:[#allocation5 + $0x2f40] sm:$0xff]  }
 0x635   :  { %v27377_v54 = vpop.f32.mrf.mxu1  ;;  %v742_v4 = vand.u32 31, %v492_v55 }
 0x636   :  { %27616 = vmatpush3.bf16.msra.mxu0 %v29833_v60 }
 0x637   :  { %v27378_v59 = vpop.f32.mrf.mxu1  ;;  %27638 = vmatpush3.bf16.msra.mxu1 %v29835_v3  ;;  %27617 = vmatprep.subr.bf16.mxu0 %v29836_v6  ;;  %v29869_v3 = vld [vmem:[#allocation5 + $0x2f00] sm:$0xff]   ;;  %v242_v6 = vld [vmem:[#allocation2 + $0x5e8] sm:$0xff] }
 0x638   :  { %v27379_v62 = vadd.f32 %v27378_v59, %v27377_v54  ;;  %27639 = vmatprep.subr.bf16.mxu1 %v29838_v11  ;;  %v29865_v54 = vld [vmem:[#allocation5 + $0x2f08] sm:$0xff]   ;;  %v495_v59 = vadd.s32 24448, %v30458_v22  ;;  %v29872_v11 = vld [vmem:[#allocation5 + $0x3078] sm:$0xff]  }
 0x639   :  { %v27380_v2 = vpop.f32.mrf.mxu1 }
 0x63a   :  { %27618 = vmatpush3.bf16.msra.mxu0 %v29837_v9  ;;  %v745_v7 = vand.u32 31, %v495_v59  ;;  %v241_v9 = vld [vmem:[#allocation2 + $0x5e0] sm:$0xff]  ;;  %v29900_v59 = vld [vmem:[#allocation5 + $0x3040] sm:$0xff]  }
 0x63b   :  { %v27381_v8 = vpop.f32.mrf.mxu1  ;;  %27640 = vmatpush3.bf16.msra.mxu1 %v29839_v14  ;;  %27647 = vmatprep.subr.bf16.mxu0 %v29840_v17  ;;  %vm992_vm10 = vcmp.eq.s32.totalorder %v742_v4, %v241_v9  ;;  %v243_v14 = vld [vmem:[#allocation2 + $0x5f0] sm:$0xff]  ;;  %v29876_v17 = vld [vmem:[#allocation5 + $0x3070] sm:$0xff]   ;;  %v29906_v9 = vld [vmem:[#allocation5 + $0x31f8] sm:$0xff]  }
 0x63c   :  { %27669 = vmatprep.subr.bf16.mxu1 %v29842_v21  ;;  %v29871_v8 = vld [vmem:[#allocation5 + $0x2f80] sm:$0xff]   ;;  %vm25457_vm11 = vmpackc.low %vm992_vm10, %vm992_vm10  ;;  %v29880_v21 = vld [vmem:[#allocation5 + $0x3068] sm:$0xff]  }
 0x63d   :  { %v27355_v47 = vpop.f32.mrf.mxu0 }
 0x63e   :  { %25454 = vmatmul.mubr.msk.bf16.vlgmr.msra.gmra.mxu1 %vm25453_vm7, %v30427_v44 }
 0x63f   :  { %v27356_v50 = vpop.f32.mrf.mxu0  ;;  %27670 = vmatpush3.bf16.msra.mxu1 %v29843_v23  ;;  %v29881_v23 = vld [vmem:[#allocation5 + $0x3028] sm:$0xff]  }
 0x640   :  { %v27357_v53 = vadd.f32 %v27356_v50, %v27355_v47  ;;  %27671 = vmatprep.subr.bf16.mxu1 %v29846_v26  ;;  %v29884_v26 = vld [vmem:[#allocation5 + $0x3060] sm:$0xff]  }
 0x641   :  { %v27358_v56 = vpop.f32.mrf.mxu0 }
 0x642   :  { %v21046_v58 = vadd.f32 %v27357_v53, %v30937_v12  ;;  %v238_v12 = vld [vmem:[#allocation2 + $0x5c8] sm:$0xff] }
 0x643   :  { %v27359_v63 = vpop.f32.mrf.mxu0  ;;  %vm989_vm0 = vcmp.eq.s32.totalorder %v739_v1, %v238_v12  ;;  %27672 = vmatpush3.bf16.msra.mxu1 %v29847_v27  ;;  %v494_v1 = vadd.s32 24320, %v30458_v22  ;;  %v244_v12 = vld [vmem:[#allocation2 + $0x5f8] sm:$0xff]  ;;  %v29885_v27 = vld [vmem:[#allocation5 + $0x3020] sm:$0xff]  }
 0x644   :  { %v30948_v5 = vadd.f32 %v27379_v62, %v21046_v58  ;;  %vm25447_vm1 = vmpackc.low %vm989_vm0, %vm989_vm0  ;;  %27673 = vmatprep.subr.bf16.mxu1 %v29850_v30  ;;  %v29866_v58 = vld [vmem:[#allocation5 + $0x2fc8] sm:$0xff]   ;;  %v743_v62 = vand.u32 31, %v493_v49  ;;  %vm995_vm12 = vcmp.eq.s32.totalorder %v745_v7, %v244_v12  ;;  %v29888_v30 = vld [vmem:[#allocation5 + $0x3058] sm:$0xff]  }
 0x645   :  { %25448 = vmatprep.mubr.msk.bf16.mxu0 %vm25447_vm1, %v30427_v44  ;;  %v744_v10 = vand.u32 31, %v494_v1  ;;  %vm25459_vm13 = vmpackc.low %vm995_vm12, %vm995_vm12  ;;  %v29905_v7 = vld [vmem:[#allocation5 + $0x3138] sm:$0xff]   ;;  %v29909_v12 = vld [vmem:[#allocation5 + $0x3130] sm:$0xff]  }
 0x646   :  { %25450 = vmatmul.mubr.msk.bf16.vlgmr.msra.gmra.mxu0 %vm25449_vm3, %v30427_v44  ;;  %vm993_vm8 = vcmp.eq.s32.totalorder %v743_v62, %v242_v6  ;;  %25460 = vmatprep.mubr.msk.bf16.mxu1 %vm25459_vm13, %v30427_v44  ;;  %v29901_v62 = vld [vmem:[#allocation5 + $0x3000] sm:$0xff]   ;;  %v248_v6 = vld [vmem:[#allocation2 + $0x618] sm:$0xff] }
 0x647   :  { %27648 = vmatpush3.bf16.msra.mxu0 %v29841_v19  ;;  %27674 = vmatpush3.bf16.msra.mxu1 %v29851_v31  ;;  %vm25455_vm9 = vmpackc.low %vm993_vm8, %vm993_vm8  ;;  %vm994_vm14 = vcmp.eq.s32.totalorder %v744_v10, %v243_v14  ;;  %v29878_v19 = vld [vmem:[#allocation5 + $0x30f0] sm:$0xff]   ;;  %v29889_v31 = vld [vmem:[#allocation5 + $0x3018] sm:$0xff]  }
 0x648   :  { %27649 = vmatprep.subr.bf16.mxu0 %v29844_v24  ;;  %27675 = vmatprep.subr.bf16.mxu1 %v29854_v34  ;;  %vm25461_vm15 = vmpackc.low %vm994_vm14, %vm994_vm14  ;;  %v29882_v24 = vld [vmem:[#allocation5 + $0x30e8] sm:$0xff]   ;;  %v29891_v34 = vld [vmem:[#allocation5 + $0x3098] sm:$0xff]  }
 0x649   :  { %25456 = vmatprep.mubr.msk.bf16.mxu0 %vm25455_vm9, %v30427_v44  ;;  %v29907_v10 = vld [vmem:[#allocation5 + $0x31b8] sm:$0xff]   ;;  %v29911_v14 = vld [vmem:[#allocation5 + $0x31b0] sm:$0xff]  }
 0x64b   :  { %27650 = vmatpush3.bf16.msra.mxu0 %v29845_v25  ;;  %27676 = vmatpush3.bf16.msra.mxu1 %v29855_v35  ;;  %v29883_v25 = vld [vmem:[#allocation5 + $0x30a8] sm:$0xff]   ;;  %v29892_v35 = vld [vmem:[#allocation5 + $0x3050] sm:$0xff]  }
 0x64c   :  { %27651 = vmatprep.subr.bf16.mxu0 %v29848_v28  ;;  %27677 = vmatprep.subr.bf16.mxu1 %v29858_v38  ;;  %v29886_v28 = vld [vmem:[#allocation5 + $0x30e0] sm:$0xff]   ;;  %v497_v38 = vadd.s32 24704, %v30458_v22 }
 0x64f   :  { %27652 = vmatpush3.bf16.msra.mxu0 %v29849_v29  ;;  %27678 = vmatpush3.bf16.msra.mxu1 %v29859_v39  ;;  %v29887_v29 = vld [vmem:[#allocation5 + $0x30a0] sm:$0xff]  }
 0x650   :  { %27653 = vmatprep.subr.bf16.mxu0 %v29852_v32  ;;  %27679 = vmatprep.subr.bf16.mxu1 %v29862_v45  ;;  %v29890_v32 = vld [vmem:[#allocation5 + $0x30d8] sm:$0xff]   ;;  %v496_v45 = vadd.s32 24576, %v30458_v22 }
 0x653   :  { %27654 = vmatpush3.bf16.msra.mxu0 %v29853_v33  ;;  %27680 = vmatpush3.bf16.msra.mxu1 %v29863_v48 }
 0x654   :  { %27655 = vmatprep.subr.bf16.mxu0 %v29856_v36  ;;  %27681 = vmatprep.subr.bf16.mxu1 %v29866_v58 }
 0x657   :  { %27656 = vmatpush3.bf16.msra.mxu0 %v29857_v37  ;;  %27682 = vmatpush3.bf16.msra.mxu1 %v29867_v61  ;;  %v29893_v37 = vld [vmem:[#allocation5 + $0x3010] sm:$0xff]  }
 0x658   :  { %27657 = vmatprep.subr.bf16.mxu0 %v29860_v41 }
 0x65b   :  { %27658 = vmatpush3.bf16.msra.mxu0 %v29861_v42 }
 0x65c   :  { %27659 = vmatprep.subr.bf16.mxu0 %v29864_v51  ;;  %v747_v51 = vand.u32 31, %v497_v38  ;;  %v29928_v38 = vld [vmem:[#allocation5 + $0x3148] sm:$0xff]  }
 0x65d   :  { %v27399_v40 = vpop.f32.mrf.mxu0 }
 0x65e   :  { %v27421_v47 = vpop.f32.mrf.mxu1 }
 0x65f   :  { %v27400_v43 = vpop.f32.mrf.mxu0  ;;  %27660 = vmatpush3.bf16.msra.mxu0 %v29865_v54  ;;  %v499_v54 = vadd.s32 24960, %v30458_v22 }
 0x660   :  { %v27401_v46 = vadd.f32 %v27400_v43, %v27399_v40  ;;  %v27422_v53 = vpop.f32.mrf.mxu1  ;;  %27661 = vmatprep.subr.bf16.mxu0 %v29868_v0  ;;  %v29894_v40 = vld [vmem:[#allocation5 + $0x30d0] sm:$0xff]   ;;  %v246_v0 = vld [vmem:[#allocation2 + $0x608] sm:$0xff] }
 0x661   :  { %v27402_v50 = vpop.f32.mrf.mxu0  ;;  %v27423_v56 = vadd.f32 %v27422_v53, %v27421_v47  ;;  %v29895_v43 = vld [vmem:[#allocation5 + $0x3090] sm:$0xff]   ;;  %v29896_v47 = vld [vmem:[#allocation5 + $0x3048] sm:$0xff]   ;;  %v749_v1 = vand.u32 31, %v499_v54  ;;  %vm997_vm0 = vcmp.eq.s32.totalorder %v747_v51, %v246_v0 }
 0x662   :  { %v21126_v52 = vadd.f32 %v27401_v46, %v30948_v5  ;;  %v27424_v60 = vpop.f32.mrf.mxu1  ;;  %v29870_v5 = vld [vmem:[#allocation5 + $0x2fc0] sm:$0xff]   ;;  %v29897_v50 = vld [vmem:[#allocation5 + $0x3008] sm:$0xff]   ;;  %vm25463_vm1 = vmpackc.low %vm997_vm0, %vm997_vm0 }
 0x663   :  { %v27403_v57 = vpop.f32.mrf.mxu0  ;;  %27662 = vmatpush3.bf16.msra.mxu0 %v29869_v3  ;;  %27683 = vmatprep.subr.bf16.mxu1 %v29870_v5  ;;  %v29898_v53 = vld [vmem:[#allocation5 + $0x30c8] sm:$0xff]   ;;  %v498_v60 = vadd.s32 24832, %v30458_v22  ;;  %v245_v3 = vld [vmem:[#allocation2 + $0x600] sm:$0xff]  ;;  %v29904_v5 = vld [vmem:[#allocation5 + $0x3178] sm:$0xff]   ;;  %vm999_vm4 = vcmp.eq.s32.totalorder %v749_v1, %v248_v6 }
 0x664   :  { %v30959_v63 = vadd.f32 %v27423_v56, %v21126_v52  ;;  %v27425_v2 = vpop.f32.mrf.mxu1  ;;  %27684 = vmatpush3.bf16.msra.mxu1 %v29871_v8  ;;  %27691 = vmatprep.subr.bf16.mxu0 %v29872_v11  ;;  %v29899_v56 = vld [vmem:[#allocation5 + $0x3088] sm:$0xff]   ;;  %v746_v57 = vand.u32 31, %v496_v45  ;;  %vm25467_vm5 = vmpackc.low %vm999_vm4, %vm999_vm4  ;;  %v247_v8 = vld [vmem:[#allocation2 + $0x610] sm:$0xff] }
 0x665   :  { %27713 = vmatprep.subr.bf16.mxu1 %v29874_v15  ;;  %v29903_v2 = vld [vmem:[#allocation5 + $0x3080] sm:$0xff]   ;;  %v748_v4 = vand.u32 31, %v498_v60  ;;  %v29908_v11 = vld [vmem:[#allocation5 + $0x3170] sm:$0xff]   ;;  %v29912_v15 = vld [vmem:[#allocation5 + $0x3168] sm:$0xff]  }
 0x666   :  { %25458 = vmatmul.mubr.msk.bf16.vlgmr.msra.gmra.mxu0 %vm25457_vm11, %v30427_v44  ;;  %vm996_vm2 = vcmp.eq.s32.totalorder %v746_v57, %v245_v3  ;;  %v29934_v57 = vld [vmem:[#allocation5 + $0x31c0] sm:$0xff]   ;;  %v252_v0 = vld [vmem:[#allocation2 + $0x638] sm:$0xff]  ;;  %v29937_v1 = vld [vmem:[#allocation5 + $0x3238] sm:$0xff]  }
 0x667   :  { %27692 = vmatpush3.bf16.msra.mxu0 %v29873_v13  ;;  %25462 = vmatmul.mubr.msk.bf16.vlgmr.msra.gmra.mxu1 %vm25461_vm15, %v30427_v44  ;;  %vm25465_vm3 = vmpackc.low %vm996_vm2, %vm996_vm2  ;;  %vm998_vm6 = vcmp.eq.s32.totalorder %v748_v4, %v247_v8  ;;  %v29910_v13 = vld [vmem:[#allocation5 + $0x31f0] sm:$0xff]   ;;  %v29935_v60 = vld [vmem:[#allocation5 + $0x3180] sm:$0xff]  }
 0x668   :  { %27714 = vmatpush3.bf16.msra.mxu1 %v29875_v16  ;;  %27693 = vmatprep.subr.bf16.mxu0 %v29876_v17  ;;  %vm25469_vm7 = vmpackc.low %vm998_vm6, %vm998_vm6  ;;  %v29913_v16 = vld [vmem:[#allocation5 + $0x3128] sm:$0xff]   ;;  %v29938_v3 = vld [vmem:[#allocation5 + $0x32f8] sm:$0xff]  }
 0x669   :  { %27715 = vmatprep.subr.bf16.mxu1 %v29878_v19  ;;  %25464 = vmatprep.mubr.msk.bf16.mxu0 %vm25463_vm1, %v30427_v44  ;;  %v29914_v17 = vld [vmem:[#allocation5 + $0x31e8] sm:$0xff]   ;;  %v29916_v19 = vld [vmem:[#allocation5 + $0x3160] sm:$0xff]   ;;  %v29939_v4 = vld [vmem:[#allocation5 + $0x32b8] sm:$0xff]  }
 0x66a   :  { %25468 = vmatprep.mubr.msk.bf16.mxu1 %vm25467_vm5, %v30427_v44  ;;  %v29941_v6 = vld [vmem:[#allocation5 + $0x3230] sm:$0xff]  }
 0x66b   :  { %27694 = vmatpush3.bf16.msra.mxu0 %v29877_v18  ;;  %v29915_v18 = vld [vmem:[#allocation5 + $0x31a8] sm:$0xff]   ;;  %v29943_v8 = vld [vmem:[#allocation5 + $0x32b0] sm:$0xff]  }
 0x66c   :  { %27716 = vmatpush3.bf16.msra.mxu1 %v29879_v20  ;;  %27695 = vmatprep.subr.bf16.mxu0 %v29880_v21  ;;  %v29917_v20 = vld [vmem:[#allocation5 + $0x3120] sm:$0xff]  }
 0x66d   :  { %27717 = vmatprep.subr.bf16.mxu1 %v29882_v24  ;;  %v29918_v21 = vld [vmem:[#allocation5 + $0x31e0] sm:$0xff]   ;;  %v29920_v24 = vld [vmem:[#allocation5 + $0x3158] sm:$0xff]  }
 0x66f   :  { %27696 = vmatpush3.bf16.msra.mxu0 %v29881_v23  ;;  %v29919_v23 = vld [vmem:[#allocation5 + $0x31a0] sm:$0xff]  }
 0x670   :  { %27718 = vmatpush3.bf16.msra.mxu1 %v29883_v25  ;;  %27697 = vmatprep.subr.bf16.mxu0 %v29884_v26  ;;  %v29921_v25 = vld [vmem:[#allocation5 + $0x3118] sm:$0xff]  }
 0x671   :  { %27719 = vmatprep.subr.bf16.mxu1 %v29886_v28  ;;  %v29922_v26 = vld [vmem:[#allocation5 + $0x31d8] sm:$0xff]  }
 0x673   :  { %27698 = vmatpush3.bf16.msra.mxu0 %v29885_v27  ;;  %v29923_v27 = vld [vmem:[#allocation5 + $0x3198] sm:$0xff]  }
 0x674   :  { %27720 = vmatpush3.bf16.msra.mxu1 %v29887_v29  ;;  %27699 = vmatprep.subr.bf16.mxu0 %v29888_v30  ;;  %v29924_v29 = vld [vmem:[#allocation5 + $0x3150] sm:$0xff]  }
 0x675   :  { %27721 = vmatprep.subr.bf16.mxu1 %v29890_v32  ;;  %v29925_v30 = vld [vmem:[#allocation5 + $0x3110] sm:$0xff]  }
 0x676   :  { %v29926_v32 = vld [vmem:[#allocation5 + $0x31d0] sm:$0xff]  }
 0x677   :  { %27700 = vmatpush3.bf16.msra.mxu0 %v29889_v31 }
 0x678   :  { %27722 = vmatpush3.bf16.msra.mxu1 %v29891_v34  ;;  %27701 = vmatprep.subr.bf16.mxu0 %v29892_v35 }
 0x679   :  { %27723 = vmatprep.subr.bf16.mxu1 %v29894_v40 }
 0x67b   :  { %27702 = vmatpush3.bf16.msra.mxu0 %v29893_v37 }
 0x67c   :  { %27724 = vmatpush3.bf16.msra.mxu1 %v29895_v43  ;;  %27703 = vmatprep.subr.bf16.mxu0 %v29896_v47 }
 0x67d   :  { %v27443_v33 = vpop.f32.mrf.mxu0  ;;  %27725 = vmatprep.subr.bf16.mxu1 %v29898_v53  ;;  %v502_v53 = vadd.s32 25344, %v30458_v22 }
 0x67e   :  { %v27465_v41 = vpop.f32.mrf.mxu1 }
 0x67f   :  { %v27444_v36 = vpop.f32.mrf.mxu0  ;;  %27704 = vmatpush3.bf16.msra.mxu0 %v29897_v50  ;;  %v503_v50 = vadd.s32 25472, %v30458_v22 }
 0x680   :  { %v27445_v39 = vadd.f32 %v27444_v36, %v27443_v33  ;;  %v27466_v48 = vpop.f32.mrf.mxu1  ;;  %27726 = vmatpush3.bf16.msra.mxu1 %v29899_v56  ;;  %27705 = vmatprep.subr.bf16.mxu0 %v29900_v59  ;;  %v501_v33 = vadd.s32 25216, %v30458_v22  ;;  %v29927_v36 = vld [vmem:[#allocation5 + $0x3190] sm:$0xff]  }
 0x681   :  { %v27446_v42 = vpop.f32.mrf.mxu0  ;;  %v27467_v52 = vadd.f32 %v27466_v48, %v27465_v41  ;;  %v29929_v41 = vld [vmem:[#allocation5 + $0x3108] sm:$0xff]   ;;  %v753_v59 = vand.u32 31, %v503_v50 }
 0x682   :  { %v21206_v46 = vadd.f32 %v27445_v39, %v30959_v63  ;;  %v27468_v55 = vpop.f32.mrf.mxu1  ;;  %v29902_v63 = vld [vmem:[#allocation5 + $0x30c0] sm:$0xff]   ;;  %v500_v42 = vadd.s32 25088, %v30458_v22  ;;  %v751_v47 = vand.u32 31, %v501_v33 }
 0x683   :  { %v27447_v49 = vpop.f32.mrf.mxu0  ;;  %27706 = vmatpush3.bf16.msra.mxu0 %v29901_v62  ;;  %27727 = vmatprep.subr.bf16.mxu1 %v29902_v63  ;;  %v29933_v55 = vld [vmem:[#allocation5 + $0x3100] sm:$0xff]   ;;  %v752_v62 = vand.u32 31, %v502_v53  ;;  %v29936_v63 = vld [vmem:[#allocation5 + $0x3278] sm:$0xff]   ;;  %vm1003_vm12 = vcmp.eq.s32.totalorder %v753_v59, %v252_v0  ;;  %v29973_v0 = vld [vmem:[#allocation5 + $0x3330] sm:$0xff]  }
 0x684   :  { %v30970_v58 = vadd.f32 %v27467_v52, %v21206_v46  ;;  %v27469_v61 = vpop.f32.mrf.mxu1  ;;  %27728 = vmatpush3.bf16.msra.mxu1 %v29903_v2  ;;  %27735 = vmatprep.subr.bf16.mxu0 %v29904_v5  ;;  %v29930_v46 = vld [vmem:[#allocation5 + $0x31c8] sm:$0xff]   ;;  %v29932_v52 = vld [vmem:[#allocation5 + $0x3140] sm:$0xff]   ;;  %v750_v56 = vand.u32 31, %v500_v42  ;;  %vm25475_vm13 = vmpackc.low %vm1003_vm12, %vm1003_vm12 }
 0x685   :  { %27757 = vmatprep.subr.bf16.mxu1 %v29906_v9  ;;  %v29931_v49 = vld [vmem:[#allocation5 + $0x3188] sm:$0xff]   ;;  %v249_v61 = vld [vmem:[#allocation2 + $0x620] sm:$0xff]  ;;  %v251_v2 = vld [vmem:[#allocation2 + $0x630] sm:$0xff] }
 0x686   :  { %25466 = vmatmul.mubr.msk.bf16.vlgmr.msra.gmra.mxu0 %vm25465_vm3, %v30427_v44  ;;  %vm1000_vm10 = vcmp.eq.s32.totalorder %v750_v56, %v249_v61  ;;  %vm1002_vm14 = vcmp.eq.s32.totalorder %v752_v62, %v251_v2  ;;  %v29940_v5 = vld [vmem:[#allocation5 + $0x3270] sm:$0xff]   ;;  %v29944_v9 = vld [vmem:[#allocation5 + $0x3268] sm:$0xff]   ;;  %v29969_v59 = vld [vmem:[#allocation5 + $0x3338] sm:$0xff]  }
 0x687   :  { %27736 = vmatpush3.bf16.msra.mxu0 %v29905_v7  ;;  %25470 = vmatmul.mubr.msk.bf16.vlgmr.msra.gmra.mxu1 %vm25469_vm7, %v30427_v44  ;;  %vm25473_vm11 = vmpackc.low %vm1000_vm10, %vm1000_vm10  ;;  %v29942_v7 = vld [vmem:[#allocation5 + $0x32f0] sm:$0xff]   ;;  %v29963_v42 = vld [vmem:[#allocation5 + $0x3288] sm:$0xff]  }
 0x688   :  { %27758 = vmatpush3.bf16.msra.mxu1 %v29907_v10  ;;  %27737 = vmatprep.subr.bf16.mxu0 %v29908_v11  ;;  %vm25477_vm15 = vmpackc.low %vm1002_vm14, %vm1002_vm14  ;;  %v29945_v10 = vld [vmem:[#allocation5 + $0x3228] sm:$0xff]   ;;  %v29970_v61 = vld [vmem:[#allocation5 + $0x33f8] sm:$0xff]  }
 0x689   :  { %27759 = vmatprep.subr.bf16.mxu1 %v29910_v13  ;;  %25476 = vmatprep.mubr.msk.bf16.mxu1 %vm25475_vm13, %v30427_v44  ;;  %v29946_v11 = vld [vmem:[#allocation5 + $0x32e8] sm:$0xff]   ;;  %v29948_v13 = vld [vmem:[#allocation5 + $0x3260] sm:$0xff]   ;;  %v29971_v62 = vld [vmem:[#allocation5 + $0x33b8] sm:$0xff]  }
 0x68a   :  { %v29975_v2 = vld [vmem:[#allocation5 + $0x33b0] sm:$0xff]  }
 0x68b   :  { %27738 = vmatpush3.bf16.msra.mxu0 %v29909_v12  ;;  %v29947_v12 = vld [vmem:[#allocation5 + $0x32a8] sm:$0xff]  }
 0x68c   :  { %27760 = vmatpush3.bf16.msra.mxu1 %v29911_v14  ;;  %27739 = vmatprep.subr.bf16.mxu0 %v29912_v15  ;;  %v29949_v14 = vld [vmem:[#allocation5 + $0x3220] sm:$0xff]  }
 0x68d   :  { %27761 = vmatprep.subr.bf16.mxu1 %v29914_v17  ;;  %v29950_v15 = vld [vmem:[#allocation5 + $0x32e0] sm:$0xff]   ;;  %v29952_v17 = vld [vmem:[#allocation5 + $0x3258] sm:$0xff]  }
 0x68f   :  { %27740 = vmatpush3.bf16.msra.mxu0 %v29913_v16  ;;  %v29951_v16 = vld [vmem:[#allocation5 + $0x32a0] sm:$0xff]  }
 0x690   :  { %27762 = vmatpush3.bf16.msra.mxu1 %v29915_v18  ;;  %27741 = vmatprep.subr.bf16.mxu0 %v29916_v19  ;;  %v29953_v18 = vld [vmem:[#allocation5 + $0x3218] sm:$0xff]  }
 0x691   :  { %27763 = vmatprep.subr.bf16.mxu1 %v29918_v21  ;;  %v29954_v19 = vld [vmem:[#allocation5 + $0x32d8] sm:$0xff]  }
 0x693   :  { %27742 = vmatpush3.bf16.msra.mxu0 %v29917_v20  ;;  %v29955_v20 = vld [vmem:[#allocation5 + $0x3298] sm:$0xff]  }
 0x694   :  { %27764 = vmatpush3.bf16.msra.mxu1 %v29919_v23  ;;  %27743 = vmatprep.subr.bf16.mxu0 %v29920_v24  ;;  %v29956_v23 = vld [vmem:[#allocation5 + $0x3250] sm:$0xff]  }
 0x695   :  { %27765 = vmatprep.subr.bf16.mxu1 %v29922_v26  ;;  %v29957_v24 = vld [vmem:[#allocation5 + $0x3210] sm:$0xff]  }
 0x696   :  { %v29958_v26 = vld [vmem:[#allocation5 + $0x32d0] sm:$0xff]  }
 0x697   :  { %27744 = vmatpush3.bf16.msra.mxu0 %v29921_v25 }
 0x698   :  { %27766 = vmatpush3.bf16.msra.mxu1 %v29923_v27  ;;  %27745 = vmatprep.subr.bf16.mxu0 %v29924_v29  ;;  %v29959_v29 = vld [vmem:[#allocation5 + $0x3290] sm:$0xff]  }
 0x699   :  { %27767 = vmatprep.subr.bf16.mxu1 %v29926_v32  ;;  %v29960_v32 = vld [vmem:[#allocation5 + $0x3248] sm:$0xff]  }
 0x69b   :  { %27746 = vmatpush3.bf16.msra.mxu0 %v29925_v30  ;;  %v505_v30 = vadd.s32 25728, %v30458_v22 }
 0x69c   :  { %27768 = vmatpush3.bf16.msra.mxu1 %v29927_v36  ;;  %27747 = vmatprep.subr.bf16.mxu0 %v29928_v38  ;;  %v504_v36 = vadd.s32 25600, %v30458_v22 }
 0x69d   :  { %v27487_v28 = vpop.f32.mrf.mxu0  ;;  %27769 = vmatprep.subr.bf16.mxu1 %v29930_v46  ;;  %v29964_v46 = vld [vmem:[#allocation5 + $0x3240] sm:$0xff]  }
 0x69e   :  { %v27509_v35 = vpop.f32.mrf.mxu1  ;;  %v754_v50 = vand.u32 31, %v504_v36 }
 0x69f   :  { %v27488_v31 = vpop.f32.mrf.mxu0  ;;  %27748 = vmatpush3.bf16.msra.mxu0 %v29929_v41 }
 0x6a0   :  { %v27489_v34 = vadd.f32 %v27488_v31, %v27487_v28  ;;  %v27510_v40 = vpop.f32.mrf.mxu1  ;;  %27770 = vmatpush3.bf16.msra.mxu1 %v29931_v49  ;;  %27749 = vmatprep.subr.bf16.mxu0 %v29932_v52  ;;  %v29965_v49 = vld [vmem:[#allocation5 + $0x3200] sm:$0xff]   ;;  %v254_v52 = vld [vmem:[#allocation2 + $0x648] sm:$0xff] }
 0x6a1   :  { %v27490_v37 = vpop.f32.mrf.mxu0  ;;  %v27511_v43 = vadd.f32 %v27510_v40, %v27509_v35  ;;  %27771 = vmatprep.subr.bf16.mxu1 %v29934_v57  ;;  %v29961_v35 = vld [vmem:[#allocation5 + $0x3208] sm:$0xff]   ;;  %v507_v40 = vadd.s32 25984, %v30458_v22  ;;  %v29968_v57 = vld [vmem:[#allocation5 + $0x3378] sm:$0xff]  }
 0x6a2   :  { %v21286_v39 = vadd.f32 %v27489_v34, %v30970_v58  ;;  %v27512_v48 = vpop.f32.mrf.mxu1  ;;  %v250_v58 = vld [vmem:[#allocation2 + $0x628] sm:$0xff] }
 0x6a3   :  { %v27491_v45 = vpop.f32.mrf.mxu0  ;;  %27750 = vmatpush3.bf16.msra.mxu0 %v29933_v55  ;;  %vm1001_vm8 = vcmp.eq.s32.totalorder %v751_v47, %v250_v58  ;;  %v506_v47 = vadd.s32 25856, %v30458_v22  ;;  %v757_v53 = vand.u32 31, %v507_v40  ;;  %v253_v55 = vld [vmem:[#allocation2 + $0x640] sm:$0xff]  ;;  %v256_v58 = vld [vmem:[#allocation2 + $0x658] sm:$0xff]  ;;  %v29996_v40 = vld [vmem:[#allocation5 + $0x3340] sm:$0xff]  }
 0x6a4   :  { %v30981_v51 = vadd.f32 %v27511_v43, %v21286_v39  ;;  %v27513_v54 = vpop.f32.mrf.mxu1  ;;  %vm25471_vm9 = vmpackc.low %vm1001_vm8, %vm1001_vm8  ;;  %27772 = vmatpush3.bf16.msra.mxu1 %v29935_v60  ;;  %27779 = vmatprep.subr.bf16.mxu0 %v29936_v63  ;;  %v29962_v39 = vld [vmem:[#allocation5 + $0x32c8] sm:$0xff]   ;;  %v755_v43 = vand.u32 31, %v505_v30  ;;  %vm1004_vm2 = vcmp.eq.s32.totalorder %v754_v50, %v253_v55  ;;  %v255_v60 = vld [vmem:[#allocation2 + $0x650] sm:$0xff] }
 0x6a5   :  { %25472 = vmatprep.mubr.msk.bf16.mxu0 %vm25471_vm9, %v30427_v44  ;;  %27801 = vmatprep.subr.bf16.mxu1 %v29938_v3  ;;  %v29967_v54 = vld [vmem:[#allocation5 + $0x3280] sm:$0xff]   ;;  %v756_v56 = vand.u32 31, %v506_v47  ;;  %vm25481_vm3 = vmpackc.low %vm1004_vm2, %vm1004_vm2  ;;  %vm1007_vm4 = vcmp.eq.s32.totalorder %v757_v53, %v256_v58  ;;  %v29972_v63 = vld [vmem:[#allocation5 + $0x3370] sm:$0xff]  }
 0x6a6   :  { %25474 = vmatmul.mubr.msk.bf16.vlgmr.msra.gmra.mxu0 %vm25473_vm11, %v30427_v44  ;;  %vm1005_vm0 = vcmp.eq.s32.totalorder %v755_v43, %v254_v52  ;;  %vm25483_vm5 = vmpackc.low %vm1007_vm4, %vm1007_vm4  ;;  %v29976_v3 = vld [vmem:[#allocation5 + $0x3368] sm:$0xff]   ;;  %v29997_v43 = vld [vmem:[#allocation5 + $0x3300] sm:$0xff]  }
 0x6a7   :  { %27780 = vmatpush3.bf16.msra.mxu0 %v29937_v1  ;;  %25478 = vmatmul.mubr.msk.bf16.vlgmr.msra.gmra.mxu1 %vm25477_vm15, %v30427_v44  ;;  %vm25479_vm1 = vmpackc.low %vm1005_vm0, %vm1005_vm0  ;;  %vm1006_vm6 = vcmp.eq.s32.totalorder %v756_v56, %v255_v60  ;;  %v29974_v1 = vld [vmem:[#allocation5 + $0x33f0] sm:$0xff]   ;;  %v260_v52 = vld [vmem:[#allocation2 + $0x678] sm:$0xff] }
 0x6a8   :  { %27802 = vmatpush3.bf16.msra.mxu1 %v29939_v4  ;;  %27781 = vmatprep.subr.bf16.mxu0 %v29940_v5  ;;  %vm25485_vm7 = vmpackc.low %vm1006_vm6, %vm1006_vm6  ;;  %v29977_v4 = vld [vmem:[#allocation5 + $0x3328] sm:$0xff]   ;;  %v30001_v53 = vld [vmem:[#allocation5 + $0x3438] sm:$0xff]  }
 0x6a9   :  { %27803 = vmatprep.subr.bf16.mxu1 %v29942_v7  ;;  %25480 = vmatprep.mubr.msk.bf16.mxu0 %vm25479_vm1, %v30427_v44  ;;  %v29978_v5 = vld [vmem:[#allocation5 + $0x33e8] sm:$0xff]   ;;  %v29980_v7 = vld [vmem:[#allocation5 + $0x3360] sm:$0xff]   ;;  %v30002_v55 = vld [vmem:[#allocation5 + $0x34f8] sm:$0xff]  }
 0x6aa   :  { %25484 = vmatprep.mubr.msk.bf16.mxu1 %vm25483_vm5, %v30427_v44  ;;  %v30003_v56 = vld [vmem:[#allocation5 + $0x34b8] sm:$0xff]   ;;  %v30005_v58 = vld [vmem:[#allocation5 + $0x3430] sm:$0xff]  }
 0x6ab   :  { %27782 = vmatpush3.bf16.msra.mxu0 %v29941_v6  ;;  %v29979_v6 = vld [vmem:[#allocation5 + $0x33a8] sm:$0xff]   ;;  %v30007_v60 = vld [vmem:[#allocation5 + $0x34b0] sm:$0xff]  }
 0x6ac   :  { %27804 = vmatpush3.bf16.msra.mxu1 %v29943_v8  ;;  %27783 = vmatprep.subr.bf16.mxu0 %v29944_v9  ;;  %v29981_v8 = vld [vmem:[#allocation5 + $0x3320] sm:$0xff]  }
 0x6ad   :  { %27805 = vmatprep.subr.bf16.mxu1 %v29946_v11  ;;  %v29982_v9 = vld [vmem:[#allocation5 + $0x33e0] sm:$0xff]   ;;  %v29984_v11 = vld [vmem:[#allocation5 + $0x3358] sm:$0xff]  }
 0x6af   :  { %27784 = vmatpush3.bf16.msra.mxu0 %v29945_v10  ;;  %v29983_v10 = vld [vmem:[#allocation5 + $0x33a0] sm:$0xff]  }
 0x6b0   :  { %27806 = vmatpush3.bf16.msra.mxu1 %v29947_v12  ;;  %27785 = vmatprep.subr.bf16.mxu0 %v29948_v13  ;;  %v29985_v12 = vld [vmem:[#allocation5 + $0x3318] sm:$0xff]  }
 0x6b1   :  { %27807 = vmatprep.subr.bf16.mxu1 %v29950_v15  ;;  %v29986_v13 = vld [vmem:[#allocation5 + $0x33d8] sm:$0xff]  }
 0x6b2   :  { %v29987_v15 = vld [vmem:[#allocation5 + $0x3398] sm:$0xff]  }
 0x6b3   :  { %27786 = vmatpush3.bf16.msra.mxu0 %v29949_v14 }
 0x6b4   :  { %27808 = vmatpush3.bf16.msra.mxu1 %v29951_v16  ;;  %27787 = vmatprep.subr.bf16.mxu0 %v29952_v17  ;;  %v29988_v16 = vld [vmem:[#allocation5 + $0x3350] sm:$0xff]  }
 0x6b5   :  { %27809 = vmatprep.subr.bf16.mxu1 %v29954_v19  ;;  %v509_v19 = vadd.s32 26240, %v30458_v22 }
 0x6b7   :  { %27788 = vmatpush3.bf16.msra.mxu0 %v29953_v18  ;;  %v29989_v18 = vld [vmem:[#allocation5 + $0x3310] sm:$0xff]  }
 0x6b8   :  { %27810 = vmatpush3.bf16.msra.mxu1 %v29955_v20  ;;  %27789 = vmatprep.subr.bf16.mxu0 %v29956_v23 }
 0x6b9   :  { %27811 = vmatprep.subr.bf16.mxu1 %v29958_v26  ;;  %v508_v26 = vadd.s32 26112, %v30458_v22 }
 0x6bb   :  { %27790 = vmatpush3.bf16.msra.mxu0 %v29957_v24 }
 0x6bc   :  { %27812 = vmatpush3.bf16.msra.mxu1 %v29959_v29  ;;  %27791 = vmatprep.subr.bf16.mxu0 %v29960_v32  ;;  %v759_v32 = vand.u32 31, %v509_v19  ;;  %v30024_v19 = vld [vmem:[#allocation5 + $0x3448] sm:$0xff]  }
 0x6bd   :  { %v27531_v21 = vpop.f32.mrf.mxu0  ;;  %27813 = vmatprep.subr.bf16.mxu1 %v29962_v39 }
 0x6be   :  { %v27553_v28 = vpop.f32.mrf.mxu1 }
 0x6bf   :  { %v27532_v25 = vpop.f32.mrf.mxu0  ;;  %27792 = vmatpush3.bf16.msra.mxu0 %v29961_v35  ;;  %v511_v35 = vadd.s32 26496, %v30458_v22 }
 0x6c0   :  { %v27533_v27 = vadd.f32 %v27532_v25, %v27531_v21  ;;  %v27554_v34 = vpop.f32.mrf.mxu1  ;;  %27814 = vmatpush3.bf16.msra.mxu1 %v29963_v42  ;;  %27793 = vmatprep.subr.bf16.mxu0 %v29964_v46  ;;  %v29990_v21 = vld [vmem:[#allocation5 + $0x33d0] sm:$0xff]   ;;  %v258_v46 = vld [vmem:[#allocation2 + $0x668] sm:$0xff] }
 0x6c1   :  { %v27534_v31 = vpop.f32.mrf.mxu0  ;;  %v27555_v37 = vadd.f32 %v27554_v34, %v27553_v28  ;;  %v29991_v25 = vld [vmem:[#allocation5 + $0x3390] sm:$0xff]   ;;  %v29992_v28 = vld [vmem:[#allocation5 + $0x3348] sm:$0xff]   ;;  %v761_v47 = vand.u32 31, %v511_v35  ;;  %vm1009_vm8 = vcmp.eq.s32.totalorder %v759_v32, %v258_v46 }
 0x6c2   :  { %v21366_v33 = vadd.f32 %v27533_v27, %v30981_v51  ;;  %v27556_v41 = vpop.f32.mrf.mxu1  ;;  %v29966_v51 = vld [vmem:[#allocation5 + $0x32c0] sm:$0xff]   ;;  %v29993_v31 = vld [vmem:[#allocation5 + $0x3308] sm:$0xff]   ;;  %vm25487_vm9 = vmpackc.low %vm1009_vm8, %vm1009_vm8 }
 0x6c3   :  { %v27535_v38 = vpop.f32.mrf.mxu0  ;;  %27794 = vmatpush3.bf16.msra.mxu0 %v29965_v49  ;;  %27815 = vmatprep.subr.bf16.mxu1 %v29966_v51  ;;  %v29994_v34 = vld [vmem:[#allocation5 + $0x33c8] sm:$0xff]   ;;  %v510_v41 = vadd.s32 26368, %v30458_v22  ;;  %v257_v49 = vld [vmem:[#allocation2 + $0x660] sm:$0xff]  ;;  %v30000_v51 = vld [vmem:[#allocation5 + $0x3478] sm:$0xff]   ;;  %vm1011_vm12 = vcmp.eq.s32.totalorder %v761_v47, %v260_v52 }
 0x6c4   :  { %v30992_v45 = vadd.f32 %v27555_v37, %v21366_v33  ;;  %v27557_v48 = vpop.f32.mrf.mxu1  ;;  %27816 = vmatpush3.bf16.msra.mxu1 %v29967_v54  ;;  %27823 = vmatprep.subr.bf16.mxu0 %v29968_v57  ;;  %v29995_v37 = vld [vmem:[#allocation5 + $0x3388] sm:$0xff]   ;;  %v758_v38 = vand.u32 31, %v508_v26  ;;  %vm25491_vm13 = vmpackc.low %vm1011_vm12, %vm1011_vm12  ;;  %v259_v54 = vld [vmem:[#allocation2 + $0x670] sm:$0xff] }
 0x6c5   :  { %27845 = vmatprep.subr.bf16.mxu1 %v29970_v61  ;;  %v29999_v48 = vld [vmem:[#allocation5 + $0x3380] sm:$0xff]   ;;  %v760_v50 = vand.u32 31, %v510_v41  ;;  %v30004_v57 = vld [vmem:[#allocation5 + $0x3470] sm:$0xff]   ;;  %v30008_v61 = vld [vmem:[#allocation5 + $0x3468] sm:$0xff]  }
 0x6c6   :  { %25482 = vmatmul.mubr.msk.bf16.vlgmr.msra.gmra.mxu0 %vm25481_vm3, %v30427_v44  ;;  %vm1008_vm10 = vcmp.eq.s32.totalorder %v758_v38, %v257_v49  ;;  %v30030_v38 = vld [vmem:[#allocation5 + $0x34c0] sm:$0xff]   ;;  %v264_v46 = vld [vmem:[#allocation2 + $0x698] sm:$0xff]  ;;  %v30033_v47 = vld [vmem:[#allocation5 + $0x3538] sm:$0xff]  }
 0x6c7   :  { %27824 = vmatpush3.bf16.msra.mxu0 %v29969_v59  ;;  %25486 = vmatmul.mubr.msk.bf16.vlgmr.msra.gmra.mxu1 %vm25485_vm7, %v30427_v44  ;;  %vm25489_vm11 = vmpackc.low %vm1008_vm10, %vm1008_vm10  ;;  %vm1010_vm14 = vcmp.eq.s32.totalorder %v760_v50, %v259_v54  ;;  %v30006_v59 = vld [vmem:[#allocation5 + $0x34f0] sm:$0xff]   ;;  %v30031_v41 = vld [vmem:[#allocation5 + $0x3480] sm:$0xff]  }
 0x6c8   :  { %27846 = vmatpush3.bf16.msra.mxu1 %v29971_v62  ;;  %27825 = vmatprep.subr.bf16.mxu0 %v29972_v63  ;;  %vm25493_vm15 = vmpackc.low %vm1010_vm14, %vm1010_vm14  ;;  %v30009_v62 = vld [vmem:[#allocation5 + $0x3428] sm:$0xff]   ;;  %v30034_v49 = vld [vmem:[#allocation5 + $0x35f8] sm:$0xff]  }
 0x6c9   :  { %27847 = vmatprep.subr.bf16.mxu1 %v29974_v1  ;;  %25488 = vmatprep.mubr.msk.bf16.mxu0 %vm25487_vm9, %v30427_v44  ;;  %v30010_v63 = vld [vmem:[#allocation5 + $0x34e8] sm:$0xff]   ;;  %v30012_v1 = vld [vmem:[#allocation5 + $0x3460] sm:$0xff]   ;;  %v30035_v50 = vld [vmem:[#allocation5 + $0x35b8] sm:$0xff]  }
 0x6ca   :  { %25492 = vmatprep.mubr.msk.bf16.mxu1 %vm25491_vm13, %v30427_v44  ;;  %v30037_v52 = vld [vmem:[#allocation5 + $0x3530] sm:$0xff]  }
 0x6cb   :  { %27826 = vmatpush3.bf16.msra.mxu0 %v29973_v0  ;;  %v30011_v0 = vld [vmem:[#allocation5 + $0x34a8] sm:$0xff]   ;;  %v30039_v54 = vld [vmem:[#allocation5 + $0x35b0] sm:$0xff]  }
 0x6cc   :  { %27848 = vmatpush3.bf16.msra.mxu1 %v29975_v2  ;;  %27827 = vmatprep.subr.bf16.mxu0 %v29976_v3  ;;  %v30013_v2 = vld [vmem:[#allocation5 + $0x3420] sm:$0xff]  }
 0x6cd   :  { %27849 = vmatprep.subr.bf16.mxu1 %v29978_v5  ;;  %v30014_v3 = vld [vmem:[#allocation5 + $0x34e0] sm:$0xff]   ;;  %v30016_v5 = vld [vmem:[#allocation5 + $0x3458] sm:$0xff]  }
 0x6cf   :  { %27828 = vmatpush3.bf16.msra.mxu0 %v29977_v4  ;;  %v30015_v4 = vld [vmem:[#allocation5 + $0x34a0] sm:$0xff]  }
 0x6d0   :  { %27850 = vmatpush3.bf16.msra.mxu1 %v29979_v6  ;;  %27829 = vmatprep.subr.bf16.mxu0 %v29980_v7  ;;  %v30017_v6 = vld [vmem:[#allocation5 + $0x3418] sm:$0xff]  }
 0x6d1   :  { %27851 = vmatprep.subr.bf16.mxu1 %v29982_v9  ;;  %v30018_v7 = vld [vmem:[#allocation5 + $0x34d8] sm:$0xff]  }
 0x6d3   :  { %27830 = vmatpush3.bf16.msra.mxu0 %v29981_v8  ;;  %v30019_v8 = vld [vmem:[#allocation5 + $0x3498] sm:$0xff]  }
 0x6d4   :  { %27852 = vmatpush3.bf16.msra.mxu1 %v29983_v10  ;;  %27831 = vmatprep.subr.bf16.mxu0 %v29984_v11  ;;  %v30020_v10 = vld [vmem:[#allocation5 + $0x3450] sm:$0xff]  }
 0x6d5   :  { %27853 = vmatprep.subr.bf16.mxu1 %v29986_v13  ;;  %v30021_v11 = vld [vmem:[#allocation5 + $0x3410] sm:$0xff]  }
 0x6d6   :  { %v30022_v13 = vld [vmem:[#allocation5 + $0x34d0] sm:$0xff]  }
 0x6d7   :  { %27832 = vmatpush3.bf16.msra.mxu0 %v29985_v12 }
 0x6d8   :  { %27854 = vmatpush3.bf16.msra.mxu1 %v29987_v15  ;;  %27833 = vmatprep.subr.bf16.mxu0 %v29988_v16 }
 0x6d9   :  { %27855 = vmatprep.subr.bf16.mxu1 %v29990_v21 }
 0x6db   :  { %27834 = vmatpush3.bf16.msra.mxu0 %v29989_v18 }
 0x6dc   :  { %27856 = vmatpush3.bf16.msra.mxu1 %v29991_v25  ;;  %27835 = vmatprep.subr.bf16.mxu0 %v29992_v28 }
 0x6dd   :  { %v27575_v14 = vpop.f32.mrf.mxu0  ;;  %27857 = vmatprep.subr.bf16.mxu1 %v29994_v34  ;;  %v514_v34 = vadd.s32 26880, %v30458_v22 }
 0x6de   :  { %v27597_v23 = vpop.f32.mrf.mxu1 }
 0x6df   :  { %v27576_v17 = vpop.f32.mrf.mxu0  ;;  %27836 = vmatpush3.bf16.msra.mxu0 %v29993_v31  ;;  %v515_v31 = vadd.s32 27008, %v30458_v22 }
 0x6e0   :  { %v27577_v20 = vadd.f32 %v27576_v17, %v27575_v14  ;;  %v27598_v29 = vpop.f32.mrf.mxu1  ;;  %27858 = vmatpush3.bf16.msra.mxu1 %v29995_v37  ;;  %27837 = vmatprep.subr.bf16.mxu0 %v29996_v40  ;;  %v513_v14 = vadd.s32 26752, %v30458_v22  ;;  %v30023_v17 = vld [vmem:[#allocation5 + $0x3490] sm:$0xff]  }
 0x6e1   :  { %v27578_v24 = vpop.f32.mrf.mxu0  ;;  %v27599_v33 = vadd.f32 %v27598_v29, %v27597_v23  ;;  %v30025_v23 = vld [vmem:[#allocation5 + $0x3408] sm:$0xff]   ;;  %v765_v40 = vand.u32 31, %v515_v31 }
 0x6e2   :  { %v21446_v27 = vadd.f32 %v27577_v20, %v30992_v45  ;;  %v27600_v36 = vpop.f32.mrf.mxu1  ;;  %v29998_v45 = vld [vmem:[#allocation5 + $0x33c0] sm:$0xff]   ;;  %v512_v24 = vadd.s32 26624, %v30458_v22  ;;  %v763_v28 = vand.u32 31, %v513_v14 }
 0x6e3   :  { %v27579_v30 = vpop.f32.mrf.mxu0  ;;  %27838 = vmatpush3.bf16.msra.mxu0 %v29997_v43  ;;  %27859 = vmatprep.subr.bf16.mxu1 %v29998_v45  ;;  %v30029_v36 = vld [vmem:[#allocation5 + $0x3400] sm:$0xff]   ;;  %v764_v43 = vand.u32 31, %v514_v34  ;;  %v30032_v45 = vld [vmem:[#allocation5 + $0x3578] sm:$0xff]   ;;  %vm1015_vm4 = vcmp.eq.s32.totalorder %v765_v40, %v264_v46  ;;  %v30069_v46 = vld [vmem:[#allocation5 + $0x3630] sm:$0xff]  }
 0x6e4   :  { %v31003_v39 = vadd.f32 %v27599_v33, %v21446_v27  ;;  %v27601_v42 = vpop.f32.mrf.mxu1  ;;  %27860 = vmatpush3.bf16.msra.mxu1 %v29999_v48  ;;  %27867 = vmatprep.subr.bf16.mxu0 %v30000_v51  ;;  %v30026_v27 = vld [vmem:[#allocation5 + $0x34c8] sm:$0xff]   ;;  %v30028_v33 = vld [vmem:[#allocation5 + $0x3440] sm:$0xff]   ;;  %v762_v37 = vand.u32 31, %v512_v24  ;;  %vm25499_vm5 = vmpackc.low %vm1015_vm4, %vm1015_vm4 }
 0x6e5   :  { %27889 = vmatprep.subr.bf16.mxu1 %v30002_v55  ;;  %v30027_v30 = vld [vmem:[#allocation5 + $0x3488] sm:$0xff]   ;;  %v261_v42 = vld [vmem:[#allocation2 + $0x680] sm:$0xff]  ;;  %v263_v48 = vld [vmem:[#allocation2 + $0x690] sm:$0xff] }
 0x6e6   :  { %25490 = vmatmul.mubr.msk.bf16.vlgmr.msra.gmra.mxu0 %vm25489_vm11, %v30427_v44  ;;  %vm1012_vm2 = vcmp.eq.s32.totalorder %v762_v37, %v261_v42  ;;  %vm1014_vm6 = vcmp.eq.s32.totalorder %v764_v43, %v263_v48  ;;  %v30036_v51 = vld [vmem:[#allocation5 + $0x3570] sm:$0xff]   ;;  %v30040_v55 = vld [vmem:[#allocation5 + $0x3568] sm:$0xff]   ;;  %v30065_v40 = vld [vmem:[#allocation5 + $0x3638] sm:$0xff]  }
 0x6e7   :  { %27868 = vmatpush3.bf16.msra.mxu0 %v30001_v53  ;;  %25494 = vmatmul.mubr.msk.bf16.vlgmr.msra.gmra.mxu1 %vm25493_vm15, %v30427_v44  ;;  %vm25497_vm3 = vmpackc.low %vm1012_vm2, %vm1012_vm2  ;;  %v30038_v53 = vld [vmem:[#allocation5 + $0x35f0] sm:$0xff]   ;;  %v30059_v24 = vld [vmem:[#allocation5 + $0x3588] sm:$0xff]  }
 0x6e8   :  { %27890 = vmatpush3.bf16.msra.mxu1 %v30003_v56  ;;  %27869 = vmatprep.subr.bf16.mxu0 %v30004_v57  ;;  %vm25501_vm7 = vmpackc.low %vm1014_vm6, %vm1014_vm6  ;;  %v30041_v56 = vld [vmem:[#allocation5 + $0x3528] sm:$0xff]   ;;  %v30066_v42 = vld [vmem:[#allocation5 + $0x36f8] sm:$0xff]  }
 0x6e9   :  { %27891 = vmatprep.subr.bf16.mxu1 %v30006_v59  ;;  %25500 = vmatprep.mubr.msk.bf16.mxu1 %vm25499_vm5, %v30427_v44  ;;  %v30042_v57 = vld [vmem:[#allocation5 + $0x35e8] sm:$0xff]   ;;  %v30044_v59 = vld [vmem:[#allocation5 + $0x3560] sm:$0xff]   ;;  %v30067_v43 = vld [vmem:[#allocation5 + $0x36b8] sm:$0xff]  }
 0x6ea   :  { %v30071_v48 = vld [vmem:[#allocation5 + $0x36b0] sm:$0xff]  }
 0x6eb   :  { %27870 = vmatpush3.bf16.msra.mxu0 %v30005_v58  ;;  %v30043_v58 = vld [vmem:[#allocation5 + $0x35a8] sm:$0xff]  }
 0x6ec   :  { %27892 = vmatpush3.bf16.msra.mxu1 %v30007_v60  ;;  %27871 = vmatprep.subr.bf16.mxu0 %v30008_v61  ;;  %v30045_v60 = vld [vmem:[#allocation5 + $0x3520] sm:$0xff]  }
 0x6ed   :  { %27893 = vmatprep.subr.bf16.mxu1 %v30010_v63  ;;  %v30046_v61 = vld [vmem:[#allocation5 + $0x35e0] sm:$0xff]   ;;  %v30048_v63 = vld [vmem:[#allocation5 + $0x3558] sm:$0xff]  }
 0x6ef   :  { %27872 = vmatpush3.bf16.msra.mxu0 %v30009_v62  ;;  %v30047_v62 = vld [vmem:[#allocation5 + $0x35a0] sm:$0xff]  }
 0x6f0   :  { %27894 = vmatpush3.bf16.msra.mxu1 %v30011_v0  ;;  %27873 = vmatprep.subr.bf16.mxu0 %v30012_v1  ;;  %v30049_v0 = vld [vmem:[#allocation5 + $0x3518] sm:$0xff]  }
 0x6f1   :  { %27895 = vmatprep.subr.bf16.mxu1 %v30014_v3  ;;  %v30050_v1 = vld [vmem:[#allocation5 + $0x35d8] sm:$0xff]  }
 0x6f3   :  { %27874 = vmatpush3.bf16.msra.mxu0 %v30013_v2  ;;  %v30051_v2 = vld [vmem:[#allocation5 + $0x3598] sm:$0xff]  }
 0x6f4   :  { %27896 = vmatpush3.bf16.msra.mxu1 %v30015_v4  ;;  %27875 = vmatprep.subr.bf16.mxu0 %v30016_v5  ;;  %v30052_v4 = vld [vmem:[#allocation5 + $0x3550] sm:$0xff]  }
 0x6f5   :  { %27897 = vmatprep.subr.bf16.mxu1 %v30018_v7  ;;  %v30053_v5 = vld [vmem:[#allocation5 + $0x3510] sm:$0xff]  }
 0x6f6   :  { %v30054_v7 = vld [vmem:[#allocation5 + $0x35d0] sm:$0xff]  }
 0x6f7   :  { %27876 = vmatpush3.bf16.msra.mxu0 %v30017_v6 }
 0x6f8   :  { %27898 = vmatpush3.bf16.msra.mxu1 %v30019_v8  ;;  %27877 = vmatprep.subr.bf16.mxu0 %v30020_v10  ;;  %v30055_v10 = vld [vmem:[#allocation5 + $0x3590] sm:$0xff]  }
 0x6f9   :  { %27899 = vmatprep.subr.bf16.mxu1 %v30022_v13  ;;  %v30056_v13 = vld [vmem:[#allocation5 + $0x3548] sm:$0xff]  }
 0x6fb   :  { %27878 = vmatpush3.bf16.msra.mxu0 %v30021_v11  ;;  %v517_v11 = vadd.s32 27264, %v30458_v22 }
 0x6fc   :  { %27900 = vmatpush3.bf16.msra.mxu1 %v30023_v17  ;;  %27879 = vmatprep.subr.bf16.mxu0 %v30024_v19  ;;  %v516_v17 = vadd.s32 27136, %v30458_v22 }
 0x6fd   :  { %27901 = vmatprep.subr.bf16.mxu1 %v30026_v27  ;;  %v30060_v27 = vld [vmem:[#allocation5 + $0x3540] sm:$0xff]  }
 0x6fe   :  { %v27641_v16 = vpop.f32.mrf.mxu1  ;;  %v766_v31 = vand.u32 31, %v516_v17 }
 0x6ff   :  { %27880 = vmatpush3.bf16.msra.mxu0 %v30025_v23 }
 0x700   :  { %v27642_v21 = vpop.f32.mrf.mxu1  ;;  %27902 = vmatpush3.bf16.msra.mxu1 %v30027_v30  ;;  %27881 = vmatprep.subr.bf16.mxu0 %v30028_v33  ;;  %v30061_v30 = vld [vmem:[#allocation5 + $0x3500] sm:$0xff]   ;;  %v266_v33 = vld [vmem:[#allocation2 + $0x6a8] sm:$0xff] }
 0x701   :  { %v27643_v25 = vadd.f32 %v27642_v21, %v27641_v16  ;;  %27903 = vmatprep.subr.bf16.mxu1 %v30030_v38  ;;  %v30057_v16 = vld [vmem:[#allocation5 + $0x3508] sm:$0xff]   ;;  %v519_v21 = vadd.s32 27520, %v30458_v22  ;;  %v30064_v38 = vld [vmem:[#allocation5 + $0x3678] sm:$0xff]  }
 0x702   :  { %v27644_v29 = vpop.f32.mrf.mxu1 }
 0x703   :  { %27882 = vmatpush3.bf16.msra.mxu0 %v30029_v36  ;;  %v769_v34 = vand.u32 31, %v519_v21  ;;  %v265_v36 = vld [vmem:[#allocation2 + $0x6a0] sm:$0xff]  ;;  %v30092_v21 = vld [vmem:[#allocation5 + $0x3640] sm:$0xff]  }
 0x704   :  { %v27645_v35 = vpop.f32.mrf.mxu1  ;;  %27904 = vmatpush3.bf16.msra.mxu1 %v30031_v41  ;;  %27911 = vmatprep.subr.bf16.mxu0 %v30032_v45  ;;  %vm1016_vm10 = vcmp.eq.s32.totalorder %v766_v31, %v265_v36  ;;  %v267_v41 = vld [vmem:[#allocation2 + $0x6b0] sm:$0xff]  ;;  %v30068_v45 = vld [vmem:[#allocation5 + $0x3670] sm:$0xff]   ;;  %v30098_v36 = vld [vmem:[#allocation5 + $0x37f8] sm:$0xff]  }
 0x705   :  { %27933 = vmatprep.subr.bf16.mxu1 %v30034_v49  ;;  %v30063_v35 = vld [vmem:[#allocation5 + $0x3580] sm:$0xff]   ;;  %vm25505_vm11 = vmpackc.low %vm1016_vm10, %vm1016_vm10  ;;  %v30072_v49 = vld [vmem:[#allocation5 + $0x3668] sm:$0xff]  }
 0x706   :  { %v27619_v9 = vpop.f32.mrf.mxu0 }
 0x707   :  { %25502 = vmatmul.mubr.msk.bf16.vlgmr.msra.gmra.mxu1 %vm25501_vm7, %v30427_v44 }
 0x708   :  { %v27620_v12 = vpop.f32.mrf.mxu0  ;;  %27934 = vmatpush3.bf16.msra.mxu1 %v30035_v50  ;;  %v30073_v50 = vld [vmem:[#allocation5 + $0x3628] sm:$0xff]  }
 0x709   :  { %v27621_v15 = vadd.f32 %v27620_v12, %v27619_v9  ;;  %27935 = vmatprep.subr.bf16.mxu1 %v30038_v53  ;;  %v30076_v53 = vld [vmem:[#allocation5 + $0x3660] sm:$0xff]  }
 0x70a   :  { %v27622_v18 = vpop.f32.mrf.mxu0 }
 0x70b   :  { %v21526_v20 = vadd.f32 %v27621_v15, %v31003_v39  ;;  %v262_v39 = vld [vmem:[#allocation2 + $0x688] sm:$0xff] }
 0x70c   :  { %v27623_v26 = vpop.f32.mrf.mxu0  ;;  %vm1013_vm0 = vcmp.eq.s32.totalorder %v763_v28, %v262_v39  ;;  %27936 = vmatpush3.bf16.msra.mxu1 %v30039_v54  ;;  %v518_v28 = vadd.s32 27392, %v30458_v22  ;;  %v268_v39 = vld [vmem:[#allocation2 + $0x6b8] sm:$0xff]  ;;  %v30077_v54 = vld [vmem:[#allocation5 + $0x3620] sm:$0xff]  }
 0x70d   :  { %v31014_v32 = vadd.f32 %v27643_v25, %v21526_v20  ;;  %vm25495_vm1 = vmpackc.low %vm1013_vm0, %vm1013_vm0  ;;  %27937 = vmatprep.subr.bf16.mxu1 %v30042_v57  ;;  %v30058_v20 = vld [vmem:[#allocation5 + $0x35c8] sm:$0xff]   ;;  %v767_v25 = vand.u32 31, %v517_v11  ;;  %vm1019_vm12 = vcmp.eq.s32.totalorder %v769_v34, %v268_v39  ;;  %v30080_v57 = vld [vmem:[#allocation5 + $0x3658] sm:$0xff]  }
 0x70e   :  { %25496 = vmatprep.mubr.msk.bf16.mxu0 %vm25495_vm1, %v30427_v44  ;;  %v768_v37 = vand.u32 31, %v518_v28  ;;  %vm25507_vm13 = vmpackc.low %vm1019_vm12, %vm1019_vm12  ;;  %v30097_v34 = vld [vmem:[#allocation5 + $0x3738] sm:$0xff]   ;;  %v30101_v39 = vld [vmem:[#allocation5 + $0x3730] sm:$0xff]  }
 0x70f   :  { %25498 = vmatmul.mubr.msk.bf16.vlgmr.msra.gmra.mxu0 %vm25497_vm3, %v30427_v44  ;;  %vm1017_vm8 = vcmp.eq.s32.totalorder %v767_v25, %v266_v33  ;;  %25508 = vmatprep.mubr.msk.bf16.mxu1 %vm25507_vm13, %v30427_v44  ;;  %v30093_v25 = vld [vmem:[#allocation5 + $0x3600] sm:$0xff]   ;;  %v272_v33 = vld [vmem:[#allocation2 + $0x6d8] sm:$0xff] }
 0x710   :  { %27912 = vmatpush3.bf16.msra.mxu0 %v30033_v47  ;;  %27938 = vmatpush3.bf16.msra.mxu1 %v30043_v58  ;;  %vm25503_vm9 = vmpackc.low %vm1017_vm8, %vm1017_vm8  ;;  %vm1018_vm14 = vcmp.eq.s32.totalorder %v768_v37, %v267_v41  ;;  %v30070_v47 = vld [vmem:[#allocation5 + $0x36f0] sm:$0xff]   ;;  %v30081_v58 = vld [vmem:[#allocation5 + $0x3618] sm:$0xff]  }
 0x711   :  { %27913 = vmatprep.subr.bf16.mxu0 %v30036_v51  ;;  %27939 = vmatprep.subr.bf16.mxu1 %v30046_v61  ;;  %vm25509_vm15 = vmpackc.low %vm1018_vm14, %vm1018_vm14  ;;  %v30074_v51 = vld [vmem:[#allocation5 + $0x36e8] sm:$0xff]   ;;  %v30083_v61 = vld [vmem:[#allocation5 + $0x3698] sm:$0xff]  }
 0x712   :  { %25504 = vmatprep.mubr.msk.bf16.mxu0 %vm25503_vm9, %v30427_v44  ;;  %v30099_v37 = vld [vmem:[#allocation5 + $0x37b8] sm:$0xff]   ;;  %v30103_v41 = vld [vmem:[#allocation5 + $0x37b0] sm:$0xff]  }
 0x714   :  { %27914 = vmatpush3.bf16.msra.mxu0 %v30037_v52  ;;  %27940 = vmatpush3.bf16.msra.mxu1 %v30047_v62  ;;  %v30075_v52 = vld [vmem:[#allocation5 + $0x36a8] sm:$0xff]   ;;  %v30084_v62 = vld [vmem:[#allocation5 + $0x3650] sm:$0xff]  }
 0x715   :  { %27915 = vmatprep.subr.bf16.mxu0 %v30040_v55  ;;  %27941 = vmatprep.subr.bf16.mxu1 %v30050_v1  ;;  %v30078_v55 = vld [vmem:[#allocation5 + $0x36e0] sm:$0xff]   ;;  %v521_v1 = vadd.s32 27776, %v30458_v22 }
 0x718   :  { %27916 = vmatpush3.bf16.msra.mxu0 %v30041_v56  ;;  %27942 = vmatpush3.bf16.msra.mxu1 %v30051_v2  ;;  %v30079_v56 = vld [vmem:[#allocation5 + $0x36a0] sm:$0xff]  }
 0x719   :  { %27917 = vmatprep.subr.bf16.mxu0 %v30044_v59  ;;  %27943 = vmatprep.subr.bf16.mxu1 %v30054_v7  ;;  %v30082_v59 = vld [vmem:[#allocation5 + $0x36d8] sm:$0xff]   ;;  %v520_v7 = vadd.s32 27648, %v30458_v22 }
 0x71c   :  { %27918 = vmatpush3.bf16.msra.mxu0 %v30045_v60  ;;  %27944 = vmatpush3.bf16.msra.mxu1 %v30055_v10 }
 0x71d   :  { %27919 = vmatprep.subr.bf16.mxu0 %v30048_v63  ;;  %27945 = vmatprep.subr.bf16.mxu1 %v30058_v20 }
 0x720   :  { %27920 = vmatpush3.bf16.msra.mxu0 %v30049_v0  ;;  %27946 = vmatpush3.bf16.msra.mxu1 %v30059_v24  ;;  %v30085_v0 = vld [vmem:[#allocation5 + $0x3610] sm:$0xff]  }
 0x721   :  { %27921 = vmatprep.subr.bf16.mxu0 %v30052_v4 }
 0x724   :  { %27922 = vmatpush3.bf16.msra.mxu0 %v30053_v5 }
 0x725   :  { %27923 = vmatprep.subr.bf16.mxu0 %v30056_v13  ;;  %v771_v13 = vand.u32 31, %v521_v1  ;;  %v30120_v1 = vld [vmem:[#allocation5 + $0x3748] sm:$0xff]  }
 0x726   :  { %v27663_v3 = vpop.f32.mrf.mxu0 }
 0x727   :  { %v27685_v9 = vpop.f32.mrf.mxu1 }
 0x728   :  { %v27664_v6 = vpop.f32.mrf.mxu0  ;;  %27924 = vmatpush3.bf16.msra.mxu0 %v30057_v16  ;;  %v523_v16 = vadd.s32 28032, %v30458_v22 }
 0x729   :  { %v27665_v8 = vadd.f32 %v27664_v6, %v27663_v3  ;;  %v27686_v15 = vpop.f32.mrf.mxu1  ;;  %27925 = vmatprep.subr.bf16.mxu0 %v30060_v27  ;;  %v30086_v3 = vld [vmem:[#allocation5 + $0x36d0] sm:$0xff]   ;;  %v270_v27 = vld [vmem:[#allocation2 + $0x6c8] sm:$0xff] }
 0x72a   :  { %v27666_v12 = vpop.f32.mrf.mxu0  ;;  %v27687_v18 = vadd.f32 %v27686_v15, %v27685_v9  ;;  %v30087_v6 = vld [vmem:[#allocation5 + $0x3690] sm:$0xff]   ;;  %v30088_v9 = vld [vmem:[#allocation5 + $0x3648] sm:$0xff]   ;;  %v773_v28 = vand.u32 31, %v523_v16  ;;  %vm1021_vm0 = vcmp.eq.s32.totalorder %v771_v13, %v270_v27 }
 0x72b   :  { %v21606_v14 = vadd.f32 %v27665_v8, %v31014_v32  ;;  %v27688_v23 = vpop.f32.mrf.mxu1  ;;  %v30062_v32 = vld [vmem:[#allocation5 + $0x35c0] sm:$0xff]   ;;  %v30089_v12 = vld [vmem:[#allocation5 + $0x3608] sm:$0xff]   ;;  %vm25511_vm1 = vmpackc.low %vm1021_vm0, %vm1021_vm0 }
 0x72c   :  { %v27667_v19 = vpop.f32.mrf.mxu0  ;;  %27926 = vmatpush3.bf16.msra.mxu0 %v30061_v30  ;;  %27947 = vmatprep.subr.bf16.mxu1 %v30062_v32  ;;  %v30090_v15 = vld [vmem:[#allocation5 + $0x36c8] sm:$0xff]   ;;  %v522_v23 = vadd.s32 27904, %v30458_v22  ;;  %v269_v30 = vld [vmem:[#allocation2 + $0x6c0] sm:$0xff]  ;;  %v30096_v32 = vld [vmem:[#allocation5 + $0x3778] sm:$0xff]   ;;  %vm1023_vm4 = vcmp.eq.s32.totalorder %v773_v28, %v272_v33 }
 0x72d   :  { %v31025_v26 = vadd.f32 %v27687_v18, %v21606_v14  ;;  %v27689_v29 = vpop.f32.mrf.mxu1  ;;  %27948 = vmatpush3.bf16.msra.mxu1 %v30063_v35  ;;  %27955 = vmatprep.subr.bf16.mxu0 %v30064_v38  ;;  %v30091_v18 = vld [vmem:[#allocation5 + $0x3688] sm:$0xff]   ;;  %v770_v19 = vand.u32 31, %v520_v7  ;;  %vm25515_vm5 = vmpackc.low %vm1023_vm4, %vm1023_vm4  ;;  %v271_v35 = vld [vmem:[#allocation2 + $0x6d0] sm:$0xff] }
 0x72e   :  { %27977 = vmatprep.subr.bf16.mxu1 %v30066_v42  ;;  %v30095_v29 = vld [vmem:[#allocation5 + $0x3680] sm:$0xff]   ;;  %v772_v31 = vand.u32 31, %v522_v23  ;;  %v30100_v38 = vld [vmem:[#allocation5 + $0x3770] sm:$0xff]   ;;  %v30104_v42 = vld [vmem:[#allocation5 + $0x3768] sm:$0xff]  }
 0x72f   :  { %25506 = vmatmul.mubr.msk.bf16.vlgmr.msra.gmra.mxu0 %vm25505_vm11, %v30427_v44  ;;  %vm1020_vm2 = vcmp.eq.s32.totalorder %v770_v19, %v269_v30  ;;  %v30126_v19 = vld [vmem:[#allocation5 + $0x37c0] sm:$0xff]   ;;  %v276_v27 = vld [vmem:[#allocation2 + $0x6f8] sm:$0xff]  ;;  %v30129_v28 = vld [vmem:[#allocation5 + $0x3838] sm:$0xff]  }
 0x730   :  { %27956 = vmatpush3.bf16.msra.mxu0 %v30065_v40  ;;  %25510 = vmatmul.mubr.msk.bf16.vlgmr.msra.gmra.mxu1 %vm25509_vm15, %v30427_v44  ;;  %vm25513_vm3 = vmpackc.low %vm1020_vm2, %vm1020_vm2  ;;  %vm1022_vm6 = vcmp.eq.s32.totalorder %v772_v31, %v271_v35  ;;  %v30102_v40 = vld [vmem:[#allocation5 + $0x37f0] sm:$0xff]   ;;  %v30127_v23 = vld [vmem:[#allocation5 + $0x3780] sm:$0xff]  }
 0x731   :  { %27978 = vmatpush3.bf16.msra.mxu1 %v30067_v43  ;;  %27957 = vmatprep.subr.bf16.mxu0 %v30068_v45  ;;  %vm25517_vm7 = vmpackc.low %vm1022_vm6, %vm1022_vm6  ;;  %v30105_v43 = vld [vmem:[#allocation5 + $0x3728] sm:$0xff]   ;;  %v30130_v30 = vld [vmem:[#allocation5 + $0x38f8] sm:$0xff]  }
 0x732   :  { %27979 = vmatprep.subr.bf16.mxu1 %v30070_v47  ;;  %25512 = vmatprep.mubr.msk.bf16.mxu0 %vm25511_vm1, %v30427_v44  ;;  %v30106_v45 = vld [vmem:[#allocation5 + $0x37e8] sm:$0xff]   ;;  %v30108_v47 = vld [vmem:[#allocation5 + $0x3760] sm:$0xff]   ;;  %v30131_v31 = vld [vmem:[#allocation5 + $0x38b8] sm:$0xff]  }
 0x733   :  { %25516 = vmatprep.mubr.msk.bf16.mxu1 %vm25515_vm5, %v30427_v44  ;;  %v30133_v33 = vld [vmem:[#allocation5 + $0x3830] sm:$0xff]  }
 0x734   :  { %27958 = vmatpush3.bf16.msra.mxu0 %v30069_v46  ;;  %v30107_v46 = vld [vmem:[#allocation5 + $0x37a8] sm:$0xff]   ;;  %v30135_v35 = vld [vmem:[#allocation5 + $0x38b0] sm:$0xff]  }
 0x735   :  { %27980 = vmatpush3.bf16.msra.mxu1 %v30071_v48  ;;  %27959 = vmatprep.subr.bf16.mxu0 %v30072_v49  ;;  %v30109_v48 = vld [vmem:[#allocation5 + $0x3720] sm:$0xff]  }
 0x736   :  { %27981 = vmatprep.subr.bf16.mxu1 %v30074_v51  ;;  %v30110_v49 = vld [vmem:[#allocation5 + $0x37e0] sm:$0xff]   ;;  %v30112_v51 = vld [vmem:[#allocation5 + $0x3758] sm:$0xff]  }
 0x738   :  { %27960 = vmatpush3.bf16.msra.mxu0 %v30073_v50  ;;  %v30111_v50 = vld [vmem:[#allocation5 + $0x37a0] sm:$0xff]  }
 0x739   :  { %27982 = vmatpush3.bf16.msra.mxu1 %v30075_v52  ;;  %27961 = vmatprep.subr.bf16.mxu0 %v30076_v53  ;;  %v30113_v52 = vld [vmem:[#allocation5 + $0x3718] sm:$0xff]  }
 0x73a   :  { %27983 = vmatprep.subr.bf16.mxu1 %v30078_v55  ;;  %v30114_v53 = vld [vmem:[#allocation5 + $0x37d8] sm:$0xff]  }
 0x73c   :  { %27962 = vmatpush3.bf16.msra.mxu0 %v30077_v54  ;;  %v30115_v54 = vld [vmem:[#allocation5 + $0x3798] sm:$0xff]  }
 0x73d   :  { %27984 = vmatpush3.bf16.msra.mxu1 %v30079_v56  ;;  %27963 = vmatprep.subr.bf16.mxu0 %v30080_v57  ;;  %v30116_v56 = vld [vmem:[#allocation5 + $0x3750] sm:$0xff]  }
 0x73e   :  { %27985 = vmatprep.subr.bf16.mxu1 %v30082_v59  ;;  %v30117_v57 = vld [vmem:[#allocation5 + $0x3710] sm:$0xff]  }
 0x73f   :  { %v30118_v59 = vld [vmem:[#allocation5 + $0x37d0] sm:$0xff]  }
 0x740   :  { %27964 = vmatpush3.bf16.msra.mxu0 %v30081_v58 }
 0x741   :  { %27986 = vmatpush3.bf16.msra.mxu1 %v30083_v61  ;;  %27965 = vmatprep.subr.bf16.mxu0 %v30084_v62 }
 0x742   :  { %27987 = vmatprep.subr.bf16.mxu1 %v30086_v3 }
 0x744   :  { %27966 = vmatpush3.bf16.msra.mxu0 %v30085_v0 }
 0x745   :  { %27988 = vmatpush3.bf16.msra.mxu1 %v30087_v6  ;;  %27967 = vmatprep.subr.bf16.mxu0 %v30088_v9 }
 0x746   :  { %v27707_v60 = vpop.f32.mrf.mxu0  ;;  %27989 = vmatprep.subr.bf16.mxu1 %v30090_v15  ;;  %v526_v15 = vadd.s32 28416, %v30458_v22 }
 0x747   :  { %v27729_v4 = vpop.f32.mrf.mxu1 }
 0x748   :  { %v27708_v63 = vpop.f32.mrf.mxu0  ;;  %27968 = vmatpush3.bf16.msra.mxu0 %v30089_v12  ;;  %v527_v12 = vadd.s32 28544, %v30458_v22 }
 0x749   :  { %v27709_v2 = vadd.f32 %v27708_v63, %v27707_v60  ;;  %v27730_v10 = vpop.f32.mrf.mxu1  ;;  %27990 = vmatpush3.bf16.msra.mxu1 %v30091_v18  ;;  %27969 = vmatprep.subr.bf16.mxu0 %v30092_v21  ;;  %v525_v60 = vadd.s32 28288, %v30458_v22  ;;  %v30119_v63 = vld [vmem:[#allocation5 + $0x3790] sm:$0xff]  }
 0x74a   :  { %v27710_v5 = vpop.f32.mrf.mxu0  ;;  %v27731_v14 = vadd.f32 %v27730_v10, %v27729_v4  ;;  %v30121_v4 = vld [vmem:[#allocation5 + $0x3708] sm:$0xff]   ;;  %v777_v21 = vand.u32 31, %v527_v12 }
 0x74b   :  { %v21686_v8 = vadd.f32 %v27709_v2, %v31025_v26  ;;  %v27732_v17 = vpop.f32.mrf.mxu1  ;;  %v30094_v26 = vld [vmem:[#allocation5 + $0x36c0] sm:$0xff]   ;;  %v524_v5 = vadd.s32 28160, %v30458_v22  ;;  %v775_v9 = vand.u32 31, %v525_v60 }
 0x74c   :  { %v27711_v11 = vpop.f32.mrf.mxu0  ;;  %27970 = vmatpush3.bf16.msra.mxu0 %v30093_v25  ;;  %27991 = vmatprep.subr.bf16.mxu1 %v30094_v26  ;;  %v30125_v17 = vld [vmem:[#allocation5 + $0x3700] sm:$0xff]   ;;  %v776_v25 = vand.u32 31, %v526_v15  ;;  %v30128_v26 = vld [vmem:[#allocation5 + $0x3878] sm:$0xff]   ;;  %vm1027_vm12 = vcmp.eq.s32.totalorder %v777_v21, %v276_v27  ;;  %v30165_v27 = vld [vmem:[#allocation5 + $0x3930] sm:$0xff]  }
 0x74d   :  { %v31036_v20 = vadd.f32 %v27731_v14, %v21686_v8  ;;  %v27733_v24 = vpop.f32.mrf.mxu1  ;;  %27992 = vmatpush3.bf16.msra.mxu1 %v30095_v29  ;;  %27999 = vmatprep.subr.bf16.mxu0 %v30096_v32  ;;  %v30122_v8 = vld [vmem:[#allocation5 + $0x37c8] sm:$0xff]   ;;  %v30124_v14 = vld [vmem:[#allocation5 + $0x3740] sm:$0xff]   ;;  %v774_v18 = vand.u32 31, %v524_v5  ;;  %vm25523_vm13 = vmpackc.low %vm1027_vm12, %vm1027_vm12 }
 0x74e   :  { %28021 = vmatprep.subr.bf16.mxu1 %v30098_v36  ;;  %v30123_v11 = vld [vmem:[#allocation5 + $0x3788] sm:$0xff]   ;;  %v273_v24 = vld [vmem:[#allocation2 + $0x6e0] sm:$0xff]  ;;  %v275_v29 = vld [vmem:[#allocation2 + $0x6f0] sm:$0xff] }
 0x74f   :  { %25514 = vmatmul.mubr.msk.bf16.vlgmr.msra.gmra.mxu0 %vm25513_vm3, %v30427_v44  ;;  %vm1024_vm10 = vcmp.eq.s32.totalorder %v774_v18, %v273_v24  ;;  %vm1026_vm14 = vcmp.eq.s32.totalorder %v776_v25, %v275_v29  ;;  %v30132_v32 = vld [vmem:[#allocation5 + $0x3870] sm:$0xff]   ;;  %v30136_v36 = vld [vmem:[#allocation5 + $0x3868] sm:$0xff]   ;;  %v30161_v21 = vld [vmem:[#allocation5 + $0x3938] sm:$0xff]  }
 0x750   :  { %28000 = vmatpush3.bf16.msra.mxu0 %v30097_v34  ;;  %25518 = vmatmul.mubr.msk.bf16.vlgmr.msra.gmra.mxu1 %vm25517_vm7, %v30427_v44  ;;  %vm25521_vm11 = vmpackc.low %vm1024_vm10, %vm1024_vm10  ;;  %v30134_v34 = vld [vmem:[#allocation5 + $0x38f0] sm:$0xff]   ;;  %v30155_v5 = vld [vmem:[#allocation5 + $0x3888] sm:$0xff]  }
 0x751   :  { %28022 = vmatpush3.bf16.msra.mxu1 %v30099_v37  ;;  %28001 = vmatprep.subr.bf16.mxu0 %v30100_v38  ;;  %vm25525_vm15 = vmpackc.low %vm1026_vm14, %vm1026_vm14  ;;  %v30137_v37 = vld [vmem:[#allocation5 + $0x3828] sm:$0xff]   ;;  %v30162_v24 = vld [vmem:[#allocation5 + $0x39f8] sm:$0xff]  }
 0x752   :  { %28023 = vmatprep.subr.bf16.mxu1 %v30102_v40  ;;  %25524 = vmatprep.mubr.msk.bf16.mxu1 %vm25523_vm13, %v30427_v44  ;;  %v30138_v38 = vld [vmem:[#allocation5 + $0x38e8] sm:$0xff]   ;;  %v30140_v40 = vld [vmem:[#allocation5 + $0x3860] sm:$0xff]   ;;  %v30163_v25 = vld [vmem:[#allocation5 + $0x39b8] sm:$0xff]  }
 0x753   :  { %v30167_v29 = vld [vmem:[#allocation5 + $0x39b0] sm:$0xff]  }
 0x754   :  { %28002 = vmatpush3.bf16.msra.mxu0 %v30101_v39  ;;  %v30139_v39 = vld [vmem:[#allocation5 + $0x38a8] sm:$0xff]  }
 0x755   :  { %28024 = vmatpush3.bf16.msra.mxu1 %v30103_v41  ;;  %28003 = vmatprep.subr.bf16.mxu0 %v30104_v42  ;;  %v30141_v41 = vld [vmem:[#allocation5 + $0x3820] sm:$0xff]  }
 0x756   :  { %28025 = vmatprep.subr.bf16.mxu1 %v30106_v45  ;;  %v30142_v42 = vld [vmem:[#allocation5 + $0x38e0] sm:$0xff]   ;;  %v30144_v45 = vld [vmem:[#allocation5 + $0x3858] sm:$0xff]  }
 0x758   :  { %28004 = vmatpush3.bf16.msra.mxu0 %v30105_v43  ;;  %v30143_v43 = vld [vmem:[#allocation5 + $0x38a0] sm:$0xff]  }
 0x759   :  { %28026 = vmatpush3.bf16.msra.mxu1 %v30107_v46  ;;  %28005 = vmatprep.subr.bf16.mxu0 %v30108_v47  ;;  %v30145_v46 = vld [vmem:[#allocation5 + $0x3818] sm:$0xff]  }
 0x75a   :  { %28027 = vmatprep.subr.bf16.mxu1 %v30110_v49  ;;  %v30146_v47 = vld [vmem:[#allocation5 + $0x38d8] sm:$0xff]  }
 0x75c   :  { %28006 = vmatpush3.bf16.msra.mxu0 %v30109_v48  ;;  %v30147_v48 = vld [vmem:[#allocation5 + $0x3898] sm:$0xff]  }
 0x75d   :  { %28028 = vmatpush3.bf16.msra.mxu1 %v30111_v50  ;;  %28007 = vmatprep.subr.bf16.mxu0 %v30112_v51  ;;  %v30148_v50 = vld [vmem:[#allocation5 + $0x3850] sm:$0xff]  }
 0x75e   :  { %28029 = vmatprep.subr.bf16.mxu1 %v30114_v53  ;;  %v30149_v51 = vld [vmem:[#allocation5 + $0x3810] sm:$0xff]  }
 0x75f   :  { %v30150_v53 = vld [vmem:[#allocation5 + $0x38d0] sm:$0xff]  }
 0x760   :  { %28008 = vmatpush3.bf16.msra.mxu0 %v30113_v52 }
 0x761   :  { %28030 = vmatpush3.bf16.msra.mxu1 %v30115_v54  ;;  %28009 = vmatprep.subr.bf16.mxu0 %v30116_v56  ;;  %v30151_v56 = vld [vmem:[#allocation5 + $0x3890] sm:$0xff]  }
 0x762   :  { %28031 = vmatprep.subr.bf16.mxu1 %v30118_v59  ;;  %v30152_v59 = vld [vmem:[#allocation5 + $0x3848] sm:$0xff]  }
 0x764   :  { %28010 = vmatpush3.bf16.msra.mxu0 %v30117_v57  ;;  %v529_v57 = vadd.s32 28800, %v30458_v22 }
 0x765   :  { %28032 = vmatpush3.bf16.msra.mxu1 %v30119_v63  ;;  %28011 = vmatprep.subr.bf16.mxu0 %v30120_v1  ;;  %v528_v63 = vadd.s32 28672, %v30458_v22 }
 0x766   :  { %v27751_v55 = vpop.f32.mrf.mxu0  ;;  %28033 = vmatprep.subr.bf16.mxu1 %v30122_v8  ;;  %v30156_v8 = vld [vmem:[#allocation5 + $0x3840] sm:$0xff]  }
 0x767   :  { %v27773_v62 = vpop.f32.mrf.mxu1  ;;  %v778_v12 = vand.u32 31, %v528_v63 }
 0x768   :  { %v27752_v58 = vpop.f32.mrf.mxu0  ;;  %28012 = vmatpush3.bf16.msra.mxu0 %v30121_v4 }
 0x769   :  { %v27753_v61 = vadd.f32 %v27752_v58, %v27751_v55  ;;  %v27774_v3 = vpop.f32.mrf.mxu1  ;;  %28034 = vmatpush3.bf16.msra.mxu1 %v30123_v11  ;;  %28013 = vmatprep.subr.bf16.mxu0 %v30124_v14  ;;  %v30157_v11 = vld [vmem:[#allocation5 + $0x3800] sm:$0xff]   ;;  %v278_v14 = vld [vmem:[#allocation2 + $0x708] sm:$0xff] }
 0x76a   :  { %v27754_v0 = vpop.f32.mrf.mxu0  ;;  %v27775_v6 = vadd.f32 %v27774_v3, %v27773_v62  ;;  %28035 = vmatprep.subr.bf16.mxu1 %v30126_v19  ;;  %v30153_v62 = vld [vmem:[#allocation5 + $0x3808] sm:$0xff]   ;;  %v531_v3 = vadd.s32 29056, %v30458_v22  ;;  %v30160_v19 = vld [vmem:[#allocation5 + $0x3978] sm:$0xff]  }
 0x76b   :  { %v21766_v2 = vadd.f32 %v27753_v61, %v31036_v20  ;;  %v27776_v10 = vpop.f32.mrf.mxu1  ;;  %v274_v20 = vld [vmem:[#allocation2 + $0x6e8] sm:$0xff] }
 0x76c   :  { %v27755_v7 = vpop.f32.mrf.mxu0  ;;  %28014 = vmatpush3.bf16.msra.mxu0 %v30125_v17  ;;  %vm1025_vm8 = vcmp.eq.s32.totalorder %v775_v9, %v274_v20  ;;  %v530_v9 = vadd.s32 28928, %v30458_v22  ;;  %v781_v15 = vand.u32 31, %v531_v3  ;;  %v277_v17 = vld [vmem:[#allocation2 + $0x700] sm:$0xff]  ;;  %v280_v20 = vld [vmem:[#allocation2 + $0x718] sm:$0xff]  ;;  %v30188_v3 = vld [vmem:[#allocation5 + $0x3940] sm:$0xff]  }
 0x76d   :  { %v31047_v13 = vadd.f32 %v27775_v6, %v21766_v2  ;;  %v27777_v16 = vpop.f32.mrf.mxu1  ;;  %vm25519_vm9 = vmpackc.low %vm1025_vm8, %vm1025_vm8  ;;  %28036 = vmatpush3.bf16.msra.mxu1 %v30127_v23  ;;  %28043 = vmatprep.subr.bf16.mxu0 %v30128_v26  ;;  %v30154_v2 = vld [vmem:[#allocation5 + $0x38c8] sm:$0xff]   ;;  %v779_v6 = vand.u32 31, %v529_v57  ;;  %vm1028_vm2 = vcmp.eq.s32.totalorder %v778_v12, %v277_v17  ;;  %v279_v23 = vld [vmem:[#allocation2 + $0x710] sm:$0xff] }
 0x76e   :  { %25520 = vmatprep.mubr.msk.bf16.mxu0 %vm25519_vm9, %v30427_v44  ;;  %28065 = vmatprep.subr.bf16.mxu1 %v30130_v30  ;;  %v30159_v16 = vld [vmem:[#allocation5 + $0x3880] sm:$0xff]   ;;  %v780_v18 = vand.u32 31, %v530_v9  ;;  %vm25529_vm3 = vmpackc.low %vm1028_vm2, %vm1028_vm2  ;;  %vm1031_vm4 = vcmp.eq.s32.totalorder %v781_v15, %v280_v20  ;;  %v30164_v26 = vld [vmem:[#allocation5 + $0x3970] sm:$0xff]  }
 0x76f   :  { %25522 = vmatmul.mubr.msk.bf16.vlgmr.msra.gmra.mxu0 %vm25521_vm11, %v30427_v44  ;;  %vm1029_vm0 = vcmp.eq.s32.totalorder %v779_v6, %v278_v14  ;;  %vm25531_vm5 = vmpackc.low %vm1031_vm4, %vm1031_vm4  ;;  %v30168_v30 = vld [vmem:[#allocation5 + $0x3968] sm:$0xff]   ;;  %v30189_v6 = vld [vmem:[#allocation5 + $0x3900] sm:$0xff]  }
 0x770   :  { %28044 = vmatpush3.bf16.msra.mxu0 %v30129_v28  ;;  %25526 = vmatmul.mubr.msk.bf16.vlgmr.msra.gmra.mxu1 %vm25525_vm15, %v30427_v44  ;;  %vm25527_vm1 = vmpackc.low %vm1029_vm0, %vm1029_vm0  ;;  %vm1030_vm6 = vcmp.eq.s32.totalorder %v780_v18, %v279_v23  ;;  %v30166_v28 = vld [vmem:[#allocation5 + $0x39f0] sm:$0xff]   ;;  %v284_v14 = vld [vmem:[#allocation2 + $0x738] sm:$0xff] }
 0x771   :  { %28066 = vmatpush3.bf16.msra.mxu1 %v30131_v31  ;;  %28045 = vmatprep.subr.bf16.mxu0 %v30132_v32  ;;  %vm25533_vm7 = vmpackc.low %vm1030_vm6, %vm1030_vm6  ;;  %v30169_v31 = vld [vmem:[#allocation5 + $0x3928] sm:$0xff]   ;;  %v30193_v15 = vld [vmem:[#allocation5 + $0x3a38] sm:$0xff]  }
 0x772   :  { %28067 = vmatprep.subr.bf16.mxu1 %v30134_v34  ;;  %25528 = vmatprep.mubr.msk.bf16.mxu0 %vm25527_vm1, %v30427_v44  ;;  %v30170_v32 = vld [vmem:[#allocation5 + $0x39e8] sm:$0xff]   ;;  %v30172_v34 = vld [vmem:[#allocation5 + $0x3960] sm:$0xff]   ;;  %v30194_v17 = vld [vmem:[#allocation5 + $0x3af8] sm:$0xff]  }
 0x773   :  { %25532 = vmatprep.mubr.msk.bf16.mxu1 %vm25531_vm5, %v30427_v44  ;;  %v30195_v18 = vld [vmem:[#allocation5 + $0x3ab8] sm:$0xff]   ;;  %v30197_v20 = vld [vmem:[#allocation5 + $0x3a30] sm:$0xff]  }
 0x774   :  { %28046 = vmatpush3.bf16.msra.mxu0 %v30133_v33  ;;  %v30171_v33 = vld [vmem:[#allocation5 + $0x39a8] sm:$0xff]   ;;  %v30199_v23 = vld [vmem:[#allocation5 + $0x3ab0] sm:$0xff]  }
 0x775   :  { %28068 = vmatpush3.bf16.msra.mxu1 %v30135_v35  ;;  %28047 = vmatprep.subr.bf16.mxu0 %v30136_v36  ;;  %v30173_v35 = vld [vmem:[#allocation5 + $0x3920] sm:$0xff]  }
 0x776   :  { %28069 = vmatprep.subr.bf16.mxu1 %v30138_v38  ;;  %v30174_v36 = vld [vmem:[#allocation5 + $0x39e0] sm:$0xff]   ;;  %v30176_v38 = vld [vmem:[#allocation5 + $0x3958] sm:$0xff]  }
 0x778   :  { %28048 = vmatpush3.bf16.msra.mxu0 %v30137_v37  ;;  %v30175_v37 = vld [vmem:[#allocation5 + $0x39a0] sm:$0xff]  }
 0x779   :  { %28070 = vmatpush3.bf16.msra.mxu1 %v30139_v39  ;;  %28049 = vmatprep.subr.bf16.mxu0 %v30140_v40  ;;  %v30177_v39 = vld [vmem:[#allocation5 + $0x3918] sm:$0xff]  }
 0x77a   :  { %28071 = vmatprep.subr.bf16.mxu1 %v30142_v42  ;;  %v30178_v40 = vld [vmem:[#allocation5 + $0x39d8] sm:$0xff]  }
 0x77b   :  { %v30179_v42 = vld [vmem:[#allocation5 + $0x3998] sm:$0xff]  }
 0x77c   :  { %28050 = vmatpush3.bf16.msra.mxu0 %v30141_v41 }
 0x77d   :  { %28072 = vmatpush3.bf16.msra.mxu1 %v30143_v43  ;;  %28051 = vmatprep.subr.bf16.mxu0 %v30144_v45  ;;  %v30180_v43 = vld [vmem:[#allocation5 + $0x3950] sm:$0xff]  }
 0x77e   :  { %28073 = vmatprep.subr.bf16.mxu1 %v30146_v47  ;;  %v533_v47 = vadd.s32 29312, %v30458_v22 }
 0x780   :  { %28052 = vmatpush3.bf16.msra.mxu0 %v30145_v46  ;;  %v30181_v46 = vld [vmem:[#allocation5 + $0x3910] sm:$0xff]  }
 0x781   :  { %28074 = vmatpush3.bf16.msra.mxu1 %v30147_v48  ;;  %28053 = vmatprep.subr.bf16.mxu0 %v30148_v50 }
 0x782   :  { %28075 = vmatprep.subr.bf16.mxu1 %v30150_v53  ;;  %v532_v53 = vadd.s32 29184, %v30458_v22 }
 0x784   :  { %28054 = vmatpush3.bf16.msra.mxu0 %v30149_v51 }
 0x785   :  { %28076 = vmatpush3.bf16.msra.mxu1 %v30151_v56  ;;  %28055 = vmatprep.subr.bf16.mxu0 %v30152_v59  ;;  %v783_v59 = vand.u32 31, %v533_v47  ;;  %v30216_v47 = vld [vmem:[#allocation5 + $0x3a48] sm:$0xff]  }
 0x786   :  { %v27795_v49 = vpop.f32.mrf.mxu0  ;;  %28077 = vmatprep.subr.bf16.mxu1 %v30154_v2 }
 0x787   :  { %v27817_v55 = vpop.f32.mrf.mxu1 }
 0x788   :  { %v27796_v52 = vpop.f32.mrf.mxu0  ;;  %28056 = vmatpush3.bf16.msra.mxu0 %v30153_v62  ;;  %v535_v62 = vadd.s32 29568, %v30458_v22 }
 0x789   :  { %v27797_v54 = vadd.f32 %v27796_v52, %v27795_v49  ;;  %v27818_v61 = vpop.f32.mrf.mxu1  ;;  %28078 = vmatpush3.bf16.msra.mxu1 %v30155_v5  ;;  %28057 = vmatprep.subr.bf16.mxu0 %v30156_v8  ;;  %v30182_v49 = vld [vmem:[#allocation5 + $0x39d0] sm:$0xff]   ;;  %v282_v8 = vld [vmem:[#allocation2 + $0x728] sm:$0xff] }
 0x78a   :  { %v27798_v58 = vpop.f32.mrf.mxu0  ;;  %v27819_v0 = vadd.f32 %v27818_v61, %v27817_v55  ;;  %v30183_v52 = vld [vmem:[#allocation5 + $0x3990] sm:$0xff]   ;;  %v30184_v55 = vld [vmem:[#allocation5 + $0x3948] sm:$0xff]   ;;  %v785_v9 = vand.u32 31, %v535_v62  ;;  %vm1033_vm8 = vcmp.eq.s32.totalorder %v783_v59, %v282_v8 }
 0x78b   :  { %v21846_v60 = vadd.f32 %v27797_v54, %v31047_v13  ;;  %v27820_v4 = vpop.f32.mrf.mxu1  ;;  %v30158_v13 = vld [vmem:[#allocation5 + $0x38c0] sm:$0xff]   ;;  %v30185_v58 = vld [vmem:[#allocation5 + $0x3908] sm:$0xff]   ;;  %vm25535_vm9 = vmpackc.low %vm1033_vm8, %vm1033_vm8 }
 0x78c   :  { %v27799_v1 = vpop.f32.mrf.mxu0  ;;  %28058 = vmatpush3.bf16.msra.mxu0 %v30157_v11  ;;  %28079 = vmatprep.subr.bf16.mxu1 %v30158_v13  ;;  %v30186_v61 = vld [vmem:[#allocation5 + $0x39c8] sm:$0xff]   ;;  %v534_v4 = vadd.s32 29440, %v30458_v22  ;;  %v281_v11 = vld [vmem:[#allocation2 + $0x720] sm:$0xff]  ;;  %v30192_v13 = vld [vmem:[#allocation5 + $0x3a78] sm:$0xff]   ;;  %vm1035_vm12 = vcmp.eq.s32.totalorder %v785_v9, %v284_v14 }
 0x78d   :  { %v31058_v7 = vadd.f32 %v27819_v0, %v21846_v60  ;;  %v27821_v10 = vpop.f32.mrf.mxu1  ;;  %28080 = vmatpush3.bf16.msra.mxu1 %v30159_v16  ;;  %28087 = vmatprep.subr.bf16.mxu0 %v30160_v19  ;;  %v30187_v0 = vld [vmem:[#allocation5 + $0x3988] sm:$0xff]   ;;  %v782_v1 = vand.u32 31, %v532_v53  ;;  %vm25539_vm13 = vmpackc.low %vm1035_vm12, %vm1035_vm12  ;;  %v283_v16 = vld [vmem:[#allocation2 + $0x730] sm:$0xff] }
 0x78e   :  { %28109 = vmatprep.subr.bf16.mxu1 %v30162_v24  ;;  %v30191_v10 = vld [vmem:[#allocation5 + $0x3980] sm:$0xff]   ;;  %v784_v12 = vand.u32 31, %v534_v4  ;;  %v30196_v19 = vld [vmem:[#allocation5 + $0x3a70] sm:$0xff]   ;;  %v30200_v24 = vld [vmem:[#allocation5 + $0x3a68] sm:$0xff]  }
 0x78f   :  { %25530 = vmatmul.mubr.msk.bf16.vlgmr.msra.gmra.mxu0 %vm25529_vm3, %v30427_v44  ;;  %vm1032_vm10 = vcmp.eq.s32.totalorder %v782_v1, %v281_v11  ;;  %v30222_v1 = vld [vmem:[#allocation5 + $0x3ac0] sm:$0xff]   ;;  %v288_v8 = vld [vmem:[#allocation2 + $0x758] sm:$0xff]  ;;  %v30225_v9 = vld [vmem:[#allocation5 + $0x3b38] sm:$0xff]  }
 0x790   :  { %28088 = vmatpush3.bf16.msra.mxu0 %v30161_v21  ;;  %25534 = vmatmul.mubr.msk.bf16.vlgmr.msra.gmra.mxu1 %vm25533_vm7, %v30427_v44  ;;  %vm25537_vm11 = vmpackc.low %vm1032_vm10, %vm1032_vm10  ;;  %vm1034_vm14 = vcmp.eq.s32.totalorder %v784_v12, %v283_v16  ;;  %v30198_v21 = vld [vmem:[#allocation5 + $0x3af0] sm:$0xff]   ;;  %v30223_v4 = vld [vmem:[#allocation5 + $0x3a80] sm:$0xff]  }
 0x791   :  { %28110 = vmatpush3.bf16.msra.mxu1 %v30163_v25  ;;  %28089 = vmatprep.subr.bf16.mxu0 %v30164_v26  ;;  %vm25541_vm15 = vmpackc.low %vm1034_vm14, %vm1034_vm14  ;;  %v30201_v25 = vld [vmem:[#allocation5 + $0x3a28] sm:$0xff]   ;;  %v30226_v11 = vld [vmem:[#allocation5 + $0x3bf8] sm:$0xff]  }
 0x792   :  { %28111 = vmatprep.subr.bf16.mxu1 %v30166_v28  ;;  %25536 = vmatprep.mubr.msk.bf16.mxu0 %vm25535_vm9, %v30427_v44  ;;  %v30202_v26 = vld [vmem:[#allocation5 + $0x3ae8] sm:$0xff]   ;;  %v30204_v28 = vld [vmem:[#allocation5 + $0x3a60] sm:$0xff]   ;;  %v30227_v12 = vld [vmem:[#allocation5 + $0x3bb8] sm:$0xff]  }
 0x793   :  { %25540 = vmatprep.mubr.msk.bf16.mxu1 %vm25539_vm13, %v30427_v44  ;;  %v30229_v14 = vld [vmem:[#allocation5 + $0x3b30] sm:$0xff]  }
 0x794   :  { %28090 = vmatpush3.bf16.msra.mxu0 %v30165_v27  ;;  %v30203_v27 = vld [vmem:[#allocation5 + $0x3aa8] sm:$0xff]   ;;  %v30231_v16 = vld [vmem:[#allocation5 + $0x3bb0] sm:$0xff]  }
 0x795   :  { %28112 = vmatpush3.bf16.msra.mxu1 %v30167_v29  ;;  %28091 = vmatprep.subr.bf16.mxu0 %v30168_v30  ;;  %v30205_v29 = vld [vmem:[#allocation5 + $0x3a20] sm:$0xff]  }
 0x796   :  { %28113 = vmatprep.subr.bf16.mxu1 %v30170_v32  ;;  %v30206_v30 = vld [vmem:[#allocation5 + $0x3ae0] sm:$0xff]   ;;  %v30208_v32 = vld [vmem:[#allocation5 + $0x3a58] sm:$0xff]  }
 0x798   :  { %28092 = vmatpush3.bf16.msra.mxu0 %v30169_v31  ;;  %v30207_v31 = vld [vmem:[#allocation5 + $0x3aa0] sm:$0xff]  }
 0x799   :  { %28114 = vmatpush3.bf16.msra.mxu1 %v30171_v33  ;;  %28093 = vmatprep.subr.bf16.mxu0 %v30172_v34  ;;  %v30209_v33 = vld [vmem:[#allocation5 + $0x3a18] sm:$0xff]  }
 0x79a   :  { %28115 = vmatprep.subr.bf16.mxu1 %v30174_v36  ;;  %v30210_v34 = vld [vmem:[#allocation5 + $0x3ad8] sm:$0xff]  }
 0x79c   :  { %28094 = vmatpush3.bf16.msra.mxu0 %v30173_v35  ;;  %v30211_v35 = vld [vmem:[#allocation5 + $0x3a98] sm:$0xff]  }
 0x79d   :  { %28116 = vmatpush3.bf16.msra.mxu1 %v30175_v37  ;;  %28095 = vmatprep.subr.bf16.mxu0 %v30176_v38  ;;  %v30212_v37 = vld [vmem:[#allocation5 + $0x3a50] sm:$0xff]  }
 0x79e   :  { %28117 = vmatprep.subr.bf16.mxu1 %v30178_v40  ;;  %v30213_v38 = vld [vmem:[#allocation5 + $0x3a10] sm:$0xff]  }
 0x79f   :  { %v30214_v40 = vld [vmem:[#allocation5 + $0x3ad0] sm:$0xff]  }
 0x7a0   :  { %28096 = vmatpush3.bf16.msra.mxu0 %v30177_v39 }
 0x7a1   :  { %28118 = vmatpush3.bf16.msra.mxu1 %v30179_v42  ;;  %28097 = vmatprep.subr.bf16.mxu0 %v30180_v43 }
 0x7a2   :  { %28119 = vmatprep.subr.bf16.mxu1 %v30182_v49 }
 0x7a4   :  { %28098 = vmatpush3.bf16.msra.mxu0 %v30181_v46 }
 0x7a5   :  { %28120 = vmatpush3.bf16.msra.mxu1 %v30183_v52  ;;  %28099 = vmatprep.subr.bf16.mxu0 %v30184_v55 }
 0x7a6   :  { %v27839_v41 = vpop.f32.mrf.mxu0  ;;  %28121 = vmatprep.subr.bf16.mxu1 %v30186_v61  ;;  %v538_v61 = vadd.s32 29952, %v30458_v22 }
 0x7a7   :  { %v27861_v50 = vpop.f32.mrf.mxu1 }
 0x7a8   :  { %v27840_v45 = vpop.f32.mrf.mxu0  ;;  %28100 = vmatpush3.bf16.msra.mxu0 %v30185_v58  ;;  %v539_v58 = vadd.s32 30080, %v30458_v22 }
 0x7a9   :  { %v27841_v48 = vadd.f32 %v27840_v45, %v27839_v41  ;;  %v27862_v56 = vpop.f32.mrf.mxu1  ;;  %28122 = vmatpush3.bf16.msra.mxu1 %v30187_v0  ;;  %28101 = vmatprep.subr.bf16.mxu0 %v30188_v3  ;;  %v537_v41 = vadd.s32 29824, %v30458_v22  ;;  %v30215_v45 = vld [vmem:[#allocation5 + $0x3a90] sm:$0xff]  }
 0x7aa   :  { %v27842_v51 = vpop.f32.mrf.mxu0  ;;  %v27863_v60 = vadd.f32 %v27862_v56, %v27861_v50  ;;  %v30217_v50 = vld [vmem:[#allocation5 + $0x3a08] sm:$0xff]   ;;  %v789_v3 = vand.u32 31, %v539_v58 }
 0x7ab   :  { %v21926_v54 = vadd.f32 %v27841_v48, %v31058_v7  ;;  %v27864_v63 = vpop.f32.mrf.mxu1  ;;  %v30190_v7 = vld [vmem:[#allocation5 + $0x39c0] sm:$0xff]   ;;  %v536_v51 = vadd.s32 29696, %v30458_v22  ;;  %v787_v55 = vand.u32 31, %v537_v41 }
 0x7ac   :  { %v27843_v57 = vpop.f32.mrf.mxu0  ;;  %28102 = vmatpush3.bf16.msra.mxu0 %v30189_v6  ;;  %28123 = vmatprep.subr.bf16.mxu1 %v30190_v7  ;;  %v30221_v63 = vld [vmem:[#allocation5 + $0x3a00] sm:$0xff]   ;;  %v788_v6 = vand.u32 31, %v538_v61  ;;  %v30224_v7 = vld [vmem:[#allocation5 + $0x3b78] sm:$0xff]   ;;  %vm1039_vm4 = vcmp.eq.s32.totalorder %v789_v3, %v288_v8  ;;  %v30261_v8 = vld [vmem:[#allocation5 + $0x3c30] sm:$0xff]  }
 0x7ad   :  { %v31069_v2 = vadd.f32 %v27863_v60, %v21926_v54  ;;  %v27865_v5 = vpop.f32.mrf.mxu1  ;;  %28124 = vmatpush3.bf16.msra.mxu1 %v30191_v10  ;;  %28131 = vmatprep.subr.bf16.mxu0 %v30192_v13  ;;  %v30218_v54 = vld [vmem:[#allocation5 + $0x3ac8] sm:$0xff]   ;;  %v30220_v60 = vld [vmem:[#allocation5 + $0x3a40] sm:$0xff]   ;;  %v786_v0 = vand.u32 31, %v536_v51  ;;  %vm25547_vm5 = vmpackc.low %vm1039_vm4, %vm1039_vm4 }
 0x7ae   :  { %28153 = vmatprep.subr.bf16.mxu1 %v30194_v17  ;;  %v30219_v57 = vld [vmem:[#allocation5 + $0x3a88] sm:$0xff]   ;;  %v285_v5 = vld [vmem:[#allocation2 + $0x740] sm:$0xff]  ;;  %v287_v10 = vld [vmem:[#allocation2 + $0x750] sm:$0xff] }
 0x7af   :  { %25538 = vmatmul.mubr.msk.bf16.vlgmr.msra.gmra.mxu0 %vm25537_vm11, %v30427_v44  ;;  %vm1036_vm2 = vcmp.eq.s32.totalorder %v786_v0, %v285_v5  ;;  %vm1038_vm6 = vcmp.eq.s32.totalorder %v788_v6, %v287_v10  ;;  %v30228_v13 = vld [vmem:[#allocation5 + $0x3b70] sm:$0xff]   ;;  %v30232_v17 = vld [vmem:[#allocation5 + $0x3b68] sm:$0xff]   ;;  %v30257_v3 = vld [vmem:[#allocation5 + $0x3c38] sm:$0xff]  }
 0x7b0   :  { %28132 = vmatpush3.bf16.msra.mxu0 %v30193_v15  ;;  %25542 = vmatmul.mubr.msk.bf16.vlgmr.msra.gmra.mxu1 %vm25541_vm15, %v30427_v44  ;;  %vm25545_vm3 = vmpackc.low %vm1036_vm2, %vm1036_vm2  ;;  %v30230_v15 = vld [vmem:[#allocation5 + $0x3bf0] sm:$0xff]   ;;  %v30251_v51 = vld [vmem:[#allocation5 + $0x3b88] sm:$0xff]  }
 0x7b1   :  { %28154 = vmatpush3.bf16.msra.mxu1 %v30195_v18  ;;  %28133 = vmatprep.subr.bf16.mxu0 %v30196_v19  ;;  %vm25549_vm7 = vmpackc.low %vm1038_vm6, %vm1038_vm6  ;;  %v30233_v18 = vld [vmem:[#allocation5 + $0x3b28] sm:$0xff]   ;;  %v30258_v5 = vld [vmem:[#allocation5 + $0x3cf8] sm:$0xff]  }
 0x7b2   :  { %28155 = vmatprep.subr.bf16.mxu1 %v30198_v21  ;;  %25548 = vmatprep.mubr.msk.bf16.mxu1 %vm25547_vm5, %v30427_v44  ;;  %v30234_v19 = vld [vmem:[#allocation5 + $0x3be8] sm:$0xff]   ;;  %v30236_v21 = vld [vmem:[#allocation5 + $0x3b60] sm:$0xff]   ;;  %v30259_v6 = vld [vmem:[#allocation5 + $0x3cb8] sm:$0xff]  }
 0x7b3   :  { %v30263_v10 = vld [vmem:[#allocation5 + $0x3cb0] sm:$0xff]  }
 0x7b4   :  { %28134 = vmatpush3.bf16.msra.mxu0 %v30197_v20  ;;  %v30235_v20 = vld [vmem:[#allocation5 + $0x3ba8] sm:$0xff]  }
 0x7b5   :  { %28156 = vmatpush3.bf16.msra.mxu1 %v30199_v23  ;;  %28135 = vmatprep.subr.bf16.mxu0 %v30200_v24  ;;  %v30237_v23 = vld [vmem:[#allocation5 + $0x3b20] sm:$0xff]  }
 0x7b6   :  { %28157 = vmatprep.subr.bf16.mxu1 %v30202_v26  ;;  %v30238_v24 = vld [vmem:[#allocation5 + $0x3be0] sm:$0xff]   ;;  %v30240_v26 = vld [vmem:[#allocation5 + $0x3b58] sm:$0xff]  }
 0x7b8   :  { %28136 = vmatpush3.bf16.msra.mxu0 %v30201_v25  ;;  %v30239_v25 = vld [vmem:[#allocation5 + $0x3ba0] sm:$0xff]  }
 0x7b9   :  { %28158 = vmatpush3.bf16.msra.mxu1 %v30203_v27  ;;  %28137 = vmatprep.subr.bf16.mxu0 %v30204_v28  ;;  %v30241_v27 = vld [vmem:[#allocation5 + $0x3b18] sm:$0xff]  }
 0x7ba   :  { %28159 = vmatprep.subr.bf16.mxu1 %v30206_v30  ;;  %v30242_v28 = vld [vmem:[#allocation5 + $0x3bd8] sm:$0xff]  }
 0x7bc   :  { %28138 = vmatpush3.bf16.msra.mxu0 %v30205_v29  ;;  %v30243_v29 = vld [vmem:[#allocation5 + $0x3b98] sm:$0xff]  }
 0x7bd   :  { %28160 = vmatpush3.bf16.msra.mxu1 %v30207_v31  ;;  %28139 = vmatprep.subr.bf16.mxu0 %v30208_v32  ;;  %v30244_v31 = vld [vmem:[#allocation5 + $0x3b50] sm:$0xff]  }
 0x7be   :  { %28161 = vmatprep.subr.bf16.mxu1 %v30210_v34  ;;  %v30245_v32 = vld [vmem:[#allocation5 + $0x3b10] sm:$0xff]  }
 0x7bf   :  { %v30246_v34 = vld [vmem:[#allocation5 + $0x3bd0] sm:$0xff]  }
 0x7c0   :  { %28140 = vmatpush3.bf16.msra.mxu0 %v30209_v33 }
 0x7c1   :  { %28162 = vmatpush3.bf16.msra.mxu1 %v30211_v35  ;;  %28141 = vmatprep.subr.bf16.mxu0 %v30212_v37  ;;  %v30247_v37 = vld [vmem:[#allocation5 + $0x3b90] sm:$0xff]  }
 0x7c2   :  { %28163 = vmatprep.subr.bf16.mxu1 %v30214_v40  ;;  %v30248_v40 = vld [vmem:[#allocation5 + $0x3b48] sm:$0xff]  }
 0x7c4   :  { %28142 = vmatpush3.bf16.msra.mxu0 %v30213_v38  ;;  %v541_v38 = vadd.s32 30336, %v30458_v22 }
 0x7c5   :  { %28164 = vmatpush3.bf16.msra.mxu1 %v30215_v45  ;;  %28143 = vmatprep.subr.bf16.mxu0 %v30216_v47  ;;  %v540_v45 = vadd.s32 30208, %v30458_v22 }
 0x7c6   :  { %28165 = vmatprep.subr.bf16.mxu1 %v30218_v54  ;;  %v30252_v54 = vld [vmem:[#allocation5 + $0x3b40] sm:$0xff]  }
 0x7c7   :  { %v27905_v43 = vpop.f32.mrf.mxu1  ;;  %v790_v58 = vand.u32 31, %v540_v45 }
 0x7c8   :  { %28144 = vmatpush3.bf16.msra.mxu0 %v30217_v50 }
 0x7c9   :  { %v27906_v49 = vpop.f32.mrf.mxu1  ;;  %28166 = vmatpush3.bf16.msra.mxu1 %v30219_v57  ;;  %28145 = vmatprep.subr.bf16.mxu0 %v30220_v60  ;;  %v30253_v57 = vld [vmem:[#allocation5 + $0x3b00] sm:$0xff]   ;;  %v290_v60 = vld [vmem:[#allocation2 + $0x768] sm:$0xff] }
 0x7ca   :  { %v27907_v52 = vadd.f32 %v27906_v49, %v27905_v43  ;;  %28167 = vmatprep.subr.bf16.mxu1 %v30222_v1  ;;  %v30249_v43 = vld [vmem:[#allocation5 + $0x3b08] sm:$0xff]   ;;  %v543_v49 = vadd.s32 30592, %v30458_v22  ;;  %v30256_v1 = vld [vmem:[#allocation5 + $0x3c78] sm:$0xff]  }
 0x7cb   :  { %v27908_v56 = vpop.f32.mrf.mxu1 }
 0x7cc   :  { %28146 = vmatpush3.bf16.msra.mxu0 %v30221_v63  ;;  %v793_v61 = vand.u32 31, %v543_v49  ;;  %v289_v63 = vld [vmem:[#allocation2 + $0x760] sm:$0xff]  ;;  %v30284_v49 = vld [vmem:[#allocation5 + $0x3c40] sm:$0xff]  }
 0x7cd   :  { %v27909_v62 = vpop.f32.mrf.mxu1  ;;  %28168 = vmatpush3.bf16.msra.mxu1 %v30223_v4  ;;  %28175 = vmatprep.subr.bf16.mxu0 %v30224_v7  ;;  %vm1040_vm10 = vcmp.eq.s32.totalorder %v790_v58, %v289_v63  ;;  %v291_v4 = vld [vmem:[#allocation2 + $0x770] sm:$0xff]  ;;  %v30260_v7 = vld [vmem:[#allocation5 + $0x3c70] sm:$0xff]   ;;  %v30290_v63 = vld [vmem:[#allocation5 + $0x3df8] sm:$0xff]  }
 0x7ce   :  { %28197 = vmatprep.subr.bf16.mxu1 %v30226_v11  ;;  %v30255_v62 = vld [vmem:[#allocation5 + $0x3b80] sm:$0xff]   ;;  %vm25553_vm11 = vmpackc.low %vm1040_vm10, %vm1040_vm10  ;;  %v30264_v11 = vld [vmem:[#allocation5 + $0x3c68] sm:$0xff]  }
 0x7cf   :  { %v27883_v36 = vpop.f32.mrf.mxu0 }
 0x7d0   :  { %25550 = vmatmul.mubr.msk.bf16.vlgmr.msra.gmra.mxu1 %vm25549_vm7, %v30427_v44 }
 0x7d1   :  { %v27884_v39 = vpop.f32.mrf.mxu0  ;;  %28198 = vmatpush3.bf16.msra.mxu1 %v30227_v12  ;;  %v30265_v12 = vld [vmem:[#allocation5 + $0x3c28] sm:$0xff]  }
 0x7d2   :  { %v27885_v42 = vadd.f32 %v27884_v39, %v27883_v36  ;;  %28199 = vmatprep.subr.bf16.mxu1 %v30230_v15  ;;  %v30268_v15 = vld [vmem:[#allocation5 + $0x3c60] sm:$0xff]  }
 0x7d3   :  { %v27886_v46 = vpop.f32.mrf.mxu0 }
 0x7d4   :  { %v22006_v48 = vadd.f32 %v27885_v42, %v31069_v2  ;;  %v286_v2 = vld [vmem:[#allocation2 + $0x748] sm:$0xff] }
 0x7d5   :  { %v27887_v53 = vpop.f32.mrf.mxu0  ;;  %vm1037_vm0 = vcmp.eq.s32.totalorder %v787_v55, %v286_v2  ;;  %28200 = vmatpush3.bf16.msra.mxu1 %v30231_v16  ;;  %v542_v55 = vadd.s32 30464, %v30458_v22  ;;  %v292_v2 = vld [vmem:[#allocation2 + $0x778] sm:$0xff]  ;;  %v30269_v16 = vld [vmem:[#allocation5 + $0x3c20] sm:$0xff]  }
 0x7d6   :  { %v31080_v59 = vadd.f32 %v27907_v52, %v22006_v48  ;;  %vm25543_vm1 = vmpackc.low %vm1037_vm0, %vm1037_vm0  ;;  %28201 = vmatprep.subr.bf16.mxu1 %v30234_v19  ;;  %v30250_v48 = vld [vmem:[#allocation5 + $0x3bc8] sm:$0xff]   ;;  %v791_v52 = vand.u32 31, %v541_v38  ;;  %vm1043_vm12 = vcmp.eq.s32.totalorder %v793_v61, %v292_v2  ;;  %v30272_v19 = vld [vmem:[#allocation5 + $0x3c58] sm:$0xff]  }
 0x7d7   :  { %25544 = vmatprep.mubr.msk.bf16.mxu0 %vm25543_vm1, %v30427_v44  ;;  %v792_v0 = vand.u32 31, %v542_v55  ;;  %vm25555_vm13 = vmpackc.low %vm1043_vm12, %vm1043_vm12  ;;  %v30289_v61 = vld [vmem:[#allocation5 + $0x3d38] sm:$0xff]   ;;  %v30293_v2 = vld [vmem:[#allocation5 + $0x3d30] sm:$0xff]  }
 0x7d8   :  { %25546 = vmatmul.mubr.msk.bf16.vlgmr.msra.gmra.mxu0 %vm25545_vm3, %v30427_v44  ;;  %vm1041_vm8 = vcmp.eq.s32.totalorder %v791_v52, %v290_v60  ;;  %25556 = vmatprep.mubr.msk.bf16.mxu1 %vm25555_vm13, %v30427_v44  ;;  %v30285_v52 = vld [vmem:[#allocation5 + $0x3c00] sm:$0xff]   ;;  %v296_v60 = vld [vmem:[#allocation2 + $0x798] sm:$0xff] }
 0x7d9   :  { %28176 = vmatpush3.bf16.msra.mxu0 %v30225_v9  ;;  %28202 = vmatpush3.bf16.msra.mxu1 %v30235_v20  ;;  %vm25551_vm9 = vmpackc.low %vm1041_vm8, %vm1041_vm8  ;;  %vm1042_vm14 = vcmp.eq.s32.totalorder %v792_v0, %v291_v4  ;;  %v30262_v9 = vld [vmem:[#allocation5 + $0x3cf0] sm:$0xff]   ;;  %v30273_v20 = vld [vmem:[#allocation5 + $0x3c18] sm:$0xff]  }
 0x7da   :  { %28177 = vmatprep.subr.bf16.mxu0 %v30228_v13  ;;  %28203 = vmatprep.subr.bf16.mxu1 %v30238_v24  ;;  %vm25557_vm15 = vmpackc.low %vm1042_vm14, %vm1042_vm14  ;;  %v30266_v13 = vld [vmem:[#allocation5 + $0x3ce8] sm:$0xff]   ;;  %v30275_v24 = vld [vmem:[#allocation5 + $0x3c98] sm:$0xff]  }
 0x7db   :  { %25552 = vmatprep.mubr.msk.bf16.mxu0 %vm25551_vm9, %v30427_v44  ;;  %v30291_v0 = vld [vmem:[#allocation5 + $0x3db8] sm:$0xff]   ;;  %v30295_v4 = vld [vmem:[#allocation5 + $0x3db0] sm:$0xff]  }
 0x7dd   :  { %28178 = vmatpush3.bf16.msra.mxu0 %v30229_v14  ;;  %28204 = vmatpush3.bf16.msra.mxu1 %v30239_v25  ;;  %v30267_v14 = vld [vmem:[#allocation5 + $0x3ca8] sm:$0xff]   ;;  %v30276_v25 = vld [vmem:[#allocation5 + $0x3c50] sm:$0xff]  }
 0x7de   :  { %28179 = vmatprep.subr.bf16.mxu0 %v30232_v17  ;;  %28205 = vmatprep.subr.bf16.mxu1 %v30242_v28  ;;  %v30270_v17 = vld [vmem:[#allocation5 + $0x3ce0] sm:$0xff]   ;;  %v545_v28 = vadd.s32 30848, %v30458_v22 }
 0x7e1   :  { %28180 = vmatpush3.bf16.msra.mxu0 %v30233_v18  ;;  %28206 = vmatpush3.bf16.msra.mxu1 %v30243_v29  ;;  %v30271_v18 = vld [vmem:[#allocation5 + $0x3ca0] sm:$0xff]  }
 0x7e2   :  { %28181 = vmatprep.subr.bf16.mxu0 %v30236_v21  ;;  %28207 = vmatprep.subr.bf16.mxu1 %v30246_v34  ;;  %v30274_v21 = vld [vmem:[#allocation5 + $0x3cd8] sm:$0xff]   ;;  %v544_v34 = vadd.s32 30720, %v30458_v22 }
 0x7e5   :  { %28182 = vmatpush3.bf16.msra.mxu0 %v30237_v23  ;;  %28208 = vmatpush3.bf16.msra.mxu1 %v30247_v37 }
 0x7e6   :  { %28183 = vmatprep.subr.bf16.mxu0 %v30240_v26  ;;  %28209 = vmatprep.subr.bf16.mxu1 %v30250_v48 }
 0x7e9   :  { %28184 = vmatpush3.bf16.msra.mxu0 %v30241_v27  ;;  %28210 = vmatpush3.bf16.msra.mxu1 %v30251_v51  ;;  %v30277_v27 = vld [vmem:[#allocation5 + $0x3c10] sm:$0xff]  }
 0x7ea   :  { %28185 = vmatprep.subr.bf16.mxu0 %v30244_v31 }
 0x7ed   :  { %28186 = vmatpush3.bf16.msra.mxu0 %v30245_v32 }
 0x7ee   :  { %28187 = vmatprep.subr.bf16.mxu0 %v30248_v40  ;;  %v795_v40 = vand.u32 31, %v545_v28  ;;  %v30312_v28 = vld [vmem:[#allocation5 + $0x3d48] sm:$0xff]  }
 0x7ef   :  { %v27927_v30 = vpop.f32.mrf.mxu0 }
 0x7f0   :  { %v27949_v36 = vpop.f32.mrf.mxu1 }
 0x7f1   :  { %v27928_v33 = vpop.f32.mrf.mxu0  ;;  %28188 = vmatpush3.bf16.msra.mxu0 %v30249_v43  ;;  %v547_v43 = vadd.s32 31104, %v30458_v22 }
 0x7f2   :  { %v27929_v35 = vadd.f32 %v27928_v33, %v27927_v30  ;;  %v27950_v42 = vpop.f32.mrf.mxu1  ;;  %28189 = vmatprep.subr.bf16.mxu0 %v30252_v54  ;;  %v30278_v30 = vld [vmem:[#allocation5 + $0x3cd0] sm:$0xff]   ;;  %v294_v54 = vld [vmem:[#allocation2 + $0x788] sm:$0xff] }
 0x7f3   :  { %v27930_v39 = vpop.f32.mrf.mxu0  ;;  %v27951_v46 = vadd.f32 %v27950_v42, %v27949_v36  ;;  %v30279_v33 = vld [vmem:[#allocation5 + $0x3c90] sm:$0xff]   ;;  %v30280_v36 = vld [vmem:[#allocation5 + $0x3c48] sm:$0xff]   ;;  %v797_v55 = vand.u32 31, %v547_v43  ;;  %vm1045_vm0 = vcmp.eq.s32.totalorder %v795_v40, %v294_v54 }
 0x7f4   :  { %v22086_v41 = vadd.f32 %v27929_v35, %v31080_v59  ;;  %v27952_v50 = vpop.f32.mrf.mxu1  ;;  %v30254_v59 = vld [vmem:[#allocation5 + $0x3bc0] sm:$0xff]   ;;  %v30281_v39 = vld [vmem:[#allocation5 + $0x3c08] sm:$0xff]   ;;  %vm25559_vm1 = vmpackc.low %vm1045_vm0, %vm1045_vm0 }
 0x7f5   :  { %v27931_v47 = vpop.f32.mrf.mxu0  ;;  %28190 = vmatpush3.bf16.msra.mxu0 %v30253_v57  ;;  %28211 = vmatprep.subr.bf16.mxu1 %v30254_v59  ;;  %v30282_v42 = vld [vmem:[#allocation5 + $0x3cc8] sm:$0xff]   ;;  %v546_v50 = vadd.s32 30976, %v30458_v22  ;;  %v293_v57 = vld [vmem:[#allocation2 + $0x780] sm:$0xff]  ;;  %v30288_v59 = vld [vmem:[#allocation5 + $0x3d78] sm:$0xff]   ;;  %vm1047_vm4 = vcmp.eq.s32.totalorder %v797_v55, %v296_v60 }
 0x7f6   :  { %v31091_v53 = vadd.f32 %v27951_v46, %v22086_v41  ;;  %v27953_v56 = vpop.f32.mrf.mxu1  ;;  %28212 = vmatpush3.bf16.msra.mxu1 %v30255_v62  ;;  %28219 = vmatprep.subr.bf16.mxu0 %v30256_v1  ;;  %v30283_v46 = vld [vmem:[#allocation5 + $0x3c88] sm:$0xff]   ;;  %v794_v47 = vand.u32 31, %v544_v34  ;;  %vm25563_vm5 = vmpackc.low %vm1047_vm4, %vm1047_vm4  ;;  %v295_v62 = vld [vmem:[#allocation2 + $0x790] sm:$0xff] }
 0x7f7   :  { %28241 = vmatprep.subr.bf16.mxu1 %v30258_v5  ;;  %v30287_v56 = vld [vmem:[#allocation5 + $0x3c80] sm:$0xff]   ;;  %v796_v58 = vand.u32 31, %v546_v50  ;;  %v30292_v1 = vld [vmem:[#allocation5 + $0x3d70] sm:$0xff]   ;;  %v30296_v5 = vld [vmem:[#allocation5 + $0x3d68] sm:$0xff]  }
 0x7f8   :  { %25554 = vmatmul.mubr.msk.bf16.vlgmr.msra.gmra.mxu0 %vm25553_vm11, %v30427_v44  ;;  %vm1044_vm2 = vcmp.eq.s32.totalorder %v794_v47, %v293_v57  ;;  %v30318_v47 = vld [vmem:[#allocation5 + $0x3dc0] sm:$0xff]   ;;  %v300_v54 = vld [vmem:[#allocation2 + $0x7b8] sm:$0xff]  ;;  %v30321_v55 = vld [vmem:[#allocation5 + $0x3e38] sm:$0xff]  }
 0x7f9   :  { %28220 = vmatpush3.bf16.msra.mxu0 %v30257_v3  ;;  %25558 = vmatmul.mubr.msk.bf16.vlgmr.msra.gmra.mxu1 %vm25557_vm15, %v30427_v44  ;;  %vm25561_vm3 = vmpackc.low %vm1044_vm2, %vm1044_vm2  ;;  %vm1046_vm6 = vcmp.eq.s32.totalorder %v796_v58, %v295_v62  ;;  %v30294_v3 = vld [vmem:[#allocation5 + $0x3df0] sm:$0xff]   ;;  %v30319_v50 = vld [vmem:[#allocation5 + $0x3d80] sm:$0xff]   ;;  %v553_v62 = vadd.s32 31872, %v30458_v22 }
 0x7fa   :  { %28242 = vmatpush3.bf16.msra.mxu1 %v30259_v6  ;;  %28221 = vmatprep.subr.bf16.mxu0 %v30260_v7  ;;  %vm25565_vm7 = vmpackc.low %vm1046_vm6, %vm1046_vm6  ;;  %v30297_v6 = vld [vmem:[#allocation5 + $0x3d28] sm:$0xff]   ;;  %v30322_v57 = vld [vmem:[#allocation5 + $0x3e70] sm:$0xff]  }
 0x7fb   :  { %28243 = vmatprep.subr.bf16.mxu1 %v30262_v9  ;;  %25560 = vmatprep.mubr.msk.bf16.mxu0 %vm25559_vm1, %v30427_v44  ;;  %v30298_v7 = vld [vmem:[#allocation5 + $0x3de8] sm:$0xff]   ;;  %v30300_v9 = vld [vmem:[#allocation5 + $0x3d60] sm:$0xff]   ;;  %v30323_v58 = vld [vmem:[#allocation5 + $0x3e30] sm:$0xff]  }
 0x7fc   :  { %25564 = vmatprep.mubr.msk.bf16.mxu1 %vm25563_vm5, %v30427_v44  ;;  %v30325_v60 = vld [vmem:[#allocation5 + $0x3e28] sm:$0xff]  }
 0x7fd   :  { %28222 = vmatpush3.bf16.msra.mxu0 %v30261_v8  ;;  %v30299_v8 = vld [vmem:[#allocation5 + $0x3da8] sm:$0xff]  }
 0x7fe   :  { %28244 = vmatpush3.bf16.msra.mxu1 %v30263_v10  ;;  %28223 = vmatprep.subr.bf16.mxu0 %v30264_v11  ;;  %v30301_v10 = vld [vmem:[#allocation5 + $0x3d20] sm:$0xff]  }
 0x7ff   :  { %28245 = vmatprep.subr.bf16.mxu1 %v30266_v13  ;;  %v30302_v11 = vld [vmem:[#allocation5 + $0x3de0] sm:$0xff]   ;;  %v30304_v13 = vld [vmem:[#allocation5 + $0x3d58] sm:$0xff]  }
 0x801   :  { %28224 = vmatpush3.bf16.msra.mxu0 %v30265_v12  ;;  %v30303_v12 = vld [vmem:[#allocation5 + $0x3da0] sm:$0xff]  }
 0x802   :  { %28246 = vmatpush3.bf16.msra.mxu1 %v30267_v14  ;;  %28225 = vmatprep.subr.bf16.mxu0 %v30268_v15  ;;  %v30305_v14 = vld [vmem:[#allocation5 + $0x3d18] sm:$0xff]  }
 0x803   :  { %28247 = vmatprep.subr.bf16.mxu1 %v30270_v17  ;;  %v30306_v15 = vld [vmem:[#allocation5 + $0x3dd8] sm:$0xff]  }
 0x805   :  { %28226 = vmatpush3.bf16.msra.mxu0 %v30269_v16  ;;  %v30307_v16 = vld [vmem:[#allocation5 + $0x3d98] sm:$0xff]  }
 0x806   :  { %28248 = vmatpush3.bf16.msra.mxu1 %v30271_v18  ;;  %28227 = vmatprep.subr.bf16.mxu0 %v30272_v19  ;;  %v30308_v18 = vld [vmem:[#allocation5 + $0x3d50] sm:$0xff]  }
 0x807   :  { %28249 = vmatprep.subr.bf16.mxu1 %v30274_v21  ;;  %v30309_v19 = vld [vmem:[#allocation5 + $0x3d10] sm:$0xff]  }
 0x808   :  { %v30310_v21 = vld [vmem:[#allocation5 + $0x3dd0] sm:$0xff]  }
 0x809   :  { %28228 = vmatpush3.bf16.msra.mxu0 %v30273_v20 }
 0x80a   :  { %28250 = vmatpush3.bf16.msra.mxu1 %v30275_v24  ;;  %28229 = vmatprep.subr.bf16.mxu0 %v30276_v25 }
 0x80b   :  { %28251 = vmatprep.subr.bf16.mxu1 %v30278_v30 }
 0x80d   :  { %28230 = vmatpush3.bf16.msra.mxu0 %v30277_v27 }
 0x80e   :  { %28252 = vmatpush3.bf16.msra.mxu1 %v30279_v33  ;;  %28231 = vmatprep.subr.bf16.mxu0 %v30280_v36 }
 0x80f   :  { %v27971_v23 = vpop.f32.mrf.mxu0  ;;  %28253 = vmatprep.subr.bf16.mxu1 %v30282_v42  ;;  %v550_v42 = vadd.s32 31488, %v30458_v22 }
 0x810   :  { %v27993_v31 = vpop.f32.mrf.mxu1 }
 0x811   :  { %v27972_v26 = vpop.f32.mrf.mxu0  ;;  %28232 = vmatpush3.bf16.msra.mxu0 %v30281_v39  ;;  %v551_v39 = vadd.s32 31616, %v30458_v22 }
 0x812   :  { %v27973_v29 = vadd.f32 %v27972_v26, %v27971_v23  ;;  %v27994_v37 = vpop.f32.mrf.mxu1  ;;  %28254 = vmatpush3.bf16.msra.mxu1 %v30283_v46  ;;  %28233 = vmatprep.subr.bf16.mxu0 %v30284_v49  ;;  %v549_v23 = vadd.s32 31360, %v30458_v22  ;;  %v30311_v26 = vld [vmem:[#allocation5 + $0x3d90] sm:$0xff]  }
 0x813   :  { %v27974_v32 = vpop.f32.mrf.mxu0  ;;  %v27995_v41 = vadd.f32 %v27994_v37, %v27993_v31  ;;  %v30313_v31 = vld [vmem:[#allocation5 + $0x3d08] sm:$0xff]   ;;  %v801_v49 = vand.u32 31, %v551_v39 }
 0x814   :  { %v22166_v35 = vadd.f32 %v27973_v29, %v31091_v53  ;;  %v27996_v45 = vpop.f32.mrf.mxu1  ;;  %v30286_v53 = vld [vmem:[#allocation5 + $0x3cc0] sm:$0xff]   ;;  %v548_v32 = vadd.s32 31232, %v30458_v22  ;;  %v799_v36 = vand.u32 31, %v549_v23 }
 0x815   :  { %v27975_v38 = vpop.f32.mrf.mxu0  ;;  %28234 = vmatpush3.bf16.msra.mxu0 %v30285_v52  ;;  %28255 = vmatprep.subr.bf16.mxu1 %v30286_v53  ;;  %v30317_v45 = vld [vmem:[#allocation5 + $0x3d00] sm:$0xff]   ;;  %v800_v52 = vand.u32 31, %v550_v42  ;;  %v30320_v53 = vld [vmem:[#allocation5 + $0x3e78] sm:$0xff]   ;;  %vm1051_vm12 = vcmp.eq.s32.totalorder %v801_v49, %v300_v54 }
 0x816   :  { %v31102_v48 = vadd.f32 %v27995_v41, %v22166_v35  ;;  %v27997_v51 = vpop.f32.mrf.mxu1  ;;  %28256 = vmatpush3.bf16.msra.mxu1 %v30287_v56  ;;  %28263 = vmatprep.subr.bf16.mxu0 %v30288_v59  ;;  %v30314_v35 = vld [vmem:[#allocation5 + $0x3dc8] sm:$0xff]   ;;  %v30316_v41 = vld [vmem:[#allocation5 + $0x3d40] sm:$0xff]   ;;  %v798_v46 = vand.u32 31, %v548_v32  ;;  %vm25571_vm13 = vmpackc.low %vm1051_vm12, %vm1051_vm12 }
 0x817   :  { %28285 = vmatprep.subr.bf16.mxu1 %v30290_v63  ;;  %v30315_v38 = vld [vmem:[#allocation5 + $0x3d88] sm:$0xff]   ;;  %v297_v51 = vld [vmem:[#allocation2 + $0x7a0] sm:$0xff]  ;;  %v299_v56 = vld [vmem:[#allocation2 + $0x7b0] sm:$0xff] }
 0x818   :  { %25562 = vmatmul.mubr.msk.bf16.vlgmr.msra.gmra.mxu0 %vm25561_vm3, %v30427_v44  ;;  %vm1048_vm10 = vcmp.eq.s32.totalorder %v798_v46, %v297_v51  ;;  %vm1050_vm14 = vcmp.eq.s32.totalorder %v800_v52, %v299_v56  ;;  %v30324_v59 = vld [vmem:[#allocation5 + $0x3e68] sm:$0xff]   ;;  %v30327_v63 = vld [vmem:[#allocation5 + $0x3e20] sm:$0xff]  }
 0x819   :  { %28264 = vmatpush3.bf16.msra.mxu0 %v30289_v61  ;;  %25566 = vmatmul.mubr.msk.bf16.vlgmr.msra.gmra.mxu1 %vm25565_vm7, %v30427_v44  ;;  %vm25569_vm11 = vmpackc.low %vm1048_vm10, %vm1048_vm10  ;;  %v30326_v61 = vld [vmem:[#allocation5 + $0x3e60] sm:$0xff]  }
 0x81a   :  { %28286 = vmatpush3.bf16.msra.mxu1 %v30291_v0  ;;  %28265 = vmatprep.subr.bf16.mxu0 %v30292_v1  ;;  %vm25573_vm15 = vmpackc.low %vm1050_vm14, %vm1050_vm14  ;;  %v30328_v0 = vld [vmem:[#allocation5 + $0x3e58] sm:$0xff]   ;;  %v803_v1 = vand.u32 31, %v553_v62 }
 0x81b   :  { %28287 = vmatprep.subr.bf16.mxu1 %v30294_v3  ;;  %25572 = vmatprep.mubr.msk.bf16.mxu1 %vm25571_vm13, %v30427_v44  ;;  %v30330_v3 = vld [vmem:[#allocation5 + $0x3e50] sm:$0xff]  }
 0x81d   :  { %28266 = vmatpush3.bf16.msra.mxu0 %v30293_v2  ;;  %v30329_v2 = vld [vmem:[#allocation5 + $0x3e18] sm:$0xff]  }
 0x81e   :  { %28288 = vmatpush3.bf16.msra.mxu1 %v30295_v4  ;;  %28267 = vmatprep.subr.bf16.mxu0 %v30296_v5  ;;  %v302_v4 = vld [vmem:[#allocation2 + $0x7c8] sm:$0xff]  ;;  %v30331_v5 = vld [vmem:[#allocation5 + $0x3e10] sm:$0xff]  }
 0x81f   :  { %28289 = vmatprep.subr.bf16.mxu1 %v30298_v7  ;;  %vm1053_vm0 = vcmp.eq.s32.totalorder %v803_v1, %v302_v4 }
 0x820   :  { %vm25575_vm1 = vmpackc.low %vm1053_vm0, %vm1053_vm0 }
 0x821   :  { %28268 = vmatpush3.bf16.msra.mxu0 %v30297_v6  ;;  %v30332_v6 = vld [vmem:[#allocation5 + $0x3e48] sm:$0xff]  }
 0x822   :  { %28290 = vmatpush3.bf16.msra.mxu1 %v30299_v8  ;;  %28269 = vmatprep.subr.bf16.mxu0 %v30300_v9  ;;  %v552_v8 = vadd.s32 31744, %v30458_v22 }
 0x823   :  { %28291 = vmatprep.subr.bf16.mxu1 %v30302_v11 }
 0x825   :  { %28270 = vmatpush3.bf16.msra.mxu0 %v30301_v10  ;;  %v30333_v10 = vld [vmem:[#allocation5 + $0x3e08] sm:$0xff]  }
 0x826   :  { %28292 = vmatpush3.bf16.msra.mxu1 %v30303_v12  ;;  %28271 = vmatprep.subr.bf16.mxu0 %v30304_v13  ;;  %v30334_v13 = vld [vmem:[#allocation5 + $0x3e40] sm:$0xff]  }
 0x827   :  { %28293 = vmatprep.subr.bf16.mxu1 %v30306_v15 }
 0x829   :  { %28272 = vmatpush3.bf16.msra.mxu0 %v30305_v14  ;;  %v802_v14 = vand.u32 31, %v552_v8 }
 0x82a   :  { %28294 = vmatpush3.bf16.msra.mxu1 %v30307_v16  ;;  %28273 = vmatprep.subr.bf16.mxu0 %v30308_v18  ;;  %v301_v16 = vld [vmem:[#allocation2 + $0x7c0] sm:$0xff] }
 0x82b   :  { %28295 = vmatprep.subr.bf16.mxu1 %v30310_v21  ;;  %v30335_v21 = vld [vmem:[#allocation5 + $0x3e00] sm:$0xff]   ;;  %vm1052_vm2 = vcmp.eq.s32.totalorder %v802_v14, %v301_v16 }
 0x82c   :  { %vm25577_vm3 = vmpackc.low %vm1052_vm2, %vm1052_vm2 }
 0x82d   :  { %28274 = vmatpush3.bf16.msra.mxu0 %v30309_v19 }
 0x82e   :  { %28296 = vmatpush3.bf16.msra.mxu1 %v30311_v26  ;;  %28275 = vmatprep.subr.bf16.mxu0 %v30312_v28 }
 0x82f   :  { %v28015_v17 = vpop.f32.mrf.mxu0  ;;  %28297 = vmatprep.subr.bf16.mxu1 %v30314_v35 }
 0x830   :  { %v28037_v25 = vpop.f32.mrf.mxu1 }
 0x831   :  { %v28016_v20 = vpop.f32.mrf.mxu0  ;;  %28276 = vmatpush3.bf16.msra.mxu0 %v30313_v31 }
 0x832   :  { %v28017_v24 = vadd.f32 %v28016_v20, %v28015_v17  ;;  %v28038_v30 = vpop.f32.mrf.mxu1  ;;  %28298 = vmatpush3.bf16.msra.mxu1 %v30315_v38  ;;  %28277 = vmatprep.subr.bf16.mxu0 %v30316_v41 }
 0x833   :  { %v28018_v27 = vpop.f32.mrf.mxu0  ;;  %v28039_v33 = vadd.f32 %v28038_v30, %v28037_v25  ;;  %28299 = vmatprep.subr.bf16.mxu1 %v30318_v47 }
 0x834   :  { %v22246_v29 = vadd.f32 %v28017_v24, %v31102_v48  ;;  %v28040_v37 = vpop.f32.mrf.mxu1  ;;  %v298_v48 = vld [vmem:[#allocation2 + $0x7a8] sm:$0xff] }
 0x835   :  { %v28019_v34 = vpop.f32.mrf.mxu0  ;;  %28278 = vmatpush3.bf16.msra.mxu0 %v30317_v45  ;;  %vm1049_vm8 = vcmp.eq.s32.totalorder %v799_v36, %v298_v48 }
 0x836   :  { %v31113_v40 = vadd.f32 %v28039_v33, %v22246_v29  ;;  %v28041_v43 = vpop.f32.mrf.mxu1  ;;  %vm25567_vm9 = vmpackc.low %vm1049_vm8, %vm1049_vm8  ;;  %28300 = vmatpush3.bf16.msra.mxu1 %v30319_v50  ;;  %28307 = vmatprep.subr.bf16.mxu0 %v30320_v53 }
 0x837   :  { %25568 = vmatprep.mubr.msk.bf16.mxu0 %vm25567_vm9, %v30427_v44 }
 0x838   :  { %25570 = vmatmul.mubr.msk.bf16.vlgmr.msra.gmra.mxu0 %vm25569_vm11, %v30427_v44 }
 0x839   :  { %28308 = vmatpush3.bf16.msra.mxu0 %v30321_v55  ;;  %25574 = vmatmul.mubr.msk.bf16.vlgmr.msra.gmra.mxu1 %vm25573_vm15, %v30427_v44 }
 0x83a   :  { %28309 = vmatprep.subr.bf16.mxu0 %v30322_v57  ;;  %25576 = vmatprep.mubr.msk.bf16.mxu0 %vm25575_vm1, %v30427_v44 }
 0x83d   :  { %28310 = vmatpush3.bf16.msra.mxu0 %v30323_v58 }
 0x83e   :  { %28311 = vmatprep.subr.bf16.mxu0 %v30324_v59 }
 0x841   :  { %28312 = vmatpush3.bf16.msra.mxu0 %v30325_v60 }
 0x842   :  { %28313 = vmatprep.subr.bf16.mxu0 %v30326_v61 }
 0x845   :  { %28314 = vmatpush3.bf16.msra.mxu0 %v30327_v63 }
 0x846   :  { %28315 = vmatprep.subr.bf16.mxu0 %v30328_v0 }
 0x849   :  { %28316 = vmatpush3.bf16.msra.mxu0 %v30329_v2 }
 0x84a   :  { %28317 = vmatprep.subr.bf16.mxu0 %v30330_v3 }
 0x84d   :  { %28318 = vmatpush3.bf16.msra.mxu0 %v30331_v5 }
 0x84e   :  { %28319 = vmatprep.subr.bf16.mxu0 %v30332_v6 }
 0x84f   :  { %v28059_v7 = vpop.f32.mrf.mxu0 }
 0x850   :  { %v28081_v12 = vpop.f32.mrf.mxu1 }
 0x851   :  { %v28060_v9 = vpop.f32.mrf.mxu0  ;;  %28320 = vmatpush3.bf16.msra.mxu0 %v30333_v10 }
 0x852   :  { %v28061_v11 = vadd.f32 %v28060_v9, %v28059_v7  ;;  %v28082_v18 = vpop.f32.mrf.mxu1  ;;  %28321 = vmatprep.subr.bf16.mxu0 %v30334_v13 }
 0x853   :  { %v28062_v15 = vpop.f32.mrf.mxu0  ;;  %v28083_v19 = vadd.f32 %v28082_v18, %v28081_v12 }
 0x854   :  { %v22326_v17 = vadd.f32 %v28061_v11, %v31113_v40  ;;  %v28084_v23 = vpop.f32.mrf.mxu1 }
 0x855   :  { %v28063_v20 = vpop.f32.mrf.mxu0  ;;  %28322 = vmatpush3.bf16.msra.mxu0 %v30335_v21 }
 0x856   :  { %v22366_v22 = vadd.f32 %v28083_v19, %v22326_v17  ;;  %v28085_v24 = vpop.f32.mrf.mxu1 }
 0x858   :  { %25578 = vmatmul.mubr.msk.bf16.vlgmr.msra.gmra.mxu0 %vm25577_vm3, %v30427_v44 }
 0x86f   :  { %v28103_v25 = vpop.f32.mrf.mxu0 }
 0x870   :  { %v28125_v28 = vpop.f32.mrf.mxu1 }
 0x871   :  { %v28104_v26 = vpop.f32.mrf.mxu0 }
 0x872   :  { %v28105_v27 = vadd.f32 %v28104_v26, %v28103_v25  ;;  %v28126_v31 = vpop.f32.mrf.mxu1 }
 0x873   :  { %v28106_v29 = vpop.f32.mrf.mxu0  ;;  %v28127_v33 = vadd.f32 %v28126_v31, %v28125_v28 }
 0x874   :  { %v22406_v30 = vadd.f32 %v28105_v27, %v22366_v22  ;;  %v28128_v34 = vpop.f32.mrf.mxu1 }
 0x875   :  { %v28107_v32 = vpop.f32.mrf.mxu0 }
 0x876   :  { %v22446_v35 = vadd.f32 %v28127_v33, %v22406_v30  ;;  %v28129_v36 = vpop.f32.mrf.mxu1 }
 0x890   :  { %v28169_v40 = vpop.f32.mrf.mxu1 }
 0x892   :  { %v28170_v43 = vpop.f32.mrf.mxu1 }
 0x893   :  { %v28171_v44 = vadd.f32 %v28170_v43, %v28169_v40 }
 0x894   :  { %v28172_v46 = vpop.f32.mrf.mxu1 }
 0x896   :  { %v28173_v48 = vpop.f32.mrf.mxu1 }
 0x898   :  { %v28147_v37 = vpop.f32.mrf.mxu0 }
 0x89a   :  { %v28148_v38 = vpop.f32.mrf.mxu0 }
 0x89b   :  { %v28149_v39 = vadd.f32 %v28148_v38, %v28147_v37 }
 0x89c   :  { %v28150_v41 = vpop.f32.mrf.mxu0 }
 0x89d   :  { %v22486_v42 = vadd.f32 %v28149_v39, %v22446_v35 }
 0x89e   :  { %v28151_v45 = vpop.f32.mrf.mxu0 }
 0x89f   :  { %v22526_v47 = vadd.f32 %v28171_v44, %v22486_v42 }
 0x8b8   :  { %v28191_v49 = vpop.f32.mrf.mxu0 }
 0x8b9   :  { %v28213_v52 = vpop.f32.mrf.mxu1 }
 0x8ba   :  { %v28192_v50 = vpop.f32.mrf.mxu0 }
 0x8bb   :  { %v28193_v51 = vadd.f32 %v28192_v50, %v28191_v49  ;;  %v28214_v55 = vpop.f32.mrf.mxu1 }
 0x8bc   :  { %v28194_v53 = vpop.f32.mrf.mxu0  ;;  %v28215_v56 = vadd.f32 %v28214_v55, %v28213_v52 }
 0x8bd   :  { %v22566_v54 = vadd.f32 %v28193_v51, %v22526_v47  ;;  %v28216_v58 = vpop.f32.mrf.mxu1 }
 0x8be   :  { %v28195_v57 = vpop.f32.mrf.mxu0 }
 0x8bf   :  { %v22606_v59 = vadd.f32 %v28215_v56, %v22566_v54  ;;  %v28217_v60 = vpop.f32.mrf.mxu1 }
 0x8d8   :  { %v28235_v61 = vpop.f32.mrf.mxu0 }
 0x8d9   :  { %v28257_v63 = vpop.f32.mrf.mxu1 }
 0x8da   :  { %v28236_v62 = vpop.f32.mrf.mxu0 }
 0x8db   :  { %v28258_v1 = vpop.f32.mrf.mxu1  ;;  %v28237_v13 = vadd.f32 %v28236_v62, %v28235_v61 }
 0x8dc   :  { %v28238_v0 = vpop.f32.mrf.mxu0  ;;  %v28259_v15 = vadd.f32 %v28258_v1, %v28257_v63 }
 0x8dd   :  { %v28260_v3 = vpop.f32.mrf.mxu1  ;;  %v22646_v14 = vadd.f32 %v28237_v13, %v22606_v59 }
 0x8de   :  { %v28239_v2 = vpop.f32.mrf.mxu0 }
 0x8df   :  { %v28261_v4 = vpop.f32.mrf.mxu1  ;;  %v22686_v17 = vadd.f32 %v28259_v15, %v22646_v14 }
 0x8f8   :  { %v28279_v5 = vpop.f32.mrf.mxu0 }
 0x8f9   :  { %v28301_v7 = vpop.f32.mrf.mxu1 }
 0x8fa   :  { %v28280_v6 = vpop.f32.mrf.mxu0 }
 0x8fb   :  { %v28302_v9 = vpop.f32.mrf.mxu1  ;;  %v28281_v16 = vadd.f32 %v28280_v6, %v28279_v5 }
 0x8fc   :  { %v28282_v8 = vpop.f32.mrf.mxu0  ;;  %v28303_v19 = vadd.f32 %v28302_v9, %v28301_v7 }
 0x8fd   :  { %v28304_v11 = vpop.f32.mrf.mxu1  ;;  %v22726_v18 = vadd.f32 %v28281_v16, %v22686_v17 }
 0x8fe   :  { %v28283_v10 = vpop.f32.mrf.mxu0 }
 0x8ff   :  { %v28305_v12 = vpop.f32.mrf.mxu1  ;;  %v22766_v23 = vadd.f32 %v28303_v19, %v22726_v18 }
 0x918   :  { %v28323_v20 = vpop.f32.mrf.mxu0 }
 0x91a   :  { %v28324_v21 = vpop.f32.mrf.mxu0 }
 0x91b   :  { %v28325_v22 = vadd.f32 %v28324_v21, %v28323_v20 }
 0x91c   :  { %v28326_v24 = vpop.f32.mrf.mxu0 }
 0x91d   :  { %v22806_v25 = vadd.f32 %v28325_v22, %v22766_v23 }
 0x91e   :  { %v28327_v26 = vpop.f32.mrf.mxu0 }
 0x91f   :  { %22811 = vst [vmem:[#allocation8] sm:$0xff] %v22806_v25 }
 0x920   :  { %30407 = shalt.err (!%p30404_p5)
}
 0x921   :  { %22821 = dma.vmem_to_hbm [thread:$0]  %s22819_s2, 128, %s31131_s3, [#allocation4]  }
 0x922   :  { %30420 = dma.done.wait [#allocation4], 128  }
 0x923   :  { %30421 = vsyncadd [#allocation4], 4294967168 }
 0x924   :  { %22825 = vsyncpa [#allocation3], 1 }
 0x925   :  { %22826 = vsyncpa [#allocation6], 1 }
 0x926   :  { %22827 = vsyncpa [#allocation4], 1 }

</bundles_post_ra>
